<compile_context>
chip_gen: v7x
topology: tpu7x:2x2x1
jax: 0.10.0
libtpu: 0.0.40
codegen_flags: <defaults>
</compile_context>

<pallas_src>
import jax
import jax.numpy as jnp
from jax import lax
from jax.experimental import pallas as pl
from jax.experimental.pallas import tpu as pltpu

BN_EPS = 0.001


def make_fused_kernel(p_true):
    """p_true: number of valid spatial columns (BN statistics divisor)."""
    inv_p = 1.0 / float(p_true)

    def fused_kernel(x_ref, res_ref,
                     w1_ref, g1_ref, b1_ref,
                     w2_ref, g2_ref, b2_ref,
                     out_ref):
        # x:   (C1, Ppad) bf16  main activation, channels-major, zero-padded cols
        # res: (C2, Ppad) f32   residual (zero-padded cols)
        # w1:  (C2, C1)   bf16  conv2d60 weight with x174 scale folded in
        # w2:  (C1, C2)   bf16  conv2d61 weight
        # g/b: (C, 1)     f32   batchnorm affine params
        x = x_ref[...]

        # conv2d60 (1x1, no bias); scale already folded into w1 -> (C2, Ppad) f32
        z = jnp.dot(w1_ref[...], x, preferred_element_type=jnp.float32)

        # batchnorm2d44: single-pass batch statistics over N*H*W per channel.
        # Padded columns of z are exactly zero, so sums stay exact; divide by p_true.
        s1 = jnp.sum(z, axis=1, keepdims=True) * inv_p
        ss1 = jnp.sum(z * z, axis=1, keepdims=True) * inv_p
        var1 = ss1 - s1 * s1
        sc1 = g1_ref[...] * lax.rsqrt(var1 + BN_EPS)          # gamma folded into rsqrt
        t = (z - s1) * sc1 + b1_ref[...] + res_ref[...]       # BN + residual add (x178)

        # Mask padded columns back to zero so BN2 statistics stay exact.
        col = lax.broadcasted_iota(jnp.int32, t.shape, 1)
        t = jnp.where(col < p_true, t, 0.0)

        # conv2d61 (1x1, no bias) -> (C1, Ppad) f32
        u = jnp.dot(w2_ref[...], t.astype(jnp.bfloat16),
                    preferred_element_type=jnp.float32)

        # batchnorm2d45
        s2 = jnp.sum(u, axis=1, keepdims=True) * inv_p
        ss2 = jnp.sum(u * u, axis=1, keepdims=True) * inv_p
        var2 = ss2 - s2 * s2
        sc2 = g2_ref[...] * lax.rsqrt(var2 + BN_EPS)
        out_ref[...] = (u - s2) * sc2 + b2_ref[...]            # x180 (padded cols sliced off outside)

    return fused_kernel


def fused_forward(x, res, w1, g1, b1, w2, g2, b2, *, p_true):
    c1, p_pad = x.shape
    c2 = w1.shape[0]
    kernel = make_fused_kernel(p_true)

    # Advisory cost hint so XLA can overlap this tiny call with neighboring ops.
    flops = 2 * p_true * c1 * c2 * 2                     # two 1x1-conv matmuls
    bytes_accessed = (x.size * 2 + res.size * 4 + w1.size * 2 + w2.size * 2
                      + (g1.size + b1.size + g2.size + b2.size) * 4
                      + c1 * p_pad * 4)

    # No grid: kernel runs once, everything resident in VMEM (no double-buffer copies).
    vmem = lambda: pl.BlockSpec(memory_space=pltpu.MemorySpace.VMEM)
    return pl.pallas_call(
        kernel,
        out_shape=jax.ShapeDtypeStruct((c1, p_pad), jnp.float32),
        in_specs=[vmem() for _ in range(8)],
        out_specs=vmem(),
        cost_estimate=pl.CostEstimate(flops=flops, transcendentals=0,
                                      bytes_accessed=bytes_accessed),
    )(x, res, w1, g1, b1, w2, g2, b2)


def nchw_to_cmajor(x):
    # (N, C, H, W) -> (C, N*H*W); pure reshape when N == 1 (no transpose pass).
    n, c, h, w = x.shape
    if n == 1:
        return x.reshape(c, h * w)
    return jnp.transpose(x, (1, 0, 2, 3)).reshape(c, n * h * w)


def cmajor_to_nchw(x, n, h, w):
    c = x.shape[0]
    if n == 1:
        return x.reshape(1, c, h, w)
    return jnp.transpose(x.reshape(c, n, h, w), (1, 0, 2, 3))


def module_m_forward(x174, x169, x163, w60, w61, g44, b44, g45, b45):
    """x174: (1, 960, 1, 1), x169: (1, 960, 14, 14), x163: (1, 160, 14, 14)."""
    n, c1, h, w = x169.shape
    c2 = x163.shape[1]
    p = n * h * w
    p_pad = ((p + 127) // 128) * 128                     # 196 -> 256 (lane-dense)

    # Channels-major activations, zero-padded spatial columns.
    x_cm = nchw_to_cmajor(x169)                          # (960, 196)
    res_cm = nchw_to_cmajor(x163)                        # (160, 196)
    x_p = jnp.pad(x_cm, ((0, 0), (0, p_pad - p))).astype(jnp.bfloat16)
    res_p = jnp.pad(res_cm, ((0, 0), (0, p_pad - p)))    # keep residual in f32

    # Conv weights used directly in (out, in) form; fold x174 scale into conv1 weight.
    scale = x174.reshape(1, c1)
    w1 = (w60.reshape(c2, c1) * scale).astype(jnp.bfloat16)   # (160, 960)
    w2 = w61.reshape(c1, c2).astype(jnp.bfloat16)             # (960, 160)

    out_p = fused_forward(
        x_p, res_p,
        w1, g44.reshape(c2, 1), b44.reshape(c2, 1),
        w2, g45.reshape(c1, 1), b45.reshape(c1, 1),
        p_true=p)

    out = out_p[:, :p]                                   # drop padded columns
    return cmajor_to_nchw(out, n, h, w)                  # (1, 960, 14, 14)
    # TODO(synk): training-mode BatchNorm also updates running_mean/running_var
    # buffers; those stateful updates are not emitted here (forward output only).


if __name__ == "__main__":
    key = jax.random.PRNGKey(0)
    k1, k2, k3, k4, k5 = jax.random.split(key, 5)

    N, C1, C2, H, W = 1, 960, 160, 14, 14

    x174 = jax.random.normal(k1, (N, C1, 1, 1), dtype=jnp.float32)
    x169 = jax.random.normal(k2, (N, C1, H, W), dtype=jnp.float32)
    x163 = jax.random.normal(k3, (N, C2, H, W), dtype=jnp.float32)

    # Deterministic params (conv weights ~ small normal, BN affine defaults gamma=1, beta=0)
    w60 = jax.random.normal(k4, (C2, C1, 1, 1), dtype=jnp.float32) * 0.02   # 960 -> 160
    w61 = jax.random.normal(k5, (C1, C2, 1, 1), dtype=jnp.float32) * 0.02   # 160 -> 960
    g44 = jnp.ones((C2,), jnp.float32)
    b44 = jnp.zeros((C2,), jnp.float32)
    g45 = jnp.ones((C1,), jnp.float32)
    b45 = jnp.zeros((C1,), jnp.float32)

    out = module_m_forward(x174, x169, x163, w60, w61, g44, b44, g45, b45)
    jax.block_until_ready(out)
    assert out.shape == (N, C1, H, W), out.shape
    assert bool(jnp.all(jnp.isfinite(out)))
    print("KERNEL_OK")
</pallas_src>

<mosaic_0001>
module attributes {stable_mosaic.version = 11 : i64} {
  func.func @fused_kernel(%arg0: memref<960x256xbf16, #tpu.memory_space<vmem>>, %arg1: memref<160x256xf32, #tpu.memory_space<vmem>>, %arg2: memref<160x960xbf16, #tpu.memory_space<vmem>>, %arg3: memref<160x1xf32, #tpu.memory_space<vmem>>, %arg4: memref<160x1xf32, #tpu.memory_space<vmem>>, %arg5: memref<960x160xbf16, #tpu.memory_space<vmem>>, %arg6: memref<960x1xf32, #tpu.memory_space<vmem>>, %arg7: memref<960x1xf32, #tpu.memory_space<vmem>>, %arg8: memref<960x256xf32, #tpu.memory_space<vmem>>) attributes {dimension_semantics = [], scalar_prefetch = 0 : i64, scratch_operands = 0 : i64, tpu.core_type = #tpu.core_type<tc>} {
    %c0 = arith.constant 0 : index
    %c0_0 = arith.constant 0 : index
    %0 = vector.load %arg0[%c0, %c0_0] : memref<960x256xbf16, #tpu.memory_space<vmem>>, vector<960x256xbf16>
    %c0_1 = arith.constant 0 : index
    %c0_2 = arith.constant 0 : index
    %1 = vector.load %arg2[%c0_1, %c0_2] : memref<160x960xbf16, #tpu.memory_space<vmem>>, vector<160x960xbf16>
    %cst = arith.constant dense<0.000000e+00> : vector<160x256xf32>
    %2 = tpu.matmul %1, %0, %cst {dimension_numbers = #tpu.dot_dimension_numbers<[1], [0], [0], [1], [0, 0, 1, 1], [], []>} : vector<160x960xbf16>, vector<960x256xbf16>, vector<160x256xf32> -> vector<160x256xf32>
    %cst_3 = arith.constant dense<0.000000e+00> : vector<160xf32>
    %3 = vector.multi_reduction <add>, %2, %cst_3 [1] : vector<160x256xf32> to vector<160xf32>
    %4 = vector.shape_cast %3 : vector<160xf32> to vector<160x1xf32>
    %cst_4 = arith.constant 0.00510204071 : f32
    %5 = vector.broadcast %cst_4 : f32 to vector<160x1xf32>
    %6 = arith.mulf %4, %5 : vector<160x1xf32>
    %7 = arith.mulf %2, %2 : vector<160x256xf32>
    %cst_5 = arith.constant dense<0.000000e+00> : vector<160xf32>
    %8 = vector.multi_reduction <add>, %7, %cst_5 [1] : vector<160x256xf32> to vector<160xf32>
    %9 = vector.shape_cast %8 : vector<160xf32> to vector<160x1xf32>
    %cst_6 = arith.constant 0.00510204071 : f32
    %10 = vector.broadcast %cst_6 : f32 to vector<160x1xf32>
    %11 = arith.mulf %9, %10 : vector<160x1xf32>
    %12 = arith.mulf %6, %6 : vector<160x1xf32>
    %13 = arith.subf %11, %12 : vector<160x1xf32>
    %c0_7 = arith.constant 0 : index
    %c0_8 = arith.constant 0 : index
    %14 = vector.load %arg3[%c0_7, %c0_8] : memref<160x1xf32, #tpu.memory_space<vmem>>, vector<160x1xf32>
    %cst_9 = arith.constant 1.000000e-03 : f32
    %15 = vector.broadcast %cst_9 : f32 to vector<160x1xf32>
    %16 = arith.addf %13, %15 : vector<160x1xf32>
    %17 = math.rsqrt %16 : vector<160x1xf32>
    %18 = arith.mulf %14, %17 : vector<160x1xf32>
    %19 = vector.broadcast %6 : vector<160x1xf32> to vector<160x256xf32>
    %20 = arith.subf %2, %19 : vector<160x256xf32>
    %21 = vector.broadcast %18 : vector<160x1xf32> to vector<160x256xf32>
    %22 = arith.mulf %20, %21 : vector<160x256xf32>
    %c0_10 = arith.constant 0 : index
    %c0_11 = arith.constant 0 : index
    %23 = vector.load %arg4[%c0_10, %c0_11] : memref<160x1xf32, #tpu.memory_space<vmem>>, vector<160x1xf32>
    %24 = vector.broadcast %23 : vector<160x1xf32> to vector<160x256xf32>
    %25 = arith.addf %22, %24 : vector<160x256xf32>
    %c0_12 = arith.constant 0 : index
    %c0_13 = arith.constant 0 : index
    %26 = vector.load %arg1[%c0_12, %c0_13] : memref<160x256xf32, #tpu.memory_space<vmem>>, vector<160x256xf32>
    %27 = arith.addf %25, %26 : vector<160x256xf32>
    %28 = tpu.iota {dimensions = array<i32: 1>} : vector<160x256xi32>
    %c196_i32 = arith.constant 196 : i32
    %29 = vector.broadcast %c196_i32 : i32 to vector<160x256xi32>
    %30 = arith.cmpi slt, %28, %29 : vector<160x256xi32>
    %cst_14 = arith.constant 0.000000e+00 : f32
    %31 = vector.broadcast %cst_14 : f32 to vector<160x256xf32>
    %32 = arith.select %30, %27, %31 : vector<160x256xi1>, vector<160x256xf32>
    %c0_15 = arith.constant 0 : index
    %c0_16 = arith.constant 0 : index
    %33 = vector.load %arg5[%c0_15, %c0_16] : memref<960x160xbf16, #tpu.memory_space<vmem>>, vector<960x160xbf16>
    %34 = arith.truncf %32 : vector<160x256xf32> to vector<160x256xbf16>
    %cst_17 = arith.constant dense<0.000000e+00> : vector<960x256xf32>
    %35 = tpu.matmul %33, %34, %cst_17 {dimension_numbers = #tpu.dot_dimension_numbers<[1], [0], [0], [1], [0, 0, 1, 1], [], []>} : vector<960x160xbf16>, vector<160x256xbf16>, vector<960x256xf32> -> vector<960x256xf32>
    %cst_18 = arith.constant dense<0.000000e+00> : vector<960xf32>
    %36 = vector.multi_reduction <add>, %35, %cst_18 [1] : vector<960x256xf32> to vector<960xf32>
    %37 = vector.shape_cast %36 : vector<960xf32> to vector<960x1xf32>
    %cst_19 = arith.constant 0.00510204071 : f32
    %38 = vector.broadcast %cst_19 : f32 to vector<960x1xf32>
    %39 = arith.mulf %37, %38 : vector<960x1xf32>
    %40 = arith.mulf %35, %35 : vector<960x256xf32>
    %cst_20 = arith.constant dense<0.000000e+00> : vector<960xf32>
    %41 = vector.multi_reduction <add>, %40, %cst_20 [1] : vector<960x256xf32> to vector<960xf32>
    %42 = vector.shape_cast %41 : vector<960xf32> to vector<960x1xf32>
    %cst_21 = arith.constant 0.00510204071 : f32
    %43 = vector.broadcast %cst_21 : f32 to vector<960x1xf32>
    %44 = arith.mulf %42, %43 : vector<960x1xf32>
    %45 = arith.mulf %39, %39 : vector<960x1xf32>
    %46 = arith.subf %44, %45 : vector<960x1xf32>
    %c0_22 = arith.constant 0 : index
    %c0_23 = arith.constant 0 : index
    %47 = vector.load %arg6[%c0_22, %c0_23] : memref<960x1xf32, #tpu.memory_space<vmem>>, vector<960x1xf32>
    %cst_24 = arith.constant 1.000000e-03 : f32
    %48 = vector.broadcast %cst_24 : f32 to vector<960x1xf32>
    %49 = arith.addf %46, %48 : vector<960x1xf32>
    %50 = math.rsqrt %49 : vector<960x1xf32>
    %51 = arith.mulf %47, %50 : vector<960x1xf32>
    %52 = vector.broadcast %39 : vector<960x1xf32> to vector<960x256xf32>
    %53 = arith.subf %35, %52 : vector<960x256xf32>
    %54 = vector.broadcast %51 : vector<960x1xf32> to vector<960x256xf32>
    %55 = arith.mulf %53, %54 : vector<960x256xf32>
    %c0_25 = arith.constant 0 : index
    %c0_26 = arith.constant 0 : index
    %56 = vector.load %arg7[%c0_25, %c0_26] : memref<960x1xf32, #tpu.memory_space<vmem>>, vector<960x1xf32>
    %57 = vector.broadcast %56 : vector<960x1xf32> to vector<960x256xf32>
    %58 = arith.addf %55, %57 : vector<960x256xf32>
    %c0_27 = arith.constant 0 : index
    %c0_28 = arith.constant 0 : index
    %59 = vector.load %arg8[%c0_27, %c0_28] : memref<960x256xf32, #tpu.memory_space<vmem>>, vector<960x256xf32>
    tpu.vector_store %arg8[%c0_27, %c0_28], %58 {strides = array<i32>} : memref<960x256xf32, #tpu.memory_space<vmem>>, vector<960x256xf32>,
    return
  }
}

</mosaic_0001>

<bundles_post_ra>
// kernel: tpu_custom_call.1
= control target key start
LH: loop header
LB: loop body
LE: loop exit
PB: predicated region body
PF: predicated region fallthrough
CT: control target
= control target key end

     0   :  { %v9509_v2 = vmov 0   ;;  %s16655_s0 = inlined_call_operand.vmem [shape: bf16[960,256], index: 0, kind: input, shape index: {}]   ;;  %s16656_s1 = inlined_call_operand.vmem [shape: f32[160,256], index: 1, kind: input, shape index: {}]   ;;  %s16657_s2 = inlined_call_operand.vmem [shape: bf16[160,960], index: 2, kind: input, shape index: {}]   ;;  %s16658_s3 = inlined_call_operand.vmem [shape: f32[160,1], index: 3, kind: input, shape index: {}]   ;;  %s16659_s4 = inlined_call_operand.vmem [shape: f32[160,1], index: 4, kind: input, shape index: {}]   ;;  %s16660_s5 = inlined_call_operand.vmem [shape: bf16[960,160], index: 5, kind: input, shape index: {}]   ;;  %s16661_s6 = inlined_call_operand.vmem [shape: f32[960,1], index: 6, kind: input, shape index: {}]   ;;  %s16662_s7 = inlined_call_operand.vmem [shape: f32[960,1], index: 7, kind: input, shape index: {}]   ;;  %s16663_s8 = inlined_call_operand.hbm [shape: f32[960,256], index: 8, kind: output, shape index: {}]  }
   0x1   :  { %v2285_v0 = vld [vmem:[%s16659_s4 + $0x8] sm:$0xff]  ;;  %v2284_v1 = vld [vmem:[%s16659_s4] sm:$0xff]  ;;  %8844 = vset.pattern.permute.xlu0 %v9509_v2  ;;  %8843 = vset.pattern.permute.xlu1 %v9509_v2  ;;  %v2287_v5 = vld [vmem:[%s16659_s4 + $0x18] sm:$0xff] }
   0x2   :  { %v8845_v3 = vld [vmem:[%s16655_s0 + $0x4] ss:$8 sps:$4 sm:$0xff]   ;;  %v8847_v4 = vld [vmem:[%s16655_s0] ss:$8 sps:$4 sm:$0xff]   ;;  %2311 = vperm.xlu0 %8844, %v2285_v0   ;;  %2306 = vperm.xlu1 %8843, %v2284_v1   ;;  %v2286_v6 = vld [vmem:[%s16659_s4 + $0x10] sm:$0xff] }
   0x3   :  { %1252 = vmatprep.subr.bf16.mxu0 %v8845_v3  ;;  %v8848_v7 = vld [vmem:[%s16655_s0 + $0x14] ss:$8 sps:$4 sm:$0xff]   ;;  %v8850_v8 = vld [vmem:[%s16655_s0 + $0x10] ss:$8 sps:$4 sm:$0xff]   ;;  %v8851_v9 = vld [vmem:[%s16655_s0 + $0x24] ss:$8 sps:$4 sm:$0xff]  }
   0x4   :  { %1253 = vmatpush1.bf16.msra.mxu0 %v8847_v4  ;;  %v2289_v10 = vld [vmem:[%s16659_s4 + $0x28] sm:$0xff]  ;;  %v2288_v11 = vld [vmem:[%s16659_s4 + $0x20] sm:$0xff]  ;;  %v8854_v13 = vld [vmem:[%s16655_s0 + $0x34] ss:$8 sps:$4 sm:$0xff]  }
   0x5   :  { %1254 = vmatprep.subr.bf16.mxu0 %v8848_v7  ;;  %v8853_v12 = vld [vmem:[%s16655_s0 + $0x20] ss:$8 sps:$4 sm:$0xff]   ;;  %v2291_v14 = vld [vmem:[%s16659_s4 + $0x38] sm:$0xff]  ;;  %v2290_v15 = vld [vmem:[%s16659_s4 + $0x30] sm:$0xff] }
   0x6   :  { %2321 = vperm.xlu0 %8844, %v2287_v5   ;;  %2316 = vperm.xlu1 %8843, %v2286_v6   ;;  %v8856_v16 = vld [vmem:[%s16655_s0 + $0x30] ss:$8 sps:$4 sm:$0xff]   ;;  %v8857_v17 = vld [vmem:[%s16655_s0 + $0x44] ss:$8 sps:$4 sm:$0xff]   ;;  %v8859_v20 = vld [vmem:[%s16655_s0 + $0x40] ss:$8 sps:$4 sm:$0xff]  }
   0x7   :  { %v2293_v18 = vld [vmem:[%s16659_s4 + $0x48] sm:$0xff]  ;;  %v2292_v19 = vld [vmem:[%s16659_s4 + $0x40] sm:$0xff]  ;;  %v8860_v21 = vld [vmem:[%s16655_s0 + $0x54] ss:$8 sps:$4 sm:$0xff]  }
   0x8   :  { %1255 = vmatpush1.bf16.msra.mxu0 %v8850_v8  ;;  %v2295_v22 = vld [vmem:[%s16659_s4 + $0x58] sm:$0xff]  ;;  %v2294_v23 = vld [vmem:[%s16659_s4 + $0x50] sm:$0xff]  ;;  %v8863_v25 = vld [vmem:[%s16655_s0 + $0x64] ss:$8 sps:$4 sm:$0xff]  }
   0x9   :  { %1256 = vmatprep.subr.bf16.mxu0 %v8851_v9  ;;  %v8862_v24 = vld [vmem:[%s16655_s0 + $0x50] ss:$8 sps:$4 sm:$0xff]   ;;  %v2297_v26 = vld [vmem:[%s16659_s4 + $0x68] sm:$0xff]  ;;  %v2296_v27 = vld [vmem:[%s16659_s4 + $0x60] sm:$0xff] }
   0xa   :  { %2331 = vperm.xlu0 %8844, %v2289_v10   ;;  %2326 = vperm.xlu1 %8843, %v2288_v11   ;;  %v8865_v28 = vld [vmem:[%s16655_s0 + $0x60] ss:$8 sps:$4 sm:$0xff]   ;;  %v8866_v29 = vld [vmem:[%s16655_s0 + $0x74] ss:$8 sps:$4 sm:$0xff]   ;;  %v8868_v32 = vld [vmem:[%s16655_s0 + $0x70] ss:$8 sps:$4 sm:$0xff]  }
   0xb   :  { %v2299_v30 = vld [vmem:[%s16659_s4 + $0x78] sm:$0xff]  ;;  %v2298_v31 = vld [vmem:[%s16659_s4 + $0x70] sm:$0xff]  ;;  %v8869_v33 = vld [vmem:[%s16655_s0 + $0x84] ss:$8 sps:$4 sm:$0xff]  }
   0xc   :  { %1257 = vmatpush1.bf16.msra.mxu0 %v8853_v12  ;;  %v2301_v34 = vld [vmem:[%s16659_s4 + $0x88] sm:$0xff]  ;;  %v2300_v35 = vld [vmem:[%s16659_s4 + $0x80] sm:$0xff]  ;;  %v8872_v38 = vld [vmem:[%s16655_s0 + $0x94] ss:$8 sps:$4 sm:$0xff]  }
   0xd   :  { %1258 = vmatprep.subr.bf16.mxu0 %v8854_v13  ;;  %v8871_v36 = vld [vmem:[%s16655_s0 + $0x80] ss:$8 sps:$4 sm:$0xff]   ;;  %v2303_v41 = vld [vmem:[%s16659_s4 + $0x98] sm:$0xff]  ;;  %v2302_v42 = vld [vmem:[%s16659_s4 + $0x90] sm:$0xff] }
   0xe   :  { %2341 = vperm.xlu0 %8844, %v2291_v14   ;;  %2336 = vperm.xlu1 %8843, %v2290_v15   ;;  %v9669_v37 = vld [vmem:[%s16657_s2] sm:$0xff]  ;;  %v8874_v43 = vld [vmem:[%s16655_s0 + $0x90] ss:$8 sps:$4 sm:$0xff]   ;;  %v7064_v45 = vld [vmem:[%s16662_s7 + $0x8] sm:$0xff] }
   0xf   :  { %v9677_v39 = vld [vmem:[%s16657_s2 + $0x20] sm:$0xff]  ;;  %v8878_v48 = vld [vmem:[%s16655_s0 + $0xb4] ss:$8 sps:$4 sm:$0xff]   ;;  %v8880_v51 = vld [vmem:[%s16655_s0 + $0xb0] ss:$8 sps:$4 sm:$0xff]  }
  0x10   :  { %1259 = vmatpush1.bf16.msra.mxu0 %v8856_v16  ;;  %v8280_v40 = vcombine.high %v9669_v37, %v9677_v39  ;;  %v8875_v44 = vld [vmem:[%s16655_s0 + $0xa4] ss:$8 sps:$4 sm:$0xff]   ;;  %v8877_v47 = vld [vmem:[%s16655_s0 + $0xa0] ss:$8 sps:$4 sm:$0xff]   ;;  %v7066_v49 = vld [vmem:[%s16662_s7 + $0x18] sm:$0xff]  ;;  %v8279_v9 = vcombine.low %v9669_v37, %v9677_v39 }
  0x11   :  { %1260 = vmatprep.subr.bf16.mxu0 %v8857_v17  ;;  %v7063_v46 = vld [vmem:[%s16662_s7] sm:$0xff]  ;;  %v7065_v50 = vld [vmem:[%s16662_s7 + $0x10] sm:$0xff]  ;;  %v7068_v53 = vld [vmem:[%s16662_s7 + $0x28] sm:$0xff] }
  0x12   :  { %2351 = vperm.xlu0 %8844, %v2293_v18   ;;  %2346 = vperm.xlu1 %8843, %v2292_v19   ;;  %v8881_v52 = vld [vmem:[%s16655_s0 + $0xc4] ss:$8 sps:$4 sm:$0xff]   ;;  %v8883_v55 = vld [vmem:[%s16655_s0 + $0xc0] ss:$8 sps:$4 sm:$0xff]   ;;  %v8884_v56 = vld [vmem:[%s16655_s0 + $0xd4] ss:$8 sps:$4 sm:$0xff]  }
  0x13   :  { %1284 = vmatprep.mubr.bf16.mxu0 %v8280_v40  ;;  %v7067_v54 = vld [vmem:[%s16662_s7 + $0x20] sm:$0xff]  ;;  %v7070_v57 = vld [vmem:[%s16662_s7 + $0x38] sm:$0xff]  ;;  %v7069_v58 = vld [vmem:[%s16662_s7 + $0x30] sm:$0xff] }
  0x14   :  { %1261 = vmatpush1.bf16.msra.mxu0 %v8859_v20  ;;  %v8886_v59 = vld [vmem:[%s16655_s0 + $0xd0] ss:$8 sps:$4 sm:$0xff]   ;;  %v8887_v60 = vld [vmem:[%s16655_s0 + $0xe4] ss:$8 sps:$4 sm:$0xff]   ;;  %v8889_v63 = vld [vmem:[%s16655_s0 + $0xe0] ss:$8 sps:$4 sm:$0xff]  }
  0x15   :  { %1262 = vmatprep.subr.bf16.mxu0 %v8860_v21  ;;  %v7072_v61 = vld [vmem:[%s16662_s7 + $0x48] sm:$0xff]  ;;  %v7071_v62 = vld [vmem:[%s16662_s7 + $0x40] sm:$0xff]  ;;  %v8890_v0 = vld [vmem:[%s16655_s0 + $0xf4] ss:$8 sps:$4 sm:$0xff]  }
  0x16   :  { %2361 = vperm.xlu0 %8844, %v2295_v22   ;;  %2356 = vperm.xlu1 %8843, %v2294_v23   ;;  %v7074_v1 = vld [vmem:[%s16662_s7 + $0x58] sm:$0xff]  ;;  %v7073_v2 = vld [vmem:[%s16662_s7 + $0x50] sm:$0xff]  ;;  %v8895_v4 = vld [vmem:[%s16655_s0 + $0x104] ss:$8 sps:$4 sm:$0xff]  }
  0x17   :  { %v8892_v3 = vld [vmem:[%s16655_s0 + $0xf0] ss:$8 sps:$4 sm:$0xff]   ;;  %v159_v5 = vld [vmem:[%s16657_s2 + $0x40] sm:$0xff]  ;;  %v7076_v7 = vld [vmem:[%s16662_s7 + $0x68] sm:$0xff] }
  0x18   :  { %1263 = vmatpush1.bf16.msra.mxu0 %v8862_v24  ;;  %v163_v6 = vld [vmem:[%s16657_s2 + $0x60] sm:$0xff]  ;;  %v8898_v12 = vld [vmem:[%s16655_s0 + $0x114] ss:$8 sps:$4 sm:$0xff]   ;;  %v8896_v15 = vld [vmem:[%s16655_s0 + $0x110] ss:$8 sps:$4 sm:$0xff]  }
  0x19   :  { %1264 = vmatprep.subr.bf16.mxu0 %v8863_v25  ;;  %v7075_v8 = vld [vmem:[%s16662_s7 + $0x60] sm:$0xff]  ;;  %v8288_v11 = vcombine.high %v159_v5, %v163_v6  ;;  %v7078_v13 = vld [vmem:[%s16662_s7 + $0x78] sm:$0xff]  ;;  %v7077_v14 = vld [vmem:[%s16662_s7 + $0x70] sm:$0xff]  ;;  %v8287_v21 = vcombine.low %v159_v5, %v163_v6 }
  0x1a   :  { %2371 = vperm.xlu0 %8844, %v2297_v26   ;;  %2366 = vperm.xlu1 %8843, %v2296_v27   ;;  %v8893_v10 = vld [vmem:[%s16655_s0 + $0x100] ss:$8 sps:$4 sm:$0xff]   ;;  %v8901_v16 = vld [vmem:[%s16655_s0 + $0x124] ss:$8 sps:$4 sm:$0xff]   ;;  %v8904_v24 = vld [vmem:[%s16655_s0 + $0x134] ss:$8 sps:$4 sm:$0xff]  }
  0x1b   :  { %v167_v17 = vld [vmem:[%s16657_s2 + $0x80] sm:$0xff]  ;;  %v7080_v19 = vld [vmem:[%s16662_s7 + $0x88] sm:$0xff]  ;;  %v7082_v25 = vld [vmem:[%s16662_s7 + $0x98] sm:$0xff] }
  0x1c   :  { %1265 = vmatpush1.bf16.msra.mxu0 %v8865_v28  ;;  %v171_v18 = vld [vmem:[%s16657_s2 + $0xa0] sm:$0xff]  ;;  %v7081_v26 = vld [vmem:[%s16662_s7 + $0x90] sm:$0xff]  ;;  %v7086_v37 = vld [vmem:[%s16662_s7 + $0xb8] sm:$0xff] }
  0x1d   :  { %1266 = vmatprep.subr.bf16.mxu0 %v8866_v29  ;;  %v7079_v20 = vld [vmem:[%s16662_s7 + $0x80] sm:$0xff]  ;;  %v8296_v23 = vcombine.high %v167_v17, %v171_v18  ;;  %v8902_v27 = vld [vmem:[%s16655_s0 + $0x130] ss:$8 sps:$4 sm:$0xff]  }
  0x1e   :  { %2381 = vperm.xlu0 %8844, %v2299_v30   ;;  %2376 = vperm.xlu1 %8843, %v2298_v31   ;;  %v8899_v22 = vld [vmem:[%s16655_s0 + $0x120] ss:$8 sps:$4 sm:$0xff]   ;;  %v8907_v30 = vld [vmem:[%s16655_s0 + $0x144] ss:$8 sps:$4 sm:$0xff]   ;;  %v8908_v39 = vld [vmem:[%s16655_s0 + $0x150] ss:$8 sps:$4 sm:$0xff]  }
  0x1f   :  { %v175_v28 = vld [vmem:[%s16657_s2 + $0xc0] sm:$0xff]  ;;  %v7084_v31 = vld [vmem:[%s16662_s7 + $0xa8] sm:$0xff] }
  0x20   :  { %1267 = vmatpush1.bf16.msra.mxu0 %v8868_v32  ;;  %v179_v29 = vld [vmem:[%s16657_s2 + $0xe0] sm:$0xff] }
  0x21   :  { %1268 = vmatprep.subr.bf16.mxu0 %v8869_v33  ;;  %v7083_v32 = vld [vmem:[%s16662_s7 + $0xa0] sm:$0xff]  ;;  %v8295_v33 = vcombine.low %v167_v17, %v171_v18 }
  0x22   :  { %2391 = vperm.xlu0 %8844, %v2301_v34   ;;  %2386 = vperm.xlu1 %8843, %v2300_v35   ;;  %v8304_v34 = vcombine.high %v175_v28, %v179_v29  ;;  %v8905_v35 = vld [vmem:[%s16655_s0 + $0x140] ss:$8 sps:$4 sm:$0xff]  }
  0x23   :  { %v183_v40 = vld [vmem:[%s16657_s2 + $0x100] sm:$0xff] }
  0x24   :  { %1269 = vmatpush1.bf16.msra.mxu0 %v8871_v36  ;;  %v8910_v36 = vld [vmem:[%s16655_s0 + $0x154] ss:$8 sps:$4 sm:$0xff]  }
  0x25   :  { %1270 = vmatprep.subr.bf16.mxu0 %v8872_v38  ;;  %v7085_v38 = vld [vmem:[%s16662_s7 + $0xb0] sm:$0xff] }
  0x26   :  { %2401 = vperm.xlu0 %8844, %v2303_v41   ;;  %2396 = vperm.xlu1 %8843, %v2302_v42   ;;  %v187_v41 = vld [vmem:[%s16657_s2 + $0x120] sm:$0xff] }
  0x27   :  { %v8913_v42 = vld [vmem:[%s16655_s0 + $0x164] ss:$8 sps:$4 sm:$0xff]  }
  0x28   :  { %1271 = vmatpush1.bf16.msra.mxu0 %v8874_v43  ;;  %v7088_v43 = vld [vmem:[%s16662_s7 + $0xc8] sm:$0xff] }
  0x29   :  { %1272 = vmatprep.subr.bf16.mxu0 %v8875_v44  ;;  %v7087_v44 = vld [vmem:[%s16662_s7 + $0xc0] sm:$0xff] }
  0x2a   :  { %7190 = vperm.xlu0 %8844, %v7064_v45   ;;  %7185 = vperm.xlu1 %8843, %v7063_v46   ;;  %v8303_v45 = vcombine.low %v175_v28, %v179_v29  ;;  %v8312_v46 = vcombine.high %v183_v40, %v187_v41  ;;  %v7103_v28 = vld [vmem:[%s16662_s7 + $0x140] sm:$0xff] }
  0x2c   :  { %1273 = vmatpush1.bf16.msra.mxu0 %v8877_v47  ;;  %v8911_v47 = vld [vmem:[%s16655_s0 + $0x160] ss:$8 sps:$4 sm:$0xff]  }
  0x2d   :  { %1274 = vmatprep.subr.bf16.mxu0 %v8878_v48  ;;  %v8916_v48 = vld [vmem:[%s16655_s0 + $0x174] ss:$8 sps:$4 sm:$0xff]  }
  0x2e   :  { %7200 = vperm.xlu0 %8844, %v7066_v49   ;;  %7195 = vperm.xlu1 %8843, %v7065_v50   ;;  %v7090_v49 = vld [vmem:[%s16662_s7 + $0xd8] sm:$0xff]  ;;  %v7089_v50 = vld [vmem:[%s16662_s7 + $0xd0] sm:$0xff] }
  0x30   :  { %1275 = vmatpush1.bf16.msra.mxu0 %v8880_v51  ;;  %v8914_v51 = vld [vmem:[%s16655_s0 + $0x170] ss:$8 sps:$4 sm:$0xff]  }
  0x31   :  { %1276 = vmatprep.subr.bf16.mxu0 %v8881_v52  ;;  %v191_v52 = vld [vmem:[%s16657_s2 + $0x140] sm:$0xff] }
  0x32   :  { %7210 = vperm.xlu0 %8844, %v7068_v53   ;;  %7205 = vperm.xlu1 %8843, %v7067_v54   ;;  %v195_v53 = vld [vmem:[%s16657_s2 + $0x160] sm:$0xff] }
  0x33   :  { %v8919_v54 = vld [vmem:[%s16655_s0 + $0x184] ss:$8 sps:$4 sm:$0xff]   ;;  %v8319_v5 = vcombine.low %v191_v52, %v195_v53 }
  0x34   :  { %1277 = vmatpush1.bf16.msra.mxu0 %v8883_v55  ;;  %v7092_v55 = vld [vmem:[%s16662_s7 + $0xe8] sm:$0xff] }
  0x35   :  { %1278 = vmatprep.subr.bf16.mxu0 %v8884_v56  ;;  %v7091_v56 = vld [vmem:[%s16662_s7 + $0xe0] sm:$0xff] }
  0x36   :  { %7220 = vperm.xlu0 %8844, %v7070_v57   ;;  %7215 = vperm.xlu1 %8843, %v7069_v58   ;;  %v8311_v57 = vcombine.low %v183_v40, %v187_v41  ;;  %v8320_v58 = vcombine.high %v191_v52, %v195_v53  ;;  %v7107_v40 = vld [vmem:[%s16662_s7 + $0x160] sm:$0xff]  ;;  %v7113_v52 = vld [vmem:[%s16662_s7 + $0x190] sm:$0xff]  ;;  %v160_v53 = vld [vmem:[%s16657_s2 + $0x48] sm:$0xff] }
  0x38   :  { %1279 = vmatpush1.bf16.msra.mxu0 %v8886_v59  ;;  %v8917_v59 = vld [vmem:[%s16655_s0 + $0x180] ss:$8 sps:$4 sm:$0xff]  }
  0x39   :  { %1280 = vmatprep.subr.bf16.mxu0 %v8887_v60  ;;  %v8922_v60 = vld [vmem:[%s16655_s0 + $0x194] ss:$8 sps:$4 sm:$0xff]  }
  0x3a   :  { %7230 = vperm.xlu0 %8844, %v7072_v61   ;;  %7225 = vperm.xlu1 %8843, %v7071_v62   ;;  %v7094_v61 = vld [vmem:[%s16662_s7 + $0xf8] sm:$0xff]  ;;  %v7093_v62 = vld [vmem:[%s16662_s7 + $0xf0] sm:$0xff] }
  0x3c   :  { %1281 = vmatpush1.bf16.msra.mxu0 %v8889_v63  ;;  %v199_v63 = vld [vmem:[%s16657_s2 + $0x180] sm:$0xff] }
  0x3d   :  { %1282 = vmatprep.subr.bf16.mxu0 %v8890_v0  ;;  %v8920_v0 = vld [vmem:[%s16655_s0 + $0x190] ss:$8 sps:$4 sm:$0xff]  }
  0x3e   :  { %7240 = vperm.xlu0 %8844, %v7074_v1   ;;  %7235 = vperm.xlu1 %8843, %v7073_v2   ;;  %v203_v1 = vld [vmem:[%s16657_s2 + $0x1a0] sm:$0xff] }
  0x3f   :  { %v8925_v2 = vld [vmem:[%s16655_s0 + $0x1a4] ss:$8 sps:$4 sm:$0xff]   ;;  %v8328_v6 = vcombine.high %v199_v63, %v203_v1  ;;  %v8327_v17 = vcombine.low %v199_v63, %v203_v1  ;;  %v8944_v63 = vld [vmem:[%s16655_s0 + $0x210] ss:$8 sps:$4 sm:$0xff]  }
  0x40   :  { %1283 = vmatpush1.bf16.msra.mxu0 %v8892_v3  ;;  %v7096_v3 = vld [vmem:[%s16662_s7 + $0x108] sm:$0xff] }
  0x41   :  { %1385 = vmatprep.subr.bf16.mxu0 %v8895_v4  ;;  %v7095_v4 = vld [vmem:[%s16662_s7 + $0x100] sm:$0xff]  ;;  %v7120_v1 = vld [vmem:[%s16662_s7 + $0x1c8] sm:$0xff] }
  0x42   :  { %7250 = vperm.xlu0 %8844, %v7076_v7   ;;  %7245 = vperm.xlu1 %8843, %v7075_v8   ;;  %v8923_v7 = vld [vmem:[%s16655_s0 + $0x1a0] ss:$8 sps:$4 sm:$0xff]   ;;  %v8928_v8 = vld [vmem:[%s16655_s0 + $0x1b4] ss:$8 sps:$4 sm:$0xff]  }
  0x43   :  { %1285 = vmatmul.mubr.bf16.vlgmr.msra.gmra.mrb[0].mxu0 %v8279_v9  ;;  %v7098_v9 = vld [vmem:[%s16662_s7 + $0x118] sm:$0xff] }
  0x44   :  { %1386 = vmatpush1.bf16.msra.mxu0 %v8893_v10  ;;  %1294 = vmatprep.mubr.bf16.mxu0 %v8288_v11  ;;  %v7097_v10 = vld [vmem:[%s16662_s7 + $0x110] sm:$0xff]  ;;  %v207_v11 = vld [vmem:[%s16657_s2 + $0x1c0] sm:$0xff] }
  0x45   :  { %1387 = vmatprep.subr.bf16.mxu0 %v8898_v12  ;;  %v8926_v12 = vld [vmem:[%s16655_s0 + $0x1b0] ss:$8 sps:$4 sm:$0xff]  }
  0x46   :  { %7260 = vperm.xlu0 %8844, %v7078_v13   ;;  %7255 = vperm.xlu1 %8843, %v7077_v14   ;;  %v211_v13 = vld [vmem:[%s16657_s2 + $0x1e0] sm:$0xff] }
  0x47   :  { %v8931_v14 = vld [vmem:[%s16655_s0 + $0x1c4] ss:$8 sps:$4 sm:$0xff]   ;;  %v8336_v18 = vcombine.high %v207_v11, %v211_v13  ;;  %v8335_v29 = vcombine.low %v207_v11, %v211_v13  ;;  %v8950_v11 = vld [vmem:[%s16655_s0 + $0x230] ss:$8 sps:$4 sm:$0xff]  }
  0x48   :  { %1388 = vmatpush1.bf16.msra.mxu0 %v8896_v15  ;;  %v7100_v15 = vld [vmem:[%s16662_s7 + $0x128] sm:$0xff] }
  0x49   :  { %1389 = vmatprep.subr.bf16.mxu0 %v8901_v16  ;;  %v7099_v16 = vld [vmem:[%s16662_s7 + $0x120] sm:$0xff]  ;;  %v7124_v13 = vld [vmem:[%s16662_s7 + $0x1e8] sm:$0xff] }
  0x4a   :  { %7270 = vperm.xlu0 %8844, %v7080_v19   ;;  %7265 = vperm.xlu1 %8843, %v7079_v20   ;;  %v8929_v19 = vld [vmem:[%s16655_s0 + $0x1c0] ss:$8 sps:$4 sm:$0xff]   ;;  %v8934_v20 = vld [vmem:[%s16655_s0 + $0x1d4] ss:$8 sps:$4 sm:$0xff]  }
  0x4b   :  { %1295 = vmatmul.mubr.bf16.gmra.mrb[4].mxu0 %v8287_v21  ;;  %v7102_v21 = vld [vmem:[%s16662_s7 + $0x138] sm:$0xff] }
  0x4c   :  { %1304 = vmatprep.mubr.bf16.mxu0 %v8296_v23  ;;  %1390 = vmatpush1.bf16.msra.mxu0 %v8899_v22  ;;  %v7101_v22 = vld [vmem:[%s16662_s7 + $0x130] sm:$0xff]  ;;  %v215_v23 = vld [vmem:[%s16657_s2 + $0x200] sm:$0xff] }
  0x4d   :  { %1391 = vmatprep.subr.bf16.mxu0 %v8904_v24  ;;  %v8932_v24 = vld [vmem:[%s16655_s0 + $0x1d0] ss:$8 sps:$4 sm:$0xff]  }
  0x4e   :  { %7280 = vperm.xlu0 %8844, %v7082_v25   ;;  %7275 = vperm.xlu1 %8843, %v7081_v26   ;;  %v219_v25 = vld [vmem:[%s16657_s2 + $0x220] sm:$0xff] }
  0x4f   :  { %v8937_v26 = vld [vmem:[%s16655_s0 + $0x1e4] ss:$8 sps:$4 sm:$0xff]   ;;  %v8343_v41 = vcombine.low %v215_v23, %v219_v25 }
  0x50   :  { %1392 = vmatpush1.bf16.msra.mxu0 %v8902_v27  ;;  %v7104_v27 = vld [vmem:[%s16662_s7 + $0x148] sm:$0xff] }
  0x51   :  { %1393 = vmatprep.subr.bf16.mxu0 %v8907_v30  ;;  %v8344_v30 = vcombine.high %v215_v23, %v219_v25  ;;  %v7126_v23 = vld [vmem:[%s16662_s7 + $0x1f8] sm:$0xff] }
  0x52   :  { %7290 = vperm.xlu0 %8844, %v7084_v31   ;;  %7285 = vperm.xlu1 %8843, %v7083_v32   ;;  %v8935_v31 = vld [vmem:[%s16655_s0 + $0x1e0] ss:$8 sps:$4 sm:$0xff]   ;;  %v8940_v32 = vld [vmem:[%s16655_s0 + $0x1f4] ss:$8 sps:$4 sm:$0xff]   ;;  %v8956_v25 = vld [vmem:[%s16655_s0 + $0x250] ss:$8 sps:$4 sm:$0xff]  }
  0x53   :  { %1305 = vmatmul.mubr.bf16.gmra.mrb[8].mxu0 %v8295_v33  ;;  %v7106_v33 = vld [vmem:[%s16662_s7 + $0x158] sm:$0xff] }
  0x54   :  { %1314 = vmatprep.mubr.bf16.mxu0 %v8304_v34  ;;  %1394 = vmatpush1.bf16.msra.mxu0 %v8905_v35  ;;  %v7105_v34 = vld [vmem:[%s16662_s7 + $0x150] sm:$0xff] }
  0x55   :  { %1395 = vmatprep.subr.bf16.mxu0 %v8910_v36  ;;  %v8938_v35 = vld [vmem:[%s16655_s0 + $0x1f0] ss:$8 sps:$4 sm:$0xff]   ;;  %v223_v36 = vld [vmem:[%s16657_s2 + $0x240] sm:$0xff] }
  0x56   :  { %7300 = vperm.xlu0 %8844, %v7086_v37   ;;  %7295 = vperm.xlu1 %8843, %v7085_v38   ;;  %v227_v37 = vld [vmem:[%s16657_s2 + $0x260] sm:$0xff] }
  0x57   :  { %v8943_v38 = vld [vmem:[%s16655_s0 + $0x204] ss:$8 sps:$4 sm:$0xff]  }
  0x58   :  { %1396 = vmatpush1.bf16.msra.mxu0 %v8908_v39  ;;  %v7108_v39 = vld [vmem:[%s16662_s7 + $0x168] sm:$0xff] }
  0x59   :  { %1397 = vmatprep.subr.bf16.mxu0 %v8913_v42  ;;  %v8352_v42 = vcombine.high %v223_v36, %v227_v37 }
  0x5a   :  { %7310 = vperm.xlu0 %8844, %v7088_v43   ;;  %7305 = vperm.xlu1 %8843, %v7087_v44   ;;  %v7110_v43 = vld [vmem:[%s16662_s7 + $0x178] sm:$0xff]  ;;  %v7109_v44 = vld [vmem:[%s16662_s7 + $0x170] sm:$0xff] }
  0x5b   :  { %1315 = vmatmul.mubr.bf16.gmra.mrb[12].mxu0 %v8303_v45  ;;  %v152_v45 = vld [vmem:[%s16657_s2 + $0x8] sm:$0xff] }
  0x5c   :  { %1324 = vmatprep.mubr.bf16.mxu0 %v8312_v46  ;;  %1398 = vmatpush1.bf16.msra.mxu0 %v8911_v47  ;;  %v156_v46 = vld [vmem:[%s16657_s2 + $0x28] sm:$0xff] }
  0x5d   :  { %1399 = vmatprep.subr.bf16.mxu0 %v8916_v48  ;;  %v7112_v47 = vld [vmem:[%s16662_s7 + $0x188] sm:$0xff]  ;;  %v7111_v48 = vld [vmem:[%s16662_s7 + $0x180] sm:$0xff] }
  0x5e   :  { %7320 = vperm.xlu0 %8844, %v7090_v49   ;;  %7315 = vperm.xlu1 %8843, %v7089_v50   ;;  %v8351_v49 = vcombine.low %v223_v36, %v227_v37  ;;  %v8282_v50 = vcombine.high %v152_v45, %v156_v46  ;;  %v7130_v36 = vld [vmem:[%s16662_s7 + $0x218] sm:$0xff]  ;;  %v7129_v37 = vld [vmem:[%s16662_s7 + $0x210] sm:$0xff] }
  0x60   :  { %1400 = vmatpush1.bf16.msra.mxu0 %v8914_v51  ;;  %v7114_v51 = vld [vmem:[%s16662_s7 + $0x198] sm:$0xff] }
  0x61   :  { %1401 = vmatprep.subr.bf16.mxu0 %v8919_v54  ;;  %v164_v54 = vld [vmem:[%s16657_s2 + $0x68] sm:$0xff] }
  0x62   :  { %7330 = vperm.xlu0 %8844, %v7092_v55   ;;  %7325 = vperm.xlu1 %8843, %v7091_v56   ;;  %v7116_v55 = vld [vmem:[%s16662_s7 + $0x1a8] sm:$0xff]  ;;  %v7115_v56 = vld [vmem:[%s16662_s7 + $0x1a0] sm:$0xff] }
  0x63   :  { %1325 = vmatmul.mubr.bf16.gmra.mrb[16].mxu0 %v8311_v57  ;;  %v8281_v57 = vcombine.low %v152_v45, %v156_v46  ;;  %v196_v45 = vld [vmem:[%s16657_s2 + $0x168] sm:$0xff] }
  0x64   :  { %1334 = vmatprep.mubr.bf16.mxu0 %v8320_v58  ;;  %1402 = vmatpush1.bf16.msra.mxu0 %v8917_v59  ;;  %v8941_v58 = vld [vmem:[%s16655_s0 + $0x200] ss:$8 sps:$4 sm:$0xff]   ;;  %v8290_v59 = vcombine.high %v160_v53, %v164_v54  ;;  %v8967_v46 = vld [vmem:[%s16655_s0 + $0x284] ss:$8 sps:$4 sm:$0xff]  }
  0x65   :  { %1403 = vmatprep.subr.bf16.mxu0 %v8922_v60  ;;  %v7118_v60 = vld [vmem:[%s16662_s7 + $0x1b8] sm:$0xff] }
  0x66   :  { %7340 = vperm.xlu0 %8844, %v7094_v61   ;;  %7335 = vperm.xlu1 %8843, %v7093_v62   ;;  %v7117_v61 = vld [vmem:[%s16662_s7 + $0x1b0] sm:$0xff] }
  0x67   :  { %v8946_v62 = vld [vmem:[%s16655_s0 + $0x214] ss:$8 sps:$4 sm:$0xff]  }
  0x68   :  { %1404 = vmatpush1.bf16.msra.mxu0 %v8920_v0  ;;  %v8949_v0 = vld [vmem:[%s16655_s0 + $0x224] ss:$8 sps:$4 sm:$0xff]  }
  0x69   :  { %1405 = vmatprep.subr.bf16.mxu0 %v8925_v2  ;;  %v7119_v2 = vld [vmem:[%s16662_s7 + $0x1c0] sm:$0xff] }
  0x6a   :  { %7350 = vperm.xlu0 %8844, %v7096_v3   ;;  %7345 = vperm.xlu1 %8843, %v7095_v4   ;;  %v168_v3 = vld [vmem:[%s16657_s2 + $0x88] sm:$0xff] }
  0x6b   :  { %1335 = vmatmul.mubr.bf16.gmra.mrb[20].mxu0 %v8319_v5  ;;  %v172_v4 = vld [vmem:[%s16657_s2 + $0xa8] sm:$0xff]  ;;  %v8289_v5 = vcombine.low %v160_v53, %v164_v54 }
  0x6c   :  { %1344 = vmatprep.mubr.bf16.mxu0 %v8328_v6  ;;  %1406 = vmatpush1.bf16.msra.mxu0 %v8923_v7  ;;  %v8947_v6 = vld [vmem:[%s16655_s0 + $0x220] ss:$8 sps:$4 sm:$0xff]   ;;  %v8952_v7 = vld [vmem:[%s16655_s0 + $0x234] ss:$8 sps:$4 sm:$0xff]  }
  0x6d   :  { %1407 = vmatprep.subr.bf16.mxu0 %v8928_v8  ;;  %v8298_v8 = vcombine.high %v168_v3, %v172_v4 }
  0x6e   :  { %7360 = vperm.xlu0 %8844, %v7098_v9   ;;  %7355 = vperm.xlu1 %8843, %v7097_v10   ;;  %v7122_v9 = vld [vmem:[%s16662_s7 + $0x1d8] sm:$0xff]  ;;  %v7121_v10 = vld [vmem:[%s16662_s7 + $0x1d0] sm:$0xff] }
  0x70   :  { %1408 = vmatpush1.bf16.msra.mxu0 %v8926_v12  ;;  %v176_v12 = vld [vmem:[%s16657_s2 + $0xc8] sm:$0xff] }
  0x71   :  { %1409 = vmatprep.subr.bf16.mxu0 %v8931_v14  ;;  %v7123_v14 = vld [vmem:[%s16662_s7 + $0x1e0] sm:$0xff] }
  0x72   :  { %7370 = vperm.xlu0 %8844, %v7100_v15   ;;  %7365 = vperm.xlu1 %8843, %v7099_v16   ;;  %v180_v15 = vld [vmem:[%s16657_s2 + $0xe8] sm:$0xff] }
  0x73   :  { %1345 = vmatmul.mubr.bf16.gmra.mrb[24].mxu0 %v8327_v17  ;;  %v8955_v16 = vld [vmem:[%s16655_s0 + $0x244] ss:$8 sps:$4 sm:$0xff]   ;;  %v8297_v17 = vcombine.low %v168_v3, %v172_v4  ;;  %v7138_v3 = vld [vmem:[%s16662_s7 + $0x258] sm:$0xff]  ;;  %v7137_v4 = vld [vmem:[%s16662_s7 + $0x250] sm:$0xff] }
  0x74   :  { %1354 = vmatprep.mubr.bf16.mxu0 %v8336_v18  ;;  %1410 = vmatpush1.bf16.msra.mxu0 %v8929_v19  ;;  %v8953_v18 = vld [vmem:[%s16655_s0 + $0x240] ss:$8 sps:$4 sm:$0xff]   ;;  %v8958_v19 = vld [vmem:[%s16655_s0 + $0x254] ss:$8 sps:$4 sm:$0xff]  }
  0x75   :  { %1411 = vmatprep.subr.bf16.mxu0 %v8934_v20 }
  0x76   :  { %7380 = vperm.xlu0 %8844, %v7102_v21   ;;  %7375 = vperm.xlu1 %8843, %v7101_v22   ;;  %v8306_v22 = vcombine.high %v176_v12, %v180_v15 }
  0x78   :  { %1412 = vmatpush1.bf16.msra.mxu0 %v8932_v24  ;;  %v7125_v24 = vld [vmem:[%s16662_s7 + $0x1f0] sm:$0xff] }
  0x79   :  { %1413 = vmatprep.subr.bf16.mxu0 %v8937_v26  ;;  %v184_v26 = vld [vmem:[%s16657_s2 + $0x108] sm:$0xff] }
  0x7a   :  { %7390 = vperm.xlu0 %8844, %v7104_v27   ;;  %7385 = vperm.xlu1 %8843, %v7103_v28   ;;  %v188_v27 = vld [vmem:[%s16657_s2 + $0x128] sm:$0xff] }
  0x7b   :  { %1355 = vmatmul.mubr.bf16.gmra.mrb[28].mxu0 %v8335_v29  ;;  %v8961_v28 = vld [vmem:[%s16655_s0 + $0x264] ss:$8 sps:$4 sm:$0xff]  }
  0x7c   :  { %1364 = vmatprep.mubr.bf16.mxu0 %v8344_v30  ;;  %1414 = vmatpush1.bf16.msra.mxu0 %v8935_v31  ;;  %v7128_v29 = vld [vmem:[%s16662_s7 + $0x208] sm:$0xff] }
  0x7d   :  { %1415 = vmatprep.subr.bf16.mxu0 %v8940_v32  ;;  %v7127_v32 = vld [vmem:[%s16662_s7 + $0x200] sm:$0xff] }
  0x7e   :  { %7400 = vperm.xlu0 %8844, %v7106_v33   ;;  %7395 = vperm.xlu1 %8843, %v7105_v34   ;;  %v8305_v33 = vcombine.low %v176_v12, %v180_v15  ;;  %v8959_v34 = vld [vmem:[%s16655_s0 + $0x260] ss:$8 sps:$4 sm:$0xff]  }
  0x80   :  { %1416 = vmatpush1.bf16.msra.mxu0 %v8938_v35  ;;  %v8314_v35 = vcombine.high %v184_v26, %v188_v27 }
  0x81   :  { %1518 = vmatprep.subr.bf16.mxu0 %v8943_v38  ;;  %v10121_v20 = vpop.permute.xlu0 %2311  ;;  %v10123_v21 = vpop.permute.xlu1 %2306  ;;  %v8964_v38 = vld [vmem:[%s16655_s0 + $0x274] ss:$8 sps:$4 sm:$0xff]  }
  0x82   :  { %7410 = vperm.xlu0 %8844, %v7108_v39   ;;  %7405 = vperm.xlu1 %8843, %v7107_v40   ;;  %v8962_v39 = vld [vmem:[%s16655_s0 + $0x270] ss:$8 sps:$4 sm:$0xff]   ;;  %v192_v40 = vld [vmem:[%s16657_s2 + $0x148] sm:$0xff] }
  0x83   :  { %1365 = vmatmul.mubr.bf16.gmra.mrb[32].mxu0 %v8343_v41 }
  0x84   :  { %1374 = vmatprep.mubr.bf16.mxu0 %v8352_v42 }
  0x85   :  { %v10146_v30 = vpop.permute.xlu0 %2321  ;;  %v10148_v31 = vpop.permute.xlu1 %2316 }
  0x86   :  { %7420 = vperm.xlu0 %8844, %v7110_v43   ;;  %7415 = vperm.xlu1 %8843, %v7109_v44   ;;  %v7132_v43 = vld [vmem:[%s16662_s7 + $0x228] sm:$0xff]  ;;  %v7131_v44 = vld [vmem:[%s16662_s7 + $0x220] sm:$0xff] }
  0x89   :  { %v10171_v41 = vpop.permute.xlu0 %2331  ;;  %v10173_v42 = vpop.permute.xlu1 %2326 }
  0x8a   :  { %7430 = vperm.xlu0 %8844, %v7112_v47   ;;  %7425 = vperm.xlu1 %8843, %v7111_v48   ;;  %17346 = vst [vmem:[#allocation5_spill] sm:$0xff] %v10171_v41  ;;  %17347 = vst [vmem:[#allocation6_spill] sm:$0xff] %v10173_v42  ;;  %v8313_v47 = vcombine.low %v184_v26, %v188_v27  ;;  %v8965_v48 = vld [vmem:[%s16655_s0 + $0x280] ss:$8 sps:$4 sm:$0xff]  }
  0x8b   :  { %1375 = vmatmul.mubr.bf16.gmra.mrb[36].mxu0 %v8351_v49  ;;  %v8970_v49 = vld [vmem:[%s16655_s0 + $0x294] ss:$8 sps:$4 sm:$0xff]  }
  0x8c   :  { %1417 = vmatprep.mubr.bf16.mxu0 %v8282_v50  ;;  %v8322_v50 = vcombine.high %v192_v40, %v196_v45 }
  0x8d   :  { %v10199_v53 = vpop.permute.xlu0 %2341  ;;  %v10201_v54 = vpop.permute.xlu1 %2336 }
  0x8e   :  { %7440 = vperm.xlu0 %8844, %v7114_v51   ;;  %7435 = vperm.xlu1 %8843, %v7113_v52   ;;  %v7134_v51 = vld [vmem:[%s16662_s7 + $0x238] sm:$0xff]  ;;  %v7133_v52 = vld [vmem:[%s16662_s7 + $0x230] sm:$0xff]  ;;  %17348 = vst [vmem:[#allocation7_spill] sm:$0xff] %v10199_v53  ;;  %17349 = vst [vmem:[#allocation8_spill] sm:$0xff] %v10201_v54 }
  0x92   :  { %7450 = vperm.xlu0 %8844, %v7116_v55   ;;  %7445 = vperm.xlu1 %8843, %v7115_v56   ;;  %v8968_v55 = vld [vmem:[%s16655_s0 + $0x290] ss:$8 sps:$4 sm:$0xff]   ;;  %v200_v56 = vld [vmem:[%s16657_s2 + $0x188] sm:$0xff] }
  0x93   :  { %1418 = vmatmul.mubr.bf16.vlgmr.msra.gmra.mrb[0].mxu0 %v8281_v57  ;;  %v204_v57 = vld [vmem:[%s16657_s2 + $0x1a8] sm:$0xff] }
  0x94   :  { %1519 = vmatpush1.bf16.msra.mxu0 %v8941_v58  ;;  %1427 = vmatprep.mubr.bf16.mxu0 %v8290_v59  ;;  %v8973_v58 = vld [vmem:[%s16655_s0 + $0x2a4] ss:$8 sps:$4 sm:$0xff]  }
  0x95   :  { %1520 = vmatprep.subr.bf16.mxu0 %v8946_v62  ;;  %v7136_v59 = vld [vmem:[%s16662_s7 + $0x248] sm:$0xff] }
  0x96   :  { %7460 = vperm.xlu0 %8844, %v7118_v60   ;;  %7455 = vperm.xlu1 %8843, %v7117_v61   ;;  %v7135_v60 = vld [vmem:[%s16662_s7 + $0x240] sm:$0xff]  ;;  %v8321_v61 = vcombine.low %v192_v40, %v196_v45 }
  0x97   :  { %v8971_v62 = vld [vmem:[%s16655_s0 + $0x2a0] ss:$8 sps:$4 sm:$0xff]  }
  0x98   :  { %1521 = vmatpush1.bf16.msra.mxu0 %v8944_v63  ;;  %v8976_v63 = vld [vmem:[%s16655_s0 + $0x2b4] ss:$8 sps:$4 sm:$0xff]  }
  0x99   :  { %1522 = vmatprep.subr.bf16.mxu0 %v8949_v0  ;;  %v10227_v0 = vpop.permute.xlu0 %2351 }
  0x9a   :  { %7470 = vperm.xlu0 %8844, %v7120_v1   ;;  %7465 = vperm.xlu1 %8843, %v7119_v2   ;;  %17350 = vst [vmem:[#allocation9_spill] sm:$0xff] %v10227_v0  ;;  %v10229_v1 = vpop.permute.xlu1 %2346  ;;  %v8330_v2 = vcombine.high %v200_v56, %v204_v57 }
  0x9b   :  { %1428 = vmatmul.mubr.bf16.gmra.mrb[4].mxu0 %v8289_v5  ;;  %17351 = vst [vmem:[#allocation10_spill] sm:$0xff] %v10229_v1 }
  0x9c   :  { %1437 = vmatprep.mubr.bf16.mxu0 %v8298_v8  ;;  %1523 = vmatpush1.bf16.msra.mxu0 %v8947_v6 }
  0x9d   :  { %1524 = vmatprep.subr.bf16.mxu0 %v8952_v7 }
  0x9e   :  { %7480 = vperm.xlu0 %8844, %v7122_v9   ;;  %7475 = vperm.xlu1 %8843, %v7121_v10  }
  0xa0   :  { %1525 = vmatpush1.bf16.msra.mxu0 %v8950_v11 }
  0xa1   :  { %1526 = vmatprep.subr.bf16.mxu0 %v8955_v16 }
  0xa2   :  { %7490 = vperm.xlu0 %8844, %v7124_v13   ;;  %7485 = vperm.xlu1 %8843, %v7123_v14  }
  0xa3   :  { %1438 = vmatmul.mubr.bf16.gmra.mrb[8].mxu0 %v8297_v17 }
  0xa4   :  { %1447 = vmatprep.mubr.bf16.mxu0 %v8306_v22  ;;  %1527 = vmatpush1.bf16.msra.mxu0 %v8953_v18 }
  0xa5   :  { %1528 = vmatprep.subr.bf16.mxu0 %v8958_v19 }
  0xa6   :  { %7500 = vperm.xlu0 %8844, %v7126_v23   ;;  %7495 = vperm.xlu1 %8843, %v7125_v24  }
  0xa8   :  { %1529 = vmatpush1.bf16.msra.mxu0 %v8956_v25 }
  0xa9   :  { %1530 = vmatprep.subr.bf16.mxu0 %v8961_v28 }
  0xaa   :  { %7510 = vperm.xlu0 %8844, %v7128_v29   ;;  %7505 = vperm.xlu1 %8843, %v7127_v32  }
  0xab   :  { %1448 = vmatmul.mubr.bf16.gmra.mrb[12].mxu0 %v8305_v33 }
  0xac   :  { %1457 = vmatprep.mubr.bf16.mxu0 %v8314_v35  ;;  %1531 = vmatpush1.bf16.msra.mxu0 %v8959_v34 }
  0xad   :  { %1532 = vmatprep.subr.bf16.mxu0 %v8964_v38 }
  0xae   :  { %7520 = vperm.xlu0 %8844, %v7130_v36   ;;  %7515 = vperm.xlu1 %8843, %v7129_v37  }
  0xb0   :  { %1533 = vmatpush1.bf16.msra.mxu0 %v8962_v39 }
  0xb1   :  { %1534 = vmatprep.subr.bf16.mxu0 %v8967_v46 }
  0xb2   :  { %7530 = vperm.xlu0 %8844, %v7132_v43   ;;  %7525 = vperm.xlu1 %8843, %v7131_v44  }
  0xb3   :  { %1458 = vmatmul.mubr.bf16.gmra.mrb[16].mxu0 %v8313_v47 }
  0xb4   :  { %1467 = vmatprep.mubr.bf16.mxu0 %v8322_v50  ;;  %1535 = vmatpush1.bf16.msra.mxu0 %v8965_v48 }
  0xb5   :  { %1536 = vmatprep.subr.bf16.mxu0 %v8970_v49 }
  0xb6   :  { %7540 = vperm.xlu0 %8844, %v7134_v51   ;;  %7535 = vperm.xlu1 %8843, %v7133_v52  }
  0xb8   :  { %1537 = vmatpush1.bf16.msra.mxu0 %v8968_v55 }
  0xb9   :  { %1538 = vmatprep.subr.bf16.mxu0 %v8973_v58 }
  0xba   :  { %7550 = vperm.xlu0 %8844, %v7136_v59   ;;  %7545 = vperm.xlu1 %8843, %v7135_v60  }
  0xbb   :  { %1468 = vmatmul.mubr.bf16.gmra.mrb[20].mxu0 %v8321_v61 }
  0xbc   :  { %13 = vsyncpa [#allocation3], 0  ;;  %1477 = vmatprep.mubr.bf16.mxu0 %v8330_v2  ;;  %1539 = vmatpush1.bf16.msra.mxu0 %v8971_v62  ;;  %v8974_v5 = vld [vmem:[%s16655_s0 + $0x2b0] ss:$8 sps:$4 sm:$0xff]   ;;  %v208_v6 = vld [vmem:[%s16657_s2 + $0x1c8] sm:$0xff]  ;;  %v10249_v9 = vpop.permute.xlu0 %2361  ;;  %v10251_v10 = vpop.permute.xlu1 %2356  ;;  %v8329_v13 = vcombine.low %v200_v56, %v204_v57  ;;  %vm1221_vm0 = vcmask 523264  }
  0xbd   :  { %v212_v7 = vld [vmem:[%s16657_s2 + $0x1e8] sm:$0xff]  ;;  %1540 = vmatprep.subr.bf16.mxu0 %v8976_v63  ;;  %17352 = vst [vmem:[#allocation11_spill] sm:$0xff] %v10249_v9  ;;  %17353 = vst [vmem:[#allocation12_spill] sm:$0xff] %v10251_v10  ;;  %v7139_v12 = vld [vmem:[%s16662_s7 + $0x260] sm:$0xff]  ;;  %vm3249_vm1 = vcmask 261120  }
  0xbe   :  { %v8979_v8 = vld [vmem:[%s16655_s0 + $0x2c4] ss:$8 sps:$4 sm:$0xff]   ;;  %7560 = vperm.xlu0 %8844, %v7138_v3   ;;  %7555 = vperm.xlu1 %8843, %v7137_v4   ;;  %v8338_v14 = vcombine.high %v208_v6, %v212_v7  ;;  %v8977_v15 = vld [vmem:[%s16655_s0 + $0x2c0] ss:$8 sps:$4 sm:$0xff]   ;;  %v8982_v16 = vld [vmem:[%s16655_s0 + $0x2d4] ss:$8 sps:$4 sm:$0xff]   ;;  %v8337_v29 = vcombine.low %v208_v6, %v212_v7 }
  0xbf   :  { %v7140_v11 = vld [vmem:[%s16662_s7 + $0x268] sm:$0xff]  ;;  %v7142_v17 = vld [vmem:[%s16662_s7 + $0x278] sm:$0xff]  ;;  %v7141_v18 = vld [vmem:[%s16662_s7 + $0x270] sm:$0xff] }
  0xc0   :  { %1541 = vmatpush1.bf16.msra.mxu0 %v8974_v5  ;;  %v10271_v19 = vpop.permute.xlu0 %2371  ;;  %v10273_v22 = vpop.permute.xlu1 %2366  ;;  %v8980_v23 = vld [vmem:[%s16655_s0 + $0x2d0] ss:$8 sps:$4 sm:$0xff]   ;;  %v216_v24 = vld [vmem:[%s16657_s2 + $0x208] sm:$0xff]  ;;  %v7143_v28 = vld [vmem:[%s16662_s7 + $0x280] sm:$0xff] }
  0xc1   :  { %1542 = vmatprep.subr.bf16.mxu0 %v8979_v8  ;;  %17354 = vst [vmem:[#allocation13_spill] sm:$0xff] %v10271_v19  ;;  %17355 = vst [vmem:[#allocation14_spill] sm:$0xff] %v10273_v22  ;;  %v220_v25 = vld [vmem:[%s16657_s2 + $0x228] sm:$0xff]  ;;  %v8988_v34 = vld [vmem:[%s16655_s0 + $0x2f4] ss:$8 sps:$4 sm:$0xff]  }
  0xc2   :  { %7570 = vperm.xlu0 %8844, %v7140_v11   ;;  %7565 = vperm.xlu1 %8843, %v7139_v12   ;;  %v8985_v26 = vld [vmem:[%s16655_s0 + $0x2e4] ss:$8 sps:$4 sm:$0xff]   ;;  %v8346_v32 = vcombine.high %v216_v24, %v220_v25  ;;  %v8983_v33 = vld [vmem:[%s16655_s0 + $0x2e0] ss:$8 sps:$4 sm:$0xff]   ;;  %v7146_v37 = vld [vmem:[%s16662_s7 + $0x298] sm:$0xff]  ;;  %v8345_v47 = vcombine.low %v216_v24, %v220_v25 }
  0xc3   :  { %1478 = vmatmul.mubr.bf16.gmra.mrb[24].mxu0 %v8329_v13  ;;  %v7144_v27 = vld [vmem:[%s16662_s7 + $0x288] sm:$0xff]  ;;  %v7145_v38 = vld [vmem:[%s16662_s7 + $0x290] sm:$0xff]  ;;  %v7147_v46 = vld [vmem:[%s16662_s7 + $0x2a0] sm:$0xff] }
  0xc4   :  { %1487 = vmatprep.mubr.bf16.mxu0 %v8338_v14  ;;  %1543 = vmatpush1.bf16.msra.mxu0 %v8977_v15  ;;  %v10299_v35 = vpop.permute.xlu0 %2381  ;;  %v10301_v36 = vpop.permute.xlu1 %2376  ;;  %v8986_v39 = vld [vmem:[%s16655_s0 + $0x2f0] ss:$8 sps:$4 sm:$0xff]   ;;  %v224_v40 = vld [vmem:[%s16657_s2 + $0x248] sm:$0xff]  ;;  %v7151_v60 = vld [vmem:[%s16662_s7 + $0x2c0] sm:$0xff] }
  0xc5   :  { %1544 = vmatprep.subr.bf16.mxu0 %v8982_v16  ;;  %17356 = vst [vmem:[#allocation15_spill] sm:$0xff] %v10299_v35  ;;  %17357 = vst [vmem:[#allocation16_spill] sm:$0xff] %v10301_v36  ;;  %v228_v43 = vld [vmem:[%s16657_s2 + $0x268] sm:$0xff]  ;;  %v7150_v51 = vld [vmem:[%s16662_s7 + $0x2b8] sm:$0xff] }
  0xc6   :  { %7580 = vperm.xlu0 %8844, %v7142_v17   ;;  %7575 = vperm.xlu1 %8843, %v7141_v18   ;;  %v8991_v44 = vld [vmem:[%s16655_s0 + $0x304] ss:$8 sps:$4 sm:$0xff]   ;;  %v8354_v50 = vcombine.high %v224_v40, %v228_v43  ;;  %v7149_v52 = vld [vmem:[%s16662_s7 + $0x2b0] sm:$0xff]  ;;  %v8353_v61 = vcombine.low %v224_v40, %v228_v43  ;;  %v7154_v63 = vld [vmem:[%s16662_s7 + $0x2d8] sm:$0xff] }
  0xc7   :  { %v7148_v45 = vld [vmem:[%s16662_s7 + $0x2a8] sm:$0xff]  ;;  %v153_v55 = vld [vmem:[%s16657_s2 + $0x10] sm:$0xff]  ;;  %v7155_v8 = vld [vmem:[%s16662_s7 + $0x2e0] sm:$0xff] }
  0xc8   :  { %1545 = vmatpush1.bf16.msra.mxu0 %v8980_v23  ;;  %v10327_v48 = vpop.permute.xlu0 %2391  ;;  %v10329_v49 = vpop.permute.xlu1 %2386  ;;  %v157_v56 = vld [vmem:[%s16657_s2 + $0x30] sm:$0xff]  ;;  %v7152_v59 = vld [vmem:[%s16662_s7 + $0x2c8] sm:$0xff]  ;;  %v7158_v17 = vld [vmem:[%s16662_s7 + $0x2f8] sm:$0xff] }
  0xc9   :  { %1546 = vmatprep.subr.bf16.mxu0 %v8985_v26  ;;  %17358 = vst [vmem:[#allocation17_spill] sm:$0xff] %v10327_v48  ;;  %17359 = vst [vmem:[#allocation18_spill] sm:$0xff] %v10329_v49  ;;  %v8284_v62 = vcombine.high %v153_v55, %v157_v56  ;;  %v7153_v2 = vld [vmem:[%s16662_s7 + $0x2d0] sm:$0xff]  ;;  %v7156_v7 = vld [vmem:[%s16662_s7 + $0x2e8] sm:$0xff]  ;;  %v8283_v11 = vcombine.low %v153_v55, %v157_v56 }
  0xca   :  { %7590 = vperm.xlu0 %8844, %v7144_v27   ;;  %7585 = vperm.xlu1 %8843, %v7143_v28   ;;  %v161_v5 = vld [vmem:[%s16657_s2 + $0x50] sm:$0xff]  ;;  %v8989_v12 = vld [vmem:[%s16655_s0 + $0x300] ss:$8 sps:$4 sm:$0xff]   ;;  %v8997_v26 = vld [vmem:[%s16655_s0 + $0x324] ss:$8 sps:$4 sm:$0xff]  }
  0xcb   :  { %1488 = vmatmul.mubr.bf16.gmra.mrb[28].mxu0 %v8337_v29  ;;  %v165_v6 = vld [vmem:[%s16657_s2 + $0x70] sm:$0xff]  ;;  %v7160_v27 = vld [vmem:[%s16662_s7 + $0x308] sm:$0xff]  ;;  %v7159_v28 = vld [vmem:[%s16662_s7 + $0x300] sm:$0xff] }
  0xcc   :  { %1497 = vmatprep.mubr.bf16.mxu0 %v8346_v32  ;;  %1547 = vmatpush1.bf16.msra.mxu0 %v8983_v33  ;;  %v10343_v57 = vpop.permute.xlu0 %2401  ;;  %v10345_v58 = vpop.permute.xlu1 %2396  ;;  %v8292_v13 = vcombine.high %v161_v5, %v165_v6  ;;  %v8994_v14 = vld [vmem:[%s16655_s0 + $0x314] ss:$8 sps:$4 sm:$0xff]   ;;  %v8992_v23 = vld [vmem:[%s16655_s0 + $0x310] ss:$8 sps:$4 sm:$0xff]   ;;  %v8291_v29 = vcombine.low %v161_v5, %v165_v6 }
  0xcd   :  { %1548 = vmatprep.subr.bf16.mxu0 %v8988_v34  ;;  %17360 = vst [vmem:[#allocation19_spill] sm:$0xff] %v10343_v57  ;;  %17361 = vst [vmem:[#allocation20_spill] sm:$0xff] %v10345_v58  ;;  %v7157_v18 = vld [vmem:[%s16662_s7 + $0x2f0] sm:$0xff] }
  0xce   :  { %7600 = vperm.xlu0 %8844, %v7146_v37   ;;  %7595 = vperm.xlu1 %8843, %v7145_v38   ;;  %v169_v24 = vld [vmem:[%s16657_s2 + $0x90] sm:$0xff]  ;;  %v8995_v37 = vld [vmem:[%s16655_s0 + $0x320] ss:$8 sps:$4 sm:$0xff]  }
  0xcf   :  { %v173_v25 = vld [vmem:[%s16657_s2 + $0xb0] sm:$0xff] }
  0xd0   :  { %1549 = vmatpush1.bf16.msra.mxu0 %v8986_v39  ;;  %v10359_v3 = vpop.permute.xlu0 %7190  ;;  %v10361_v4 = vpop.permute.xlu1 %7185  ;;  %v8300_v34 = vcombine.high %v169_v24, %v173_v25  ;;  %v9000_v38 = vld [vmem:[%s16655_s0 + $0x334] ss:$8 sps:$4 sm:$0xff]   ;;  %v8998_v43 = vld [vmem:[%s16655_s0 + $0x330] ss:$8 sps:$4 sm:$0xff]   ;;  %v8299_v55 = vcombine.low %v169_v24, %v173_v25 }
  0xd1   :  { %1651 = vmatprep.subr.bf16.mxu0 %v8991_v44  ;;  %17362 = vst [vmem:[#allocation21_spill] sm:$0xff] %v10359_v3  ;;  %17363 = vst [vmem:[#allocation22_spill] sm:$0xff] %v10361_v4  ;;  %v7162_v39 = vld [vmem:[%s16662_s7 + $0x318] sm:$0xff]  ;;  %v7161_v40 = vld [vmem:[%s16662_s7 + $0x310] sm:$0xff] }
  0xd2   :  { %7610 = vperm.xlu0 %8844, %v7148_v45   ;;  %7605 = vperm.xlu1 %8843, %v7147_v46   ;;  %v177_v44 = vld [vmem:[%s16657_s2 + $0xd0] sm:$0xff]  ;;  %v9003_v46 = vld [vmem:[%s16655_s0 + $0x344] ss:$8 sps:$4 sm:$0xff]   ;;  %v7170_v25 = vld [vmem:[%s16662_s7 + $0x358] sm:$0xff] }
  0xd3   :  { %1498 = vmatmul.mubr.bf16.gmra.mrb[32].mxu0 %v8345_v47  ;;  %v181_v45 = vld [vmem:[%s16657_s2 + $0xf0] sm:$0xff] }
  0xd4   :  { %1507 = vmatprep.mubr.bf16.mxu0 %v8354_v50  ;;  %v10381_v15 = vpop.permute.xlu0 %7200  ;;  %v10383_v16 = vpop.permute.xlu1 %7195  ;;  %v8308_v56 = vcombine.high %v177_v44, %v181_v45  ;;  %v9004_v5 = vld [vmem:[%s16655_s0 + $0x350] ss:$8 sps:$4 sm:$0xff]  }
  0xd5   :  { %17364 = vst [vmem:[#allocation23_spill] sm:$0xff] %v10381_v15  ;;  %17365 = vst [vmem:[#allocation24_spill] sm:$0xff] %v10383_v16  ;;  %v185_v6 = vld [vmem:[%s16657_s2 + $0x110] sm:$0xff] }
  0xd6   :  { %7620 = vperm.xlu0 %8844, %v7150_v51   ;;  %7615 = vperm.xlu1 %8843, %v7149_v52   ;;  %v7164_v51 = vld [vmem:[%s16662_s7 + $0x328] sm:$0xff]  ;;  %v7163_v52 = vld [vmem:[%s16662_s7 + $0x320] sm:$0xff] }
  0xd8   :  { %v10409_v32 = vpop.permute.xlu0 %7210  ;;  %v10411_v33 = vpop.permute.xlu1 %7205 }
  0xd9   :  { %17366 = vst [vmem:[#allocation25_spill] sm:$0xff] %v10409_v32  ;;  %17367 = vst [vmem:[#allocation26_spill] sm:$0xff] %v10411_v33 }
  0xda   :  { %7630 = vperm.xlu0 %8844, %v7152_v59   ;;  %7625 = vperm.xlu1 %8843, %v7151_v60   ;;  %v9001_v59 = vld [vmem:[%s16655_s0 + $0x340] ss:$8 sps:$4 sm:$0xff]   ;;  %v9006_v60 = vld [vmem:[%s16655_s0 + $0x354] ss:$8 sps:$4 sm:$0xff]  }
  0xdb   :  { %1508 = vmatmul.mubr.bf16.gmra.mrb[36].mxu0 %v8353_v61  ;;  %v7166_v61 = vld [vmem:[%s16662_s7 + $0x338] sm:$0xff] }
  0xdc   :  { %1550 = vmatprep.mubr.bf16.mxu0 %v8284_v62  ;;  %v10437_v47 = vpop.permute.xlu0 %7220  ;;  %v10439_v50 = vpop.permute.xlu1 %7215  ;;  %v7165_v62 = vld [vmem:[%s16662_s7 + $0x330] sm:$0xff] }
  0xdd   :  { %17368 = vst [vmem:[#allocation27_spill] sm:$0xff] %v10437_v47  ;;  %17369 = vst [vmem:[#allocation28_spill] sm:$0xff] %v10439_v50 }
  0xde   :  { %7640 = vperm.xlu0 %8844, %v7154_v63   ;;  %7635 = vperm.xlu1 %8843, %v7153_v2  }
  0xe0   :  { %v10459_v63 = vpop.permute.xlu0 %7230  ;;  %v10461_v2 = vpop.permute.xlu1 %7225 }
  0xe1   :  { %17370 = vst [vmem:[#allocation29_spill] sm:$0xff] %v10459_v63  ;;  %17371 = vst [vmem:[#allocation30_spill] sm:$0xff] %v10461_v2 }
  0xe2   :  { %7650 = vperm.xlu0 %8844, %v7156_v7   ;;  %7645 = vperm.xlu1 %8843, %v7155_v8   ;;  %v189_v7 = vld [vmem:[%s16657_s2 + $0x130] sm:$0xff]  ;;  %v9009_v8 = vld [vmem:[%s16655_s0 + $0x364] ss:$8 sps:$4 sm:$0xff]  }
  0xe3   :  { %1551 = vmatmul.mubr.bf16.vlgmr.msra.gmra.mrb[0].mxu0 %v8283_v11  ;;  %v7168_v11 = vld [vmem:[%s16662_s7 + $0x348] sm:$0xff] }
  0xe4   :  { %1652 = vmatpush1.bf16.msra.mxu0 %v8989_v12  ;;  %1560 = vmatprep.mubr.bf16.mxu0 %v8292_v13  ;;  %v7167_v12 = vld [vmem:[%s16662_s7 + $0x340] sm:$0xff]  ;;  %v8307_v13 = vcombine.low %v177_v44, %v181_v45  ;;  %v10489_v24 = vpop.permute.xlu1 %7235 }
  0xe5   :  { %1653 = vmatprep.subr.bf16.mxu0 %v8994_v14  ;;  %v8316_v14 = vcombine.high %v185_v6, %v189_v7  ;;  %17373 = vst [vmem:[#allocation32_spill] sm:$0xff] %v10489_v24  ;;  %v9013_v45 = vld [vmem:[%s16655_s0 + $0x380] ss:$8 sps:$4 sm:$0xff]  }
  0xe6   :  { %7660 = vperm.xlu0 %8844, %v7158_v17   ;;  %7655 = vperm.xlu1 %8843, %v7157_v18   ;;  %v9007_v17 = vld [vmem:[%s16655_s0 + $0x360] ss:$8 sps:$4 sm:$0xff]   ;;  %v9012_v18 = vld [vmem:[%s16655_s0 + $0x374] ss:$8 sps:$4 sm:$0xff]  }
  0xe8   :  { %1654 = vmatpush1.bf16.msra.mxu0 %v8992_v23  ;;  %v10487_v23 = vpop.permute.xlu0 %7240 }
  0xe9   :  { %1655 = vmatprep.subr.bf16.mxu0 %v8997_v26  ;;  %17372 = vst [vmem:[#allocation31_spill] sm:$0xff] %v10487_v23  ;;  %v7169_v26 = vld [vmem:[%s16662_s7 + $0x350] sm:$0xff] }
  0xea   :  { %7670 = vperm.xlu0 %8844, %v7160_v27   ;;  %7665 = vperm.xlu1 %8843, %v7159_v28   ;;  %v9010_v27 = vld [vmem:[%s16655_s0 + $0x370] ss:$8 sps:$4 sm:$0xff]  }
  0xeb   :  { %1561 = vmatmul.mubr.bf16.gmra.mrb[4].mxu0 %v8291_v29  ;;  %v193_v28 = vld [vmem:[%s16657_s2 + $0x150] sm:$0xff] }
  0xec   :  { %1570 = vmatprep.mubr.bf16.mxu0 %v8300_v34  ;;  %1656 = vmatpush1.bf16.msra.mxu0 %v8995_v37  ;;  %v197_v29 = vld [vmem:[%s16657_s2 + $0x170] sm:$0xff]  ;;  %v9015_v34 = vld [vmem:[%s16655_s0 + $0x384] ss:$8 sps:$4 sm:$0xff]  }
  0xed   :  { %1657 = vmatprep.subr.bf16.mxu0 %v9000_v38  ;;  %v7172_v37 = vld [vmem:[%s16662_s7 + $0x368] sm:$0xff]  ;;  %v7171_v38 = vld [vmem:[%s16662_s7 + $0x360] sm:$0xff]  ;;  %v8324_v44 = vcombine.high %v193_v28, %v197_v29 }
  0xee   :  { %7680 = vperm.xlu0 %8844, %v7162_v39   ;;  %7675 = vperm.xlu1 %8843, %v7161_v40   ;;  %v8315_v39 = vcombine.low %v185_v6, %v189_v7  ;;  %v10515_v40 = vpop.permute.xlu0 %7250  ;;  %v7175_v6 = vld [vmem:[%s16662_s7 + $0x380] sm:$0xff]  ;;  %v8323_v7 = vcombine.low %v193_v28, %v197_v29  ;;  %v7180_v28 = vld [vmem:[%s16662_s7 + $0x3a8] sm:$0xff] }
  0xef   :  { %17374 = vst [vmem:[#allocation33_spill] sm:$0xff] %v10515_v40  ;;  %v7179_v29 = vld [vmem:[%s16662_s7 + $0x3a0] sm:$0xff] }
  0xf0   :  { %1658 = vmatpush1.bf16.msra.mxu0 %v8998_v43  ;;  %v10517_v43 = vpop.permute.xlu1 %7245 }
  0xf1   :  { %1659 = vmatprep.subr.bf16.mxu0 %v9003_v46  ;;  %17375 = vst [vmem:[#allocation34_spill] sm:$0xff] %v10517_v43  ;;  %v9018_v46 = vld [vmem:[%s16655_s0 + $0x394] ss:$8 sps:$4 sm:$0xff]  }
  0xf2   :  { %7690 = vperm.xlu0 %8844, %v7164_v51   ;;  %7685 = vperm.xlu1 %8843, %v7163_v52   ;;  %v7174_v51 = vld [vmem:[%s16662_s7 + $0x378] sm:$0xff]  ;;  %v7173_v52 = vld [vmem:[%s16662_s7 + $0x370] sm:$0xff] }
  0xf3   :  { %1571 = vmatmul.mubr.bf16.gmra.mrb[8].mxu0 %v8299_v55  ;;  %v9016_v55 = vld [vmem:[%s16655_s0 + $0x390] ss:$8 sps:$4 sm:$0xff]  }
  0xf4   :  { %1580 = vmatprep.mubr.bf16.mxu0 %v8308_v56  ;;  %1660 = vmatpush1.bf16.msra.mxu0 %v9001_v59  ;;  %v201_v56 = vld [vmem:[%s16657_s2 + $0x190] sm:$0xff] }
  0xf5   :  { %1661 = vmatprep.subr.bf16.mxu0 %v9006_v60  ;;  %v205_v59 = vld [vmem:[%s16657_s2 + $0x1b0] sm:$0xff]  ;;  %v9021_v60 = vld [vmem:[%s16655_s0 + $0x3a4] ss:$8 sps:$4 sm:$0xff]  }
  0xf6   :  { %7700 = vperm.xlu0 %8844, %v7166_v61   ;;  %7695 = vperm.xlu1 %8843, %v7165_v62   ;;  %v10543_v61 = vpop.permute.xlu0 %7260  ;;  %v10545_v62 = vpop.permute.xlu1 %7255 }
  0xf7   :  { %17376 = vst [vmem:[#allocation35_spill] sm:$0xff] %v10543_v61  ;;  %17377 = vst [vmem:[#allocation36_spill] sm:$0xff] %v10545_v62 }
  0xf8   :  { %1662 = vmatpush1.bf16.msra.mxu0 %v9004_v5  ;;  %v7176_v5 = vld [vmem:[%s16662_s7 + $0x388] sm:$0xff] }
  0xf9   :  { %1663 = vmatprep.subr.bf16.mxu0 %v9009_v8  ;;  %v8332_v8 = vcombine.high %v201_v56, %v205_v59 }
  0xfa   :  { %7710 = vperm.xlu0 %8844, %v7168_v11   ;;  %7705 = vperm.xlu1 %8843, %v7167_v12   ;;  %v9019_v11 = vld [vmem:[%s16655_s0 + $0x3a0] ss:$8 sps:$4 sm:$0xff]   ;;  %v9024_v12 = vld [vmem:[%s16655_s0 + $0x3b4] ss:$8 sps:$4 sm:$0xff]  }
  0xfb   :  { %1581 = vmatmul.mubr.bf16.gmra.mrb[12].mxu0 %v8307_v13  ;;  %v7178_v13 = vld [vmem:[%s16662_s7 + $0x398] sm:$0xff] }
  0xfc   :  { %1590 = vmatprep.mubr.bf16.mxu0 %v8316_v14  ;;  %1664 = vmatpush1.bf16.msra.mxu0 %v9007_v17  ;;  %v7177_v14 = vld [vmem:[%s16662_s7 + $0x390] sm:$0xff]  ;;  %v10565_v17 = vpop.permute.xlu0 %7270 }
  0xfd   :  { %1665 = vmatprep.subr.bf16.mxu0 %v9012_v18  ;;  %17378 = vst [vmem:[#allocation37_spill] sm:$0xff] %v10565_v17  ;;  %v10567_v18 = vpop.permute.xlu1 %7265 }
  0xfe   :  { %7720 = vperm.xlu0 %8844, %v7170_v25   ;;  %7715 = vperm.xlu1 %8843, %v7169_v26   ;;  %17379 = vst [vmem:[#allocation38_spill] sm:$0xff] %v10567_v18  ;;  %v9022_v25 = vld [vmem:[%s16655_s0 + $0x3b0] ss:$8 sps:$4 sm:$0xff]  }
  0xff   :  { %v209_v26 = vld [vmem:[%s16657_s2 + $0x1d0] sm:$0xff] }
 0x100   :  { %1666 = vmatpush1.bf16.msra.mxu0 %v9010_v27  ;;  %v213_v27 = vld [vmem:[%s16657_s2 + $0x1f0] sm:$0xff] }
 0x101   :  { %1667 = vmatprep.subr.bf16.mxu0 %v9015_v34  ;;  %v8331_v34 = vcombine.low %v201_v56, %v205_v59 }
 0x102   :  { %7730 = vperm.xlu0 %8844, %v7172_v37   ;;  %7725 = vperm.xlu1 %8843, %v7171_v38   ;;  %v8340_v37 = vcombine.high %v209_v26, %v213_v27  ;;  %v10584_v38 = vpop.permute.xlu0 %7280 }
 0x103   :  { %1591 = vmatmul.mubr.bf16.gmra.mrb[16].mxu0 %v8315_v39  ;;  %17380 = vst [vmem:[#allocation39_spill] sm:$0xff] %v10584_v38  ;;  %v10586_v39 = vpop.permute.xlu1 %7275 }
 0x104   :  { %1600 = vmatprep.mubr.bf16.mxu0 %v8324_v44  ;;  %1668 = vmatpush1.bf16.msra.mxu0 %v9013_v45  ;;  %17381 = vst [vmem:[#allocation40_spill] sm:$0xff] %v10586_v39  ;;  %v217_v44 = vld [vmem:[%s16657_s2 + $0x210] sm:$0xff] }
 0x105   :  { %1669 = vmatprep.subr.bf16.mxu0 %v9018_v46  ;;  %v221_v45 = vld [vmem:[%s16657_s2 + $0x230] sm:$0xff]  ;;  %v8339_v46 = vcombine.low %v209_v26, %v213_v27 }
 0x106   :  { %7740 = vperm.xlu0 %8844, %v7174_v51   ;;  %7735 = vperm.xlu1 %8843, %v7173_v52   ;;  %v8348_v51 = vcombine.high %v217_v44, %v221_v45  ;;  %v225_v52 = vld [vmem:[%s16657_s2 + $0x250] sm:$0xff]  ;;  %v8347_v56 = vcombine.low %v217_v44, %v221_v45  ;;  %v186_v44 = vld [vmem:[%s16657_s2 + $0x118] sm:$0xff] }
 0x107   :  { %v190_v45 = vld [vmem:[%s16657_s2 + $0x138] sm:$0xff] }
 0x108   :  { %1670 = vmatpush1.bf16.msra.mxu0 %v9016_v55  ;;  %v229_v55 = vld [vmem:[%s16657_s2 + $0x270] sm:$0xff] }
 0x109   :  { %1671 = vmatprep.subr.bf16.mxu0 %v9021_v60  ;;  %v8356_v59 = vcombine.high %v225_v52, %v229_v55  ;;  %v154_v60 = vld [vmem:[%s16657_s2 + $0x18] sm:$0xff] }
 0x10a   :  { %7750 = vperm.xlu0 %8844, %v7176_v5   ;;  %7745 = vperm.xlu1 %8843, %v7175_v6   ;;  %v158_v5 = vld [vmem:[%s16657_s2 + $0x38] sm:$0xff]  ;;  %v8355_v6 = vcombine.low %v225_v52, %v229_v55 }
 0x10b   :  { %1601 = vmatmul.mubr.bf16.gmra.mrb[20].mxu0 %v8323_v7  ;;  %v8286_v7 = vcombine.high %v154_v60, %v158_v5  ;;  %v194_v52 = vld [vmem:[%s16657_s2 + $0x158] sm:$0xff] }
 0x10c   :  { %1610 = vmatprep.mubr.bf16.mxu0 %v8332_v8  ;;  %1672 = vmatpush1.bf16.msra.mxu0 %v9019_v11  ;;  %v162_v8 = vld [vmem:[%s16657_s2 + $0x58] sm:$0xff] }
 0x10d   :  { %1673 = vmatprep.subr.bf16.mxu0 %v9024_v12  ;;  %v166_v11 = vld [vmem:[%s16657_s2 + $0x78] sm:$0xff]  ;;  %v8285_v12 = vcombine.low %v154_v60, %v158_v5 }
 0x10e   :  { %7760 = vperm.xlu0 %8844, %v7178_v13   ;;  %7755 = vperm.xlu1 %8843, %v7177_v14   ;;  %v8294_v13 = vcombine.high %v162_v8, %v166_v11  ;;  %v170_v14 = vld [vmem:[%s16657_s2 + $0x98] sm:$0xff]  ;;  %v8293_v26 = vcombine.low %v162_v8, %v166_v11 }
 0x10f   :  { %v198_v55 = vld [vmem:[%s16657_s2 + $0x178] sm:$0xff] }
 0x110   :  { %1674 = vmatpush1.bf16.msra.mxu0 %v9022_v25  ;;  %v174_v25 = vld [vmem:[%s16657_s2 + $0xb8] sm:$0xff] }
 0x111   :  { %v8302_v27 = vcombine.high %v170_v14, %v174_v25  ;;  %v202_v60 = vld [vmem:[%s16657_s2 + $0x198] sm:$0xff] }
 0x112   :  { %7770 = vperm.xlu0 %8844, %v7180_v28   ;;  %7765 = vperm.xlu1 %8843, %v7179_v29   ;;  %v178_v28 = vld [vmem:[%s16657_s2 + $0xd8] sm:$0xff] }
 0x113   :  { %1611 = vmatmul.mubr.bf16.gmra.mrb[24].mxu0 %v8331_v34  ;;  %v182_v29 = vld [vmem:[%s16657_s2 + $0xf8] sm:$0xff]  ;;  %v8301_v34 = vcombine.low %v170_v14, %v174_v25 }
 0x114   :  { %1620 = vmatprep.mubr.bf16.mxu0 %v8340_v37  ;;  %v8310_v37 = vcombine.high %v178_v28, %v182_v29  ;;  %v206_v5 = vld [vmem:[%s16657_s2 + $0x1b8] sm:$0xff] }
 0x115   :  { %v210_v8 = vld [vmem:[%s16657_s2 + $0x1d8] sm:$0xff] }
 0x116   :  { %v214_v11 = vld [vmem:[%s16657_s2 + $0x1f8] sm:$0xff] }
 0x117   :  { %v218_v14 = vld [vmem:[%s16657_s2 + $0x218] sm:$0xff] }
 0x118   :  { %v222_v25 = vld [vmem:[%s16657_s2 + $0x238] sm:$0xff] }
 0x11b   :  { %1621 = vmatmul.mubr.bf16.gmra.mrb[28].mxu0 %v8339_v46  ;;  %v8309_v46 = vcombine.low %v178_v28, %v182_v29  ;;  %v226_v28 = vld [vmem:[%s16657_s2 + $0x258] sm:$0xff] }
 0x11c   :  { %1630 = vmatprep.mubr.bf16.mxu0 %v8348_v51  ;;  %v8318_v51 = vcombine.high %v186_v44, %v190_v45  ;;  %v230_v29 = vld [vmem:[%s16657_s2 + $0x278] sm:$0xff] }
 0x123   :  { %1631 = vmatmul.mubr.bf16.gmra.mrb[32].mxu0 %v8347_v56  ;;  %v8317_v56 = vcombine.low %v186_v44, %v190_v45  ;;  %v10669_v44 = vpop.permute.xlu0 %7290  ;;  %v10672_v45 = vpop.permute.xlu1 %7285 }
 0x124   :  { %1640 = vmatprep.mubr.bf16.mxu0 %v8356_v59  ;;  %v8326_v59 = vcombine.high %v194_v52, %v198_v55  ;;  %17382 = vst [vmem:[#allocation41_spill] sm:$0xff] %v10669_v44  ;;  %17383 = vst [vmem:[#allocation42_spill] sm:$0xff] %v10672_v45 }
 0x12b   :  { %1641 = vmatmul.mubr.bf16.gmra.mrb[36].mxu0 %v8355_v6  ;;  %v8325_v6 = vcombine.low %v194_v52, %v198_v55  ;;  %v10676_v52 = vpop.permute.xlu1 %7295 }
 0x12c   :  { %8479 = vmatprep.mubr.msk.bf16.mxu0 %vm1221_vm0, %v8286_v7  ;;  %v8334_v7 = vcombine.high %v202_v60, %v206_v5  ;;  %17385 = vst [vmem:[#allocation44_spill] sm:$0xff] %v10676_v52 }
 0x133   :  { %1684 = vmatmul.mubr.bf16.vlgmr.msra.gmra.mrb[0].mxu0 %v8285_v12  ;;  %v8333_v12 = vcombine.low %v202_v60, %v206_v5 }
 0x134   :  { %8480 = vmatprep.mubr.msk.bf16.mxu0 %vm1221_vm0, %v8294_v13  ;;  %v8342_v13 = vcombine.high %v210_v8, %v214_v11 }
 0x13b   :  { %1694 = vmatmul.mubr.bf16.gmra.mrb[4].mxu0 %v8293_v26  ;;  %v8341_v26 = vcombine.low %v210_v8, %v214_v11 }
 0x13c   :  { %8481 = vmatprep.mubr.msk.bf16.mxu0 %vm1221_vm0, %v8302_v27  ;;  %v8350_v27 = vcombine.high %v218_v14, %v222_v25 }
 0x143   :  { %1704 = vmatmul.mubr.bf16.gmra.mrb[8].mxu0 %v8301_v34  ;;  %v8349_v34 = vcombine.low %v218_v14, %v222_v25 }
 0x144   :  { %8482 = vmatprep.mubr.msk.bf16.mxu0 %vm1221_vm0, %v8310_v37  ;;  %v8358_v37 = vcombine.high %v226_v28, %v230_v29 }
 0x14b   :  { %1714 = vmatmul.mubr.bf16.gmra.mrb[12].mxu0 %v8309_v46  ;;  %v8357_v46 = vcombine.low %v226_v28, %v230_v29 }
 0x14c   :  { %8483 = vmatprep.mubr.msk.bf16.mxu0 %vm1221_vm0, %v8318_v51  ;;  %v10674_v51 = vpop.permute.xlu0 %7300 }
 0x14d   :  { %17384 = vst [vmem:[#allocation43_spill] sm:$0xff] %v10674_v51 }
 0x150   :  { %v10678_v55 = vpop.permute.xlu0 %7310 }
 0x151   :  { %17386 = vst [vmem:[#allocation45_spill] sm:$0xff] %v10678_v55 }
 0x153   :  { %1724 = vmatmul.mubr.bf16.gmra.mrb[16].mxu0 %v8317_v56  ;;  %v10680_v56 = vpop.permute.xlu1 %7305 }
 0x154   :  { %8484 = vmatprep.mubr.msk.bf16.mxu0 %vm1221_vm0, %v8326_v59  ;;  %17387 = vst [vmem:[#allocation46_spill] sm:$0xff] %v10680_v56  ;;  %v10682_v59 = vpop.permute.xlu0 %7320 }
 0x155   :  { %17388 = vst [vmem:[#allocation47_spill] sm:$0xff] %v10682_v59 }
 0x157   :  { %v10684_v60 = vpop.permute.xlu1 %7315 }
 0x158   :  { %17389 = vst [vmem:[#allocation48_spill] sm:$0xff] %v10684_v60  ;;  %v10686_v5 = vpop.permute.xlu0 %7330 }
 0x159   :  { %17390 = vst [vmem:[#allocation49_spill] sm:$0xff] %v10686_v5 }
 0x15b   :  { %1734 = vmatmul.mubr.bf16.gmra.mrb[20].mxu0 %v8325_v6  ;;  %v10688_v6 = vpop.permute.xlu1 %7325 }
 0x15c   :  { %8485 = vmatprep.mubr.msk.bf16.mxu0 %vm1221_vm0, %v8334_v7  ;;  %17391 = vst [vmem:[#allocation50_spill] sm:$0xff] %v10688_v6  ;;  %v10690_v7 = vpop.permute.xlu0 %7340 }
 0x15d   :  { %17392 = vst [vmem:[#allocation51_spill] sm:$0xff] %v10690_v7 }
 0x15f   :  { %v10692_v8 = vpop.permute.xlu1 %7335 }
 0x160   :  { %17393 = vst [vmem:[#allocation52_spill] sm:$0xff] %v10692_v8  ;;  %v10694_v11 = vpop.permute.xlu0 %7350 }
 0x161   :  { %17394 = vst [vmem:[#allocation53_spill] sm:$0xff] %v10694_v11 }
 0x163   :  { %1744 = vmatmul.mubr.bf16.gmra.mrb[24].mxu0 %v8333_v12  ;;  %v10696_v12 = vpop.permute.xlu1 %7345 }
 0x164   :  { %8486 = vmatprep.mubr.msk.bf16.mxu0 %vm1221_vm0, %v8342_v13  ;;  %17395 = vst [vmem:[#allocation54_spill] sm:$0xff] %v10696_v12  ;;  %v10698_v13 = vpop.permute.xlu0 %7360 }
 0x165   :  { %17396 = vst [vmem:[#allocation55_spill] sm:$0xff] %v10698_v13 }
 0x167   :  { %v10700_v14 = vpop.permute.xlu1 %7355 }
 0x168   :  { %17397 = vst [vmem:[#allocation56_spill] sm:$0xff] %v10700_v14  ;;  %v10702_v25 = vpop.permute.xlu0 %7370 }
 0x169   :  { %17398 = vst [vmem:[#allocation57_spill] sm:$0xff] %v10702_v25 }
 0x16b   :  { %1754 = vmatmul.mubr.bf16.gmra.mrb[28].mxu0 %v8341_v26  ;;  %v10704_v26 = vpop.permute.xlu1 %7365 }
 0x16c   :  { %8487 = vmatprep.mubr.msk.bf16.mxu0 %vm1221_vm0, %v8350_v27  ;;  %17399 = vst [vmem:[#allocation58_spill] sm:$0xff] %v10704_v26  ;;  %v10706_v27 = vpop.permute.xlu0 %7380 }
 0x16d   :  { %17400 = vst [vmem:[#allocation59_spill] sm:$0xff] %v10706_v27 }
 0x16f   :  { %v10708_v28 = vpop.permute.xlu1 %7375 }
 0x170   :  { %17401 = vst [vmem:[#allocation60_spill] sm:$0xff] %v10708_v28  ;;  %v10710_v29 = vpop.permute.xlu0 %7390 }
 0x171   :  { %17402 = vst [vmem:[#allocation61_spill] sm:$0xff] %v10710_v29 }
 0x173   :  { %1764 = vmatmul.mubr.bf16.gmra.mrb[32].mxu0 %v8349_v34  ;;  %v10712_v34 = vpop.permute.xlu1 %7385 }
 0x174   :  { %8488 = vmatprep.mubr.msk.bf16.mxu0 %vm1221_vm0, %v8358_v37  ;;  %17403 = vst [vmem:[#allocation62_spill] sm:$0xff] %v10712_v34  ;;  %v10714_v37 = vpop.permute.xlu0 %7400 }
 0x175   :  { %17404 = vst [vmem:[#allocation63_spill] sm:$0xff] %v10714_v37 }
 0x178   :  { %v10718_v12 = vpop.permute.xlu0 %7410 }
 0x179   :  { %17406 = vst [vmem:[#allocation65_spill] sm:$0xff] %v10718_v12 }
 0x17b   :  { %1774 = vmatmul.mubr.bf16.gmra.mrb[36].mxu0 %v8357_v46  ;;  %v10716_v46 = vpop.permute.xlu1 %7395 }
 0x17c   :  { %17405 = vst [vmem:[#allocation64_spill] sm:$0xff] %v10716_v46  ;;  %v10722_v14 = vpop.permute.xlu0 %7420 }
 0x17d   :  { %17408 = vst [vmem:[#allocation67_spill] sm:$0xff] %v10722_v14 }
 0x17f   :  { %v10720_v13 = vpop.permute.xlu1 %7405 }
 0x180   :  { %17407 = vst [vmem:[#allocation66_spill] sm:$0xff] %v10720_v13  ;;  %v10726_v26 = vpop.permute.xlu0 %7430 }
 0x181   :  { %17410 = vst [vmem:[#allocation69_spill] sm:$0xff] %v10726_v26 }
 0x183   :  { %v10724_v25 = vpop.permute.xlu1 %7415 }
 0x184   :  { %17409 = vst [vmem:[#allocation68_spill] sm:$0xff] %v10724_v25  ;;  %v10730_v28 = vpop.permute.xlu0 %7440 }
 0x185   :  { %17412 = vst [vmem:[#allocation71_spill] sm:$0xff] %v10730_v28 }
 0x187   :  { %v10728_v27 = vpop.permute.xlu1 %7425 }
 0x188   :  { %17411 = vst [vmem:[#allocation70_spill] sm:$0xff] %v10728_v27  ;;  %v10734_v34 = vpop.permute.xlu0 %7450 }
 0x189   :  { %17414 = vst [vmem:[#allocation73_spill] sm:$0xff] %v10734_v34 }
 0x18b   :  { %v10732_v29 = vpop.permute.xlu1 %7435 }
 0x18c   :  { %17413 = vst [vmem:[#allocation72_spill] sm:$0xff] %v10732_v29  ;;  %v10738_v46 = vpop.permute.xlu0 %7460 }
 0x18d   :  { %17416 = vst [vmem:[#allocation75_spill] sm:$0xff] %v10738_v46 }
 0x18f   :  { %v10736_v37 = vpop.permute.xlu1 %7445 }
 0x190   :  { %17415 = vst [vmem:[#allocation74_spill] sm:$0xff] %v10736_v37  ;;  %v10742_v13 = vpop.permute.xlu0 %7470 }
 0x191   :  { %17418 = vst [vmem:[#allocation77_spill] sm:$0xff] %v10742_v13 }
 0x193   :  { %v10740_v12 = vpop.permute.xlu1 %7455 }
 0x194   :  { %17417 = vst [vmem:[#allocation76_spill] sm:$0xff] %v10740_v12  ;;  %v10746_v25 = vpop.permute.xlu0 %7480 }
 0x195   :  { %17420 = vst [vmem:[#allocation79_spill] sm:$0xff] %v10746_v25 }
 0x197   :  { %v10744_v14 = vpop.permute.xlu1 %7465 }
 0x198   :  { %17419 = vst [vmem:[#allocation78_spill] sm:$0xff] %v10744_v14  ;;  %v10750_v27 = vpop.permute.xlu0 %7490 }
 0x199   :  { %17422 = vst [vmem:[#allocation81_spill] sm:$0xff] %v10750_v27 }
 0x19b   :  { %v10748_v26 = vpop.permute.xlu1 %7475 }
 0x19c   :  { %17421 = vst [vmem:[#allocation80_spill] sm:$0xff] %v10748_v26  ;;  %v10754_v29 = vpop.permute.xlu0 %7500 }
 0x19d   :  { %17424 = vst [vmem:[#allocation83_spill] sm:$0xff] %v10754_v29 }
 0x19f   :  { %v10752_v28 = vpop.permute.xlu1 %7485 }
 0x1a0   :  { %17423 = vst [vmem:[#allocation82_spill] sm:$0xff] %v10752_v28  ;;  %v10758_v37 = vpop.permute.xlu0 %7510 }
 0x1a1   :  { %17426 = vst [vmem:[#allocation85_spill] sm:$0xff] %v10758_v37 }
 0x1a3   :  { %v10756_v34 = vpop.permute.xlu1 %7495 }
 0x1a4   :  { %17425 = vst [vmem:[#allocation84_spill] sm:$0xff] %v10756_v34  ;;  %v10762_v12 = vpop.permute.xlu0 %7520 }
 0x1a5   :  { %17428 = vst [vmem:[#allocation87_spill] sm:$0xff] %v10762_v12 }
 0x1a7   :  { %v10760_v46 = vpop.permute.xlu1 %7505 }
 0x1a8   :  { %17427 = vst [vmem:[#allocation86_spill] sm:$0xff] %v10760_v46  ;;  %v10766_v14 = vpop.permute.xlu0 %7530 }
 0x1a9   :  { %17430 = vst [vmem:[#allocation89_spill] sm:$0xff] %v10766_v14 }
 0x1ab   :  { %v10764_v13 = vpop.permute.xlu1 %7515 }
 0x1ac   :  { %17429 = vst [vmem:[#allocation88_spill] sm:$0xff] %v10764_v13  ;;  %v10782_v13 = vpop.permute.xlu0 %7540 }
 0x1ad   :  { %17432 = vst [vmem:[#allocation91_spill] sm:$0xff] %v10782_v13 }
 0x1af   :  { %v10770_v26 = vpop.permute.xlu1 %7525 }
 0x1b0   :  { %17431 = vst [vmem:[#allocation90_spill] sm:$0xff] %v10770_v26  ;;  %v10796_v13 = vpop.permute.xlu0 %7550 }
 0x1b1   :  { %17434 = vst [vmem:[#allocation93_spill] sm:$0xff] %v10796_v13 }
 0x1b3   :  { %v10792_v62 = vpop.permute.xlu1 %7535 }
 0x1b4   :  { %17433 = vst [vmem:[#allocation92_spill] sm:$0xff] %v10792_v62  ;;  %v10818_v5 = vpop.permute.xlu0 %7560 }
 0x1b5   :  { %17436 = vst [vmem:[#allocation95_spill] sm:$0xff] %v10818_v5 }
 0x1b7   :  { %v10816_v13 = vpop.permute.xlu1 %7545 }
 0x1b8   :  { %17435 = vst [vmem:[#allocation94_spill] sm:$0xff] %v10816_v13  ;;  %v10842_v5 = vpop.permute.xlu0 %7570 }
 0x1b9   :  { %17439 = vst [vmem:[#allocation98_spill] sm:$0xff] %v10842_v5 }
 0x206   :  { %v10768_v25 = vpop.f32.mrb[0].mxu0 }
 0x207   :  { %v1864_v28 = vmul.f32 %v10768_v25, %v10768_v25  ;;  %v10774_v29 = vpop.f32.mrb[1].mxu0 }
 0x208   :  { %v1784_v37 = vadd.f32 %v10774_v29, %v10768_v25  ;;  %v1865_v46 = vmul.f32 %v10774_v29, %v10774_v29  ;;  %v10780_v12 = vpop.f32.mrb[2].mxu0 }
 0x209   :  { %v1866_v14 = vmul.f32 %v10780_v12, %v10780_v12  ;;  %v10786_v34 = vpop.f32.mrb[3].mxu0 }
 0x20a   :  { %v1787_v26 = vadd.f32 %v10786_v34, %v10780_v12  ;;  %v1867_v27 = vmul.f32 %v10786_v34, %v10786_v34  ;;  %1785 = vadd.xlane.f32.xlu0 %v1784_v37  ;;  %v1904_v11 = vadd.f32 %v1865_v46, %v1864_v28 }
 0x20c   :  { %v1907_v8 = vadd.f32 %v1867_v27, %v1866_v14 }
 0x20e   :  { %1908 = vadd.xlane.f32.xlu1 %v1907_v8  ;;  %1788 = vadd.xlane.f32.xlu0 %v1787_v26  ;;  %v10794_v7 = vpop.f32.mrb[4].mxu0 }
 0x20f   :  { %v1868_v61 = vmul.f32 %v10794_v7, %v10794_v7  ;;  %v10800_v6 = vpop.f32.mrb[5].mxu0 }
 0x210   :  { %v1790_v43 = vadd.f32 %v10800_v6, %v10794_v7  ;;  %v1869_v28 = vmul.f32 %v10800_v6, %v10800_v6  ;;  %v10806_v14 = vpop.f32.mrb[6].mxu0 }
 0x211   :  { %v1870_v8 = vmul.f32 %v10806_v14, %v10806_v14  ;;  %v10810_v26 = vpop.f32.mrb[7].mxu0 }
 0x212   :  { %v1793_v27 = vadd.f32 %v10810_v26, %v10806_v14  ;;  %v1871_v37 = vmul.f32 %v10810_v26, %v10810_v26  ;;  %1905 = vadd.xlane.f32.xlu0 %v1904_v11  ;;  %1791 = vadd.xlane.f32.xlu1 %v1790_v43  ;;  %v1910_v46 = vadd.f32 %v1869_v28, %v1868_v61  ;;  %v10832_v11 = vpop.permute.xlu1 %7555 }
 0x213   :  { %17438 = vst [vmem:[#allocation97_spill] sm:$0xff] %v10832_v11 }
 0x214   :  { %v1913_v62 = vadd.f32 %v1871_v37, %v1870_v8 }
 0x216   :  { %1911 = vadd.xlane.f32.xlu0 %v1910_v46  ;;  %1794 = vadd.xlane.f32.xlu1 %v1793_v27  ;;  %v10820_v40 = vpop.f32.mrb[8].mxu0  ;;  %v10846_v23 = vpop.permute.xlu1 %7565 }
 0x217   :  { %v1872_v60 = vmul.f32 %v10820_v40, %v10820_v40  ;;  %v10824_v24 = vpop.f32.mrb[9].mxu0  ;;  %17440 = vst [vmem:[#allocation99_spill] sm:$0xff] %v10846_v23 }
 0x218   :  { %17437 = vst [vmem:[#allocation96_spill] sm:$0xff] %v10824_v24  ;;  %v1796_v59 = vadd.f32 %v10824_v24, %v10820_v40  ;;  %v1873_v43 = vmul.f32 %v10824_v24, %v10824_v24  ;;  %v10830_v61 = vpop.f32.mrb[10].mxu0 }
 0x219   :  { %v1874_v28 = vmul.f32 %v10830_v61, %v10830_v61  ;;  %v10836_v8 = vpop.f32.mrb[11].mxu0 }
 0x21a   :  { %v1799_v27 = vadd.f32 %v10836_v8, %v10830_v61  ;;  %v1875_v37 = vmul.f32 %v10836_v8, %v10836_v8  ;;  %1914 = vadd.xlane.f32.xlu1 %v1913_v62  ;;  %1797 = vadd.xlane.f32.xlu0 %v1796_v59  ;;  %v1916_v46 = vadd.f32 %v1873_v43, %v1872_v60  ;;  %v10858_v60 = vpop.permute.xlu0 %7580  ;;  %v10868_v5 = vpop.permute.xlu1 %7575 }
 0x21b   :  { %17442 = vst [vmem:[#allocation101_spill] sm:$0xff] %v10858_v60  ;;  %17444 = vst [vmem:[#allocation103_spill] sm:$0xff] %v10868_v5 }
 0x21c   :  { %v1919_v13 = vadd.f32 %v1875_v37, %v1874_v28 }
 0x21e   :  { %1917 = vadd.xlane.f32.xlu0 %v1916_v46  ;;  %1800 = vadd.xlane.f32.xlu1 %v1799_v27  ;;  %v10844_v11 = vpop.f32.mrb[12].mxu0  ;;  %v10872_v63 = vpop.permute.xlu0 %7590 }
 0x21f   :  { %v1876_v56 = vmul.f32 %v10844_v11, %v10844_v11  ;;  %v10850_v2 = vpop.f32.mrb[13].mxu0  ;;  %17445 = vst [vmem:[#allocation104_spill] sm:$0xff] %v10872_v63 }
 0x220   :  { %17441 = vst [vmem:[#allocation100_spill] sm:$0xff] %v10850_v2  ;;  %v1802_v55 = vadd.f32 %v10850_v2, %v10844_v11  ;;  %v1877_v62 = vmul.f32 %v10850_v2, %v10850_v2  ;;  %v10856_v59 = vpop.f32.mrb[14].mxu0 }
 0x221   :  { %v1878_v43 = vmul.f32 %v10856_v59, %v10856_v59  ;;  %v10862_v28 = vpop.f32.mrb[15].mxu0 }
 0x222   :  { %17443 = vst [vmem:[#allocation102_spill] sm:$0xff] %v10862_v28  ;;  %v1805_v27 = vadd.f32 %v10862_v28, %v10856_v59  ;;  %v1879_v37 = vmul.f32 %v10862_v28, %v10862_v28  ;;  %1920 = vadd.xlane.f32.xlu1 %v1919_v13  ;;  %1803 = vadd.xlane.f32.xlu0 %v1802_v55  ;;  %v10894_v63 = vpop.permute.xlu0 %7600 }
 0x223   :  { %v1922_v46 = vadd.f32 %v1877_v62, %v1876_v56  ;;  %17449 = vst [vmem:[#allocation108_spill] sm:$0xff] %v10894_v63 }
 0x224   :  { %v1925_v23 = vadd.f32 %v1879_v37, %v1878_v43 }
 0x226   :  { %1923 = vadd.xlane.f32.xlu0 %v1922_v46  ;;  %1806 = vadd.xlane.f32.xlu1 %v1805_v27  ;;  %v10870_v60 = vpop.f32.mrb[16].mxu0  ;;  %v10892_v46 = vpop.permute.xlu1 %7585 }
 0x227   :  { %v1880_v52 = vmul.f32 %v10870_v60, %v10870_v60  ;;  %v10876_v50 = vpop.f32.mrb[17].mxu0  ;;  %17448 = vst [vmem:[#allocation107_spill] sm:$0xff] %v10892_v46  ;;  %v10918_v46 = vpop.permute.xlu0 %7610 }
 0x228   :  { %17446 = vst [vmem:[#allocation105_spill] sm:$0xff] %v10876_v50  ;;  %v1808_v51 = vadd.f32 %v10876_v50, %v10870_v60  ;;  %v1881_v55 = vmul.f32 %v10876_v50, %v10876_v50  ;;  %v10882_v56 = vpop.f32.mrb[18].mxu0  ;;  %17453 = vst [vmem:[#allocation112_spill] sm:$0xff] %v10918_v46 }
 0x229   :  { %v1882_v13 = vmul.f32 %v10882_v56, %v10882_v56  ;;  %v10886_v62 = vpop.f32.mrb[19].mxu0 }
 0x22a   :  { %17447 = vst [vmem:[#allocation106_spill] sm:$0xff] %v10886_v62  ;;  %v1811_v43 = vadd.f32 %v10886_v62, %v10882_v56  ;;  %v1883_v27 = vmul.f32 %v10886_v62, %v10886_v62  ;;  %1926 = vadd.xlane.f32.xlu1 %v1925_v23  ;;  %1809 = vadd.xlane.f32.xlu0 %v1808_v51 }
 0x22b   :  { %v1928_v37 = vadd.f32 %v1881_v55, %v1880_v52  ;;  %v10908_v52 = vpop.permute.xlu1 %7595 }
 0x22c   :  { %v1931_v5 = vadd.f32 %v1883_v27, %v1882_v13  ;;  %17451 = vst [vmem:[#allocation110_spill] sm:$0xff] %v10908_v52 }
 0x22e   :  { %1929 = vadd.xlane.f32.xlu0 %v1928_v37  ;;  %1812 = vadd.xlane.f32.xlu1 %v1811_v43  ;;  %v10896_v47 = vpop.f32.mrb[20].mxu0 }
 0x22f   :  { %v1884_v45 = vmul.f32 %v10896_v47, %v10896_v47  ;;  %v10900_v33 = vpop.f32.mrb[21].mxu0  ;;  %v10922_v32 = vpop.permute.xlu1 %7605 }
 0x230   :  { %17450 = vst [vmem:[#allocation109_spill] sm:$0xff] %v10900_v33  ;;  %v1814_v44 = vadd.f32 %v10900_v33, %v10896_v47  ;;  %v1885_v23 = vmul.f32 %v10900_v33, %v10900_v33  ;;  %v10906_v51 = vpop.f32.mrb[22].mxu0  ;;  %17454 = vst [vmem:[#allocation113_spill] sm:$0xff] %v10922_v32 }
 0x231   :  { %v1886_v55 = vmul.f32 %v10906_v51, %v10906_v51  ;;  %v10912_v13 = vpop.f32.mrb[23].mxu0 }
 0x232   :  { %17452 = vst [vmem:[#allocation111_spill] sm:$0xff] %v10912_v13  ;;  %v1817_v43 = vadd.f32 %v10912_v13, %v10906_v51  ;;  %v1887_v27 = vmul.f32 %v10912_v13, %v10912_v13  ;;  %1932 = vadd.xlane.f32.xlu1 %v1931_v5  ;;  %1815 = vadd.xlane.f32.xlu0 %v1814_v44  ;;  %v10934_v5 = vpop.permute.xlu0 %7620 }
 0x233   :  { %v1934_v37 = vadd.f32 %v1885_v23, %v1884_v45  ;;  %17456 = vst [vmem:[#allocation115_spill] sm:$0xff] %v10934_v5  ;;  %v10944_v46 = vpop.permute.xlu1 %7615 }
 0x234   :  { %v1937_v63 = vadd.f32 %v1887_v27, %v1886_v55  ;;  %17458 = vst [vmem:[#allocation117_spill] sm:$0xff] %v10944_v46 }
 0x236   :  { %1935 = vadd.xlane.f32.xlu0 %v1934_v37  ;;  %1818 = vadd.xlane.f32.xlu1 %v1817_v43  ;;  %v10920_v52 = vpop.f32.mrb[24].mxu0  ;;  %v10948_v15 = vpop.permute.xlu0 %7630 }
 0x237   :  { %v1888_v39 = vmul.f32 %v10920_v52, %v10920_v52  ;;  %v10926_v16 = vpop.f32.mrb[25].mxu0  ;;  %17459 = vst [vmem:[#allocation118_spill] sm:$0xff] %v10948_v15 }
 0x238   :  { %17455 = vst [vmem:[#allocation114_spill] sm:$0xff] %v10926_v16  ;;  %v1820_v38 = vadd.f32 %v10926_v16, %v10920_v52  ;;  %v1889_v44 = vmul.f32 %v10926_v16, %v10926_v16  ;;  %v10932_v45 = vpop.f32.mrb[26].mxu0 }
 0x239   :  { %v1890_v23 = vmul.f32 %v10932_v45, %v10932_v45  ;;  %v10938_v55 = vpop.f32.mrb[27].mxu0 }
 0x23a   :  { %17457 = vst [vmem:[#allocation116_spill] sm:$0xff] %v10938_v55  ;;  %v1823_v43 = vadd.f32 %v10938_v55, %v10932_v45  ;;  %v1891_v27 = vmul.f32 %v10938_v55, %v10938_v55  ;;  %1938 = vadd.xlane.f32.xlu1 %v1937_v63  ;;  %1821 = vadd.xlane.f32.xlu0 %v1820_v38  ;;  %v10970_v15 = vpop.permute.xlu0 %7640 }
 0x23b   :  { %v1940_v37 = vadd.f32 %v1889_v44, %v1888_v39  ;;  %17463 = vst [vmem:[#allocation122_spill] sm:$0xff] %v10970_v15 }
 0x23c   :  { %v1943_v32 = vadd.f32 %v1891_v27, %v1890_v23 }
 0x23e   :  { %1941 = vadd.xlane.f32.xlu0 %v1940_v37  ;;  %1824 = vadd.xlane.f32.xlu1 %v1823_v43  ;;  %v10946_v5 = vpop.f32.mrb[28].mxu0  ;;  %v10968_v37 = vpop.permute.xlu1 %7625 }
 0x23f   :  { %v1892_v3 = vmul.f32 %v10946_v5, %v10946_v5  ;;  %v10952_v17 = vpop.f32.mrb[29].mxu0  ;;  %17462 = vst [vmem:[#allocation121_spill] sm:$0xff] %v10968_v37  ;;  %v10994_v37 = vpop.permute.xlu0 %7650 }
 0x240   :  { %17460 = vst [vmem:[#allocation119_spill] sm:$0xff] %v10952_v17  ;;  %v1826_v4 = vadd.f32 %v10952_v17, %v10946_v5  ;;  %v1893_v63 = vmul.f32 %v10952_v17, %v10952_v17  ;;  %v10958_v38 = vpop.f32.mrb[30].mxu0  ;;  %17467 = vst [vmem:[#allocation126_spill] sm:$0xff] %v10994_v37 }
 0x241   :  { %v1894_v39 = vmul.f32 %v10958_v38, %v10958_v38  ;;  %v10962_v44 = vpop.f32.mrb[31].mxu0 }
 0x242   :  { %17461 = vst [vmem:[#allocation120_spill] sm:$0xff] %v10962_v44  ;;  %v1829_v23 = vadd.f32 %v10962_v44, %v10958_v38  ;;  %v1895_v43 = vmul.f32 %v10962_v44, %v10962_v44  ;;  %1944 = vadd.xlane.f32.xlu1 %v1943_v32  ;;  %1827 = vadd.xlane.f32.xlu0 %v1826_v4  ;;  %v10984_v32 = vpop.permute.xlu1 %7635 }
 0x243   :  { %v1946_v27 = vadd.f32 %v1893_v63, %v1892_v3  ;;  %17465 = vst [vmem:[#allocation124_spill] sm:$0xff] %v10984_v32 }
 0x244   :  { %v1949_v46 = vadd.f32 %v1895_v43, %v1894_v39 }
 0x246   :  { %1947 = vadd.xlane.f32.xlu0 %v1946_v27  ;;  %1830 = vadd.xlane.f32.xlu1 %v1829_v23  ;;  %v10972_v18 = vpop.f32.mrb[32].mxu0  ;;  %v10998_v49 = vpop.permute.xlu1 %7645 }
 0x247   :  { %v1896_v57 = vmul.f32 %v10972_v18, %v10972_v18  ;;  %v10976_v58 = vpop.f32.mrb[33].mxu0  ;;  %17468 = vst [vmem:[#allocation127_spill] sm:$0xff] %v10998_v49 }
 0x248   :  { %17464 = vst [vmem:[#allocation123_spill] sm:$0xff] %v10976_v58  ;;  %v1832_v48 = vadd.f32 %v10976_v58, %v10972_v18  ;;  %v1897_v3 = vmul.f32 %v10976_v58, %v10976_v58  ;;  %v10982_v4 = vpop.f32.mrb[34].mxu0 }
 0x249   :  { %v1898_v63 = vmul.f32 %v10982_v4, %v10982_v4  ;;  %v10988_v39 = vpop.f32.mrb[35].mxu0 }
 0x24a   :  { %17466 = vst [vmem:[#allocation125_spill] sm:$0xff] %v10988_v39  ;;  %v1835_v23 = vadd.f32 %v10988_v39, %v10982_v4  ;;  %v1899_v43 = vmul.f32 %v10988_v39, %v10988_v39  ;;  %1950 = vadd.xlane.f32.xlu1 %v1949_v46  ;;  %1833 = vadd.xlane.f32.xlu0 %v1832_v48  ;;  %v11010_v46 = vpop.permute.xlu0 %7660  ;;  %v11020_v37 = vpop.permute.xlu1 %7655 }
 0x24b   :  { %v1952_v27 = vadd.f32 %v1897_v3, %v1896_v57  ;;  %17470 = vst [vmem:[#allocation129_spill] sm:$0xff] %v11010_v46  ;;  %17471 = vst [vmem:[#allocation130_spill] sm:$0xff] %v11020_v37 }
 0x24c   :  { %v1955_v15 = vadd.f32 %v1899_v43, %v1898_v63 }
 0x24e   :  { %1953 = vadd.xlane.f32.xlu0 %v1952_v27  ;;  %1836 = vadd.xlane.f32.xlu1 %v1835_v23  ;;  %v10996_v32 = vpop.f32.mrb[36].mxu0  ;;  %v11022_v46 = vpop.permute.xlu0 %7670 }
 0x24f   :  { %v1900_v35 = vmul.f32 %v10996_v32, %v10996_v32  ;;  %v11002_v36 = vpop.f32.mrb[37].mxu0  ;;  %17472 = vst [vmem:[#allocation131_spill] sm:$0xff] %v11022_v46  ;;  %v11024_v22 = vpop.permute.xlu1 %7665 }
 0x250   :  { %17469 = vst [vmem:[#allocation128_spill] sm:$0xff] %v11002_v36  ;;  %v1838_v19 = vadd.f32 %v11002_v36, %v10996_v32  ;;  %v1901_v48 = vmul.f32 %v11002_v36, %v11002_v36  ;;  %v11008_v57 = vpop.f32.mrb[38].mxu0  ;;  %17473 = vst [vmem:[#allocation132_spill] sm:$0xff] %v11024_v22 }
 0x251   :  { %v1902_v3 = vmul.f32 %v11008_v57, %v11008_v57  ;;  %v11014_v63 = vpop.f32.mrb[39].mxu0 }
 0x252   :  { %v1841_v23 = vadd.f32 %v11014_v63, %v11008_v57  ;;  %v1903_v43 = vmul.f32 %v11014_v63, %v11014_v63  ;;  %1956 = vadd.xlane.f32.xlu1 %v1955_v15  ;;  %1839 = vadd.xlane.f32.xlu0 %v1838_v19  ;;  %v1958_v27 = vadd.f32 %v1901_v48, %v1900_v35  ;;  %v11026_v9 = vpop.permute.xlu0 %7680 }
 0x253   :  { %17474 = vst [vmem:[#allocation133_spill] sm:$0xff] %v11026_v9  ;;  %v11028_v10 = vpop.permute.xlu1 %7675 }
 0x254   :  { %v1961_v49 = vadd.f32 %v1903_v43, %v1902_v3  ;;  %17475 = vst [vmem:[#allocation134_spill] sm:$0xff] %v11028_v10 }
 0x256   :  { %1959 = vadd.xlane.f32.xlu0 %v1958_v27  ;;  %1842 = vadd.xlane.f32.xlu1 %v1841_v23  ;;  %v11030_v0 = vpop.permute.xlu0 %7690 }
 0x257   :  { %17476 = vst [vmem:[#allocation135_spill] sm:$0xff] %v11030_v0  ;;  %v11032_v1 = vpop.permute.xlu1 %7685 }
 0x258   :  { %17477 = vst [vmem:[#allocation136_spill] sm:$0xff] %v11032_v1 }
 0x25a   :  { %1962 = vadd.xlane.f32.xlu1 %v1961_v49  ;;  %v11034_v19 = vpop.permute.xlu0 %7700 }
 0x25b   :  { %17478 = vst [vmem:[#allocation137_spill] sm:$0xff] %v11034_v19  ;;  %v11036_v35 = vpop.permute.xlu1 %7695 }
 0x25c   :  { %17479 = vst [vmem:[#allocation138_spill] sm:$0xff] %v11036_v35 }
 0x25e   :  { %v11038_v15 = vpop.permute.xlu0 %7710 }
 0x25f   :  { %17480 = vst [vmem:[#allocation139_spill] sm:$0xff] %v11038_v15  ;;  %v11040_v48 = vpop.permute.xlu1 %7705 }
 0x260   :  { %17481 = vst [vmem:[#allocation140_spill] sm:$0xff] %v11040_v48 }
 0x262   :  { %v11042_v3 = vpop.permute.xlu0 %7720 }
 0x263   :  { %17482 = vst [vmem:[#allocation141_spill] sm:$0xff] %v11042_v3  ;;  %v11044_v49 = vpop.permute.xlu1 %7715 }
 0x264   :  { %17483 = vst [vmem:[#allocation142_spill] sm:$0xff] %v11044_v49 }
 0x266   :  { %v11046_v23 = vpop.permute.xlu0 %7730 }
 0x267   :  { %17484 = vst [vmem:[#allocation143_spill] sm:$0xff] %v11046_v23  ;;  %v11048_v43 = vpop.permute.xlu1 %7725 }
 0x268   :  { %17485 = vst [vmem:[#allocation144_spill] sm:$0xff] %v11048_v43 }
 0x26a   :  { %v11050_v27 = vpop.permute.xlu0 %7740 }
 0x26b   :  { %17486 = vst [vmem:[#allocation145_spill] sm:$0xff] %v11050_v27  ;;  %v11052_v10 = vpop.permute.xlu1 %7735 }
 0x26c   :  { %17487 = vst [vmem:[#allocation146_spill] sm:$0xff] %v11052_v10 }
 0x26e   :  { %v11054_v1 = vpop.permute.xlu0 %7750 }
 0x26f   :  { %17488 = vst [vmem:[#allocation147_spill] sm:$0xff] %v11054_v1  ;;  %v11056_v22 = vpop.permute.xlu1 %7745 }
 0x270   :  { %17489 = vst [vmem:[#allocation148_spill] sm:$0xff] %v11056_v22 }
 0x272   :  { %v11058_v35 = vpop.permute.xlu0 %7760 }
 0x273   :  { %17490 = vst [vmem:[#allocation149_spill] sm:$0xff] %v11058_v35  ;;  %v11060_v37 = vpop.permute.xlu1 %7755 }
 0x274   :  { %17491 = vst [vmem:[#allocation150_spill] sm:$0xff] %v11060_v37 }
 0x276   :  { %v11062_v48 = vpop.permute.xlu0 %7770 }
 0x277   :  { %17492 = vst [vmem:[#allocation151_spill] sm:$0xff] %v11062_v48  ;;  %v11064_v3 = vpop.permute.xlu1 %7765 }
 0x278   :  { %17493 = vst [vmem:[#allocation152_spill] sm:$0xff] %v11064_v3 }
 0x297   :  { %v1786_v49 = vpop.xlane.xlu0 %1785 }
 0x298   :  { %v11066_v23 = vmul.f32 0.0051020407, %v1786_v49 }
 0x29a   :  { %v1984_v10 = vmul.f32 %v11066_v23, %v11066_v23 }
 0x29b   :  { %v1909_v1 = vpop.xlane.xlu1 %1908  ;;  %v1789_v27 = vpop.xlane.xlu0 %1788 }
 0x29c   :  { %v11072_v22 = vmul.f32 0.0051020407, %v1789_v27  ;;  %v1965_v35 = vmul.f32 0.0051020407, %v1909_v1 }
 0x29e   :  { %v1985_v37 = vmul.f32 %v11072_v22, %v11072_v22 }
 0x29f   :  { %v1906_v3 = vpop.xlane.xlu0 %1905  ;;  %v1792_v15 = vpop.xlane.xlu1 %1791 }
 0x2a0   :  { %v2005_v43 = vsub.f32 %v1965_v35, %v1985_v37  ;;  %v1964_v19 = vmul.f32 0.0051020407, %v1906_v3  ;;  %v11082_v0 = vmul.f32 0.0051020407, %v1792_v15 }
 0x2a2   :  { %v2045_v27 = vadd.f32 0.001, %v2005_v43  ;;  %v2004_v1 = vsub.f32 %v1964_v19, %v1984_v10  ;;  %v1986_v48 = vmul.f32 %v11082_v0, %v11082_v0 }
 0x2a3   :  { %v1912_v46 = vpop.xlane.xlu0 %1911  ;;  %v1795_v53 = vpop.xlane.xlu1 %1794 }
 0x2a4   :  { %9205 = vrsqrt.f32 %v2045_v27  ;;  %v2044_v37 = vadd.f32 0.001, %v2004_v1  ;;  %v1966_v35 = vmul.f32 0.0051020407, %v1912_v46  ;;  %v11090_v54 = vmul.f32 0.0051020407, %v1795_v53 }
 0x2a5   :  { %v2026_v46 = vld [vmem:[%s16658_s3 + $0x10] sm:$0xff] }
 0x2a6   :  { %9207 = vrsqrt.f32 %v2044_v37  ;;  %v2006_v15 = vsub.f32 %v1966_v35, %v1986_v48  ;;  %v1987_v41 = vmul.f32 %v11090_v54, %v11090_v54  ;;  %v2025_v37 = vld [vmem:[%s16658_s3 + $0x8] sm:$0xff] }
 0x2a7   :  { %v1915_v19 = vpop.xlane.xlu1 %1914  ;;  %v1798_v3 = vpop.xlane.xlu0 %1797 }
 0x2a8   :  { %v2046_v9 = vadd.f32 0.001, %v2006_v15  ;;  %v1967_v49 = vmul.f32 0.0051020407, %v1915_v19  ;;  %v11098_v27 = vmul.f32 0.0051020407, %v1798_v3 }
 0x2aa   :  { %17494 = vst [vmem:[#allocation153_spill] sm:$0xff] %v11098_v27  ;;  %9209 = vrsqrt.f32 %v2046_v9  ;;  %v2007_v53 = vsub.f32 %v1967_v49, %v1987_v41  ;;  %v1988_v19 = vmul.f32 %v11098_v27, %v11098_v27  ;;  %v2024_v49 = vld [vmem:[%s16658_s3] sm:$0xff] }
 0x2ab   :  { %v1918_v48 = vpop.xlane.xlu0 %1917  ;;  %v1801_v1 = vpop.xlane.xlu1 %1800 }
 0x2ac   :  { %v2047_v15 = vadd.f32 0.001, %v2007_v53  ;;  %v1968_v3 = vmul.f32 0.0051020407, %v1918_v48  ;;  %v11109_v43 = vmul.f32 0.0051020407, %v1801_v1 }
 0x2ae   :  { %v9206_v41 = vpop.eup %9205  ;;  %9211 = vrsqrt.f32 %v2047_v15  ;;  %v2008_v9 = vsub.f32 %v1968_v3, %v1988_v19  ;;  %v1989_v1 = vmul.f32 %v11109_v43, %v11109_v43 }
 0x2af   :  { %v1921_v10 = vpop.xlane.xlu1 %1920  ;;  %v1804_v42 = vpop.xlane.xlu0 %1803  ;;  %v2085_v35 = vmul.f32 %v9206_v41, %v2025_v37 }
 0x2b0   :  { %v9208_v24 = vpop.eup %9207  ;;  %v2048_v48 = vadd.f32 0.001, %v2008_v9  ;;  %v1969_v15 = vmul.f32 0.0051020407, %v1921_v10  ;;  %v11120_v19 = vmul.f32 0.0051020407, %v1804_v42 }
 0x2b1   :  { %2151 = vperm.xlu1 %8843, %v2085_v35   ;;  %v2084_v3 = vmul.f32 %v9208_v24, %v2024_v49 }
 0x2b2   :  { %9213 = vrsqrt.f32 %v2048_v48  ;;  %v2009_v27 = vsub.f32 %v1969_v15, %v1989_v1  ;;  %v1990_v24 = vmul.f32 %v11120_v19, %v11120_v19  ;;  %v2027_v15 = vld [vmem:[%s16658_s3 + $0x18] sm:$0xff] }
 0x2b3   :  { %v1924_v41 = vpop.xlane.xlu0 %1923  ;;  %v1807_v53 = vpop.xlane.xlu1 %1806  ;;  %2146 = vperm.xlu0 %8844, %v2084_v3  }
 0x2b4   :  { %v9210_v10 = vpop.eup %9209  ;;  %v2049_v42 = vadd.f32 0.001, %v2009_v27  ;;  %v1970_v35 = vmul.f32 0.0051020407, %v1924_v41  ;;  %v11131_v49 = vmul.f32 0.0051020407, %v1807_v53 }
 0x2b5   :  { %v2086_v48 = vmul.f32 %v9210_v10, %v2026_v46 }
 0x2b6   :  { %9215 = vrsqrt.f32 %v2049_v42  ;;  %v2010_v1 = vsub.f32 %v1970_v35, %v1990_v24  ;;  %v1991_v46 = vmul.f32 %v11131_v49, %v11131_v49  ;;  %v2028_v35 = vld [vmem:[%s16658_s3 + $0x20] sm:$0xff] }
 0x2b7   :  { %v1927_v37 = vpop.xlane.xlu1 %1926  ;;  %v1810_v3 = vpop.xlane.xlu0 %1809  ;;  %2156 = vperm.xlu1 %8843, %v2086_v48  }
 0x2b8   :  { %v9212_v2 = vpop.eup %9211  ;;  %v2050_v41 = vadd.f32 0.001, %v2010_v1  ;;  %v1971_v53 = vmul.f32 0.0051020407, %v1927_v37  ;;  %v11142_v10 = vmul.f32 0.0051020407, %v1810_v3 }
 0x2b9   :  { %v2087_v42 = vmul.f32 %v9212_v2, %v2027_v15 }
 0x2ba   :  { %9217 = vrsqrt.f32 %v2050_v41  ;;  %v2011_v24 = vsub.f32 %v1971_v53, %v1991_v46  ;;  %v1992_v2 = vmul.f32 %v11142_v10, %v11142_v10  ;;  %v2029_v53 = vld [vmem:[%s16658_s3 + $0x28] sm:$0xff] }
 0x2bb   :  { %v1930_v9 = vpop.xlane.xlu0 %1929  ;;  %v1813_v27 = vpop.xlane.xlu1 %1812  ;;  %2161 = vperm.xlu1 %8843, %v2087_v42  }
 0x2bc   :  { %v9214_v28 = vpop.eup %9213  ;;  %v2051_v37 = vadd.f32 0.001, %v2011_v24  ;;  %v1972_v15 = vmul.f32 0.0051020407, %v1930_v9  ;;  %v11153_v3 = vmul.f32 0.0051020407, %v1813_v27 }
 0x2bd   :  { %v2088_v41 = vmul.f32 %v9214_v28, %v2028_v35 }
 0x2be   :  { %9219 = vrsqrt.f32 %v2051_v37  ;;  %v2012_v46 = vsub.f32 %v1972_v15, %v1992_v2  ;;  %v1993_v28 = vmul.f32 %v11153_v3, %v11153_v3  ;;  %v2030_v15 = vld [vmem:[%s16658_s3 + $0x30] sm:$0xff] }
 0x2bf   :  { %v1933_v48 = vpop.xlane.xlu1 %1932  ;;  %v1816_v1 = vpop.xlane.xlu0 %1815  ;;  %2166 = vperm.xlu1 %8843, %v2088_v41  }
 0x2c0   :  { %v9216_v50 = vpop.eup %9215  ;;  %v2052_v9 = vadd.f32 0.001, %v2012_v46  ;;  %v1973_v27 = vmul.f32 0.0051020407, %v1933_v48  ;;  %v11164_v35 = vmul.f32 0.0051020407, %v1816_v1 }
 0x2c1   :  { %v2089_v37 = vmul.f32 %v9216_v50, %v2029_v53 }
 0x2c2   :  { %9221 = vrsqrt.f32 %v2052_v9  ;;  %v2013_v2 = vsub.f32 %v1973_v27, %v1993_v28  ;;  %v1994_v50 = vmul.f32 %v11164_v35, %v11164_v35  ;;  %v2031_v27 = vld [vmem:[%s16658_s3 + $0x38] sm:$0xff] }
 0x2c3   :  { %v1936_v42 = vpop.xlane.xlu0 %1935  ;;  %v1819_v24 = vpop.xlane.xlu1 %1818  ;;  %2171 = vperm.xlu1 %8843, %v2089_v37  }
 0x2c4   :  { %v9218_v62 = vpop.eup %9217  ;;  %v2053_v48 = vadd.f32 0.001, %v2013_v2  ;;  %v1974_v1 = vmul.f32 0.0051020407, %v1936_v42  ;;  %v11175_v53 = vmul.f32 0.0051020407, %v1819_v24 }
 0x2c5   :  { %v2090_v9 = vmul.f32 %v9218_v62, %v2030_v15 }
 0x2c6   :  { %9223 = vrsqrt.f32 %v2053_v48  ;;  %v2014_v28 = vsub.f32 %v1974_v1, %v1994_v50  ;;  %v1995_v62 = vmul.f32 %v11175_v53, %v11175_v53  ;;  %v2032_v1 = vld [vmem:[%s16658_s3 + $0x40] sm:$0xff] }
 0x2c7   :  { %v1939_v41 = vpop.xlane.xlu1 %1938  ;;  %v1822_v46 = vpop.xlane.xlu0 %1821  ;;  %2176 = vperm.xlu1 %8843, %v2090_v9  }
 0x2c8   :  { %v9220_v33 = vpop.eup %9219  ;;  %v2054_v42 = vadd.f32 0.001, %v2014_v28  ;;  %v1975_v24 = vmul.f32 0.0051020407, %v1939_v41  ;;  %v11186_v15 = vmul.f32 0.0051020407, %v1822_v46 }
 0x2c9   :  { %v2091_v48 = vmul.f32 %v9220_v33, %v2031_v27 }
 0x2ca   :  { %9225 = vrsqrt.f32 %v2054_v42  ;;  %v2015_v50 = vsub.f32 %v1975_v24, %v1995_v62  ;;  %v1996_v33 = vmul.f32 %v11186_v15, %v11186_v15  ;;  %v2033_v24 = vld [vmem:[%s16658_s3 + $0x48] sm:$0xff] }
 0x2cb   :  { %v1942_v37 = vpop.xlane.xlu0 %1941  ;;  %v1825_v2 = vpop.xlane.xlu1 %1824  ;;  %2181 = vperm.xlu1 %8843, %v2091_v48  }
 0x2cc   :  { %v9222_v13 = vpop.eup %9221  ;;  %v2055_v41 = vadd.f32 0.001, %v2015_v50  ;;  %v1976_v46 = vmul.f32 0.0051020407, %v1942_v37  ;;  %v11197_v27 = vmul.f32 0.0051020407, %v1825_v2 }
 0x2cd   :  { %v2092_v42 = vmul.f32 %v9222_v13, %v2032_v1 }
 0x2ce   :  { %9227 = vrsqrt.f32 %v2055_v41  ;;  %v2016_v62 = vsub.f32 %v1976_v46, %v1996_v33  ;;  %v1997_v13 = vmul.f32 %v11197_v27, %v11197_v27  ;;  %v2034_v46 = vld [vmem:[%s16658_s3 + $0x50] sm:$0xff] }
 0x2cf   :  { %v1945_v9 = vpop.xlane.xlu1 %1944  ;;  %v1828_v28 = vpop.xlane.xlu0 %1827  ;;  %2186 = vperm.xlu1 %8843, %v2092_v42  }
 0x2d0   :  { %v9224_v16 = vpop.eup %9223  ;;  %v2056_v37 = vadd.f32 0.001, %v2016_v62  ;;  %v1977_v2 = vmul.f32 0.0051020407, %v1945_v9  ;;  %v11208_v1 = vmul.f32 0.0051020407, %v1828_v28 }
 0x2d1   :  { %v2093_v41 = vmul.f32 %v9224_v16, %v2033_v24 }
 0x2d2   :  { %9229 = vrsqrt.f32 %v2056_v37  ;;  %v2017_v33 = vsub.f32 %v1977_v2, %v1997_v13  ;;  %v1998_v16 = vmul.f32 %v11208_v1, %v11208_v1  ;;  %v2035_v2 = vld [vmem:[%s16658_s3 + $0x58] sm:$0xff] }
 0x2d3   :  { %v1948_v48 = vpop.xlane.xlu0 %1947  ;;  %v1831_v50 = vpop.xlane.xlu1 %1830  ;;  %2191 = vperm.xlu0 %8844, %v2093_v41  }
 0x2d4   :  { %v9226_v55 = vpop.eup %9225  ;;  %v2057_v9 = vadd.f32 0.001, %v2017_v33  ;;  %v1978_v28 = vmul.f32 0.0051020407, %v1948_v48  ;;  %v11219_v24 = vmul.f32 0.0051020407, %v1831_v50 }
 0x2d5   :  { %v2094_v37 = vmul.f32 %v9226_v55, %v2034_v46 }
 0x2d6   :  { %9231 = vrsqrt.f32 %v2057_v9  ;;  %v2018_v13 = vsub.f32 %v1978_v28, %v1998_v16  ;;  %v1999_v55 = vmul.f32 %v11219_v24, %v11219_v24  ;;  %v2036_v28 = vld [vmem:[%s16658_s3 + $0x60] sm:$0xff] }
 0x2d7   :  { %v1951_v42 = vpop.xlane.xlu1 %1950  ;;  %v1834_v62 = vpop.xlane.xlu0 %1833  ;;  %2196 = vperm.xlu1 %8843, %v2094_v37  }
 0x2d8   :  { %v9228_v17 = vpop.eup %9227  ;;  %v2058_v48 = vadd.f32 0.001, %v2018_v13  ;;  %v1979_v50 = vmul.f32 0.0051020407, %v1951_v42  ;;  %v11230_v46 = vmul.f32 0.0051020407, %v1834_v62 }
 0x2d9   :  { %v2095_v9 = vmul.f32 %v9228_v17, %v2035_v2 }
 0x2da   :  { %9233 = vrsqrt.f32 %v2058_v48  ;;  %v2019_v16 = vsub.f32 %v1979_v50, %v1999_v55  ;;  %v2000_v17 = vmul.f32 %v11230_v46, %v11230_v46  ;;  %v2037_v50 = vld [vmem:[%s16658_s3 + $0x68] sm:$0xff] }
 0x2db   :  { %v1954_v41 = vpop.xlane.xlu0 %1953  ;;  %v1837_v33 = vpop.xlane.xlu1 %1836  ;;  %2201 = vperm.xlu0 %8844, %v2095_v9  }
 0x2dc   :  { %v9230_v44 = vpop.eup %9229  ;;  %v2059_v42 = vadd.f32 0.001, %v2019_v16  ;;  %v1980_v62 = vmul.f32 0.0051020407, %v1954_v41  ;;  %v11241_v2 = vmul.f32 0.0051020407, %v1837_v33 }
 0x2dd   :  { %v2096_v48 = vmul.f32 %v9230_v44, %v2036_v28 }
 0x2de   :  { %9235 = vrsqrt.f32 %v2059_v42  ;;  %v2020_v55 = vsub.f32 %v1980_v62, %v2000_v17  ;;  %v2001_v44 = vmul.f32 %v11241_v2, %v11241_v2  ;;  %v2038_v62 = vld [vmem:[%s16658_s3 + $0x70] sm:$0xff] }
 0x2df   :  { %v1957_v37 = vpop.xlane.xlu1 %1956  ;;  %v1840_v13 = vpop.xlane.xlu0 %1839  ;;  %2206 = vperm.xlu1 %8843, %v2096_v48  }
 0x2e0   :  { %v9232_v58 = vpop.eup %9231  ;;  %v2060_v41 = vadd.f32 0.001, %v2020_v55  ;;  %v1981_v33 = vmul.f32 0.0051020407, %v1957_v37  ;;  %v11252_v28 = vmul.f32 0.0051020407, %v1840_v13 }
 0x2e1   :  { %v2097_v42 = vmul.f32 %v9232_v58, %v2037_v50 }
 0x2e2   :  { %9237 = vrsqrt.f32 %v2060_v41  ;;  %v2021_v17 = vsub.f32 %v1981_v33, %v2001_v44  ;;  %v2002_v58 = vmul.f32 %v11252_v28, %v11252_v28  ;;  %v2039_v33 = vld [vmem:[%s16658_s3 + $0x78] sm:$0xff] }
 0x2e3   :  { %2211 = vperm.xlu0 %8844, %v2097_v42   ;;  %v1960_v16 = vpop.xlane.xlu0 %1959  ;;  %v1843_v9 = vpop.xlane.xlu1 %1842 }
 0x2e4   :  { %v9234_v39 = vpop.eup %9233  ;;  %v2061_v37 = vadd.f32 0.001, %v2021_v17  ;;  %v1982_v13 = vmul.f32 0.0051020407, %v1960_v16  ;;  %v11263_v50 = vmul.f32 0.0051020407, %v1843_v9 }
 0x2e5   :  { %v2098_v41 = vmul.f32 %v9234_v39, %v2038_v62 }
 0x2e6   :  { %9239 = vrsqrt.f32 %v2061_v37  ;;  %v2022_v44 = vsub.f32 %v1982_v13, %v2002_v58  ;;  %v2003_v9 = vmul.f32 %v11263_v50, %v11263_v50  ;;  %v2040_v37 = vld [vmem:[%s16658_s3 + $0x80] sm:$0xff] }
 0x2e7   :  { %2216 = vperm.xlu1 %8843, %v2098_v41   ;;  %v1963_v55 = vpop.xlane.xlu1 %1962 }
 0x2e8   :  { %v9236_v48 = vpop.eup %9235  ;;  %v2062_v36 = vadd.f32 0.001, %v2022_v44  ;;  %v1983_v39 = vmul.f32 0.0051020407, %v1963_v55  ;;  %v2041_v44 = vld [vmem:[%s16658_s3 + $0x88] sm:$0xff] }
 0x2e9   :  { %v2099_v16 = vmul.f32 %v9236_v48, %v2039_v33  ;;  %v2043_v33 = vld [vmem:[%s16658_s3 + $0x98] sm:$0xff] }
 0x2ea   :  { %9241 = vrsqrt.f32 %v2062_v36  ;;  %v2023_v62 = vsub.f32 %v1983_v39, %v2003_v9  ;;  %v2042_v36 = vld [vmem:[%s16658_s3 + $0x90] sm:$0xff] }
 0x2eb   :  { %2221 = vperm.xlu0 %8844, %v2099_v16   ;;  %v9027_v16 = vld [vmem:[%s16660_s5 + $0x4] ss:$8 sps:$4 sm:$0xff]  }
 0x2ec   :  { %v9238_v58 = vpop.eup %9237  ;;  %v2063_v13 = vadd.f32 0.001, %v2023_v62  ;;  %8639 = vmatprep.mubr.msk.bf16.mxu0 %vm3249_vm1, %v9027_v16 }
 0x2ed   :  { %v2100_v41 = vmul.f32 %v9238_v58, %v2040_v37  ;;  %v17495_v58 = vsub.f32 %v10780_v12, %v11072_v22  ;;  %v17497_v12 = vsub.f32 %v10768_v25, %v11066_v23 }
 0x2ee   :  { %9243 = vrsqrt.f32 %v2063_v13 }
 0x2ef   :  { %2226 = vperm.xlu1 %8843, %v2100_v41   ;;  %v17496_v41 = vsub.f32 %v10786_v34, %v11072_v22  ;;  %v17498_v22 = vsub.f32 %v10774_v29, %v11066_v23  ;;  %v17499_v29 = vsub.f32 %v10794_v7, %v11082_v0  ;;  %v2448_v7 = vld [vmem:[%s16656_s1 + $0x20] sm:$0xff] }
 0x2f0   :  { %v9240_v17 = vpop.eup %9239 }
 0x2f1   :  { %v2101_v42 = vmul.f32 %v9240_v17, %v2041_v44  ;;  %v9030_v17 = vld [vmem:[%s16660_s5 + $0x84] ss:$8 sps:$4 sm:$0xff]  }
 0x2f2   :  { %8647 = vmatprep.mubr.msk.bf16.mxu1 %vm3249_vm1, %v9030_v17  ;;  %v2444_v17 = vld [vmem:[%s16656_s1] sm:$0xff] }
 0x2f3   :  { %2231 = vperm.xlu0 %8844, %v2101_v42   ;;  %v2524_v42 = vlaneseq }
 0x2f4   :  { %v9242_v48 = vpop.eup %9241 }
 0x2f5   :  { %v2102_v55 = vmul.f32 %v9242_v48, %v2042_v36  ;;  %v2525_v62 = vand.u32 127, %v2524_v42  ;;  %v2445_v42 = vld [vmem:[%s16656_s1 + $0x8] sm:$0xff] }
 0x2f7   :  { %2236 = vperm.xlu1 %8843, %v2102_v55   ;;  %v2526_v36 = vadd.s32 128, %v2525_v62  ;;  %v2446_v55 = vld [vmem:[%s16656_s1 + $0x10] sm:$0xff] }
 0x2f8   :  { %v9244_v9 = vpop.eup %9243 }
 0x2f9   :  { %v2103_v39 = vmul.f32 %v9244_v9, %v2043_v33  ;;  %v2447_v33 = vld [vmem:[%s16656_s1 + $0x18] sm:$0xff]  ;;  %vm2528_vm2 = vcmp.lt.s32.totalorder %v2526_v36, 196 }
 0x2fa   :  { %vm11328_vm3 = vmpackc.low %vm2528_vm2, %vm2528_vm2 }
 0x2fb   :  { %2241 = vperm.xlu0 %8844, %v2103_v39  }
 0x330   :  { %v2152_v37 = vpop.permute.xlu1 %2151 }
 0x331   :  { %v2246_v13 = vmul.f32 %v2152_v37, %v17495_v58  ;;  %v2247_v44 = vmul.f32 %v2152_v37, %v17496_v41 }
 0x332   :  { %v2147_v48 = vpop.permute.xlu0 %2146 }
 0x333   :  { %v2406_v9 = vadd.f32 %v10121_v20, %v2246_v13  ;;  %v2407_v39 = vadd.f32 %v10121_v20, %v2247_v44  ;;  %v2244_v16 = vmul.f32 %v2147_v48, %v17497_v12  ;;  %v2245_v34 = vmul.f32 %v2147_v48, %v17498_v22  ;;  %v9033_v12 = vld [vmem:[%s16660_s5 + $0x10] ss:$8 sps:$4 sm:$0xff]  }
 0x334   :  { %v17500_v44 = vsub.f32 %v10800_v6, %v11082_v0  ;;  %v2449_v0 = vld [vmem:[%s16656_s1 + $0x28] sm:$0xff]  ;;  %v17503_v6 = vsub.f32 %v10806_v14, %v11090_v54 }
 0x335   :  { %v2404_v62 = vadd.f32 %v10123_v21, %v2244_v16  ;;  %v2405_v20 = vadd.f32 %v10123_v21, %v2245_v34  ;;  %v2486_v37 = vadd.f32 %v2446_v55, %v2406_v9  ;;  %v2487_v25 = vadd.f32 %v2447_v33, %v2407_v39  ;;  %v2451_v34 = vld [vmem:[%s16656_s1 + $0x38] sm:$0xff] }
 0x336   :  { %v2157_v58 = vpop.permute.xlu1 %2156  ;;  %v17504_v39 = vsub.f32 %v10810_v26, %v11090_v54 }
 0x337   :  { %v2484_v13 = vadd.f32 %v2444_v17, %v2404_v62  ;;  %v2485_v41 = vadd.f32 %v2445_v42, %v2405_v20  ;;  %v2248_v23 = vmul.f32 %v2157_v58, %v17499_v29  ;;  %v2249_v48 = vmul.f32 %v2157_v58, %v17500_v44 }
 0x339   :  { %v8610_v16 = vpack.c.bf16 %v2487_v25, %v2485_v41  ;;  %v2689_v21 = vpack.c.bf16 %v2486_v37, %v2484_v13  ;;  %v2408_v36 = vadd.f32 %v10148_v31, %v2248_v23  ;;  %v2409_v55 = vadd.f32 %v10148_v31, %v2249_v48  ;;  %v2450_v31 = vld [vmem:[%s16656_s1 + $0x30] sm:$0xff]  ;;  %v17505_v37 = vld [vmem:[#allocation153_spill] sm:$0xff]  ;;  %v17507_v13 = vld [vmem:[#allocation96_spill] sm:$0xff] }
 0x33a   :  { %v2162_v33 = vpop.permute.xlu1 %2161  ;;  %v17506_v25 = vsub.f32 %v10820_v40, %v17505_v37  ;;  %v17508_v41 = vsub.f32 %v17507_v13, %v17505_v37  ;;  %v17509_v48 = vld [vmem:[#allocation6_spill] sm:$0xff] }
 0x33b   :  { %v2250_v9 = vmul.f32 %v2162_v33, %v17503_v6  ;;  %v2251_v22 = vmul.f32 %v2162_v33, %v17504_v39  ;;  %8611 = vmatprep.subr.msk.bf16.mxu0 %vm11328_vm3, %v8610_v16  ;;  %8699 = vmatprep.subr.msk.bf16.mxu1 %vm11328_vm3, %v8610_v16  ;;  %v2488_v26 = vadd.f32 %v2448_v7, %v2408_v36  ;;  %v2452_v36 = vld [vmem:[%s16656_s1 + $0x40] sm:$0xff]  ;;  %v2453_v40 = vld [vmem:[%s16656_s1 + $0x48] sm:$0xff]  ;;  %v2454_v6 = vld [vmem:[%s16656_s1 + $0x50] sm:$0xff] }
 0x33c   :  { %3431 = vmatpush1.bf16.msra.mxu0 %v2689_v21  ;;  %8709 = vmatpush1.bf16.msra.mxu1 %v2689_v21  ;;  %v2489_v17 = vadd.f32 %v2449_v0, %v2409_v55  ;;  %v17510_v55 = vsub.f32 %v10830_v61, %v11109_v43  ;;  %v17511_v7 = vsub.f32 %v10836_v8, %v11109_v43  ;;  %v17512_v61 = vld [vmem:[#allocation5_spill] sm:$0xff] }
 0x33d   :  { %v2410_v14 = vadd.f32 %v10146_v30, %v2250_v9  ;;  %v2411_v54 = vadd.f32 %v10146_v30, %v2251_v22  ;;  %v2455_v9 = vld [vmem:[%s16656_s1 + $0x58] sm:$0xff] }
 0x33e   :  { %v2167_v42 = vpop.permute.xlu1 %2166 }
 0x33f   :  { %v2490_v62 = vadd.f32 %v2450_v31, %v2410_v14  ;;  %v2491_v20 = vadd.f32 %v2451_v34, %v2411_v54  ;;  %v2252_v58 = vmul.f32 %v2167_v42, %v17506_v25  ;;  %v2253_v29 = vmul.f32 %v2167_v42, %v17508_v41  ;;  %v17516_v25 = vld [vmem:[#allocation8_spill] sm:$0xff] }
 0x340   :  { %v17513_v54 = vsub.f32 %v10844_v11, %v11120_v19  ;;  %v2457_v11 = vld [vmem:[%s16656_s1 + $0x68] sm:$0xff] }
 0x341   :  { %v8613_v23 = vpack.c.bf16 %v2491_v20, %v2489_v17  ;;  %v2691_v44 = vpack.c.bf16 %v2490_v62, %v2488_v26  ;;  %v2412_v16 = vadd.f32 %v17509_v48, %v2252_v58  ;;  %v2413_v30 = vadd.f32 %v17509_v48, %v2253_v29  ;;  %v17514_v17 = vld [vmem:[#allocation100_spill] sm:$0xff]  ;;  %v2456_v29 = vld [vmem:[%s16656_s1 + $0x60] sm:$0xff] }
 0x342   :  { %v2172_v21 = vpop.permute.xlu1 %2171  ;;  %v17515_v42 = vsub.f32 %v17514_v17, %v11120_v19  ;;  %v17525_v17 = vsub.f32 %v10882_v56, %v11153_v3  ;;  %v17528_v56 = vld [vmem:[#allocation9_spill] sm:$0xff] }
 0x343   :  { %v2254_v33 = vmul.f32 %v2172_v21, %v17510_v55  ;;  %v2255_v0 = vmul.f32 %v2172_v21, %v17511_v7  ;;  %8614 = vmatprep.subr.msk.bf16.mxu0 %vm11328_vm3, %v8613_v23  ;;  %8700 = vmatprep.subr.msk.bf16.mxu1 %vm11328_vm3, %v8613_v23  ;;  %v2492_v43 = vadd.f32 %v2452_v36, %v2412_v16  ;;  %v2459_v21 = vld [vmem:[%s16656_s1 + $0x78] sm:$0xff] }
 0x344   :  { %3433 = vmatpush1.bf16.msra.mxu0 %v2691_v44  ;;  %8710 = vmatpush1.bf16.msra.mxu1 %v2691_v44  ;;  %v2493_v22 = vadd.f32 %v2453_v40, %v2413_v30  ;;  %v17517_v23 = vsub.f32 %v10856_v59, %v11131_v49  ;;  %v17518_v44 = vld [vmem:[#allocation102_spill] sm:$0xff]  ;;  %v2458_v30 = vld [vmem:[%s16656_s1 + $0x70] sm:$0xff] }
 0x345   :  { %v2414_v39 = vadd.f32 %v17512_v61, %v2254_v33  ;;  %v2415_v8 = vadd.f32 %v17512_v61, %v2255_v0  ;;  %v17519_v48 = vsub.f32 %v17518_v44, %v11131_v49  ;;  %v17520_v59 = vld [vmem:[#allocation7_spill] sm:$0xff]  ;;  %v17522_v61 = vld [vmem:[#allocation105_spill] sm:$0xff] }
 0x346   :  { %v2177_v31 = vpop.permute.xlu1 %2176 }
 0x347   :  { %v2494_v34 = vadd.f32 %v2454_v6, %v2414_v39  ;;  %v2495_v14 = vadd.f32 %v2455_v9, %v2415_v8  ;;  %v2256_v26 = vmul.f32 %v2177_v31, %v17513_v54  ;;  %v2257_v62 = vmul.f32 %v2177_v31, %v17515_v42  ;;  %v17524_v31 = vld [vmem:[#allocation10_spill] sm:$0xff] }
 0x348   :  { %v17521_v6 = vsub.f32 %v10870_v60, %v11142_v10  ;;  %v17523_v39 = vsub.f32 %v17522_v61, %v11142_v10  ;;  %v2461_v60 = vld [vmem:[%s16656_s1 + $0x88] sm:$0xff]  ;;  %v2466_v61 = vld [vmem:[%s16656_s1 + $0xb0] sm:$0xff] }
 0x349   :  { %v8616_v20 = vpack.c.bf16 %v2495_v14, %v2493_v22  ;;  %v2693_v37 = vpack.c.bf16 %v2494_v34, %v2492_v43  ;;  %v2416_v58 = vadd.f32 %v17516_v25, %v2256_v26  ;;  %v2417_v13 = vadd.f32 %v17516_v25, %v2257_v62  ;;  %v2460_v26 = vld [vmem:[%s16656_s1 + $0x80] sm:$0xff]  ;;  %v17526_v42 = vld [vmem:[#allocation106_spill] sm:$0xff]  ;;  %v2463_v25 = vld [vmem:[%s16656_s1 + $0x98] sm:$0xff] }
 0x34a   :  { %v2182_v41 = vpop.permute.xlu1 %2181  ;;  %v17527_v62 = vsub.f32 %v17526_v42, %v11153_v3 }
 0x34b   :  { %v2258_v19 = vmul.f32 %v2182_v41, %v17517_v23  ;;  %v2259_v16 = vmul.f32 %v2182_v41, %v17519_v48  ;;  %8617 = vmatprep.subr.msk.bf16.mxu0 %vm11328_vm3, %v8616_v20  ;;  %8701 = vmatprep.subr.msk.bf16.mxu1 %vm11328_vm3, %v8616_v20  ;;  %v2496_v40 = vadd.f32 %v2456_v29, %v2416_v58  ;;  %v17530_v48 = vld [vmem:[#allocation109_spill] sm:$0xff] }
 0x34c   :  { %3435 = vmatpush1.bf16.msra.mxu0 %v2693_v37  ;;  %8711 = vmatpush1.bf16.msra.mxu1 %v2693_v37  ;;  %v2497_v55 = vadd.f32 %v2457_v11, %v2417_v13  ;;  %v2462_v37 = vld [vmem:[%s16656_s1 + $0x90] sm:$0xff] }
 0x34d   :  { %v2418_v36 = vadd.f32 %v17520_v59, %v2258_v19  ;;  %v2419_v49 = vadd.f32 %v17520_v59, %v2259_v16  ;;  %v17529_v19 = vsub.f32 %v10896_v47, %v11164_v35  ;;  %v17531_v16 = vsub.f32 %v17530_v48, %v11164_v35  ;;  %v2465_v47 = vld [vmem:[%s16656_s1 + $0xa8] sm:$0xff] }
 0x34e   :  { %v2187_v33 = vpop.permute.xlu1 %2186 }
 0x34f   :  { %v2498_v7 = vadd.f32 %v2458_v30, %v2418_v36  ;;  %v2499_v0 = vadd.f32 %v2459_v21, %v2419_v49  ;;  %v2260_v9 = vmul.f32 %v2187_v33, %v17521_v6  ;;  %v2261_v8 = vmul.f32 %v2187_v33, %v17523_v39  ;;  %v17532_v36 = vld [vmem:[#allocation12_spill] sm:$0xff]  ;;  %v2464_v33 = vld [vmem:[%s16656_s1 + $0xa0] sm:$0xff] }
 0x350   :  { %v2467_v39 = vld [vmem:[%s16656_s1 + $0xb8] sm:$0xff] }
 0x351   :  { %v8619_v43 = vpack.c.bf16 %v2499_v0, %v2497_v55  ;;  %v2695_v22 = vpack.c.bf16 %v2498_v7, %v2496_v40  ;;  %v2420_v34 = vadd.f32 %v17524_v31, %v2260_v9  ;;  %v2421_v14 = vadd.f32 %v17524_v31, %v2261_v8  ;;  %v17534_v0 = vld [vmem:[#allocation111_spill] sm:$0xff] }
 0x352   :  { %v2192_v54 = vpop.permute.xlu0 %2191  ;;  %v17533_v7 = vsub.f32 %v10906_v51, %v11175_v53  ;;  %v17535_v6 = vsub.f32 %v17534_v0, %v11175_v53  ;;  %v17536_v51 = vld [vmem:[#allocation11_spill] sm:$0xff] }
 0x353   :  { %v2262_v10 = vmul.f32 %v2192_v54, %v17525_v17  ;;  %v2263_v20 = vmul.f32 %v2192_v54, %v17527_v62  ;;  %8620 = vmatprep.subr.msk.bf16.mxu0 %vm11328_vm3, %v8619_v43  ;;  %8702 = vmatprep.subr.msk.bf16.mxu1 %vm11328_vm3, %v8619_v43  ;;  %v2500_v13 = vadd.f32 %v2460_v26, %v2420_v34 }
 0x354   :  { %3437 = vmatpush1.bf16.msra.mxu0 %v2695_v22  ;;  %8712 = vmatpush1.bf16.msra.mxu1 %v2695_v22  ;;  %v2501_v41 = vadd.f32 %v2461_v60, %v2421_v14  ;;  %v17537_v54 = vsub.f32 %v10920_v52, %v11186_v15  ;;  %v17538_v60 = vld [vmem:[#allocation114_spill] sm:$0xff] }
 0x355   :  { %v2422_v58 = vadd.f32 %v17528_v56, %v2262_v10  ;;  %v2423_v3 = vadd.f32 %v17528_v56, %v2263_v20  ;;  %v17539_v17 = vsub.f32 %v17538_v60, %v11186_v15  ;;  %v17540_v20 = vld [vmem:[#allocation14_spill] sm:$0xff]  ;;  %v17553_v60 = vsub.f32 %v10972_v18, %v11230_v46 }
 0x356   :  { %v2197_v29 = vpop.permute.xlu1 %2196  ;;  %v2469_v52 = vld [vmem:[%s16656_s1 + $0xc8] sm:$0xff] }
 0x357   :  { %v2502_v11 = vadd.f32 %v2462_v37, %v2422_v58  ;;  %v2503_v23 = vadd.f32 %v2463_v25, %v2423_v3  ;;  %v2264_v44 = vmul.f32 %v2197_v29, %v17529_v19  ;;  %v2265_v30 = vmul.f32 %v2197_v29, %v17531_v16  ;;  %v2468_v58 = vld [vmem:[%s16656_s1 + $0xc0] sm:$0xff]  ;;  %v2477_v18 = vld [vmem:[%s16656_s1 + $0x108] sm:$0xff] }
 0x358   :  { %v17541_v3 = vsub.f32 %v10932_v45, %v11197_v27  ;;  %v17544_v45 = vld [vmem:[#allocation13_spill] sm:$0xff] }
 0x359   :  { %v8622_v21 = vpack.c.bf16 %v2503_v23, %v2501_v41  ;;  %v2697_v59 = vpack.c.bf16 %v2502_v11, %v2500_v13  ;;  %v2424_v49 = vadd.f32 %v17532_v36, %v2264_v44  ;;  %v2425_v40 = vadd.f32 %v17532_v36, %v2265_v30  ;;  %v17542_v13 = vld [vmem:[#allocation116_spill] sm:$0xff]  ;;  %v2470_v11 = vld [vmem:[%s16656_s1 + $0xd0] sm:$0xff] }
 0x35a   :  { %v2202_v55 = vpop.permute.xlu0 %2201  ;;  %v17543_v41 = vsub.f32 %v17542_v13, %v11197_v27  ;;  %v2471_v23 = vld [vmem:[%s16656_s1 + $0xd8] sm:$0xff]  ;;  %v17558_v13 = vld [vmem:[#allocation125_spill] sm:$0xff] }
 0x35b   :  { %v2266_v35 = vmul.f32 %v2202_v55, %v17533_v7  ;;  %v2267_v9 = vmul.f32 %v2202_v55, %v17535_v6  ;;  %8623 = vmatprep.subr.msk.bf16.mxu0 %vm11328_vm3, %v8622_v21  ;;  %8703 = vmatprep.subr.msk.bf16.mxu1 %vm11328_vm3, %v8622_v21  ;;  %v2504_v43 = vadd.f32 %v2464_v33, %v2424_v49  ;;  %v17546_v49 = vld [vmem:[#allocation119_spill] sm:$0xff]  ;;  %v17548_v7 = vld [vmem:[#allocation16_spill] sm:$0xff] }
 0x35c   :  { %3439 = vmatpush1.bf16.msra.mxu0 %v2697_v59  ;;  %8713 = vmatpush1.bf16.msra.mxu1 %v2697_v59  ;;  %v2505_v22 = vadd.f32 %v2465_v47, %v2425_v40  ;;  %v17545_v59 = vsub.f32 %v10946_v5, %v11208_v1  ;;  %v17547_v40 = vsub.f32 %v17546_v49, %v11208_v1  ;;  %v2473_v5 = vld [vmem:[%s16656_s1 + $0xe8] sm:$0xff] }
 0x35d   :  { %v2426_v8 = vadd.f32 %v17536_v51, %v2266_v35  ;;  %v2427_v53 = vadd.f32 %v17536_v51, %v2267_v9  ;;  %v2472_v9 = vld [vmem:[%s16656_s1 + $0xe0] sm:$0xff] }
 0x35e   :  { %v2207_v31 = vpop.permute.xlu1 %2206 }
 0x35f   :  { %v2506_v34 = vadd.f32 %v2466_v61, %v2426_v8  ;;  %v2507_v14 = vadd.f32 %v2467_v39, %v2427_v53  ;;  %v2268_v26 = vmul.f32 %v2207_v31, %v17537_v54  ;;  %v2269_v10 = vmul.f32 %v2207_v31, %v17539_v17  ;;  %v17550_v39 = vld [vmem:[#allocation120_spill] sm:$0xff]  ;;  %v2474_v53 = vld [vmem:[%s16656_s1 + $0xf0] sm:$0xff] }
 0x360   :  { %v17549_v61 = vsub.f32 %v10958_v38, %v11219_v24  ;;  %v17551_v51 = vsub.f32 %v17550_v39, %v11219_v24  ;;  %v17552_v38 = vld [vmem:[#allocation15_spill] sm:$0xff] }
 0x361   :  { %v8625_v42 = vpack.c.bf16 %v2507_v14, %v2505_v22  ;;  %v2699_v62 = vpack.c.bf16 %v2506_v34, %v2504_v43  ;;  %v2428_v37 = vadd.f32 %v17540_v20, %v2268_v26  ;;  %v2429_v25 = vadd.f32 %v17540_v20, %v2269_v10  ;;  %v2475_v43 = vld [vmem:[%s16656_s1 + $0xf8] sm:$0xff]  ;;  %v17554_v10 = vld [vmem:[#allocation123_spill] sm:$0xff] }
 0x362   :  { %v2212_v56 = vpop.permute.xlu0 %2211 }
 0x363   :  { %v2270_v15 = vmul.f32 %v2212_v56, %v17541_v3  ;;  %v2271_v29 = vmul.f32 %v2212_v56, %v17543_v41  ;;  %8626 = vmatprep.subr.msk.bf16.mxu0 %vm11328_vm3, %v8625_v42  ;;  %8704 = vmatprep.subr.msk.bf16.mxu1 %vm11328_vm3, %v8625_v42  ;;  %v2508_v44 = vadd.f32 %v2468_v58, %v2428_v37  ;;  %v2476_v3 = vld [vmem:[%s16656_s1 + $0x100] sm:$0xff] }
 0x364   :  { %3441 = vmatpush1.bf16.msra.mxu0 %v2699_v62  ;;  %8714 = vmatpush1.bf16.msra.mxu1 %v2699_v62  ;;  %v2509_v48 = vadd.f32 %v2469_v52, %v2429_v25  ;;  %v17555_v42 = vsub.f32 %v17554_v10, %v11230_v46  ;;  %v17556_v25 = vld [vmem:[#allocation18_spill] sm:$0xff]  ;;  %v17559_v41 = vsub.f32 %v17558_v13, %v11241_v2  ;;  %v9043_v10 = vld [vmem:[%s16660_s5 + $0x34] ss:$8 sps:$4 sm:$0xff]  }
 0x365   :  { %v2430_v19 = vadd.f32 %v17544_v45, %v2270_v15  ;;  %v2431_v27 = vadd.f32 %v17544_v45, %v2271_v29  ;;  %v17557_v15 = vsub.f32 %v10982_v4, %v11241_v2  ;;  %v17560_v4 = vld [vmem:[#allocation17_spill] sm:$0xff] }
 0x366   :  { %v2217_v16 = vpop.permute.xlu1 %2216  ;;  %v9064_v13 = vld [vmem:[%s16660_s5 + $0xe4] ss:$8 sps:$4 sm:$0xff]  }
 0x367   :  { %v2510_v30 = vadd.f32 %v2470_v11, %v2430_v19  ;;  %v2511_v21 = vadd.f32 %v2471_v23, %v2431_v27  ;;  %v2272_v36 = vmul.f32 %v2217_v16, %v17545_v59  ;;  %v2273_v55 = vmul.f32 %v2217_v16, %v17547_v40  ;;  %v2478_v11 = vld [vmem:[%s16656_s1 + $0x110] sm:$0xff]  ;;  %v2479_v23 = vld [vmem:[%s16656_s1 + $0x118] sm:$0xff] }
 0x368   :  { %v17562_v59 = vld [vmem:[#allocation128_spill] sm:$0xff] }
 0x369   :  { %v8628_v33 = vpack.c.bf16 %v2511_v21, %v2509_v48  ;;  %v2701_v47 = vpack.c.bf16 %v2510_v30, %v2508_v44  ;;  %v2432_v35 = vadd.f32 %v17548_v7, %v2272_v36  ;;  %v2433_v0 = vadd.f32 %v17548_v7, %v2273_v55  ;;  %v17564_v7 = vld [vmem:[#allocation20_spill] sm:$0xff] }
 0x36a   :  { %v2222_v6 = vpop.permute.xlu0 %2221  ;;  %v17561_v30 = vsub.f32 %v10996_v32, %v11252_v28  ;;  %v17563_v36 = vsub.f32 %v17562_v59, %v11252_v28  ;;  %v9085_v59 = vld [vmem:[%s16660_s5 + $0x144] ss:$8 sps:$4 sm:$0xff]  }
 0x36b   :  { %v2274_v1 = vmul.f32 %v2222_v6, %v17549_v61  ;;  %v2275_v8 = vmul.f32 %v2222_v6, %v17551_v51  ;;  %8629 = vmatprep.subr.msk.bf16.mxu0 %vm11328_vm3, %v8628_v33  ;;  %8705 = vmatprep.subr.msk.bf16.mxu1 %vm11328_vm3, %v8628_v33  ;;  %v2512_v31 = vadd.f32 %v2472_v9, %v2432_v35  ;;  %v2482_v61 = vld [vmem:[%s16656_s1 + $0x130] sm:$0xff] }
 0x36c   :  { %3443 = vmatpush1.bf16.msra.mxu0 %v2701_v47  ;;  %8715 = vmatpush1.bf16.msra.mxu1 %v2701_v47  ;;  %v2513_v34 = vadd.f32 %v2473_v5, %v2433_v0  ;;  %v2480_v47 = vld [vmem:[%s16656_s1 + $0x120] sm:$0xff]  ;;  %v17565_v6 = vsub.f32 %v11008_v57, %v11263_v50  ;;  %v17566_v9 = vsub.f32 %v11014_v63, %v11263_v50  ;;  %v2481_v5 = vld [vmem:[%s16656_s1 + $0x128] sm:$0xff]  ;;  %v2483_v57 = vld [vmem:[%s16656_s1 + $0x138] sm:$0xff] }
 0x36d   :  { %v2434_v22 = vadd.f32 %v17552_v38, %v2274_v1  ;;  %v2435_v24 = vadd.f32 %v17552_v38, %v2275_v8  ;;  %v17567_v63 = vld [vmem:[#allocation19_spill] sm:$0xff] }
 0x36e   :  { %v2227_v14 = vpop.permute.xlu1 %2226 }
 0x36f   :  { %v2514_v54 = vadd.f32 %v2474_v53, %v2434_v22  ;;  %v2515_v26 = vadd.f32 %v2475_v43, %v2435_v24  ;;  %v2276_v17 = vmul.f32 %v2227_v14, %v17553_v60  ;;  %v2277_v62 = vmul.f32 %v2227_v14, %v17555_v42  ;;  %v9025_v22 = vld [vmem:[%s16660_s5] ss:$8 sps:$4 sm:$0xff]   ;;  %v9036_v14 = vld [vmem:[%s16660_s5 + $0x90] ss:$8 sps:$4 sm:$0xff]   ;;  %v9046_v42 = vld [vmem:[%s16660_s5 + $0xb4] ss:$8 sps:$4 sm:$0xff]  }
 0x370   :  { %v9028_v24 = vld [vmem:[%s16660_s5 + $0x80] ss:$8 sps:$4 sm:$0xff]  }
 0x371   :  { %v8631_v20 = vpack.c.bf16 %v2515_v26, %v2513_v34  ;;  %v2703_v37 = vpack.c.bf16 %v2514_v54, %v2512_v31  ;;  %v2436_v56 = vadd.f32 %v17556_v25, %v2276_v17  ;;  %v2437_v58 = vadd.f32 %v17556_v25, %v2277_v62  ;;  %v9031_v31 = vld [vmem:[%s16660_s5 + $0x14] ss:$8 sps:$4 sm:$0xff]   ;;  %v9037_v54 = vld [vmem:[%s16660_s5 + $0x24] ss:$8 sps:$4 sm:$0xff]   ;;  %v9039_v60 = vld [vmem:[%s16660_s5 + $0x20] ss:$8 sps:$4 sm:$0xff]  }
 0x372   :  { %v2232_v52 = vpop.permute.xlu0 %2231  ;;  %v9034_v34 = vld [vmem:[%s16660_s5 + $0x94] ss:$8 sps:$4 sm:$0xff]   ;;  %v9040_v26 = vld [vmem:[%s16660_s5 + $0xa4] ss:$8 sps:$4 sm:$0xff]   ;;  %v9042_v17 = vld [vmem:[%s16660_s5 + $0xa0] ss:$8 sps:$4 sm:$0xff]  }
 0x373   :  { %v2278_v46 = vmul.f32 %v2232_v52, %v17557_v15  ;;  %v2279_v29 = vmul.f32 %v2232_v52, %v17559_v41  ;;  %8632 = vmatprep.subr.msk.bf16.mxu0 %vm11328_vm3, %v8631_v20  ;;  %8706 = vmatprep.subr.msk.bf16.mxu1 %vm11328_vm3, %v8631_v20  ;;  %v2516_v19 = vadd.f32 %v2476_v3, %v2436_v56  ;;  %v9045_v62 = vld [vmem:[%s16660_s5 + $0x30] ss:$8 sps:$4 sm:$0xff]   ;;  %v9052_v25 = vld [vmem:[%s16660_s5 + $0xc4] ss:$8 sps:$4 sm:$0xff]   ;;  %v9051_v56 = vld [vmem:[%s16660_s5 + $0x40] ss:$8 sps:$4 sm:$0xff]  }
 0x374   :  { %3445 = vmatpush1.bf16.msra.mxu0 %v2703_v37  ;;  %8716 = vmatpush1.bf16.msra.mxu1 %v2703_v37  ;;  %v2517_v27 = vadd.f32 %v2477_v18, %v2437_v58  ;;  %v9048_v20 = vld [vmem:[%s16660_s5 + $0xb0] ss:$8 sps:$4 sm:$0xff]   ;;  %v9049_v37 = vld [vmem:[%s16660_s5 + $0x44] ss:$8 sps:$4 sm:$0xff]   ;;  %v9054_v58 = vld [vmem:[%s16660_s5 + $0xc0] ss:$8 sps:$4 sm:$0xff]  }
 0x375   :  { %v2438_v45 = vadd.f32 %v17560_v4, %v2278_v46  ;;  %v2439_v2 = vadd.f32 %v17560_v4, %v2279_v29  ;;  %v9055_v52 = vld [vmem:[%s16660_s5 + $0x54] ss:$8 sps:$4 sm:$0xff]   ;;  %v9057_v18 = vld [vmem:[%s16660_s5 + $0x50] ss:$8 sps:$4 sm:$0xff]   ;;  %v9061_v46 = vld [vmem:[%s16660_s5 + $0x64] ss:$8 sps:$4 sm:$0xff]  }
 0x376   :  { %v2237_v44 = vpop.permute.xlu1 %2236  ;;  %v9058_v3 = vld [vmem:[%s16660_s5 + $0xd4] ss:$8 sps:$4 sm:$0xff]   ;;  %v9060_v15 = vld [vmem:[%s16660_s5 + $0xd0] ss:$8 sps:$4 sm:$0xff]   ;;  %v9063_v41 = vld [vmem:[%s16660_s5 + $0x60] ss:$8 sps:$4 sm:$0xff]  }
 0x377   :  { %v2518_v48 = vadd.f32 %v2478_v11, %v2438_v45  ;;  %v2519_v16 = vadd.f32 %v2479_v23, %v2439_v2  ;;  %v2280_v21 = vmul.f32 %v2237_v44, %v17561_v30  ;;  %v2281_v49 = vmul.f32 %v2237_v44, %v17563_v36  ;;  %v9066_v29 = vld [vmem:[%s16660_s5 + $0xe0] ss:$8 sps:$4 sm:$0xff]   ;;  %v9067_v11 = vld [vmem:[%s16660_s5 + $0x74] ss:$8 sps:$4 sm:$0xff]   ;;  %v9069_v4 = vld [vmem:[%s16660_s5 + $0x70] ss:$8 sps:$4 sm:$0xff]  }
 0x378   :  { %v9070_v23 = vld [vmem:[%s16660_s5 + $0xf4] ss:$8 sps:$4 sm:$0xff]   ;;  %v9072_v45 = vld [vmem:[%s16660_s5 + $0xf0] ss:$8 sps:$4 sm:$0xff]   ;;  %v9073_v2 = vld [vmem:[%s16660_s5 + $0x104] ss:$8 sps:$4 sm:$0xff]  }
 0x379   :  { %v8634_v40 = vpack.c.bf16 %v2519_v16, %v2517_v27  ;;  %v2705_v55 = vpack.c.bf16 %v2518_v48, %v2516_v19  ;;  %v2440_v35 = vadd.f32 %v17564_v7, %v2280_v21  ;;  %v2441_v0 = vadd.f32 %v17564_v7, %v2281_v49  ;;  %v9075_v19 = vld [vmem:[%s16660_s5 + $0x100] ss:$8 sps:$4 sm:$0xff]   ;;  %v9076_v27 = vld [vmem:[%s16660_s5 + $0x114] ss:$8 sps:$4 sm:$0xff]   ;;  %v9078_v44 = vld [vmem:[%s16660_s5 + $0x110] ss:$8 sps:$4 sm:$0xff]  }
 0x37a   :  { %v2242_v33 = vpop.permute.xlu0 %2241  ;;  %v9079_v48 = vld [vmem:[%s16660_s5 + $0x124] ss:$8 sps:$4 sm:$0xff]   ;;  %v9081_v16 = vld [vmem:[%s16660_s5 + $0x120] ss:$8 sps:$4 sm:$0xff]   ;;  %v9082_v30 = vld [vmem:[%s16660_s5 + $0x134] ss:$8 sps:$4 sm:$0xff]  }
 0x37b   :  { %v2282_v32 = vmul.f32 %v2242_v33, %v17565_v6  ;;  %v2283_v28 = vmul.f32 %v2242_v33, %v17566_v9  ;;  %8635 = vmatprep.subr.msk.bf16.mxu0 %vm11328_vm3, %v8634_v40  ;;  %8707 = vmatprep.subr.msk.bf16.mxu1 %vm11328_vm3, %v8634_v40  ;;  %v2520_v39 = vadd.f32 %v2480_v47, %v2440_v35  ;;  %v9084_v21 = vld [vmem:[%s16660_s5 + $0x130] ss:$8 sps:$4 sm:$0xff]   ;;  %v9087_v36 = vld [vmem:[%s16660_s5 + $0x140] ss:$8 sps:$4 sm:$0xff]   ;;  %v9088_v49 = vld [vmem:[%s16660_s5 + $0x154] ss:$8 sps:$4 sm:$0xff]  }
 0x37c   :  { %3447 = vmatpush1.bf16.msra.mxu0 %v2705_v55  ;;  %8717 = vmatpush1.bf16.msra.mxu1 %v2705_v55  ;;  %v2521_v51 = vadd.f32 %v2481_v5, %v2441_v0  ;;  %v9090_v40 = vld [vmem:[%s16660_s5 + $0x150] ss:$8 sps:$4 sm:$0xff]   ;;  %v9091_v55 = vld [vmem:[%s16660_s5 + $0x164] ss:$8 sps:$4 sm:$0xff]   ;;  %v9093_v33 = vld [vmem:[%s16660_s5 + $0x160] ss:$8 sps:$4 sm:$0xff]  }
 0x37d   :  { %v2442_v50 = vadd.f32 %v17567_v63, %v2282_v32  ;;  %v2443_v1 = vadd.f32 %v17567_v63, %v2283_v28  ;;  %v9094_v47 = vld [vmem:[%s16660_s5 + $0x174] ss:$8 sps:$4 sm:$0xff]   ;;  %v9096_v7 = vld [vmem:[%s16660_s5 + $0x170] ss:$8 sps:$4 sm:$0xff]   ;;  %v9097_v35 = vld [vmem:[%s16660_s5 + $0x184] ss:$8 sps:$4 sm:$0xff]  }
 0x37e   :  { %v9099_v0 = vld [vmem:[%s16660_s5 + $0x180] ss:$8 sps:$4 sm:$0xff]   ;;  %v9100_v6 = vld [vmem:[%s16660_s5 + $0x194] ss:$8 sps:$4 sm:$0xff]   ;;  %v9102_v32 = vld [vmem:[%s16660_s5 + $0x190] ss:$8 sps:$4 sm:$0xff]  }
 0x37f   :  { %v2522_v8 = vadd.f32 %v2482_v61, %v2442_v50  ;;  %v2523_v53 = vadd.f32 %v2483_v57, %v2443_v1  ;;  %v9103_v9 = vld [vmem:[%s16660_s5 + $0x1a4] ss:$8 sps:$4 sm:$0xff]   ;;  %v9105_v28 = vld [vmem:[%s16660_s5 + $0x1a0] ss:$8 sps:$4 sm:$0xff]   ;;  %v9106_v5 = vld [vmem:[%s16660_s5 + $0x1b4] ss:$8 sps:$4 sm:$0xff]  }
 0x380   :  { %v9108_v61 = vld [vmem:[%s16660_s5 + $0x1b0] ss:$8 sps:$4 sm:$0xff]   ;;  %v9109_v57 = vld [vmem:[%s16660_s5 + $0x1c4] ss:$8 sps:$4 sm:$0xff]   ;;  %v9111_v63 = vld [vmem:[%s16660_s5 + $0x1c0] ss:$8 sps:$4 sm:$0xff]  }
 0x381   :  { %v8637_v43 = vpack.c.bf16 %v2523_v53, %v2521_v51  ;;  %v2707_v38 = vpack.c.bf16 %v2522_v8, %v2520_v39  ;;  %v9112_v50 = vld [vmem:[%s16660_s5 + $0x1d4] ss:$8 sps:$4 sm:$0xff]   ;;  %v9114_v1 = vld [vmem:[%s16660_s5 + $0x1d0] ss:$8 sps:$4 sm:$0xff]  }
 0x383   :  { %8638 = vmatprep.subr.msk.bf16.mxu0 %vm11328_vm3, %v8637_v43  ;;  %8708 = vmatprep.subr.msk.bf16.mxu1 %vm11328_vm3, %v8637_v43 }
 0x384   :  { %3449 = vmatpush1.bf16.msra.mxu0 %v2707_v38  ;;  %8718 = vmatpush1.bf16.msra.mxu1 %v2707_v38 }
 0x387   :  { %3463 = vmatmul.mubr.bf16.vlgmr.msra.gmra.mrb[40].mxu0 %v9025_v22  ;;  %3543 = vmatmul.mubr.bf16.vlgmr.msra.gmra.mrb[0].mxu1 %v9028_v24 }
 0x388   :  { %8640 = vmatprep.mubr.msk.bf16.mxu0 %vm3249_vm1, %v9031_v31  ;;  %8648 = vmatprep.mubr.msk.bf16.mxu1 %vm3249_vm1, %v9034_v34 }
 0x38f   :  { %3473 = vmatmul.mubr.bf16.gmra.mrb[44].mxu0 %v9033_v12  ;;  %3553 = vmatmul.mubr.bf16.gmra.mrb[4].mxu1 %v9036_v14 }
 0x390   :  { %8641 = vmatprep.mubr.msk.bf16.mxu0 %vm3249_vm1, %v9037_v54  ;;  %8649 = vmatprep.mubr.msk.bf16.mxu1 %vm3249_vm1, %v9040_v26 }
 0x397   :  { %3483 = vmatmul.mubr.bf16.gmra.mrb[48].mxu0 %v9039_v60  ;;  %3563 = vmatmul.mubr.bf16.gmra.mrb[8].mxu1 %v9042_v17 }
 0x398   :  { %8642 = vmatprep.mubr.msk.bf16.mxu0 %vm3249_vm1, %v9043_v10  ;;  %8650 = vmatprep.mubr.msk.bf16.mxu1 %vm3249_vm1, %v9046_v42 }
 0x39f   :  { %3493 = vmatmul.mubr.bf16.gmra.mrb[52].mxu0 %v9045_v62  ;;  %3573 = vmatmul.mubr.bf16.gmra.mrb[12].mxu1 %v9048_v20  ;;  %v9115_v20 = vld [vmem:[%s16660_s5 + $0x1e4] ss:$8 sps:$4 sm:$0xff]  }
 0x3a0   :  { %8643 = vmatprep.mubr.msk.bf16.mxu0 %vm3249_vm1, %v9049_v37  ;;  %8651 = vmatprep.mubr.msk.bf16.mxu1 %vm3249_vm1, %v9052_v25  ;;  %v9117_v37 = vld [vmem:[%s16660_s5 + $0x1e0] ss:$8 sps:$4 sm:$0xff]  }
 0x3a7   :  { %3503 = vmatmul.mubr.bf16.gmra.mrb[56].mxu0 %v9051_v56  ;;  %3583 = vmatmul.mubr.bf16.gmra.mrb[16].mxu1 %v9054_v58 }
 0x3a8   :  { %8644 = vmatprep.mubr.msk.bf16.mxu0 %vm3249_vm1, %v9055_v52  ;;  %8652 = vmatprep.mubr.msk.bf16.mxu1 %vm3249_vm1, %v9058_v3 }
 0x3af   :  { %3513 = vmatmul.mubr.bf16.gmra.mrb[60].mxu0 %v9057_v18  ;;  %3593 = vmatmul.mubr.bf16.gmra.mrb[20].mxu1 %v9060_v15 }
 0x3b0   :  { %8645 = vmatprep.mubr.msk.bf16.mxu0 %vm3249_vm1, %v9061_v46  ;;  %8653 = vmatprep.mubr.msk.bf16.mxu1 %vm3249_vm1, %v9064_v13 }
 0x3b7   :  { %3523 = vmatmul.mubr.bf16.gmra.mrb[64].mxu0 %v9063_v41  ;;  %3603 = vmatmul.mubr.bf16.gmra.mrb[24].mxu1 %v9066_v29 }
 0x3b8   :  { %8646 = vmatprep.mubr.msk.bf16.mxu0 %vm3249_vm1, %v9067_v11  ;;  %8654 = vmatprep.mubr.msk.bf16.mxu1 %vm3249_vm1, %v9070_v23 }
 0x3bf   :  { %3533 = vmatmul.mubr.bf16.gmra.mrb[68].mxu0 %v9069_v4  ;;  %3613 = vmatmul.mubr.bf16.gmra.mrb[28].mxu1 %v9072_v45 }
 0x3c0   :  { %8655 = vmatprep.mubr.msk.bf16.mxu1 %vm3249_vm1, %v9073_v2 }
 0x3c7   :  { %3623 = vmatmul.mubr.bf16.gmra.mrb[32].mxu1 %v9075_v19 }
 0x3c8   :  { %8656 = vmatprep.mubr.msk.bf16.mxu1 %vm3249_vm1, %v9076_v27 }
 0x3cf   :  { %3633 = vmatmul.mubr.bf16.gmra.mrb[36].mxu1 %v9078_v44 }
 0x3d0   :  { %8657 = vmatprep.mubr.msk.bf16.mxu1 %vm3249_vm1, %v9079_v48 }
 0x3d7   :  { %3643 = vmatmul.mubr.bf16.gmra.mrb[40].mxu1 %v9081_v16 }
 0x3d8   :  { %8658 = vmatprep.mubr.msk.bf16.mxu1 %vm3249_vm1, %v9082_v30 }
 0x3df   :  { %3653 = vmatmul.mubr.bf16.gmra.mrb[44].mxu1 %v9084_v21 }
 0x3e0   :  { %8659 = vmatprep.mubr.msk.bf16.mxu1 %vm3249_vm1, %v9085_v59 }
 0x3e7   :  { %3663 = vmatmul.mubr.bf16.gmra.mrb[48].mxu1 %v9087_v36 }
 0x3e8   :  { %8660 = vmatprep.mubr.msk.bf16.mxu1 %vm3249_vm1, %v9088_v49 }
 0x3ef   :  { %3673 = vmatmul.mubr.bf16.gmra.mrb[52].mxu1 %v9090_v40 }
 0x3f0   :  { %8661 = vmatprep.mubr.msk.bf16.mxu1 %vm3249_vm1, %v9091_v55 }
 0x3f7   :  { %3683 = vmatmul.mubr.bf16.gmra.mrb[56].mxu1 %v9093_v33 }
 0x3f8   :  { %8662 = vmatprep.mubr.msk.bf16.mxu1 %vm3249_vm1, %v9094_v47 }
 0x3ff   :  { %3693 = vmatmul.mubr.bf16.gmra.mrb[60].mxu1 %v9096_v7 }
 0x400   :  { %8663 = vmatprep.mubr.msk.bf16.mxu1 %vm3249_vm1, %v9097_v35 }
 0x407   :  { %3703 = vmatmul.mubr.bf16.gmra.mrb[64].mxu1 %v9099_v0 }
 0x408   :  { %8664 = vmatprep.mubr.msk.bf16.mxu1 %vm3249_vm1, %v9100_v6 }
 0x40f   :  { %3713 = vmatmul.mubr.bf16.gmra.mrb[68].mxu1 %v9102_v32 }
 0x410   :  { %8665 = vmatprep.mubr.msk.bf16.mxu1 %vm3249_vm1, %v9103_v9 }
 0x417   :  { %3723 = vmatmul.mubr.bf16.gmra.mrb[72].mxu1 %v9105_v28 }
 0x418   :  { %8666 = vmatprep.mubr.msk.bf16.mxu1 %vm3249_vm1, %v9106_v5 }
 0x41f   :  { %3733 = vmatmul.mubr.bf16.gmra.mrb[76].mxu1 %v9108_v61 }
 0x420   :  { %8667 = vmatprep.mubr.msk.bf16.mxu1 %vm3249_vm1, %v9109_v57 }
 0x427   :  { %3743 = vmatmul.mubr.bf16.gmra.mrb[80].mxu1 %v9111_v63 }
 0x428   :  { %8668 = vmatprep.mubr.msk.bf16.mxu1 %vm3249_vm1, %v9112_v50 }
 0x42f   :  { %3753 = vmatmul.mubr.bf16.gmra.mrb[84].mxu1 %v9114_v1 }
 0x430   :  { %8669 = vmatprep.mubr.msk.bf16.mxu1 %vm3249_vm1, %v9115_v20 }
 0x437   :  { %3763 = vmatmul.mubr.bf16.gmra.mrb[88].mxu1 %v9117_v37 }
 0x45a   :  { %v11820_v39 = vpop.f32.mrb[40].mxu0  ;;  %v11822_v51 = vpop.f32.mrb[0].mxu1 }
 0x45b   :  { %17568 = vst [vmem:[#allocation153_spill] sm:$0xff] %v11820_v39  ;;  %17569 = vst [vmem:[#allocation96_spill] sm:$0xff] %v11822_v51  ;;  %v4543_v8 = vmul.f32 %v11820_v39, %v11820_v39  ;;  %v4575_v53 = vmul.f32 %v11822_v51, %v11822_v51  ;;  %v11828_v43 = vpop.f32.mrb[41].mxu0  ;;  %v11830_v38 = vpop.f32.mrb[1].mxu1 }
 0x45c   :  { %17570 = vst [vmem:[#allocation6_spill] sm:$0xff] %v11828_v43  ;;  %17571 = vst [vmem:[#allocation5_spill] sm:$0xff] %v11830_v38  ;;  %v4063_v22 = vadd.f32 %v11828_v43, %v11820_v39  ;;  %v4544_v24 = vmul.f32 %v11828_v43, %v11828_v43  ;;  %v4111_v31 = vadd.f32 %v11830_v38, %v11822_v51  ;;  %v11840_v12 = vpop.f32.mrb[2].mxu1  ;;  %v11842_v14 = vpop.f32.mrb[42].mxu0 }
 0x45d   :  { %v4576_v34 = vmul.f32 %v11830_v38, %v11830_v38  ;;  %17572 = vst [vmem:[#allocation100_spill] sm:$0xff] %v11840_v12  ;;  %17573 = vst [vmem:[#allocation8_spill] sm:$0xff] %v11842_v14  ;;  %v4577_v54 = vmul.f32 %v11840_v12, %v11840_v12  ;;  %v4545_v26 = vmul.f32 %v11842_v14, %v11842_v14  ;;  %v11848_v60 = vpop.f32.mrb[43].mxu0  ;;  %v11850_v17 = vpop.f32.mrb[3].mxu1 }
 0x45e   :  { %17574 = vst [vmem:[#allocation102_spill] sm:$0xff] %v11848_v60  ;;  %17575 = vst [vmem:[#allocation7_spill] sm:$0xff] %v11850_v17  ;;  %4112 = vadd.xlane.f32.xlu0 %v4111_v31  ;;  %4064 = vadd.xlane.f32.xlu1 %v4063_v22  ;;  %v4066_v10 = vadd.f32 %v11848_v60, %v11842_v14  ;;  %v4546_v42 = vmul.f32 %v11848_v60, %v11848_v60 }
 0x45f   :  { %v4114_v62 = vadd.f32 %v11850_v17, %v11840_v12  ;;  %v4578_v25 = vmul.f32 %v11850_v17, %v11850_v17  ;;  %v4783_v56 = vadd.f32 %v4544_v24, %v4543_v8  ;;  %v4831_v58 = vadd.f32 %v4576_v34, %v4575_v53 }
 0x460   :  { %v4786_v52 = vadd.f32 %v4546_v42, %v4545_v26 }
 0x461   :  { %v4834_v3 = vadd.f32 %v4578_v25, %v4577_v54 }
 0x462   :  { %4115 = vadd.xlane.f32.xlu1 %v4114_v62  ;;  %4067 = vadd.xlane.f32.xlu0 %v4066_v10  ;;  %v11867_v18 = vpop.f32.mrb[44].mxu0  ;;  %v11869_v15 = vpop.f32.mrb[4].mxu1 }
 0x463   :  { %17576 = vst [vmem:[#allocation105_spill] sm:$0xff] %v11867_v18  ;;  %17577 = vst [vmem:[#allocation10_spill] sm:$0xff] %v11869_v15  ;;  %v4547_v46 = vmul.f32 %v11867_v18, %v11867_v18  ;;  %v11873_v13 = vpop.f32.mrb[45].mxu0  ;;  %v4579_v41 = vmul.f32 %v11869_v15, %v11869_v15  ;;  %v11877_v29 = vpop.f32.mrb[5].mxu1 }
 0x464   :  { %17578 = vst [vmem:[#allocation106_spill] sm:$0xff] %v11873_v13  ;;  %17579 = vst [vmem:[#allocation9_spill] sm:$0xff] %v11877_v29  ;;  %v4069_v11 = vadd.f32 %v11873_v13, %v11867_v18  ;;  %v4548_v23 = vmul.f32 %v11873_v13, %v11873_v13  ;;  %v11883_v4 = vpop.f32.mrb[46].mxu0  ;;  %v4117_v45 = vadd.f32 %v11877_v29, %v11869_v15  ;;  %v11889_v19 = vpop.f32.mrb[6].mxu1 }
 0x465   :  { %v4580_v2 = vmul.f32 %v11877_v29, %v11877_v29  ;;  %17580 = vst [vmem:[#allocation109_spill] sm:$0xff] %v11889_v19  ;;  %v4549_v27 = vmul.f32 %v11883_v4, %v11883_v4  ;;  %v11893_v44 = vpop.f32.mrb[47].mxu0  ;;  %v4581_v48 = vmul.f32 %v11889_v19, %v11889_v19  ;;  %v11897_v16 = vpop.f32.mrb[7].mxu1 }
 0x466   :  { %17581 = vst [vmem:[#allocation12_spill] sm:$0xff] %v11893_v44  ;;  %17582 = vst [vmem:[#allocation111_spill] sm:$0xff] %v11897_v16  ;;  %4787 = vadd.xlane.f32.xlu1 %v4786_v52  ;;  %4784 = vadd.xlane.f32.xlu0 %v4783_v56  ;;  %v4072_v30 = vadd.f32 %v11893_v44, %v11883_v4  ;;  %v4550_v21 = vmul.f32 %v11893_v44, %v11893_v44 }
 0x467   :  { %v4120_v59 = vadd.f32 %v11897_v16, %v11889_v19  ;;  %v4582_v36 = vmul.f32 %v11897_v16, %v11897_v16  ;;  %v4789_v49 = vadd.f32 %v4548_v23, %v4547_v46  ;;  %v4837_v40 = vadd.f32 %v4580_v2, %v4579_v41 }
 0x468   :  { %v4792_v55 = vadd.f32 %v4550_v21, %v4549_v27 }
 0x469   :  { %v4840_v33 = vadd.f32 %v4582_v36, %v4581_v48 }
 0x46a   :  { %4835 = vadd.xlane.f32.xlu1 %v4834_v3  ;;  %4832 = vadd.xlane.f32.xlu0 %v4831_v58  ;;  %v11907_v47 = vpop.f32.mrb[48].mxu0  ;;  %v11909_v7 = vpop.f32.mrb[8].mxu1 }
 0x46b   :  { %17583 = vst [vmem:[#allocation11_spill] sm:$0xff] %v11907_v47  ;;  %17584 = vst [vmem:[#allocation114_spill] sm:$0xff] %v11909_v7  ;;  %v4551_v35 = vmul.f32 %v11907_v47, %v11907_v47  ;;  %v11913_v0 = vpop.f32.mrb[49].mxu0  ;;  %v4583_v6 = vmul.f32 %v11909_v7, %v11909_v7  ;;  %v11917_v32 = vpop.f32.mrb[9].mxu1 }
 0x46c   :  { %17585 = vst [vmem:[#allocation14_spill] sm:$0xff] %v11913_v0  ;;  %17586 = vst [vmem:[#allocation116_spill] sm:$0xff] %v11917_v32  ;;  %v11921_v9 = vadd.f32 %v11913_v0, %v11907_v47  ;;  %v4552_v28 = vmul.f32 %v11913_v0, %v11913_v0  ;;  %v11925_v5 = vpop.f32.mrb[50].mxu0  ;;  %v11929_v61 = vadd.f32 %v11917_v32, %v11909_v7  ;;  %v11933_v63 = vpop.f32.mrb[10].mxu1 }
 0x46d   :  { %17587 = vst [vmem:[#allocation13_spill] sm:$0xff] %v11925_v5  ;;  %v4584_v57 = vmul.f32 %v11917_v32, %v11917_v32  ;;  %17588 = vst [vmem:[#allocation119_spill] sm:$0xff] %v11933_v63  ;;  %v4553_v50 = vmul.f32 %v11925_v5, %v11925_v5  ;;  %v11937_v1 = vpop.f32.mrb[51].mxu0  ;;  %v4585_v8 = vmul.f32 %v11933_v63, %v11933_v63  ;;  %v11941_v53 = vpop.f32.mrb[11].mxu1 }
 0x46e   :  { %17589 = vst [vmem:[#allocation16_spill] sm:$0xff] %v11937_v1  ;;  %17590 = vst [vmem:[#allocation120_spill] sm:$0xff] %v11941_v53  ;;  %4070 = vadd.xlane.f32.xlu0 %v4069_v11  ;;  %4073 = vadd.xlane.f32.xlu1 %v4072_v30  ;;  %v4078_v22 = vadd.f32 %v11937_v1, %v11925_v5  ;;  %v4554_v24 = vmul.f32 %v11937_v1, %v11937_v1 }
 0x46f   :  { %v4126_v31 = vadd.f32 %v11941_v53, %v11933_v63  ;;  %v4586_v34 = vmul.f32 %v11941_v53, %v11941_v53  ;;  %v11951_v54 = vadd.f32 %v4552_v28, %v4551_v35  ;;  %v11953_v26 = vadd.f32 %v4584_v57, %v4583_v6 }
 0x470   :  { %v11955_v10 = vadd.f32 %v4554_v24, %v4553_v50 }
 0x471   :  { %v11957_v42 = vadd.f32 %v4586_v34, %v4585_v8 }
 0x472   :  { %4118 = vadd.xlane.f32.xlu0 %v4117_v45  ;;  %4121 = vadd.xlane.f32.xlu1 %v4120_v59  ;;  %v11959_v62 = vpop.f32.mrb[52].mxu0  ;;  %v11961_v20 = vpop.f32.mrb[12].mxu1 }
 0x473   :  { %17591 = vst [vmem:[#allocation15_spill] sm:$0xff] %v11959_v62  ;;  %17592 = vst [vmem:[#allocation123_spill] sm:$0xff] %v11961_v20  ;;  %v4555_v37 = vmul.f32 %v11959_v62, %v11959_v62  ;;  %v11965_v25 = vpop.f32.mrb[53].mxu0  ;;  %v4587_v56 = vmul.f32 %v11961_v20, %v11961_v20  ;;  %v11969_v58 = vpop.f32.mrb[13].mxu1 }
 0x474   :  { %17593 = vst [vmem:[#allocation18_spill] sm:$0xff] %v11965_v25  ;;  %17594 = vst [vmem:[#allocation125_spill] sm:$0xff] %v11969_v58  ;;  %v11973_v52 = vadd.f32 %v11965_v25, %v11959_v62  ;;  %v4556_v3 = vmul.f32 %v11965_v25, %v11965_v25  ;;  %v11977_v46 = vpop.f32.mrb[54].mxu0  ;;  %v11981_v41 = vadd.f32 %v11969_v58, %v11961_v20  ;;  %v11985_v23 = vpop.f32.mrb[14].mxu1 }
 0x475   :  { %17595 = vst [vmem:[#allocation17_spill] sm:$0xff] %v11977_v46  ;;  %v4588_v11 = vmul.f32 %v11969_v58, %v11969_v58  ;;  %17596 = vst [vmem:[#allocation128_spill] sm:$0xff] %v11985_v23  ;;  %v4557_v45 = vmul.f32 %v11977_v46, %v11977_v46  ;;  %v11989_v2 = vpop.f32.mrb[55].mxu0  ;;  %v4589_v27 = vmul.f32 %v11985_v23, %v11985_v23  ;;  %v11993_v48 = vpop.f32.mrb[15].mxu1 }
 0x476   :  { %17597 = vst [vmem:[#allocation20_spill] sm:$0xff] %v11989_v2  ;;  %17598 = vst [vmem:[#allocation19_spill] sm:$0xff] %v11993_v48  ;;  %4790 = vadd.xlane.f32.xlu0 %v4789_v49  ;;  %4793 = vadd.xlane.f32.xlu1 %v4792_v55  ;;  %v11997_v30 = vadd.f32 %v11989_v2, %v11977_v46  ;;  %v4558_v21 = vmul.f32 %v11989_v2, %v11989_v2 }
 0x477   :  { %v12003_v59 = vadd.f32 %v11993_v48, %v11985_v23  ;;  %v4590_v36 = vmul.f32 %v11993_v48, %v11993_v48  ;;  %v12007_v35 = vadd.f32 %v4556_v3, %v4555_v37  ;;  %v12009_v6 = vadd.f32 %v4588_v11, %v4587_v56 }
 0x478   :  { %v12011_v49 = vadd.f32 %v4558_v21, %v4557_v45 }
 0x479   :  { %v12013_v55 = vadd.f32 %v4590_v36, %v4589_v27 }
 0x47a   :  { %4838 = vadd.xlane.f32.xlu0 %v4837_v40  ;;  %4841 = vadd.xlane.f32.xlu1 %v4840_v33  ;;  %v12015_v28 = vpop.f32.mrb[56].mxu0  ;;  %v12017_v57 = vpop.f32.mrb[16].mxu1 }
 0x47b   :  { %17599 = vst [vmem:[#allocation154_spill] sm:$0xff] %v12015_v28  ;;  %17600 = vst [vmem:[#allocation155_spill] sm:$0xff] %v12017_v57  ;;  %v4559_v50 = vmul.f32 %v12015_v28, %v12015_v28  ;;  %v12021_v8 = vpop.f32.mrb[57].mxu0  ;;  %v4591_v24 = vmul.f32 %v12017_v57, %v12017_v57  ;;  %v12025_v34 = vpop.f32.mrb[17].mxu1 }
 0x47c   :  { %17601 = vst [vmem:[#allocation156_spill] sm:$0xff] %v12021_v8  ;;  %17602 = vst [vmem:[#allocation157_spill] sm:$0xff] %v12025_v34  ;;  %v12029_v37 = vadd.f32 %v12021_v8, %v12015_v28  ;;  %v4560_v40 = vmul.f32 %v12021_v8, %v12021_v8  ;;  %v12033_v33 = vpop.f32.mrb[58].mxu0  ;;  %v12037_v56 = vadd.f32 %v12025_v34, %v12017_v57  ;;  %v12041_v11 = vpop.f32.mrb[18].mxu1 }
 0x47d   :  { %17603 = vst [vmem:[#allocation158_spill] sm:$0xff] %v12033_v33  ;;  %v4592_v3 = vmul.f32 %v12025_v34, %v12025_v34  ;;  %17604 = vst [vmem:[#allocation159_spill] sm:$0xff] %v12041_v11  ;;  %v4561_v45 = vmul.f32 %v12033_v33, %v12033_v33  ;;  %v12045_v27 = vpop.f32.mrb[59].mxu0  ;;  %v4593_v21 = vmul.f32 %v12041_v11, %v12041_v11  ;;  %v12049_v36 = vpop.f32.mrb[19].mxu1 }
 0x47e   :  { %17605 = vst [vmem:[#allocation160_spill] sm:$0xff] %v12045_v27  ;;  %17606 = vst [vmem:[#allocation161_spill] sm:$0xff] %v12049_v36  ;;  %4076 = vadd.xlane.f32.xlu0 %v11921_v9  ;;  %4079 = vadd.xlane.f32.xlu1 %v4078_v22  ;;  %v12054_v57 = vadd.f32 %v12045_v27, %v12033_v33  ;;  %v4562_v34 = vmul.f32 %v12045_v27, %v12045_v27 }
 0x47f   :  { %v12060_v8 = vadd.f32 %v12049_v36, %v12041_v11  ;;  %v4594_v28 = vmul.f32 %v12049_v36, %v12049_v36  ;;  %v12064_v58 = vadd.f32 %v4560_v40, %v4559_v50  ;;  %v12066_v20 = vadd.f32 %v4592_v3, %v4591_v24 }
 0x480   :  { %v12068_v9 = vadd.f32 %v4562_v34, %v4561_v45 }
 0x481   :  { %v12070_v22 = vadd.f32 %v4594_v28, %v4593_v21 }
 0x482   :  { %4124 = vadd.xlane.f32.xlu0 %v11929_v61  ;;  %4127 = vadd.xlane.f32.xlu1 %v4126_v31  ;;  %v12073_v33 = vpop.f32.mrb[60].mxu0  ;;  %v12075_v27 = vpop.f32.mrb[20].mxu1 }
 0x483   :  { %17607 = vst [vmem:[#allocation162_spill] sm:$0xff] %v12073_v33  ;;  %17608 = vst [vmem:[#allocation163_spill] sm:$0xff] %v12075_v27  ;;  %v4563_v11 = vmul.f32 %v12073_v33, %v12073_v33  ;;  %v12079_v48 = vpop.f32.mrb[61].mxu0  ;;  %v4595_v50 = vmul.f32 %v12075_v27, %v12075_v27  ;;  %v12083_v24 = vpop.f32.mrb[21].mxu1 }
 0x484   :  { %17609 = vst [vmem:[#allocation164_spill] sm:$0xff] %v12079_v48  ;;  %17610 = vst [vmem:[#allocation165_spill] sm:$0xff] %v12083_v24  ;;  %v12087_v28 = vadd.f32 %v12079_v48, %v12073_v33  ;;  %v4564_v61 = vmul.f32 %v12079_v48, %v12079_v48  ;;  %v12091_v31 = vpop.f32.mrb[62].mxu0  ;;  %v12095_v34 = vadd.f32 %v12083_v24, %v12075_v27  ;;  %v12099_v3 = vpop.f32.mrb[22].mxu1 }
 0x485   :  { %17611 = vst [vmem:[#allocation166_spill] sm:$0xff] %v12091_v31  ;;  %v4596_v40 = vmul.f32 %v12083_v24, %v12083_v24  ;;  %17612 = vst [vmem:[#allocation167_spill] sm:$0xff] %v12099_v3  ;;  %v4565_v45 = vmul.f32 %v12091_v31, %v12091_v31  ;;  %v12103_v21 = vpop.f32.mrb[63].mxu0  ;;  %v4597_v33 = vmul.f32 %v12099_v3, %v12099_v3  ;;  %v12107_v48 = vpop.f32.mrb[23].mxu1 }
 0x486   :  { %17613 = vst [vmem:[#allocation168_spill] sm:$0xff] %v12103_v21  ;;  %17614 = vst [vmem:[#allocation169_spill] sm:$0xff] %v12107_v48  ;;  %4796 = vadd.xlane.f32.xlu0 %v11951_v54  ;;  %4799 = vadd.xlane.f32.xlu1 %v11955_v10  ;;  %v12113_v27 = vadd.f32 %v12103_v21, %v12091_v31  ;;  %v4566_v24 = vmul.f32 %v12103_v21, %v12103_v21 }
 0x487   :  { %v12119_v36 = vadd.f32 %v12107_v48, %v12099_v3  ;;  %v4598_v23 = vmul.f32 %v12107_v48, %v12107_v48  ;;  %v12123_v25 = vadd.f32 %v4564_v61, %v4563_v11  ;;  %v12125_v62 = vadd.f32 %v4596_v40, %v4595_v50 }
 0x488   :  { %v12127_v54 = vadd.f32 %v4566_v24, %v4565_v45 }
 0x489   :  { %v12129_v10 = vadd.f32 %v4598_v23, %v4597_v33 }
 0x48a   :  { %4844 = vadd.xlane.f32.xlu0 %v11953_v26  ;;  %4847 = vadd.xlane.f32.xlu1 %v11957_v42  ;;  %v12133_v21 = vpop.f32.mrb[64].mxu0  ;;  %v12135_v31 = vpop.f32.mrb[24].mxu1 }
 0x48b   :  { %17615 = vst [vmem:[#allocation170_spill] sm:$0xff] %v12133_v21  ;;  %17616 = vst [vmem:[#allocation171_spill] sm:$0xff] %v12135_v31  ;;  %v4567_v3 = vmul.f32 %v12133_v21, %v12133_v21  ;;  %v12139_v48 = vpop.f32.mrb[65].mxu0  ;;  %v4599_v11 = vmul.f32 %v12135_v31, %v12135_v31  ;;  %v12143_v50 = vpop.f32.mrb[25].mxu1 }
 0x48c   :  { %17617 = vst [vmem:[#allocation172_spill] sm:$0xff] %v12139_v48  ;;  %17618 = vst [vmem:[#allocation173_spill] sm:$0xff] %v12143_v50  ;;  %v12147_v23 = vadd.f32 %v12139_v48, %v12133_v21  ;;  %v4568_v26 = vmul.f32 %v12139_v48, %v12139_v48  ;;  %v12151_v42 = vpop.f32.mrb[66].mxu0  ;;  %v12155_v33 = vadd.f32 %v12143_v50, %v12135_v31  ;;  %v12159_v61 = vpop.f32.mrb[26].mxu1 }
 0x48d   :  { %17619 = vst [vmem:[#allocation174_spill] sm:$0xff] %v12151_v42  ;;  %v4600_v24 = vmul.f32 %v12143_v50, %v12143_v50  ;;  %17620 = vst [vmem:[#allocation175_spill] sm:$0xff] %v12159_v61  ;;  %v4569_v40 = vmul.f32 %v12151_v42, %v12151_v42  ;;  %v12163_v45 = vpop.f32.mrb[67].mxu0  ;;  %v4601_v21 = vmul.f32 %v12159_v61, %v12159_v61  ;;  %v12167_v48 = vpop.f32.mrb[27].mxu1 }
 0x48e   :  { %17621 = vst [vmem:[#allocation176_spill] sm:$0xff] %v12163_v45  ;;  %17622 = vst [vmem:[#allocation177_spill] sm:$0xff] %v12167_v48  ;;  %4082 = vadd.xlane.f32.xlu0 %v11973_v52  ;;  %4085 = vadd.xlane.f32.xlu1 %v11997_v30  ;;  %v12173_v31 = vadd.f32 %v12163_v45, %v12151_v42  ;;  %v4570_v50 = vmul.f32 %v12163_v45, %v12163_v45 }
 0x48f   :  { %v12179_v2 = vadd.f32 %v12167_v48, %v12159_v61  ;;  %v4602_v46 = vmul.f32 %v12167_v48, %v12167_v48  ;;  %v12183_v32 = vadd.f32 %v4568_v26, %v4567_v3  ;;  %v12185_v7 = vadd.f32 %v4600_v24, %v4599_v11 }
 0x490   :  { %v12187_v52 = vadd.f32 %v4570_v50, %v4569_v40 }
 0x491   :  { %v12189_v30 = vadd.f32 %v4602_v46, %v4601_v21 }
 0x492   :  { %4130 = vadd.xlane.f32.xlu0 %v11981_v41  ;;  %4133 = vadd.xlane.f32.xlu1 %v12003_v59  ;;  %v12193_v45 = vpop.f32.mrb[68].mxu0  ;;  %v12195_v42 = vpop.f32.mrb[28].mxu1 }
 0x493   :  { %17623 = vst [vmem:[#allocation178_spill] sm:$0xff] %v12193_v45  ;;  %17624 = vst [vmem:[#allocation179_spill] sm:$0xff] %v12195_v42  ;;  %v4571_v61 = vmul.f32 %v12193_v45, %v12193_v45  ;;  %v12199_v48 = vpop.f32.mrb[69].mxu0  ;;  %v4603_v3 = vmul.f32 %v12195_v42, %v12195_v42  ;;  %v12203_v11 = vpop.f32.mrb[29].mxu1 }
 0x494   :  { %17625 = vst [vmem:[#allocation180_spill] sm:$0xff] %v12199_v48  ;;  %17626 = vst [vmem:[#allocation181_spill] sm:$0xff] %v12203_v11  ;;  %v12207_v46 = vadd.f32 %v12199_v48, %v12193_v45  ;;  %v4572_v41 = vmul.f32 %v12199_v48, %v12199_v48  ;;  %v12211_v59 = vpop.f32.mrb[70].mxu0  ;;  %v12215_v21 = vadd.f32 %v12203_v11, %v12195_v42  ;;  %v12219_v26 = vpop.f32.mrb[30].mxu1 }
 0x495   :  { %17627 = vst [vmem:[#allocation182_spill] sm:$0xff] %v12211_v59  ;;  %v4604_v50 = vmul.f32 %v12203_v11, %v12203_v11  ;;  %17628 = vst [vmem:[#allocation183_spill] sm:$0xff] %v12219_v26  ;;  %v4573_v24 = vmul.f32 %v12211_v59, %v12211_v59  ;;  %v12223_v40 = vpop.f32.mrb[71].mxu0  ;;  %v4605_v45 = vmul.f32 %v12219_v26, %v12219_v26  ;;  %v12227_v48 = vpop.f32.mrb[31].mxu1 }
 0x496   :  { %17629 = vst [vmem:[#allocation184_spill] sm:$0xff] %v12223_v40  ;;  %17630 = vst [vmem:[#allocation185_spill] sm:$0xff] %v12227_v48  ;;  %4802 = vadd.xlane.f32.xlu0 %v12007_v35  ;;  %4805 = vadd.xlane.f32.xlu1 %v12011_v49  ;;  %v12233_v42 = vadd.f32 %v12223_v40, %v12211_v59  ;;  %v4574_v11 = vmul.f32 %v12223_v40, %v12223_v40 }
 0x497   :  { %v12239_v53 = vadd.f32 %v12227_v48, %v12219_v26  ;;  %v4606_v63 = vmul.f32 %v12227_v48, %v12227_v48  ;;  %v12243_v0 = vadd.f32 %v4572_v41, %v4571_v61  ;;  %v12245_v47 = vadd.f32 %v4604_v50, %v4603_v3 }
 0x498   :  { %v12247_v35 = vadd.f32 %v4574_v11, %v4573_v24  ;;  %v9120_v11 = vld [vmem:[%s16660_s5 + $0x1f0] ss:$8 sps:$4 sm:$0xff]  }
 0x499   :  { %v12249_v49 = vadd.f32 %v4606_v63, %v4605_v45 }
 0x49a   :  { %4850 = vadd.xlane.f32.xlu0 %v12009_v6  ;;  %4853 = vadd.xlane.f32.xlu1 %v12013_v55  ;;  %v12253_v40 = vpop.f32.mrb[32].mxu1  ;;  %v9118_v6 = vld [vmem:[%s16660_s5 + $0x1f4] ss:$8 sps:$4 sm:$0xff]  }
 0x49b   :  { %17631 = vst [vmem:[#allocation186_spill] sm:$0xff] %v12253_v40  ;;  %v4607_v26 = vmul.f32 %v12253_v40, %v12253_v40  ;;  %v12257_v59 = vpop.f32.mrb[33].mxu1  ;;  %8670 = vmatprep.mubr.msk.bf16.mxu1 %vm3249_vm1, %v9118_v6 }
 0x49c   :  { %17632 = vst [vmem:[#allocation187_spill] sm:$0xff] %v12257_v59  ;;  %v12261_v61 = vadd.f32 %v12257_v59, %v12253_v40  ;;  %v4608_v3 = vmul.f32 %v12257_v59, %v12257_v59  ;;  %v12265_v63 = vpop.f32.mrb[34].mxu1  ;;  %3773 = vmatmul.mubr.bf16.gmra.mrb[92].mxu1 %v9120_v11 }
 0x49d   :  { %17633 = vst [vmem:[#allocation188_spill] sm:$0xff] %v12265_v63  ;;  %v4609_v55 = vmul.f32 %v12265_v63, %v12265_v63  ;;  %v12272_v45 = vpop.f32.mrb[35].mxu1 }
 0x49e   :  { %17634 = vst [vmem:[#allocation189_spill] sm:$0xff] %v12272_v45  ;;  %4088 = vadd.xlane.f32.xlu0 %v12029_v37  ;;  %4091 = vadd.xlane.f32.xlu1 %v12054_v57  ;;  %v12281_v41 = vadd.f32 %v12272_v45, %v12265_v63  ;;  %v4610_v50 = vmul.f32 %v12272_v45, %v12272_v45 }
 0x49f   :  { %v12285_v24 = vadd.f32 %v4608_v3, %v4607_v26 }
 0x4a0   :  { %v12288_v59 = vadd.f32 %v4610_v50, %v4609_v55 }
 0x4a2   :  { %4136 = vadd.xlane.f32.xlu0 %v12037_v56  ;;  %4139 = vadd.xlane.f32.xlu1 %v12060_v8  ;;  %v12292_v37 = vpop.f32.mrb[36].mxu1 }
 0x4a3   :  { %17635 = vst [vmem:[#allocation190_spill] sm:$0xff] %v12292_v37  ;;  %v4611_v57 = vmul.f32 %v12292_v37, %v12292_v37  ;;  %v12296_v40 = vpop.f32.mrb[37].mxu1 }
 0x4a4   :  { %17636 = vst [vmem:[#allocation191_spill] sm:$0xff] %v12296_v40  ;;  %v12300_v26 = vadd.f32 %v12296_v40, %v12292_v37  ;;  %v4612_v3 = vmul.f32 %v12296_v40, %v12296_v40  ;;  %v12304_v6 = vpop.f32.mrb[38].mxu1 }
 0x4a5   :  { %17637 = vst [vmem:[#allocation192_spill] sm:$0xff] %v12304_v6  ;;  %v4613_v56 = vmul.f32 %v12304_v6, %v12304_v6  ;;  %v12308_v8 = vpop.f32.mrb[39].mxu1 }
 0x4a6   :  { %17638 = vst [vmem:[#allocation193_spill] sm:$0xff] %v12308_v8  ;;  %4808 = vadd.xlane.f32.xlu0 %v12064_v58  ;;  %4811 = vadd.xlane.f32.xlu1 %v12068_v9  ;;  %v12314_v55 = vadd.f32 %v12308_v8, %v12304_v6  ;;  %v4614_v11 = vmul.f32 %v12308_v8, %v12308_v8 }
 0x4a7   :  { %v12318_v50 = vadd.f32 %v4612_v3, %v4611_v57 }
 0x4a8   :  { %v12320_v40 = vadd.f32 %v4614_v11, %v4613_v56 }
 0x4aa   :  { %4856 = vadd.xlane.f32.xlu0 %v12066_v20  ;;  %4859 = vadd.xlane.f32.xlu1 %v12070_v22  ;;  %v12324_v37 = vpop.f32.mrb[40].mxu1 }
 0x4ab   :  { %17639 = vst [vmem:[#allocation194_spill] sm:$0xff] %v12324_v37  ;;  %v4615_v58 = vmul.f32 %v12324_v37, %v12324_v37  ;;  %v12328_v9 = vpop.f32.mrb[41].mxu1 }
 0x4ac   :  { %17640 = vst [vmem:[#allocation195_spill] sm:$0xff] %v12328_v9  ;;  %v12332_v6 = vadd.f32 %v12328_v9, %v12324_v37  ;;  %v4616_v57 = vmul.f32 %v12328_v9, %v12328_v9  ;;  %v12336_v3 = vpop.f32.mrb[42].mxu1 }
 0x4ad   :  { %17641 = vst [vmem:[#allocation196_spill] sm:$0xff] %v12336_v3  ;;  %v4617_v20 = vmul.f32 %v12336_v3, %v12336_v3  ;;  %v12340_v22 = vpop.f32.mrb[43].mxu1 }
 0x4ae   :  { %17642 = vst [vmem:[#allocation197_spill] sm:$0xff] %v12340_v22  ;;  %4094 = vadd.xlane.f32.xlu0 %v12087_v28  ;;  %4097 = vadd.xlane.f32.xlu1 %v12113_v27  ;;  %v12346_v56 = vadd.f32 %v12340_v22, %v12336_v3  ;;  %v4618_v11 = vmul.f32 %v12340_v22, %v12340_v22 }
 0x4af   :  { %v12350_v37 = vadd.f32 %v4616_v57, %v4615_v58 }
 0x4b0   :  { %v12352_v9 = vadd.f32 %v4618_v11, %v4617_v20 }
 0x4b2   :  { %4142 = vadd.xlane.f32.xlu0 %v12095_v34  ;;  %4145 = vadd.xlane.f32.xlu1 %v12119_v36  ;;  %v12356_v8 = vpop.f32.mrb[44].mxu1 }
 0x4b3   :  { %17643 = vst [vmem:[#allocation198_spill] sm:$0xff] %v12356_v8  ;;  %v4619_v27 = vmul.f32 %v12356_v8, %v12356_v8  ;;  %v12360_v28 = vpop.f32.mrb[45].mxu1 }
 0x4b4   :  { %17644 = vst [vmem:[#allocation199_spill] sm:$0xff] %v12360_v28  ;;  %v12364_v3 = vadd.f32 %v12360_v28, %v12356_v8  ;;  %v4620_v58 = vmul.f32 %v12360_v28, %v12360_v28  ;;  %v12368_v57 = vpop.f32.mrb[46].mxu1 }
 0x4b5   :  { %17645 = vst [vmem:[#allocation200_spill] sm:$0xff] %v12368_v57  ;;  %v4621_v34 = vmul.f32 %v12368_v57, %v12368_v57  ;;  %v12372_v36 = vpop.f32.mrb[47].mxu1 }
 0x4b6   :  { %17646 = vst [vmem:[#allocation201_spill] sm:$0xff] %v12372_v36  ;;  %4814 = vadd.xlane.f32.xlu0 %v12123_v25  ;;  %4817 = vadd.xlane.f32.xlu1 %v12127_v54  ;;  %v12378_v20 = vadd.f32 %v12372_v36, %v12368_v57  ;;  %v4622_v11 = vmul.f32 %v12372_v36, %v12372_v36 }
 0x4b7   :  { %v12382_v8 = vadd.f32 %v4620_v58, %v4619_v27 }
 0x4b8   :  { %v12384_v28 = vadd.f32 %v4622_v11, %v4621_v34 }
 0x4ba   :  { %4862 = vadd.xlane.f32.xlu0 %v12125_v62  ;;  %4865 = vadd.xlane.f32.xlu1 %v12129_v10  ;;  %v12388_v22 = vpop.f32.mrb[48].mxu1 }
 0x4bb   :  { %17647 = vst [vmem:[#allocation202_spill] sm:$0xff] %v12388_v22  ;;  %v4623_v25 = vmul.f32 %v12388_v22, %v12388_v22  ;;  %v12392_v54 = vpop.f32.mrb[49].mxu1 }
 0x4bc   :  { %17648 = vst [vmem:[#allocation203_spill] sm:$0xff] %v12392_v54  ;;  %v12396_v57 = vadd.f32 %v12392_v54, %v12388_v22  ;;  %v4624_v27 = vmul.f32 %v12392_v54, %v12392_v54  ;;  %v12400_v58 = vpop.f32.mrb[50].mxu1 }
 0x4bd   :  { %17649 = vst [vmem:[#allocation204_spill] sm:$0xff] %v12400_v58  ;;  %v4625_v62 = vmul.f32 %v12400_v58, %v12400_v58  ;;  %v12404_v10 = vpop.f32.mrb[51].mxu1 }
 0x4be   :  { %17650 = vst [vmem:[#allocation205_spill] sm:$0xff] %v12404_v10  ;;  %4100 = vadd.xlane.f32.xlu0 %v12147_v23  ;;  %4103 = vadd.xlane.f32.xlu1 %v12173_v31  ;;  %v12410_v34 = vadd.f32 %v12404_v10, %v12400_v58  ;;  %v4626_v11 = vmul.f32 %v12404_v10, %v12404_v10 }
 0x4bf   :  { %v12414_v22 = vadd.f32 %v4624_v27, %v4623_v25 }
 0x4c0   :  { %v12416_v54 = vadd.f32 %v4626_v11, %v4625_v62 }
 0x4c2   :  { %4148 = vadd.xlane.f32.xlu0 %v12155_v33  ;;  %4151 = vadd.xlane.f32.xlu1 %v12179_v2  ;;  %v12420_v36 = vpop.f32.mrb[52].mxu1 }
 0x4c3   :  { %17651 = vst [vmem:[#allocation206_spill] sm:$0xff] %v12420_v36  ;;  %v4627_v31 = vmul.f32 %v12420_v36, %v12420_v36  ;;  %v12424_v23 = vpop.f32.mrb[53].mxu1 }
 0x4c4   :  { %17652 = vst [vmem:[#allocation207_spill] sm:$0xff] %v12424_v23  ;;  %v12428_v58 = vadd.f32 %v12424_v23, %v12420_v36  ;;  %v4628_v25 = vmul.f32 %v12424_v23, %v12424_v23  ;;  %v12432_v27 = vpop.f32.mrb[54].mxu1 }
 0x4c5   :  { %17653 = vst [vmem:[#allocation208_spill] sm:$0xff] %v12432_v27  ;;  %v4629_v33 = vmul.f32 %v12432_v27, %v12432_v27  ;;  %v12436_v2 = vpop.f32.mrb[55].mxu1 }
 0x4c6   :  { %17654 = vst [vmem:[#allocation209_spill] sm:$0xff] %v12436_v2  ;;  %4820 = vadd.xlane.f32.xlu0 %v12183_v32  ;;  %4823 = vadd.xlane.f32.xlu1 %v12187_v52  ;;  %v12442_v62 = vadd.f32 %v12436_v2, %v12432_v27  ;;  %v4630_v11 = vmul.f32 %v12436_v2, %v12436_v2 }
 0x4c7   :  { %v12446_v36 = vadd.f32 %v4628_v25, %v4627_v31 }
 0x4c8   :  { %v12448_v23 = vadd.f32 %v4630_v11, %v4629_v33 }
 0x4ca   :  { %4868 = vadd.xlane.f32.xlu0 %v12185_v7  ;;  %4871 = vadd.xlane.f32.xlu1 %v12189_v30  ;;  %v12452_v10 = vpop.f32.mrb[56].mxu1 }
 0x4cb   :  { %17655 = vst [vmem:[#allocation210_spill] sm:$0xff] %v12452_v10  ;;  %v4631_v32 = vmul.f32 %v12452_v10, %v12452_v10  ;;  %v12456_v52 = vpop.f32.mrb[57].mxu1 }
 0x4cc   :  { %17656 = vst [vmem:[#allocation211_spill] sm:$0xff] %v12456_v52  ;;  %v12460_v27 = vadd.f32 %v12456_v52, %v12452_v10  ;;  %v4632_v31 = vmul.f32 %v12456_v52, %v12456_v52  ;;  %v12464_v25 = vpop.f32.mrb[58].mxu1 }
 0x4cd   :  { %17657 = vst [vmem:[#allocation212_spill] sm:$0xff] %v12464_v25  ;;  %v4633_v7 = vmul.f32 %v12464_v25, %v12464_v25  ;;  %v12468_v30 = vpop.f32.mrb[59].mxu1 }
 0x4ce   :  { %17658 = vst [vmem:[#allocation213_spill] sm:$0xff] %v12468_v30  ;;  %4106 = vadd.xlane.f32.xlu0 %v12207_v46  ;;  %4109 = vadd.xlane.f32.xlu1 %v12233_v42  ;;  %v12474_v33 = vadd.f32 %v12468_v30, %v12464_v25  ;;  %v4634_v11 = vmul.f32 %v12468_v30, %v12468_v30  ;;  %v9121_v30 = vld [vmem:[%s16660_s5 + $0x204] ss:$8 sps:$4 sm:$0xff]  }
 0x4cf   :  { %v12478_v10 = vadd.f32 %v4632_v31, %v4631_v32  ;;  %8671 = vmatprep.mubr.msk.bf16.mxu1 %vm3249_vm1, %v9121_v30 }
 0x4d0   :  { %v12480_v52 = vadd.f32 %v4634_v11, %v4633_v7 }
 0x4d2   :  { %4154 = vadd.xlane.f32.xlu0 %v12215_v21  ;;  %4157 = vadd.xlane.f32.xlu1 %v12239_v53  ;;  %v12484_v2 = vpop.f32.mrb[60].mxu1 }
 0x4d3   :  { %17659 = vst [vmem:[#allocation214_spill] sm:$0xff] %v12484_v2  ;;  %v4635_v42 = vmul.f32 %v12484_v2, %v12484_v2  ;;  %v12488_v46 = vpop.f32.mrb[61].mxu1 }
 0x4d4   :  { %17660 = vst [vmem:[#allocation215_spill] sm:$0xff] %v12488_v46  ;;  %v12492_v25 = vadd.f32 %v12488_v46, %v12484_v2  ;;  %v4636_v32 = vmul.f32 %v12488_v46, %v12488_v46  ;;  %v12496_v31 = vpop.f32.mrb[62].mxu1 }
 0x4d5   :  { %17661 = vst [vmem:[#allocation216_spill] sm:$0xff] %v12496_v31  ;;  %v4637_v21 = vmul.f32 %v12496_v31, %v12496_v31  ;;  %v12500_v53 = vpop.f32.mrb[63].mxu1 }
 0x4d6   :  { %17662 = vst [vmem:[#allocation217_spill] sm:$0xff] %v12500_v53  ;;  %4826 = vadd.xlane.f32.xlu0 %v12243_v0  ;;  %4829 = vadd.xlane.f32.xlu1 %v12247_v35  ;;  %v12506_v7 = vadd.f32 %v12500_v53, %v12496_v31  ;;  %v4638_v11 = vmul.f32 %v12500_v53, %v12500_v53  ;;  %v9123_v35 = vld [vmem:[%s16660_s5 + $0x200] ss:$8 sps:$4 sm:$0xff]  }
 0x4d7   :  { %v12510_v2 = vadd.f32 %v4636_v32, %v4635_v42  ;;  %3783 = vmatmul.mubr.bf16.gmra.mrb[96].mxu1 %v9123_v35 }
 0x4d8   :  { %v12512_v46 = vadd.f32 %v4638_v11, %v4637_v21 }
 0x4da   :  { %4874 = vadd.xlane.f32.xlu0 %v12245_v47  ;;  %4877 = vadd.xlane.f32.xlu1 %v12249_v49  ;;  %v12519_v0 = vpop.f32.mrb[64].mxu1 }
 0x4db   :  { %17663 = vst [vmem:[#allocation218_spill] sm:$0xff] %v12519_v0  ;;  %v4639_v42 = vmul.f32 %v12519_v0, %v12519_v0  ;;  %v12526_v32 = vpop.f32.mrb[65].mxu1 }
 0x4dc   :  { %17664 = vst [vmem:[#allocation219_spill] sm:$0xff] %v12526_v32  ;;  %v12531_v21 = vadd.f32 %v12526_v32, %v12519_v0  ;;  %v4640_v47 = vmul.f32 %v12526_v32, %v12526_v32  ;;  %v12535_v49 = vpop.f32.mrb[66].mxu1 }
 0x4dd   :  { %17665 = vst [vmem:[#allocation220_spill] sm:$0xff] %v12535_v49  ;;  %v4641_v11 = vmul.f32 %v12535_v49, %v12535_v49  ;;  %v12539_v53 = vpop.f32.mrb[67].mxu1 }
 0x4de   :  { %17666 = vst [vmem:[#allocation221_spill] sm:$0xff] %v12539_v53  ;;  %4160 = vadd.xlane.f32.xlu0 %v12261_v61  ;;  %4163 = vadd.xlane.f32.xlu1 %v12281_v41  ;;  %v12545_v30 = vadd.f32 %v12539_v53, %v12535_v49  ;;  %v4642_v0 = vmul.f32 %v12539_v53, %v12539_v53 }
 0x4df   :  { %v12549_v32 = vadd.f32 %v4640_v47, %v4639_v42 }
 0x4e0   :  { %v12551_v31 = vadd.f32 %v4642_v0, %v4641_v11 }
 0x4e2   :  { %4880 = vadd.xlane.f32.xlu0 %v12285_v24  ;;  %4883 = vadd.xlane.f32.xlu1 %v12288_v59  ;;  %v12555_v35 = vpop.f32.mrb[68].mxu1 }
 0x4e3   :  { %17667 = vst [vmem:[#allocation222_spill] sm:$0xff] %v12555_v35  ;;  %v4643_v61 = vmul.f32 %v12555_v35, %v12555_v35  ;;  %v12559_v41 = vpop.f32.mrb[69].mxu1 }
 0x4e4   :  { %17668 = vst [vmem:[#allocation223_spill] sm:$0xff] %v12559_v41  ;;  %v12563_v49 = vadd.f32 %v12559_v41, %v12555_v35  ;;  %v4644_v42 = vmul.f32 %v12559_v41, %v12559_v41  ;;  %v12567_v0 = vpop.f32.mrb[70].mxu1 }
 0x4e5   :  { %17669 = vst [vmem:[#allocation224_spill] sm:$0xff] %v12567_v0  ;;  %v4645_v24 = vmul.f32 %v12567_v0, %v12567_v0  ;;  %v12571_v59 = vpop.f32.mrb[71].mxu1 }
 0x4e6   :  { %17670 = vst [vmem:[#allocation225_spill] sm:$0xff] %v12571_v59  ;;  %4166 = vadd.xlane.f32.xlu0 %v12300_v26  ;;  %4169 = vadd.xlane.f32.xlu1 %v12314_v55  ;;  %v12577_v47 = vadd.f32 %v12571_v59, %v12567_v0  ;;  %v4646_v11 = vmul.f32 %v12571_v59, %v12571_v59 }
 0x4e7   :  { %v12581_v35 = vadd.f32 %v4644_v42, %v4643_v61 }
 0x4e8   :  { %v12583_v41 = vadd.f32 %v4646_v11, %v4645_v24 }
 0x4ea   :  { %17671 = vst [vmem:[#allocation226_spill] sm:$0xff] %v12583_v41  ;;  %4886 = vadd.xlane.f32.xlu0 %v12318_v50  ;;  %4889 = vadd.xlane.f32.xlu1 %v12320_v40  ;;  %v12587_v53 = vpop.f32.mrb[72].mxu1 }
 0x4eb   :  { %17672 = vst [vmem:[#allocation227_spill] sm:$0xff] %v12587_v53  ;;  %v4113_v26 = vpop.xlane.xlu0 %4112  ;;  %v4065_v45 = vpop.xlane.xlu1 %4064  ;;  %v4647_v55 = vmul.f32 %v12587_v53, %v12587_v53 }
 0x4ec   :  { %v12591_v0 = vmul.f32 0.0051020407, %v4113_v26  ;;  %v12593_v63 = vmul.f32 0.0051020407, %v4065_v45  ;;  %v12595_v59 = vpop.f32.mrb[73].mxu1 }
 0x4ed   :  { %17675 = vst [vmem:[#allocation230_spill] sm:$0xff] %v12595_v59  ;;  %v12599_v61 = vadd.f32 %v12595_v59, %v12587_v53  ;;  %v4648_v40 = vmul.f32 %v12595_v59, %v12595_v59  ;;  %v12603_v50 = vpop.f32.mrb[74].mxu1 }
 0x4ee   :  { %17673 = vst [vmem:[#allocation228_spill] sm:$0xff] %v12591_v0  ;;  %17674 = vst [vmem:[#allocation229_spill] sm:$0xff] %v12593_v63  ;;  %4172 = vadd.xlane.f32.xlu0 %v12332_v6  ;;  %4175 = vadd.xlane.f32.xlu1 %v12346_v56  ;;  %v4649_v42 = vmul.f32 %v12603_v50, %v12603_v50  ;;  %v12609_v45 = vpop.f32.mrb[75].mxu1  ;;  %v12695_v60 = vmul.f32 %v12591_v0, %v12591_v0 }
 0x4ef   :  { %17676 = vst [vmem:[#allocation231_spill] sm:$0xff] %v12599_v61  ;;  %17677 = vst [vmem:[#allocation232_spill] sm:$0xff] %v12603_v50  ;;  %v4116_v24 = vpop.xlane.xlu1 %4115  ;;  %v4068_v11 = vpop.xlane.xlu0 %4067  ;;  %v12613_v26 = vadd.f32 %v12609_v45, %v12603_v50  ;;  %v4650_v59 = vmul.f32 %v12609_v45, %v12609_v45  ;;  %v12617_v53 = vadd.f32 %v4648_v40, %v4647_v55 }
 0x4f0   :  { %17678 = vst [vmem:[#allocation233_spill] sm:$0xff] %v12609_v45  ;;  %v12621_v56 = vmul.f32 0.0051020407, %v4116_v24  ;;  %v12623_v48 = vmul.f32 0.0051020407, %v4068_v11  ;;  %v12655_v40 = vmul.f32 %v12593_v63, %v12593_v63 }
 0x4f1   :  { %v12629_v50 = vadd.f32 %v4650_v59, %v4649_v42 }
 0x4f2   :  { %17679 = vst [vmem:[#allocation234_spill] sm:$0xff] %v12621_v56  ;;  %17680 = vst [vmem:[#allocation235_spill] sm:$0xff] %v12623_v48  ;;  %4892 = vadd.xlane.f32.xlu0 %v12350_v37  ;;  %4895 = vadd.xlane.f32.xlu1 %v12352_v9  ;;  %v12635_v55 = vpop.f32.mrb[76].mxu1  ;;  %v12651_v45 = vmul.f32 %v12623_v48, %v12623_v48 }
 0x4f3   :  { %17681 = vst [vmem:[#allocation236_spill] sm:$0xff] %v12635_v55  ;;  %v4788_v24 = vpop.xlane.xlu1 %4787  ;;  %v4785_v11 = vpop.xlane.xlu0 %4784  ;;  %v4651_v61 = vmul.f32 %v12635_v55, %v12635_v55 }
 0x4f4   :  { %v12647_v9 = vmul.f32 0.0051020407, %v4788_v24  ;;  %v12657_v41 = vmul.f32 0.0051020407, %v4785_v11  ;;  %v12659_v6 = vpop.f32.mrb[77].mxu1 }
 0x4f5   :  { %17682 = vst [vmem:[#allocation237_spill] sm:$0xff] %v12659_v6  ;;  %v12663_v42 = vadd.f32 %v12659_v6, %v12635_v55  ;;  %v4652_v24 = vmul.f32 %v12659_v6, %v12659_v6  ;;  %v12667_v37 = vpop.f32.mrb[78].mxu1  ;;  %v9135_v55 = vld [vmem:[%s16660_s5 + $0x240] ss:$8 sps:$4 sm:$0xff]  }
 0x4f6   :  { %17683 = vst [vmem:[#allocation238_spill] sm:$0xff] %v12667_v37  ;;  %4178 = vadd.xlane.f32.xlu0 %v12364_v3  ;;  %4181 = vadd.xlane.f32.xlu1 %v12378_v20  ;;  %v4653_v11 = vmul.f32 %v12667_v37, %v12667_v37  ;;  %v12677_v48 = vpop.f32.mrb[79].mxu1  ;;  %v12689_v3 = vmul.f32 %v12621_v56, %v12621_v56 }
 0x4f7   :  { %17684 = vst [vmem:[#allocation239_spill] sm:$0xff] %v12677_v48  ;;  %v4836_v14 = vpop.xlane.xlu1 %4835  ;;  %v4833_v17 = vpop.xlane.xlu0 %4832  ;;  %v12681_v12 = vadd.f32 %v12677_v48, %v12667_v37  ;;  %v4654_v59 = vmul.f32 %v12677_v48, %v12677_v48  ;;  %v12685_v43 = vadd.f32 %v4652_v24, %v4651_v61 }
 0x4f8   :  { %v12691_v20 = vmul.f32 0.0051020407, %v4836_v14  ;;  %v12697_v63 = vmul.f32 0.0051020407, %v4833_v17 }
 0x4f9   :  { %v12699_v39 = vadd.f32 %v4654_v59, %v4653_v11 }
 0x4fa   :  { %4898 = vadd.xlane.f32.xlu0 %v12382_v8  ;;  %4901 = vadd.xlane.f32.xlu1 %v12384_v28  ;;  %v12705_v61 = vpop.f32.mrb[80].mxu1 }
 0x4fb   :  { %17685 = vst [vmem:[#allocation240_spill] sm:$0xff] %v12705_v61  ;;  %v4071_v24 = vpop.xlane.xlu0 %4070  ;;  %v4074_v56 = vpop.xlane.xlu1 %4073  ;;  %v4655_v59 = vmul.f32 %v12705_v61, %v12705_v61 }
 0x4fc   :  { %v12709_v0 = vmul.f32 0.0051020407, %v4071_v24  ;;  %v12711_v17 = vmul.f32 0.0051020407, %v4074_v56  ;;  %v12715_v11 = vpop.f32.mrb[81].mxu1 }
 0x4fd   :  { %17688 = vst [vmem:[#allocation243_spill] sm:$0xff] %v12715_v11  ;;  %v12721_v8 = vadd.f32 %v12715_v11, %v12705_v61  ;;  %v12723_v28 = vpop.f32.mrb[82].mxu1  ;;  %v4656_v56 = vmul.f32 %v12715_v11, %v12715_v11 }
 0x4fe   :  { %17686 = vst [vmem:[#allocation241_spill] sm:$0xff] %v12709_v0  ;;  %17687 = vst [vmem:[#allocation242_spill] sm:$0xff] %v12711_v17  ;;  %4184 = vadd.xlane.f32.xlu0 %v12396_v57  ;;  %4187 = vadd.xlane.f32.xlu1 %v12410_v34  ;;  %v4657_v14 = vmul.f32 %v12723_v28, %v12723_v28  ;;  %v12735_v48 = vpop.f32.mrb[83].mxu1  ;;  %v12773_v13 = vmul.f32 %v12711_v17, %v12711_v17 }
 0x4ff   :  { %17689 = vst [vmem:[#allocation244_spill] sm:$0xff] %v12723_v28  ;;  %v4119_v38 = vpop.xlane.xlu0 %4118  ;;  %v4122_v24 = vpop.xlane.xlu1 %4121  ;;  %17692 = vst [vmem:[#allocation247_spill] sm:$0xff] %v12735_v48  ;;  %v12743_v11 = vadd.f32 %v12735_v48, %v12723_v28  ;;  %v4658_v6 = vmul.f32 %v12735_v48, %v12735_v48  ;;  %v12747_v51 = vadd.f32 %v4656_v56, %v4655_v59  ;;  %v17896_v28 = vld [vmem:[#allocation6_spill] sm:$0xff] }
 0x500   :  { %v12731_v57 = vmul.f32 0.0051020407, %v4119_v38  ;;  %v12733_v34 = vmul.f32 0.0051020407, %v4122_v24  ;;  %v12755_v24 = vmul.f32 %v12709_v0, %v12709_v0 }
 0x501   :  { %v12761_v59 = vadd.f32 %v4658_v6, %v4657_v14 }
 0x502   :  { %17690 = vst [vmem:[#allocation245_spill] sm:$0xff] %v12731_v57  ;;  %17691 = vst [vmem:[#allocation246_spill] sm:$0xff] %v12733_v34  ;;  %4904 = vadd.xlane.f32.xlu0 %v12414_v22  ;;  %4907 = vadd.xlane.f32.xlu1 %v12416_v54  ;;  %v12757_v37 = vpop.f32.mrb[84].mxu1  ;;  %v12797_v29 = vmul.f32 %v12731_v57, %v12731_v57 }
 0x503   :  { %17693 = vst [vmem:[#allocation248_spill] sm:$0xff] %v12757_v37  ;;  %v4791_v18 = vpop.xlane.xlu0 %4790  ;;  %v4794_v44 = vpop.xlane.xlu1 %4793  ;;  %v4659_v56 = vmul.f32 %v12757_v37, %v12757_v37 }
 0x504   :  { %v12769_v38 = vmul.f32 0.0051020407, %v4791_v18  ;;  %v12775_v61 = vmul.f32 0.0051020407, %v4794_v44  ;;  %v12777_v0 = vpop.f32.mrb[85].mxu1  ;;  %v12803_v18 = vmul.f32 %v12733_v34, %v12733_v34 }
 0x505   :  { %17694 = vst [vmem:[#allocation249_spill] sm:$0xff] %v12777_v0  ;;  %v12783_v14 = vadd.f32 %v12777_v0, %v12757_v37  ;;  %v4660_v54 = vmul.f32 %v12777_v0, %v12777_v0 }
 0x506   :  { %4190 = vadd.xlane.f32.xlu0 %v12428_v58  ;;  %4193 = vadd.xlane.f32.xlu1 %v12442_v62  ;;  %v9126_v62 = vld [vmem:[%s16660_s5 + $0x210] ss:$8 sps:$4 sm:$0xff]  }
 0x507   :  { %v4839_v44 = vpop.xlane.xlu0 %4838  ;;  %v4842_v15 = vpop.xlane.xlu1 %4841  ;;  %v12793_v6 = vadd.f32 %v4660_v54, %v4659_v56 }
 0x508   :  { %v12799_v16 = vmul.f32 0.0051020407, %v4839_v44  ;;  %v12805_v19 = vmul.f32 0.0051020407, %v4842_v15 }
 0x50a   :  { %4910 = vadd.xlane.f32.xlu0 %v12446_v36  ;;  %4913 = vadd.xlane.f32.xlu1 %v12448_v23 }
 0x50b   :  { %v4077_v56 = vpop.xlane.xlu0 %4076  ;;  %v4080_v54 = vpop.xlane.xlu1 %4079 }
 0x50c   :  { %v12813_v44 = vmul.f32 0.0051020407, %v4077_v56  ;;  %v12815_v22 = vmul.f32 0.0051020407, %v4080_v54 }
 0x50e   :  { %4196 = vadd.xlane.f32.xlu0 %v12460_v27  ;;  %4199 = vadd.xlane.f32.xlu1 %v12474_v33 }
 0x50f   :  { %v4125_v58 = vpop.xlane.xlu0 %4124  ;;  %v4128_v36 = vpop.xlane.xlu1 %4127 }
 0x510   :  { %v12827_v54 = vmul.f32 0.0051020407, %v4125_v58  ;;  %v12829_v17 = vmul.f32 0.0051020407, %v4128_v36 }
 0x512   :  { %4916 = vadd.xlane.f32.xlu0 %v12478_v10  ;;  %4919 = vadd.xlane.f32.xlu1 %v12480_v52  ;;  %v9124_v10 = vld [vmem:[%s16660_s5 + $0x214] ss:$8 sps:$4 sm:$0xff]  }
 0x513   :  { %v12835_v15 = vpop.xlane.xlu0 %4796  ;;  %v12837_v23 = vpop.xlane.xlu1 %4799  ;;  %8672 = vmatprep.mubr.msk.bf16.mxu1 %vm3249_vm1, %v9124_v10 }
 0x514   :  { %3793 = vmatmul.mubr.bf16.gmra.mrb[100].mxu1 %v9126_v62 }
 0x516   :  { %4202 = vadd.xlane.f32.xlu0 %v12492_v25  ;;  %4205 = vadd.xlane.f32.xlu1 %v12506_v7 }
 0x517   :  { %v12850_v52 = vpop.xlane.xlu0 %4844  ;;  %v12852_v33 = vpop.xlane.xlu1 %4847 }
 0x51a   :  { %4922 = vadd.xlane.f32.xlu0 %v12510_v2  ;;  %4925 = vadd.xlane.f32.xlu1 %v12512_v46 }
 0x51b   :  { %v4083_v25 = vpop.xlane.xlu0 %4082  ;;  %v4086_v7 = vpop.xlane.xlu1 %4085 }
 0x51c   :  { %v12860_v56 = vmul.f32 0.0051020407, %v4083_v25  ;;  %v12862_v58 = vmul.f32 0.0051020407, %v4086_v7  ;;  %v17715_v25 = vld [vmem:[#allocation226_spill] sm:$0xff] }
 0x51e   :  { %17701 = vst [vmem:[#allocation250_spill] sm:$0xff] %v12860_v56  ;;  %4208 = vadd.xlane.f32.xlu0 %v12531_v21  ;;  %4211 = vadd.xlane.f32.xlu1 %v12545_v30  ;;  %v12880_v21 = vpop.f32.mrb[86].mxu1  ;;  %v17730_v56 = vsub.f32 %v12697_v63, %v12695_v60 }
 0x51f   :  { %v4131_v57 = vpop.xlane.xlu0 %4130  ;;  %v4134_v10 = vpop.xlane.xlu1 %4133  ;;  %17707 = vst [vmem:[#allocation252_spill] sm:$0xff] %v12880_v21 }
 0x520   :  { %v12874_v7 = vmul.f32 0.0051020407, %v4131_v57  ;;  %v12876_v5 = vmul.f32 0.0051020407, %v4134_v10  ;;  %v12896_v46 = vpop.f32.mrb[87].mxu1 }
 0x521   :  { %17713 = vst [vmem:[#allocation254_spill] sm:$0xff] %v12896_v46  ;;  %v12900_v34 = vadd.f32 %v12896_v46, %v12880_v21  ;;  %v4662_v30 = vmul.f32 %v12896_v46, %v12896_v46  ;;  %v17717_v46 = vld [vmem:[#allocation231_spill] sm:$0xff] }
 0x522   :  { %17706 = vst [vmem:[#allocation251_spill] sm:$0xff] %v12874_v7  ;;  %4928 = vadd.xlane.f32.xlu0 %v12549_v32  ;;  %4931 = vadd.xlane.f32.xlu1 %v12551_v31  ;;  %v4661_v31 = vmul.f32 %v12880_v21, %v12880_v21 }
 0x523   :  { %v12884_v2 = vpop.xlane.xlu0 %4802  ;;  %v12886_v62 = vpop.xlane.xlu1 %4805 }
 0x524   :  { %17709 = vst [vmem:[#allocation253_spill] sm:$0xff] %v12884_v2  ;;  %v12910_v32 = vadd.f32 %v4662_v30, %v4661_v31  ;;  %v12946_v31 = vpop.f32.mrb[88].mxu1 }
 0x525   :  { %17727 = vst [vmem:[#allocation256_spill] sm:$0xff] %v12946_v31 }
 0x526   :  { %4214 = vadd.xlane.f32.xlu0 %v12563_v49  ;;  %4217 = vadd.xlane.f32.xlu1 %v12577_v47 }
 0x527   :  { %v12906_v10 = vpop.xlane.xlu0 %4850  ;;  %v12908_v1 = vpop.xlane.xlu1 %4853 }
 0x528   :  { %17714 = vst [vmem:[#allocation255_spill] sm:$0xff] %v12906_v10  ;;  %v5639_v10 = vadd.f32 0.001, %v17730_v56  ;;  %v5519_v56 = vld [vmem:[%s16661_s6 + $0x80] sm:$0xff] }
 0x52a   :  { %4934 = vadd.xlane.f32.xlu0 %v12581_v35  ;;  %4937 = vadd.xlane.f32.xlu1 %v17715_v25  ;;  %v4663_v25 = vmul.f32 %v12946_v31, %v12946_v31  ;;  %9245 = vrsqrt.f32 %v5639_v10 }
 0x52b   :  { %v4089_v57 = vpop.xlane.xlu0 %4088  ;;  %v4092_v27 = vpop.xlane.xlu1 %4091 }
 0x52c   :  { %v12914_v36 = vmul.f32 0.0051020407, %v4089_v57  ;;  %v12916_v21 = vmul.f32 0.0051020407, %v4092_v27 }
 0x52e   :  { %17716 = vst [vmem:[#allocation226_spill] sm:$0xff] %v12914_v36  ;;  %4220 = vadd.xlane.f32.xlu0 %v17717_v46  ;;  %4223 = vadd.xlane.f32.xlu1 %v12613_v26 }
 0x52f   :  { %v4137_v7 = vpop.xlane.xlu0 %4136  ;;  %v4140_v30 = vpop.xlane.xlu1 %4139 }
 0x530   :  { %v12928_v27 = vmul.f32 0.0051020407, %v4137_v7  ;;  %v12930_v2 = vmul.f32 0.0051020407, %v4140_v30 }
 0x532   :  { %17722 = vst [vmem:[#allocation231_spill] sm:$0xff] %v12928_v27  ;;  %4940 = vadd.xlane.f32.xlu0 %v12617_v53  ;;  %4943 = vadd.xlane.f32.xlu1 %v12629_v50  ;;  %v12950_v53 = vpop.f32.mrb[89].mxu1 }
 0x533   :  { %v12936_v47 = vpop.xlane.xlu0 %4808  ;;  %v12938_v35 = vpop.xlane.xlu1 %4811  ;;  %17728 = vst [vmem:[#allocation257_spill] sm:$0xff] %v12950_v53  ;;  %v12960_v7 = vadd.f32 %v12950_v53, %v12946_v31  ;;  %v4664_v57 = vmul.f32 %v12950_v53, %v12950_v53 }
 0x534   :  { %v9246_v27 = vpop.eup %9245 }
 0x535   :  { %v12966_v30 = vadd.f32 %v4664_v57, %v4663_v25 }
 0x536   :  { %4226 = vadd.xlane.f32.xlu0 %v12663_v42  ;;  %4229 = vadd.xlane.f32.xlu1 %v12681_v12 }
 0x537   :  { %v12952_v50 = vpop.xlane.xlu0 %4856  ;;  %v12954_v46 = vpop.xlane.xlu1 %4859 }
 0x538   :  { %17729 = vst [vmem:[#allocation258_spill] sm:$0xff] %v12952_v50 }
 0x53a   :  { %4946 = vadd.xlane.f32.xlu0 %v12685_v43  ;;  %4949 = vadd.xlane.f32.xlu1 %v12699_v39  ;;  %v17745_v43 = vsub.f32 %v12691_v20, %v12689_v3 }
 0x53b   :  { %v4095_v12 = vpop.xlane.xlu0 %4094  ;;  %v4098_v42 = vpop.xlane.xlu1 %4097 }
 0x53c   :  { %v12971_v26 = vmul.f32 0.0051020407, %v4095_v12  ;;  %v12973_v49 = vmul.f32 0.0051020407, %v4098_v42  ;;  %v5640_v36 = vadd.f32 0.001, %v17745_v43 }
 0x53e   :  { %17731 = vst [vmem:[#allocation259_spill] sm:$0xff] %v12971_v26  ;;  %4232 = vadd.xlane.f32.xlu0 %v12721_v8  ;;  %4235 = vadd.xlane.f32.xlu1 %v12743_v11  ;;  %v5520_v26 = vld [vmem:[%s16661_s6 + $0x88] sm:$0xff] }
 0x53f   :  { %v4143_v39 = vpop.xlane.xlu0 %4142  ;;  %v4146_v50 = vpop.xlane.xlu1 %4145 }
 0x540   :  { %v12985_v12 = vmul.f32 0.0051020407, %v4143_v39  ;;  %v12987_v8 = vmul.f32 0.0051020407, %v4146_v50  ;;  %v17743_v50 = vsub.f32 %v12657_v41, %v12655_v40  ;;  %v5879_v40 = vmul.f32 %v9246_v27, %v5519_v56  ;;  %v9127_v27 = vld [vmem:[%s16660_s5 + $0x224] ss:$8 sps:$4 sm:$0xff]  }
 0x541   :  { %8673 = vmatprep.mubr.msk.bf16.mxu1 %vm3249_vm1, %v9127_v27 }
 0x542   :  { %17736 = vst [vmem:[#allocation260_spill] sm:$0xff] %v12985_v12  ;;  %17737 = vst [vmem:[#allocation261_spill] sm:$0xff] %v12987_v8  ;;  %4952 = vadd.xlane.f32.xlu0 %v12747_v51  ;;  %v5623_v51 = vadd.f32 0.001, %v17743_v50 }
 0x543   :  { %v12994_v57 = vpop.xlane.xlu0 %4814  ;;  %v12996_v25 = vpop.xlane.xlu1 %4817 }
 0x544   :  { %17740 = vst [vmem:[#allocation262_spill] sm:$0xff] %v12994_v57  ;;  %9247 = vrsqrt.f32 %v5623_v51  ;;  %v9129_v51 = vld [vmem:[%s16660_s5 + $0x220] ss:$8 sps:$4 sm:$0xff]  }
 0x545   :  { %9249 = vrsqrt.f32 %v5640_v36  ;;  %3803 = vmatmul.mubr.bf16.gmra.mrb[104].mxu1 %v9129_v51 }
 0x547   :  { %v13005_v63 = vpop.xlane.xlu0 %4862  ;;  %v13007_v42 = vpop.xlane.xlu1 %4865 }
 0x548   :  { %17744 = vst [vmem:[#allocation263_spill] sm:$0xff] %v13005_v63  ;;  %v5503_v63 = vld [vmem:[%s16661_s6] sm:$0xff] }
 0x54b   :  { %v4101_v60 = vpop.xlane.xlu0 %4100  ;;  %v4104_v39 = vpop.xlane.xlu1 %4103 }
 0x54c   :  { %v13015_v10 = vmul.f32 0.0051020407, %v4101_v60  ;;  %v13017_v41 = vmul.f32 0.0051020407, %v4104_v39 }
 0x54e   :  { %17746 = vst [vmem:[#allocation264_spill] sm:$0xff] %v13015_v10  ;;  %17747 = vst [vmem:[#allocation265_spill] sm:$0xff] %v13017_v41 }
 0x54f   :  { %v4149_v11 = vpop.xlane.xlu0 %4148  ;;  %v4152_v12 = vpop.xlane.xlu1 %4151  ;;  %6305 = vperm.xlu1 %8843, %v5879_v40  }
 0x550   :  { %v13027_v57 = vmul.f32 0.0051020407, %v4149_v11  ;;  %v13029_v39 = vmul.f32 0.0051020407, %v4152_v12  ;;  %v9248_v40 = vpop.eup %9247 }
 0x551   :  { %v5863_v43 = vmul.f32 %v9248_v40, %v5503_v63  ;;  %v9250_v56 = vpop.eup %9249 }
 0x552   :  { %17752 = vst [vmem:[#allocation266_spill] sm:$0xff] %v13027_v57  ;;  %17753 = vst [vmem:[#allocation267_spill] sm:$0xff] %v13029_v39  ;;  %v5880_v60 = vmul.f32 %v9250_v56, %v5520_v26 }
 0x553   :  { %v13035_v50 = vpop.xlane.xlu0 %4820  ;;  %v13037_v20 = vpop.xlane.xlu1 %4823 }
 0x554   :  { %17756 = vst [vmem:[#allocation268_spill] sm:$0xff] %v13035_v50  ;;  %17757 = vst [vmem:[#allocation269_spill] sm:$0xff] %v13037_v20 }
 0x557   :  { %v13053_v36 = vpop.xlane.xlu0 %4868  ;;  %v13055_v3 = vpop.xlane.xlu1 %4871 }
 0x558   :  { %17760 = vst [vmem:[#allocation270_spill] sm:$0xff] %v13053_v36  ;;  %17761 = vst [vmem:[#allocation271_spill] sm:$0xff] %v13055_v3  ;;  %6225 = vperm.xlu0 %8844, %v5863_v43  }
 0x55b   :  { %v4107_v12 = vpop.xlane.xlu0 %4106  ;;  %v4110_v11 = vpop.xlane.xlu1 %4109 }
 0x55c   :  { %v13060_v57 = vmul.f32 0.0051020407, %v4107_v12  ;;  %v13062_v10 = vmul.f32 0.0051020407, %v4110_v11  ;;  %6310 = vperm.xlu0 %8844, %v5880_v60   ;;  %v13076_v11 = vpop.f32.mrb[90].mxu1 }
 0x55d   :  { %17770 = vst [vmem:[#allocation276_spill] sm:$0xff] %v13076_v11  ;;  %v4665_v60 = vmul.f32 %v13076_v11, %v13076_v11  ;;  %v13080_v27 = vpop.f32.mrb[91].mxu1 }
 0x55e   :  { %17762 = vst [vmem:[#allocation272_spill] sm:$0xff] %v13060_v57  ;;  %17763 = vst [vmem:[#allocation273_spill] sm:$0xff] %v13062_v10  ;;  %v13084_v39 = vadd.f32 %v13080_v27, %v13076_v11  ;;  %v4666_v51 = vmul.f32 %v13080_v27, %v13080_v27 }
 0x55f   :  { %v4155_v40 = vpop.xlane.xlu0 %4154  ;;  %v4158_v36 = vpop.xlane.xlu1 %4157  ;;  %17771 = vst [vmem:[#allocation277_spill] sm:$0xff] %v13080_v27 }
 0x560   :  { %v13072_v56 = vmul.f32 0.0051020407, %v4155_v40  ;;  %v13074_v12 = vmul.f32 0.0051020407, %v4158_v36  ;;  %v13100_v20 = vadd.f32 %v4666_v51, %v4665_v60 }
 0x562   :  { %17768 = vst [vmem:[#allocation274_spill] sm:$0xff] %v13072_v56  ;;  %17769 = vst [vmem:[#allocation275_spill] sm:$0xff] %v13074_v12 }
 0x563   :  { %v13088_v3 = vpop.xlane.xlu0 %4826  ;;  %v13090_v40 = vpop.xlane.xlu1 %4829 }
 0x564   :  { %17772 = vst [vmem:[#allocation278_spill] sm:$0xff] %v13088_v3  ;;  %17773 = vst [vmem:[#allocation279_spill] sm:$0xff] %v13090_v40 }
 0x567   :  { %v13102_v11 = vpop.xlane.xlu0 %4874  ;;  %v13104_v27 = vpop.xlane.xlu1 %4877 }
 0x568   :  { %17778 = vst [vmem:[#allocation280_spill] sm:$0xff] %v13102_v11  ;;  %17779 = vst [vmem:[#allocation281_spill] sm:$0xff] %v13104_v27 }
 0x56b   :  { %v4161_v3 = vpop.xlane.xlu0 %4160  ;;  %v4164_v40 = vpop.xlane.xlu1 %4163 }
 0x56c   :  { %v13106_v8 = vmul.f32 0.0051020407, %v4161_v3  ;;  %v13108_v43 = vmul.f32 0.0051020407, %v4164_v40  ;;  %v17788_v3 = vsub.f32 %v12647_v9, %v12651_v45 }
 0x56e   :  { %17780 = vst [vmem:[#allocation282_spill] sm:$0xff] %v13106_v8  ;;  %17781 = vst [vmem:[#allocation283_spill] sm:$0xff] %v13108_v43  ;;  %v5624_v40 = vadd.f32 0.001, %v17788_v3 }
 0x56f   :  { %v13112_v36 = vpop.xlane.xlu0 %4880  ;;  %v13114_v57 = vpop.xlane.xlu1 %4883 }
 0x570   :  { %17783 = vst [vmem:[#allocation284_spill] sm:$0xff] %v13112_v36  ;;  %17784 = vst [vmem:[#allocation285_spill] sm:$0xff] %v13114_v57  ;;  %9251 = vrsqrt.f32 %v5624_v40  ;;  %v13130_v60 = vpop.f32.mrb[92].mxu1 }
 0x571   :  { %17789 = vst [vmem:[#allocation286_spill] sm:$0xff] %v13130_v60  ;;  %v4667_v10 = vmul.f32 %v13130_v60, %v13130_v60  ;;  %v13134_v41 = vpop.f32.mrb[93].mxu1 }
 0x572   :  { %17790 = vst [vmem:[#allocation287_spill] sm:$0xff] %v13134_v41  ;;  %v13142_v9 = vadd.f32 %v13134_v41, %v13130_v60 }
 0x573   :  { %v4167_v11 = vpop.xlane.xlu0 %4166  ;;  %4955 = vadd.xlane.f32.xlu1 %v12761_v59  ;;  %v4170_v26 = vpop.xlane.xlu1 %4169  ;;  %v4668_v59 = vmul.f32 %v13134_v41, %v13134_v41 }
 0x574   :  { %v13126_v50 = vmul.f32 0.0051020407, %v4167_v11  ;;  %v13128_v36 = vmul.f32 0.0051020407, %v4170_v26 }
 0x575   :  { %v13150_v63 = vadd.f32 %v4668_v59, %v4667_v10  ;;  %v17805_v59 = vsub.f32 %v12775_v61, %v12773_v13  ;;  %v9130_v13 = vld [vmem:[%s16660_s5 + $0x234] ss:$8 sps:$4 sm:$0xff]  }
 0x576   :  { %8674 = vmatprep.mubr.msk.bf16.mxu1 %vm3249_vm1, %v9130_v13 }
 0x577   :  { %v13136_v56 = vpop.xlane.xlu0 %4886  ;;  %v13138_v45 = vpop.xlane.xlu1 %4889  ;;  %v5626_v10 = vadd.f32 0.001, %v17805_v59  ;;  %v9132_v59 = vld [vmem:[%s16660_s5 + $0x230] ss:$8 sps:$4 sm:$0xff]  }
 0x578   :  { %17791 = vst [vmem:[#allocation288_spill] sm:$0xff] %v13136_v56  ;;  %17792 = vst [vmem:[#allocation289_spill] sm:$0xff] %v13138_v45  ;;  %3813 = vmatmul.mubr.bf16.gmra.mrb[108].mxu1 %v9132_v59 }
 0x579   :  { %9253 = vrsqrt.f32 %v5626_v10 }
 0x57a   :  { %v9252_v40 = vpop.eup %9251 }
 0x57b   :  { %4238 = vadd.xlane.f32.xlu0 %v12783_v14  ;;  %v4173_v43 = vpop.xlane.xlu0 %4172  ;;  %v4176_v57 = vpop.xlane.xlu1 %4175  ;;  %v5504_v14 = vld [vmem:[%s16661_s6 + $0x8] sm:$0xff] }
 0x57c   :  { %v13157_v12 = vmul.f32 0.0051020407, %v4173_v43  ;;  %v13159_v27 = vmul.f32 0.0051020407, %v4176_v57  ;;  %v5864_v11 = vmul.f32 %v9252_v40, %v5504_v14 }
 0x57e   :  { %17797 = vst [vmem:[#allocation290_spill] sm:$0xff] %v13157_v12  ;;  %17798 = vst [vmem:[#allocation291_spill] sm:$0xff] %v13159_v27  ;;  %v17843_v27 = vsub.f32 %v12769_v38, %v12755_v24  ;;  %v17850_v38 = vsub.f32 %v12799_v16, %v12797_v29 }
 0x57f   :  { %4958 = vadd.xlane.f32.xlu0 %v12793_v6  ;;  %v13166_v56 = vpop.xlane.xlu0 %4892  ;;  %v13168_v8 = vpop.xlane.xlu1 %4895 }
 0x580   :  { %17801 = vst [vmem:[#allocation292_spill] sm:$0xff] %v13166_v56  ;;  %17802 = vst [vmem:[#allocation293_spill] sm:$0xff] %v13168_v8  ;;  %v17808_v56 = vsub.f32 %v12805_v19, %v12803_v18  ;;  %v5625_v8 = vadd.f32 0.001, %v17843_v27  ;;  %v5641_v24 = vadd.f32 0.001, %v17850_v38 }
 0x581   :  { %v5505_v38 = vld [vmem:[%s16661_s6 + $0x10] sm:$0xff] }
 0x582   :  { %v5642_v43 = vadd.f32 0.001, %v17808_v56 }
 0x583   :  { %v4179_v6 = vpop.xlane.xlu0 %4178  ;;  %v4182_v51 = vpop.xlane.xlu1 %4181 }
 0x584   :  { %v13180_v3 = vmul.f32 0.0051020407, %v4179_v6  ;;  %6230 = vperm.xlu1 %8843, %v5864_v11   ;;  %v13182_v12 = vmul.f32 0.0051020407, %v4182_v51  ;;  %9255 = vrsqrt.f32 %v5642_v43  ;;  %v5522_v51 = vld [vmem:[%s16661_s6 + $0x98] sm:$0xff] }
 0x585   :  { %9257 = vrsqrt.f32 %v5625_v8 }
 0x586   :  { %17806 = vst [vmem:[#allocation294_spill] sm:$0xff] %v13180_v3  ;;  %17807 = vst [vmem:[#allocation295_spill] sm:$0xff] %v13182_v12  ;;  %9259 = vrsqrt.f32 %v5641_v24 }
 0x587   :  { %v13191_v61 = vpop.xlane.xlu0 %4898  ;;  %v13193_v40 = vpop.xlane.xlu1 %4901 }
 0x588   :  { %17811 = vst [vmem:[#allocation296_spill] sm:$0xff] %v13191_v61  ;;  %17812 = vst [vmem:[#allocation297_spill] sm:$0xff] %v13193_v40 }
 0x58b   :  { %v4185_v14 = vpop.xlane.xlu0 %4184  ;;  %v4188_v19 = vpop.xlane.xlu1 %4187 }
 0x58c   :  { %v13199_v18 = vmul.f32 0.0051020407, %v4185_v14  ;;  %v13201_v56 = vmul.f32 0.0051020407, %v4188_v19  ;;  %v9254_v14 = vpop.eup %9253  ;;  %v5506_v19 = vld [vmem:[%s16661_s6 + $0x18] sm:$0xff] }
 0x58d   :  { %v5866_v6 = vmul.f32 %v9254_v14, %v5506_v19 }
 0x58e   :  { %17815 = vst [vmem:[#allocation298_spill] sm:$0xff] %v13199_v18  ;;  %17816 = vst [vmem:[#allocation299_spill] sm:$0xff] %v13201_v56  ;;  %v9256_v10 = vpop.eup %9255  ;;  %v13248_v18 = vpop.f32.mrb[94].mxu1 }
 0x58f   :  { %v13207_v57 = vpop.xlane.xlu0 %4904  ;;  %v13209_v3 = vpop.xlane.xlu1 %4907  ;;  %17833 = vst [vmem:[#allocation308_spill] sm:$0xff] %v13248_v18 }
 0x590   :  { %17819 = vst [vmem:[#allocation300_spill] sm:$0xff] %v13207_v57  ;;  %17820 = vst [vmem:[#allocation301_spill] sm:$0xff] %v13209_v3  ;;  %v5882_v3 = vmul.f32 %v9256_v10, %v5522_v51  ;;  %v4669_v57 = vmul.f32 %v13248_v18, %v13248_v18  ;;  %v13252_v19 = vpop.f32.mrb[95].mxu1  ;;  %v9258_v16 = vpop.eup %9257 }
 0x591   :  { %17834 = vst [vmem:[#allocation309_spill] sm:$0xff] %v13252_v19 }
 0x593   :  { %v4191_v45 = vpop.xlane.xlu0 %4190  ;;  %v4194_v26 = vpop.xlane.xlu1 %4193 }
 0x594   :  { %v13224_v11 = vmul.f32 0.0051020407, %v4191_v45  ;;  %v13230_v43 = vmul.f32 0.0051020407, %v4194_v26 }
 0x595   :  { %6240 = vperm.xlu0 %8844, %v5866_v6  }
 0x596   :  { %17823 = vst [vmem:[#allocation302_spill] sm:$0xff] %v13224_v11  ;;  %17824 = vst [vmem:[#allocation303_spill] sm:$0xff] %v13230_v43 }
 0x597   :  { %v13236_v56 = vpop.xlane.xlu0 %4910  ;;  %v13238_v45 = vpop.xlane.xlu1 %4913 }
 0x598   :  { %17827 = vst [vmem:[#allocation304_spill] sm:$0xff] %v13236_v56  ;;  %17828 = vst [vmem:[#allocation305_spill] sm:$0xff] %v13238_v45 }
 0x599   :  { %6320 = vperm.xlu0 %8844, %v5882_v3   ;;  %v13262_v3 = vadd.f32 %v13252_v19, %v13248_v18  ;;  %v18020_v18 = vld [vmem:[#allocation44_spill] sm:$0xff] }
 0x59b   :  { %v4197_v6 = vpop.xlane.xlu0 %4196  ;;  %v4200_v59 = vpop.xlane.xlu1 %4199 }
 0x59c   :  { %v13244_v40 = vmul.f32 0.0051020407, %v4197_v6  ;;  %v13246_v14 = vmul.f32 0.0051020407, %v4200_v59  ;;  %v4670_v6 = vmul.f32 %v13252_v19, %v13252_v19 }
 0x59e   :  { %17831 = vst [vmem:[#allocation306_spill] sm:$0xff] %v13244_v40  ;;  %17832 = vst [vmem:[#allocation307_spill] sm:$0xff] %v13246_v14  ;;  %v13272_v51 = vadd.f32 %v4670_v6, %v4669_v57 }
 0x59f   :  { %v13256_v12 = vpop.xlane.xlu0 %4916  ;;  %v13258_v26 = vpop.xlane.xlu1 %4919 }
 0x5a0   :  { %17836 = vst [vmem:[#allocation310_spill] sm:$0xff] %v13256_v12  ;;  %17837 = vst [vmem:[#allocation311_spill] sm:$0xff] %v13258_v26 }
 0x5a3   :  { %v4203_v12 = vpop.xlane.xlu0 %4202  ;;  %v4206_v26 = vpop.xlane.xlu1 %4205 }
 0x5a4   :  { %v13274_v43 = vmul.f32 0.0051020407, %v4203_v12  ;;  %v13276_v45 = vmul.f32 0.0051020407, %v4206_v26 }
 0x5a6   :  { %17841 = vst [vmem:[#allocation312_spill] sm:$0xff] %v13274_v43  ;;  %17842 = vst [vmem:[#allocation313_spill] sm:$0xff] %v13276_v45 }
 0x5a7   :  { %v13285_v14 = vpop.xlane.xlu0 %4922  ;;  %v13287_v57 = vpop.xlane.xlu1 %4925 }
 0x5a8   :  { %17846 = vst [vmem:[#allocation314_spill] sm:$0xff] %v13285_v14  ;;  %17847 = vst [vmem:[#allocation315_spill] sm:$0xff] %v13287_v57  ;;  %4241 = vadd.xlane.f32.xlu1 %v12900_v34  ;;  %v5865_v14 = vmul.f32 %v9258_v16, %v5505_v38  ;;  %v5164_v38 = vmul.f32 0.0051020407, %v12852_v33 }
 0x5ab   :  { %v4209_v27 = vpop.xlane.xlu0 %4208  ;;  %v4212_v59 = vpop.xlane.xlu1 %4211 }
 0x5ac   :  { %v13297_v61 = vmul.f32 0.0051020407, %v4209_v27  ;;  %v13299_v11 = vmul.f32 0.0051020407, %v4212_v59  ;;  %v13313_v27 = vpop.f32.mrb[96].mxu1 }
 0x5ad   :  { %17859 = vst [vmem:[#allocation320_spill] sm:$0xff] %v13313_v27  ;;  %v13315_v59 = vpop.f32.mrb[97].mxu1  ;;  %v4671_v24 = vmul.f32 %v13313_v27, %v13313_v27 }
 0x5ae   :  { %17851 = vst [vmem:[#allocation316_spill] sm:$0xff] %v13297_v61  ;;  %17852 = vst [vmem:[#allocation317_spill] sm:$0xff] %v13299_v11  ;;  %v13321_v10 = vadd.f32 %v13315_v59, %v13313_v27  ;;  %v4672_v12 = vmul.f32 %v13315_v59, %v13315_v59  ;;  %v5148_v11 = vmul.f32 0.0051020407, %v12837_v23 }
 0x5af   :  { %v13305_v26 = vpop.xlane.xlu0 %4928  ;;  %v13307_v34 = vpop.xlane.xlu1 %4931  ;;  %17860 = vst [vmem:[#allocation321_spill] sm:$0xff] %v13315_v59 }
 0x5b0   :  { %17855 = vst [vmem:[#allocation318_spill] sm:$0xff] %v13305_v26  ;;  %17856 = vst [vmem:[#allocation319_spill] sm:$0xff] %v13307_v34  ;;  %v13332_v56 = vadd.f32 %v4672_v12, %v4671_v24  ;;  %v5521_v12 = vld [vmem:[%s16661_s6 + $0x90] sm:$0xff]  ;;  %v5268_v26 = vmul.f32 %v12815_v22, %v12815_v22 }
 0x5b2   :  { %v5388_v16 = vsub.f32 %v5148_v11, %v5268_v26 }
 0x5b3   :  { %v4215_v6 = vpop.xlane.xlu0 %4214  ;;  %v4218_v13 = vpop.xlane.xlu1 %4217 }
 0x5b4   :  { %v13325_v29 = vmul.f32 0.0051020407, %v4215_v6  ;;  %v13330_v8 = vmul.f32 0.0051020407, %v4218_v13  ;;  %v9260_v13 = vpop.eup %9259  ;;  %v5628_v33 = vadd.f32 0.001, %v5388_v16 }
 0x5b5   :  { %v5881_v40 = vmul.f32 %v9260_v13, %v5521_v12 }
 0x5b6   :  { %17861 = vst [vmem:[#allocation322_spill] sm:$0xff] %v13325_v29  ;;  %17862 = vst [vmem:[#allocation323_spill] sm:$0xff] %v13330_v8  ;;  %9261 = vrsqrt.f32 %v5628_v33 }
 0x5b7   :  { %v13337_v34 = vpop.xlane.xlu0 %4934  ;;  %v13339_v43 = vpop.xlane.xlu1 %4937 }
 0x5b8   :  { %17864 = vst [vmem:[#allocation324_spill] sm:$0xff] %v13337_v34  ;;  %4244 = vadd.xlane.f32.xlu0 %v12960_v7  ;;  %v5284_v7 = vmul.f32 %v12829_v17, %v12829_v17 }
 0x5b9   :  { %6235 = vperm.xlu1 %8843, %v5865_v14  }
 0x5ba   :  { %v5404_v26 = vsub.f32 %v5164_v38, %v5284_v7 }
 0x5bb   :  { %v4221_v45 = vpop.xlane.xlu0 %4220  ;;  %v4224_v61 = vpop.xlane.xlu1 %4223 }
 0x5bc   :  { %v13354_v57 = vmul.f32 0.0051020407, %v4221_v45  ;;  %4964 = vadd.xlane.f32.xlu0 %v12966_v30  ;;  %v13359_v6 = vmul.f32 0.0051020407, %v4224_v61  ;;  %v17886_v61 = vld [vmem:[#allocation96_spill] sm:$0xff] }
 0x5bd   :  { %6315 = vperm.xlu1 %8843, %v5881_v40   ;;  %v5644_v40 = vadd.f32 0.001, %v5404_v26 }
 0x5be   :  { %17868 = vst [vmem:[#allocation325_spill] sm:$0xff] %v13354_v57  ;;  %17869 = vst [vmem:[#allocation326_spill] sm:$0xff] %v13359_v6 }
 0x5bf   :  { %v13365_v29 = vpop.xlane.xlu0 %4940  ;;  %v13367_v45 = vpop.xlane.xlu1 %4943  ;;  %9263 = vrsqrt.f32 %v5644_v40  ;;  %v5508_v40 = vld [vmem:[%s16661_s6 + $0x28] sm:$0xff] }
 0x5c0   :  { %17872 = vst [vmem:[#allocation327_spill] sm:$0xff] %v13365_v29  ;;  %v9262_v30 = vpop.eup %9261  ;;  %v17945_v29 = vld [vmem:[#allocation24_spill] sm:$0xff] }
 0x5c1   :  { %v5868_v26 = vmul.f32 %v9262_v30, %v5508_v40 }
 0x5c3   :  { %v4227_v34 = vpop.xlane.xlu0 %4226  ;;  %v4230_v8 = vpop.xlane.xlu1 %4229 }
 0x5c4   :  { %v13373_v23 = vmul.f32 0.0051020407, %v4227_v34  ;;  %v13375_v24 = vmul.f32 0.0051020407, %v4230_v8  ;;  %v9133_v34 = vld [vmem:[%s16660_s5 + $0x244] ss:$8 sps:$4 sm:$0xff]  }
 0x5c5   :  { %8675 = vmatprep.mubr.msk.bf16.mxu1 %vm3249_vm1, %v9133_v34 }
 0x5c6   :  { %17875 = vst [vmem:[#allocation328_spill] sm:$0xff] %v13373_v23  ;;  %17876 = vst [vmem:[#allocation329_spill] sm:$0xff] %v13375_v24  ;;  %v17887_v23 = vld [vmem:[#allocation228_spill] sm:$0xff]  ;;  %3823 = vmatmul.mubr.bf16.gmra.mrb[112].mxu1 %v9135_v55  ;;  %v13432_v55 = vpop.f32.mrb[98].mxu1 }
 0x5c7   :  { %v13381_v14 = vpop.xlane.xlu0 %4946  ;;  %v13383_v13 = vpop.xlane.xlu1 %4949  ;;  %17899 = vst [vmem:[#allocation228_spill] sm:$0xff] %v13432_v55 }
 0x5c8   :  { %17878 = vst [vmem:[#allocation330_spill] sm:$0xff] %v13381_v14  ;;  %17879 = vst [vmem:[#allocation331_spill] sm:$0xff] %v13383_v13  ;;  %v17888_v14 = vsub.f32 %v17886_v61, %v17887_v23  ;;  %v17889_v13 = vld [vmem:[#allocation5_spill] sm:$0xff] }
 0x5c9   :  { %v17890_v38 = vsub.f32 %v17889_v13, %v17887_v23  ;;  %v17893_v61 = vld [vmem:[#allocation153_spill] sm:$0xff] }
 0x5cb   :  { %v4233_v11 = vpop.xlane.xlu0 %4232  ;;  %v4236_v8 = vpop.xlane.xlu1 %4235 }
 0x5cc   :  { %v13389_v12 = vmul.f32 0.0051020407, %v4233_v11  ;;  %v13391_v16 = vmul.f32 0.0051020407, %v4236_v8  ;;  %v5524_v11 = vld [vmem:[%s16661_s6 + $0xa8] sm:$0xff] }
 0x5cd   :  { %v17891_v8 = vld [vmem:[#allocation38_spill] sm:$0xff] }
 0x5ce   :  { %17882 = vst [vmem:[#allocation332_spill] sm:$0xff] %v13389_v12  ;;  %17883 = vst [vmem:[#allocation333_spill] sm:$0xff] %v13391_v16  ;;  %v9264_v12 = vpop.eup %9263 }
 0x5cf   :  { %v6306_v33 = vpop.permute.xlu1 %6305  ;;  %v13422_v23 = vpop.xlane.xlu0 %4952  ;;  %v5884_v30 = vmul.f32 %v9264_v12, %v5524_v11  ;;  %v4673_v12 = vmul.f32 %v13432_v55, %v13432_v55 }
 0x5d0   :  { %v6855_v24 = vmul.f32 %v6306_v33, %v17888_v14  ;;  %v6856_v7 = vmul.f32 %v6306_v33, %v17890_v38  ;;  %17892 = vst [vmem:[#allocation96_spill] sm:$0xff] %v13422_v23  ;;  %v17894_v38 = vld [vmem:[#allocation229_spill] sm:$0xff]  ;;  %v13437_v11 = vpop.f32.mrb[99].mxu1 }
 0x5d1   :  { %v17895_v33 = vsub.f32 %v17893_v61, %v17894_v38  ;;  %v17897_v34 = vsub.f32 %v17896_v28, %v17894_v38  ;;  %17900 = vst [vmem:[#allocation5_spill] sm:$0xff] %v13437_v11  ;;  %v13447_v38 = vadd.f32 %v13437_v11, %v13432_v55  ;;  %v17941_v23 = vld [vmem:[#allocation241_spill] sm:$0xff] }
 0x5d2   :  { %v7815_v48 = vadd.f32 %v17891_v8, %v6855_v24  ;;  %v7816_v14 = vadd.f32 %v17891_v8, %v6856_v7  ;;  %6250 = vperm.xlu0 %8844, %v5868_v26   ;;  %v17898_v24 = vld [vmem:[#allocation22_spill] sm:$0xff]  ;;  %v17901_v8 = vld [vmem:[#allocation100_spill] sm:$0xff] }
 0x5d4   :  { %8055 = vst [vmem:[#allocation2 + $0x100] sm:$0xff] %v7815_v48  ;;  %8056 = vst [vmem:[#allocation2 + $0x108] sm:$0xff] %v7816_v14  ;;  %v5147_v48 = vmul.f32 0.0051020407, %v12835_v15  ;;  %v17902_v14 = vld [vmem:[#allocation234_spill] sm:$0xff]  ;;  %v4674_v15 = vmul.f32 %v13437_v11, %v13437_v11 }
 0x5d5   :  { %v17903_v28 = vsub.f32 %v17901_v8, %v17902_v14  ;;  %v18055_v11 = vld [vmem:[#allocation46_spill] sm:$0xff] }
 0x5d6   :  { %6330 = vperm.xlu0 %8844, %v5884_v30   ;;  %v13456_v8 = vadd.f32 %v4674_v15, %v4673_v12 }
 0x5d7   :  { %v6226_v13 = vpop.permute.xlu0 %6225 }
 0x5d8   :  { %v6823_v40 = vmul.f32 %v6226_v13, %v17895_v33  ;;  %v6824_v16 = vmul.f32 %v6226_v13, %v17897_v34  ;;  %v17904_v13 = vld [vmem:[#allocation7_spill] sm:$0xff]  ;;  %v5267_v33 = vmul.f32 %v12813_v44, %v12813_v44 }
 0x5d9   :  { %v17905_v61 = vsub.f32 %v17904_v13, %v17902_v14 }
 0x5da   :  { %v7783_v57 = vadd.f32 %v17898_v24, %v6823_v40  ;;  %v7784_v7 = vadd.f32 %v17898_v24, %v6824_v16  ;;  %v5387_v24 = vsub.f32 %v5147_v48, %v5267_v33 }
 0x5db   :  { %v6311_v26 = vpop.permute.xlu0 %6310 }
 0x5dc   :  { %8023 = vst [vmem:[#allocation2] sm:$0xff] %v7783_v57  ;;  %8024 = vst [vmem:[#allocation2 + $0x8] sm:$0xff] %v7784_v7  ;;  %v6857_v30 = vmul.f32 %v6311_v26, %v17903_v28  ;;  %v6858_v16 = vmul.f32 %v6311_v26, %v17905_v61  ;;  %v17906_v57 = vld [vmem:[#allocation37_spill] sm:$0xff]  ;;  %v5163_v7 = vmul.f32 0.0051020407, %v12850_v52  ;;  %v5283_v26 = vmul.f32 %v12827_v54, %v12827_v54 }
 0x5dd   :  { %v5627_v14 = vadd.f32 0.001, %v5387_v24 }
 0x5de   :  { %v7817_v40 = vadd.f32 %v17906_v57, %v6857_v30  ;;  %v7818_v34 = vadd.f32 %v17906_v57, %v6858_v16  ;;  %v5403_v28 = vsub.f32 %v5163_v7, %v5283_v26  ;;  %v5150_v16 = vmul.f32 0.0051020407, %v12886_v62 }
 0x5df   :  { %9265 = vrsqrt.f32 %v5627_v14  ;;  %v5166_v7 = vmul.f32 0.0051020407, %v12908_v1  ;;  %v5286_v62 = vmul.f32 %v12876_v5, %v12876_v5  ;;  %v9138_v1 = vld [vmem:[%s16660_s5 + $0x250] ss:$8 sps:$4 sm:$0xff]  }
 0x5e0   :  { %8057 = vst [vmem:[#allocation2 + $0x110] sm:$0xff] %v7817_v40  ;;  %8058 = vst [vmem:[#allocation2 + $0x118] sm:$0xff] %v7818_v34  ;;  %v5643_v30 = vadd.f32 0.001, %v5403_v28  ;;  %v5523_v40 = vld [vmem:[%s16661_s6 + $0xa0] sm:$0xff]  ;;  %v5270_v34 = vmul.f32 %v12862_v58, %v12862_v58 }
 0x5e1   :  { %4961 = vadd.xlane.f32.xlu1 %v12910_v32 }
 0x5e2   :  { %9267 = vrsqrt.f32 %v5643_v30  ;;  %v5390_v24 = vsub.f32 %v5150_v16, %v5270_v34  ;;  %v17915_v34 = vld [vmem:[#allocation21_spill] sm:$0xff] }
 0x5e4   :  { %v5630_v14 = vadd.f32 0.001, %v5390_v24 }
 0x5e5   :  { %4247 = vadd.xlane.f32.xlu1 %v13084_v39  ;;  %v5507_v39 = vld [vmem:[%s16661_s6 + $0x20] sm:$0xff] }
 0x5e6   :  { %9269 = vrsqrt.f32 %v5630_v14 }
 0x5e7   :  { %v13462_v13 = vpop.f32.mrb[100].mxu1 }
 0x5e8   :  { %17907 = vst [vmem:[#allocation38_spill] sm:$0xff] %v13462_v13  ;;  %v13464_v48 = vpop.f32.mrb[101].mxu1  ;;  %v4675_v12 = vmul.f32 %v13462_v13, %v13462_v13 }
 0x5e9   :  { %17908 = vst [vmem:[#allocation153_spill] sm:$0xff] %v13464_v48  ;;  %v13468_v52 = vadd.f32 %v13464_v48, %v13462_v13  ;;  %v4676_v32 = vmul.f32 %v13464_v48, %v13464_v48  ;;  %v9266_v61 = vpop.eup %9265  ;;  %v18070_v48 = vld [vmem:[#allocation272_spill] sm:$0xff]  ;;  %v18071_v13 = vld [vmem:[#allocation47_spill] sm:$0xff] }
 0x5ea   :  { %v5867_v15 = vmul.f32 %v9266_v61, %v5507_v39  ;;  %v17911_v61 = vld [vmem:[#allocation235_spill] sm:$0xff] }
 0x5eb   :  { %v13478_v33 = vadd.f32 %v4676_v32, %v4675_v12  ;;  %v9136_v12 = vld [vmem:[%s16660_s5 + $0x254] ss:$8 sps:$4 sm:$0xff]  }
 0x5ec   :  { %v9268_v57 = vpop.eup %9267  ;;  %v17910_v32 = vld [vmem:[#allocation8_spill] sm:$0xff]  ;;  %8676 = vmatprep.mubr.msk.bf16.mxu1 %vm3249_vm1, %v9136_v12  ;;  %v13529_v12 = vpop.f32.mrb[102].mxu1 }
 0x5ed   :  { %v5883_v26 = vmul.f32 %v9268_v57, %v5523_v40  ;;  %v17912_v39 = vsub.f32 %v17910_v32, %v17911_v61  ;;  %3833 = vmatmul.mubr.bf16.gmra.mrb[116].mxu1 %v9138_v1  ;;  %17923 = vst [vmem:[#allocation100_spill] sm:$0xff] %v13529_v12 }
 0x5f0   :  { %v9270_v14 = vpop.eup %9269 }
 0x5f5   :  { %4250 = vadd.xlane.f32.xlu0 %v13142_v9  ;;  %v5406_v9 = vsub.f32 %v5166_v7, %v5286_v62 }
 0x5f6   :  { %6245 = vperm.xlu1 %8843, %v5867_v15   ;;  %v17913_v15 = vld [vmem:[#allocation102_spill] sm:$0xff] }
 0x5f7   :  { %v5646_v28 = vadd.f32 0.001, %v5406_v9  ;;  %v17914_v57 = vsub.f32 %v17913_v15, %v17911_v61  ;;  %v5510_v9 = vld [vmem:[%s16661_s6 + $0x38] sm:$0xff]  ;;  %v17918_v15 = vld [vmem:[#allocation242_spill] sm:$0xff] }
 0x5f8   :  { %v5870_v1 = vmul.f32 %v9270_v14, %v5510_v9  ;;  %v5526_v61 = vld [vmem:[%s16661_s6 + $0xb8] sm:$0xff] }
 0x5f9   :  { %4970 = vadd.xlane.f32.xlu0 %v13150_v63  ;;  %9271 = vrsqrt.f32 %v5646_v28  ;;  %v17924_v28 = vld [vmem:[#allocation253_spill] sm:$0xff] }
 0x5fa   :  { %6325 = vperm.xlu1 %8843, %v5883_v26   ;;  %v5149_v0 = vmul.f32 0.0051020407, %v17924_v28 }
 0x600   :  { %v13490_v30 = vpop.xlane.xlu1 %4955 }
 0x601   :  { %17909 = vst [vmem:[#allocation229_spill] sm:$0xff] %v13490_v30 }
 0x604   :  { %v6231_v63 = vpop.permute.xlu1 %6230 }
 0x605   :  { %v6825_v16 = vmul.f32 %v6231_v63, %v17912_v39  ;;  %v6826_v40 = vmul.f32 %v6231_v63, %v17914_v57  ;;  %v9272_v63 = vpop.eup %9271  ;;  %v17919_v57 = vsub.f32 %v11883_v4, %v17918_v15  ;;  %v17926_v4 = vld [vmem:[#allocation109_spill] sm:$0xff] }
 0x606   :  { %v5886_v39 = vmul.f32 %v9272_v63, %v5526_v61  ;;  %v4677_v63 = vmul.f32 %v13529_v12, %v13529_v12  ;;  %v13534_v61 = vpop.f32.mrb[103].mxu1 }
 0x607   :  { %v7785_v24 = vadd.f32 %v17915_v34, %v6825_v16  ;;  %v7786_v7 = vadd.f32 %v17915_v34, %v6826_v40  ;;  %v17920_v34 = vld [vmem:[#allocation12_spill] sm:$0xff]  ;;  %17925 = vst [vmem:[#allocation234_spill] sm:$0xff] %v13534_v61  ;;  %v4678_v28 = vmul.f32 %v13534_v61, %v13534_v61 }
 0x608   :  { %v4239_v26 = vpop.xlane.xlu0 %4238 }
 0x609   :  { %8025 = vst [vmem:[#allocation2 + $0x10] sm:$0xff] %v7785_v24  ;;  %8026 = vst [vmem:[#allocation2 + $0x18] sm:$0xff] %v7786_v7  ;;  %v13507_v62 = vmul.f32 0.0051020407, %v4239_v26  ;;  %v17921_v24 = vsub.f32 %v17920_v34, %v17918_v15  ;;  %v17922_v26 = vld [vmem:[#allocation23_spill] sm:$0xff] }
 0x60b   :  { %17916 = vst [vmem:[#allocation6_spill] sm:$0xff] %v13507_v62  ;;  %v13553_v62 = vadd.f32 %v4678_v28, %v4677_v63  ;;  %v5152_v28 = vmul.f32 0.0051020407, %v12938_v35 }
 0x60c   :  { %v13516_v32 = vpop.xlane.xlu0 %4958 }
 0x60d   :  { %17917 = vst [vmem:[#allocation22_spill] sm:$0xff] %v13516_v32 }
 0x60f   :  { %6260 = vperm.xlu0 %8844, %v5870_v1  }
 0x613   :  { %6340 = vperm.xlu0 %8844, %v5886_v39   ;;  %v17927_v39 = vld [vmem:[#allocation246_spill] sm:$0xff] }
 0x614   :  { %v6241_v16 = vpop.permute.xlu0 %6240  ;;  %v17928_v15 = vsub.f32 %v17926_v4, %v17927_v39 }
 0x615   :  { %v6829_v40 = vmul.f32 %v6241_v16, %v17919_v57  ;;  %v6830_v7 = vmul.f32 %v6241_v16, %v17921_v24  ;;  %v17929_v57 = vld [vmem:[#allocation111_spill] sm:$0xff]  ;;  %v13544_v24 = vadd.f32 %v13534_v61, %v13529_v12  ;;  %v18085_v61 = vld [vmem:[#allocation165_spill] sm:$0xff]  ;;  %v18087_v12 = vld [vmem:[#allocation48_spill] sm:$0xff] }
 0x617   :  { %v7789_v14 = vadd.f32 %v17922_v26, %v6829_v40  ;;  %v7790_v9 = vadd.f32 %v17922_v26, %v6830_v7  ;;  %v17930_v40 = vsub.f32 %v17929_v57, %v17927_v39  ;;  %v17931_v7 = vld [vmem:[#allocation250_spill] sm:$0xff] }
 0x618   :  { %v6321_v1 = vpop.permute.xlu0 %6320  ;;  %v5269_v26 = vmul.f32 %v17931_v7, %v17931_v7 }
 0x619   :  { %8029 = vst [vmem:[#allocation2 + $0x30] sm:$0xff] %v7789_v14  ;;  %8030 = vst [vmem:[#allocation2 + $0x38] sm:$0xff] %v7790_v9  ;;  %v6861_v16 = vmul.f32 %v6321_v1, %v17928_v15  ;;  %v6862_v34 = vmul.f32 %v6321_v1, %v17930_v40  ;;  %v17932_v14 = vld [vmem:[#allocation39_spill] sm:$0xff] }
 0x61a   :  { %v5389_v4 = vsub.f32 %v5149_v0, %v5269_v26  ;;  %v17933_v15 = vld [vmem:[#allocation255_spill] sm:$0xff] }
 0x61b   :  { %v7821_v9 = vadd.f32 %v17932_v14, %v6861_v16  ;;  %v7822_v37 = vadd.f32 %v17932_v14, %v6862_v34  ;;  %v5165_v32 = vmul.f32 0.0051020407, %v17933_v15  ;;  %v17934_v1 = vld [vmem:[#allocation251_spill] sm:$0xff]  ;;  %v13559_v34 = vpop.f32.mrb[104].mxu1  ;;  %v5272_v15 = vmul.f32 %v12916_v21, %v12916_v21 }
 0x61c   :  { %v5285_v39 = vmul.f32 %v17934_v1, %v17934_v1  ;;  %v5629_v57 = vadd.f32 0.001, %v5389_v4  ;;  %17935 = vst [vmem:[#allocation7_spill] sm:$0xff] %v13559_v34  ;;  %v13561_v0 = vpop.f32.mrb[105].mxu1  ;;  %v5525_v4 = vld [vmem:[%s16661_s6 + $0xb0] sm:$0xff] }
 0x61d   :  { %8061 = vst [vmem:[#allocation2 + $0x130] sm:$0xff] %v7821_v9  ;;  %8062 = vst [vmem:[#allocation2 + $0x138] sm:$0xff] %v7822_v37  ;;  %v13565_v63 = vadd.f32 %v13561_v0, %v13559_v34  ;;  %v4679_v37 = vmul.f32 %v13559_v34, %v13559_v34  ;;  %v18098_v34 = vld [vmem:[#allocation175_spill] sm:$0xff] }
 0x61e   :  { %4967 = vadd.xlane.f32.xlu1 %v13100_v20  ;;  %v5405_v40 = vsub.f32 %v5165_v32, %v5285_v39  ;;  %9273 = vrsqrt.f32 %v5629_v57  ;;  %17936 = vst [vmem:[#allocation37_spill] sm:$0xff] %v13561_v0  ;;  %v4680_v20 = vmul.f32 %v13561_v0, %v13561_v0  ;;  %v5392_v39 = vsub.f32 %v5152_v28, %v5272_v15 }
 0x61f   :  { %v5168_v57 = vmul.f32 0.0051020407, %v12954_v46  ;;  %v17940_v46 = vld [vmem:[#allocation105_spill] sm:$0xff] }
 0x620   :  { %v5645_v16 = vadd.f32 0.001, %v5405_v40  ;;  %v13575_v14 = vadd.f32 %v4680_v20, %v4679_v37 }
 0x622   :  { %4253 = vadd.xlane.f32.xlu1 %v13262_v3  ;;  %9275 = vrsqrt.f32 %v5645_v16  ;;  %v5509_v3 = vld [vmem:[%s16661_s6 + $0x30] sm:$0xff] }
 0x628   :  { %v9274_v32 = vpop.eup %9273 }
 0x629   :  { %v5869_v26 = vmul.f32 %v9274_v32, %v5509_v3  ;;  %v17949_v32 = vld [vmem:[#allocation9_spill] sm:$0xff] }
 0x62c   :  { %v9276_v9 = vpop.eup %9275 }
 0x62d   :  { %v5885_v16 = vmul.f32 %v9276_v9, %v5525_v4  ;;  %v17942_v9 = vsub.f32 %v17940_v46, %v17941_v23 }
 0x632   :  { %4256 = vadd.xlane.f32.xlu0 %v13321_v10  ;;  %v5288_v10 = vmul.f32 %v12930_v2, %v12930_v2 }
 0x633   :  { %6255 = vperm.xlu1 %8843, %v5869_v26   ;;  %v5632_v26 = vadd.f32 0.001, %v5392_v39  ;;  %v17946_v39 = vld [vmem:[#allocation10_spill] sm:$0xff] }
 0x634   :  { %v5408_v28 = vsub.f32 %v5168_v57, %v5288_v10  ;;  %v17947_v57 = vld [vmem:[#allocation245_spill] sm:$0xff] }
 0x635   :  { %v4242_v40 = vpop.xlane.xlu1 %4241  ;;  %9277 = vrsqrt.f32 %v5632_v26  ;;  %v17948_v10 = vsub.f32 %v17946_v39, %v17947_v57  ;;  %v17950_v46 = vsub.f32 %v17949_v32, %v17947_v57  ;;  %v17954_v39 = vld [vmem:[#allocation13_spill] sm:$0xff] }
 0x636   :  { %v13584_v35 = vmul.f32 0.0051020407, %v4242_v40  ;;  %4976 = vadd.xlane.f32.xlu0 %v13332_v56  ;;  %v17943_v40 = vld [vmem:[#allocation106_spill] sm:$0xff]  ;;  %v5648_v20 = vadd.f32 0.001, %v5408_v28  ;;  %v17955_v57 = vsub.f32 %v17954_v39, %v12815_v22 }
 0x637   :  { %6335 = vperm.xlu1 %8843, %v5885_v16   ;;  %v17944_v56 = vsub.f32 %v17943_v40, %v17941_v23  ;;  %v5528_v40 = vld [vmem:[%s16661_s6 + $0xc8] sm:$0xff] }
 0x638   :  { %17937 = vst [vmem:[#allocation8_spill] sm:$0xff] %v13584_v35  ;;  %v17951_v35 = vld [vmem:[#allocation40_spill] sm:$0xff]  ;;  %9279 = vrsqrt.f32 %v5648_v20 }
 0x639   :  { %v6236_v15 = vpop.permute.xlu1 %6235 }
 0x63a   :  { %v6827_v4 = vmul.f32 %v6236_v15, %v17942_v9  ;;  %v6828_v30 = vmul.f32 %v6236_v15, %v17944_v56 }
 0x63c   :  { %v7787_v6 = vadd.f32 %v17945_v29, %v6827_v4  ;;  %v7788_v16 = vadd.f32 %v17945_v29, %v6828_v30  ;;  %v9139_v29 = vld [vmem:[%s16660_s5 + $0x264] ss:$8 sps:$4 sm:$0xff]  }
 0x63d   :  { %v6316_v37 = vpop.permute.xlu1 %6315  ;;  %8677 = vmatprep.mubr.msk.bf16.mxu1 %vm3249_vm1, %v9139_v29 }
 0x63e   :  { %8027 = vst [vmem:[#allocation2 + $0x20] sm:$0xff] %v7787_v6  ;;  %8028 = vst [vmem:[#allocation2 + $0x28] sm:$0xff] %v7788_v16  ;;  %v6859_v3 = vmul.f32 %v6316_v37, %v17948_v10  ;;  %v6860_v9 = vmul.f32 %v6316_v37, %v17950_v46  ;;  %v9141_v6 = vld [vmem:[%s16660_s5 + $0x260] ss:$8 sps:$4 sm:$0xff]   ;;  %v17956_v46 = vld [vmem:[#allocation16_spill] sm:$0xff] }
 0x63f   :  { %3843 = vmatmul.mubr.bf16.gmra.mrb[120].mxu1 %v9141_v6  ;;  %v9278_v32 = vpop.eup %9277 }
 0x640   :  { %v7819_v23 = vadd.f32 %v17951_v35, %v6859_v3  ;;  %v7820_v15 = vadd.f32 %v17951_v35, %v6860_v9  ;;  %v5512_v35 = vld [vmem:[%s16661_s6 + $0x48] sm:$0xff]  ;;  %v17957_v9 = vsub.f32 %v17956_v46, %v12815_v22 }
 0x641   :  { %v5872_v20 = vmul.f32 %v9278_v32, %v5512_v35  ;;  %v5151_v32 = vmul.f32 0.0051020407, %v12936_v47  ;;  %v17965_v46 = vld [vmem:[#allocation226_spill] sm:$0xff] }
 0x642   :  { %8059 = vst [vmem:[#allocation2 + $0x120] sm:$0xff] %v7819_v23  ;;  %8060 = vst [vmem:[#allocation2 + $0x128] sm:$0xff] %v7820_v15  ;;  %v9280_v28 = vpop.eup %9279  ;;  %v17958_v15 = vld [vmem:[#allocation25_spill] sm:$0xff] }
 0x643   :  { %v5888_v56 = vmul.f32 %v9280_v28, %v5528_v40  ;;  %v17961_v40 = vld [vmem:[#allocation119_spill] sm:$0xff] }
 0x644   :  { %v17962_v22 = vsub.f32 %v17961_v40, %v12829_v17  ;;  %v17967_v40 = vld [vmem:[#allocation258_spill] sm:$0xff] }
 0x645   :  { %v4245_v30 = vpop.xlane.xlu0 %4244 }
 0x646   :  { %v13616_v37 = vmul.f32 0.0051020407, %v4245_v30  ;;  %v13638_v30 = vpop.f32.mrb[106].mxu1 }
 0x647   :  { %17959 = vst [vmem:[#allocation21_spill] sm:$0xff] %v13638_v30  ;;  %v13643_v28 = vpop.f32.mrb[107].mxu1 }
 0x648   :  { %17952 = vst [vmem:[#allocation235_spill] sm:$0xff] %v13616_v37  ;;  %17960 = vst [vmem:[#allocation242_spill] sm:$0xff] %v13643_v28  ;;  %v4682_v47 = vmul.f32 %v13643_v28, %v13643_v28 }
 0x649   :  { %v13625_v4 = vpop.xlane.xlu0 %4964 }
 0x64a   :  { %17953 = vst [vmem:[#allocation102_spill] sm:$0xff] %v13625_v4  ;;  %v17979_v4 = vld [vmem:[#allocation26_spill] sm:$0xff] }
 0x64c   :  { %6270 = vperm.xlu0 %8844, %v5872_v20   ;;  %v4681_v20 = vmul.f32 %v13638_v30, %v13638_v30 }
 0x64e   :  { %v13662_v26 = vadd.f32 %v4682_v47, %v4681_v20 }
 0x650   :  { %6350 = vperm.xlu0 %8844, %v5888_v56  }
 0x651   :  { %v6251_v16 = vpop.permute.xlu0 %6250 }
 0x652   :  { %v6833_v10 = vmul.f32 %v6251_v16, %v17955_v57  ;;  %v6834_v23 = vmul.f32 %v6251_v16, %v17957_v9  ;;  %v17963_v16 = vld [vmem:[#allocation120_spill] sm:$0xff]  ;;  %v5271_v9 = vmul.f32 %v17965_v46, %v17965_v46 }
 0x653   :  { %v17964_v39 = vsub.f32 %v17963_v16, %v12829_v17  ;;  %v17968_v17 = vld [vmem:[#allocation231_spill] sm:$0xff] }
 0x654   :  { %v7793_v29 = vadd.f32 %v17958_v15, %v6833_v10  ;;  %v7794_v6 = vadd.f32 %v17958_v15, %v6834_v23  ;;  %v13653_v10 = vadd.f32 %v13643_v28, %v13638_v30  ;;  %v17966_v23 = vld [vmem:[#allocation41_spill] sm:$0xff] }
 0x655   :  { %v6331_v35 = vpop.permute.xlu0 %6330 }
 0x656   :  { %8033 = vst [vmem:[#allocation2 + $0x50] sm:$0xff] %v7793_v29  ;;  %8034 = vst [vmem:[#allocation2 + $0x58] sm:$0xff] %v7794_v6  ;;  %v6865_v56 = vmul.f32 %v6331_v35, %v17962_v22  ;;  %v6866_v57 = vmul.f32 %v6331_v35, %v17964_v39  ;;  %v5391_v6 = vsub.f32 %v5151_v32, %v5271_v9  ;;  %v5167_v22 = vmul.f32 0.0051020407, %v17967_v40 }
 0x657   :  { %v5287_v35 = vmul.f32 %v17968_v17, %v17968_v17 }
 0x658   :  { %v7825_v15 = vadd.f32 %v17966_v23, %v6865_v56  ;;  %v7826_v29 = vadd.f32 %v17966_v23, %v6866_v57  ;;  %v5631_v16 = vadd.f32 0.001, %v5391_v6  ;;  %v13668_v57 = vpop.f32.mrb[108].mxu1  ;;  %v5154_v23 = vmul.f32 0.0051020407, %v12996_v25 }
 0x659   :  { %v5407_v39 = vsub.f32 %v5167_v22, %v5287_v35  ;;  %17969 = vst [vmem:[#allocation12_spill] sm:$0xff] %v13668_v57  ;;  %v13670_v32 = vpop.f32.mrb[109].mxu1  ;;  %v4683_v20 = vmul.f32 %v13668_v57, %v13668_v57  ;;  %v5527_v22 = vld [vmem:[%s16661_s6 + $0xc0] sm:$0xff]  ;;  %v5274_v35 = vmul.f32 %v12973_v49, %v12973_v49 }
 0x65a   :  { %8065 = vst [vmem:[#allocation2 + $0x150] sm:$0xff] %v7825_v15  ;;  %8066 = vst [vmem:[#allocation2 + $0x158] sm:$0xff] %v7826_v29  ;;  %9281 = vrsqrt.f32 %v5631_v16  ;;  %v13676_v47 = vadd.f32 %v13670_v32, %v13668_v57 }
 0x65b   :  { %4973 = vadd.xlane.f32.xlu1 %v13272_v51  ;;  %v5647_v56 = vadd.f32 0.001, %v5407_v39  ;;  %17970 = vst [vmem:[#allocation23_spill] sm:$0xff] %v13670_v32  ;;  %v4684_v51 = vmul.f32 %v13670_v32, %v13670_v32  ;;  %v5394_v16 = vsub.f32 %v5154_v23, %v5274_v35  ;;  %v5170_v39 = vmul.f32 0.0051020407, %v13007_v42  ;;  %v17975_v42 = vld [vmem:[#allocation11_spill] sm:$0xff] }
 0x65d   :  { %9283 = vrsqrt.f32 %v5647_v56  ;;  %v13686_v6 = vadd.f32 %v4684_v51, %v4683_v20  ;;  %v17972_v20 = vld [vmem:[#allocation261_spill] sm:$0xff] }
 0x65f   :  { %4259 = vadd.xlane.f32.xlu1 %v13447_v38  ;;  %v5511_v38 = vld [vmem:[%s16661_s6 + $0x40] sm:$0xff] }
 0x664   :  { %v9282_v9 = vpop.eup %9281 }
 0x665   :  { %v5871_v29 = vmul.f32 %v9282_v9, %v5511_v38  ;;  %v9142_v9 = vld [vmem:[%s16660_s5 + $0x274] ss:$8 sps:$4 sm:$0xff]  }
 0x666   :  { %8678 = vmatprep.mubr.msk.bf16.mxu1 %vm3249_vm1, %v9142_v9  ;;  %v13749_v9 = vpop.f32.mrb[110].mxu1  ;;  %v18008_v38 = vld [vmem:[#allocation271_spill] sm:$0xff] }
 0x667   :  { %v9284_v40 = vpop.eup %9283  ;;  %17992 = vst [vmem:[#allocation111_spill] sm:$0xff] %v13749_v9  ;;  %v5172_v51 = vmul.f32 0.0051020407, %v18008_v38  ;;  %v9145_v38 = vld [vmem:[%s16660_s5 + $0x284] ss:$8 sps:$4 sm:$0xff]  }
 0x668   :  { %v5887_v56 = vmul.f32 %v9284_v40, %v5527_v22  ;;  %v17976_v40 = vsub.f32 %v17975_v42, %v12813_v44  ;;  %v17980_v42 = vld [vmem:[#allocation114_spill] sm:$0xff] }
 0x66e   :  { %v13684_v15 = vpop.xlane.xlu1 %4961 }
 0x66f   :  { %4262 = vadd.xlane.f32.xlu0 %v13468_v52  ;;  %v5290_v52 = vmul.f32 %v17972_v20, %v17972_v20 }
 0x670   :  { %6265 = vperm.xlu1 %8843, %v5871_v29   ;;  %v5634_v29 = vadd.f32 0.001, %v5394_v16  ;;  %v9144_v16 = vld [vmem:[%s16660_s5 + $0x270] ss:$8 sps:$4 sm:$0xff]  }
 0x671   :  { %v5410_v23 = vsub.f32 %v5170_v39, %v5290_v52  ;;  %3853 = vmatmul.mubr.bf16.gmra.mrb[124].mxu1 %v9144_v16 }
 0x672   :  { %v4248_v25 = vpop.xlane.xlu1 %4247  ;;  %9285 = vrsqrt.f32 %v5634_v29  ;;  %8679 = vmatprep.mubr.msk.bf16.mxu1 %vm3249_vm1, %v9145_v38 }
 0x673   :  { %v13695_v3 = vmul.f32 0.0051020407, %v4248_v25  ;;  %4982 = vadd.xlane.f32.xlu0 %v13478_v33  ;;  %v17977_v25 = vld [vmem:[#allocation14_spill] sm:$0xff]  ;;  %v5650_v39 = vadd.f32 0.001, %v5410_v23 }
 0x674   :  { %6345 = vperm.xlu1 %8843, %v5887_v56   ;;  %v17978_v33 = vsub.f32 %v17977_v25, %v12813_v44  ;;  %v17981_v44 = vsub.f32 %v17980_v42, %v12827_v54 }
 0x675   :  { %17971 = vst [vmem:[#allocation253_spill] sm:$0xff] %v13695_v3  ;;  %9287 = vrsqrt.f32 %v5650_v39  ;;  %v5530_v39 = vld [vmem:[%s16661_s6 + $0xd8] sm:$0xff] }
 0x676   :  { %v6246_v35 = vpop.permute.xlu1 %6245 }
 0x677   :  { %v6831_v22 = vmul.f32 %v6246_v35, %v17976_v40  ;;  %v6832_v31 = vmul.f32 %v6246_v35, %v17978_v33  ;;  %v17982_v40 = vld [vmem:[#allocation116_spill] sm:$0xff] }
 0x679   :  { %v7791_v37 = vadd.f32 %v17979_v4, %v6831_v22  ;;  %v7792_v56 = vadd.f32 %v17979_v4, %v6832_v31  ;;  %v17983_v31 = vsub.f32 %v17982_v40, %v12827_v54  ;;  %v17984_v22 = vld [vmem:[#allocation42_spill] sm:$0xff]  ;;  %v17987_v40 = vld [vmem:[#allocation17_spill] sm:$0xff] }
 0x67a   :  { %v6326_v52 = vpop.permute.xlu1 %6325  ;;  %v17993_v54 = vld [vmem:[#allocation262_spill] sm:$0xff] }
 0x67b   :  { %8031 = vst [vmem:[#allocation2 + $0x40] sm:$0xff] %v7791_v37  ;;  %8032 = vst [vmem:[#allocation2 + $0x48] sm:$0xff] %v7792_v56  ;;  %v6863_v35 = vmul.f32 %v6326_v52, %v17981_v44  ;;  %v6864_v4 = vmul.f32 %v6326_v52, %v17983_v31  ;;  %v5514_v56 = vld [vmem:[%s16661_s6 + $0x58] sm:$0xff]  ;;  %v17988_v31 = vsub.f32 %v17987_v40, %v12862_v58  ;;  %v5153_v53 = vmul.f32 0.0051020407, %v17993_v54  ;;  %v17997_v40 = vld [vmem:[#allocation19_spill] sm:$0xff] }
 0x67c   :  { %v9286_v23 = vpop.eup %9285 }
 0x67d   :  { %v7823_v25 = vadd.f32 %v17984_v22, %v6863_v35  ;;  %v7824_v33 = vadd.f32 %v17984_v22, %v6864_v4  ;;  %v5874_v16 = vmul.f32 %v9286_v23, %v5514_v56  ;;  %v17989_v22 = vld [vmem:[#allocation20_spill] sm:$0xff] }
 0x67f   :  { %8063 = vst [vmem:[#allocation2 + $0x140] sm:$0xff] %v7823_v25  ;;  %8064 = vst [vmem:[#allocation2 + $0x148] sm:$0xff] %v7824_v33  ;;  %v9288_v52 = vpop.eup %9287  ;;  %v17990_v25 = vsub.f32 %v17989_v22, %v12862_v58 }
 0x680   :  { %v5890_v44 = vmul.f32 %v9288_v52, %v5530_v39  ;;  %v4685_v52 = vmul.f32 %v13749_v9, %v13749_v9  ;;  %v13754_v39 = vpop.f32.mrb[111].mxu1 }
 0x681   :  { %17994 = vst [vmem:[#allocation250_spill] sm:$0xff] %v13754_v39  ;;  %v13764_v22 = vadd.f32 %v13754_v39, %v13749_v9  ;;  %v4686_v54 = vmul.f32 %v13754_v39, %v13754_v39  ;;  %v18153_v9 = vld [vmem:[#allocation189_spill] sm:$0xff] }
 0x682   :  { %v4251_v37 = vpop.xlane.xlu0 %4250 }
 0x683   :  { %v13727_v29 = vmul.f32 0.0051020407, %v4251_v37  ;;  %v17991_v37 = vld [vmem:[#allocation27_spill] sm:$0xff]  ;;  %v13773_v60 = vadd.f32 %v4686_v54, %v4685_v52 }
 0x685   :  { %17985 = vst [vmem:[#allocation109_spill] sm:$0xff] %v13727_v29 }
 0x686   :  { %v13736_v42 = vpop.xlane.xlu0 %4970 }
 0x687   :  { %17986 = vst [vmem:[#allocation246_spill] sm:$0xff] %v13736_v42 }
 0x689   :  { %6280 = vperm.xlu0 %8844, %v5874_v16  }
 0x68d   :  { %6360 = vperm.xlu0 %8844, %v5890_v44   ;;  %v17995_v44 = vld [vmem:[#allocation128_spill] sm:$0xff] }
 0x68e   :  { %v6261_v35 = vpop.permute.xlu0 %6260  ;;  %v17996_v58 = vsub.f32 %v17995_v44, %v12876_v5 }
 0x68f   :  { %v6837_v4 = vmul.f32 %v6261_v35, %v17988_v31  ;;  %v6838_v33 = vmul.f32 %v6261_v35, %v17990_v25  ;;  %v17998_v31 = vsub.f32 %v17997_v40, %v12876_v5  ;;  %v17999_v25 = vld [vmem:[#allocation259_spill] sm:$0xff]  ;;  %v18002_v5 = vld [vmem:[#allocation260_spill] sm:$0xff] }
 0x691   :  { %v7797_v23 = vadd.f32 %v17991_v37, %v6837_v4  ;;  %v7798_v56 = vadd.f32 %v17991_v37, %v6838_v33  ;;  %v5273_v33 = vmul.f32 %v17999_v25, %v17999_v25  ;;  %v18000_v37 = vld [vmem:[#allocation43_spill] sm:$0xff] }
 0x692   :  { %v6341_v16 = vpop.permute.xlu0 %6340 }
 0x693   :  { %8037 = vst [vmem:[#allocation2 + $0x70] sm:$0xff] %v7797_v23  ;;  %8038 = vst [vmem:[#allocation2 + $0x78] sm:$0xff] %v7798_v56  ;;  %v6869_v35 = vmul.f32 %v6341_v16, %v17996_v58  ;;  %v6870_v4 = vmul.f32 %v6341_v16, %v17998_v31  ;;  %v5393_v44 = vsub.f32 %v5153_v53, %v5273_v33  ;;  %v18001_v58 = vld [vmem:[#allocation263_spill] sm:$0xff]  ;;  %v18005_v33 = vld [vmem:[#allocation269_spill] sm:$0xff] }
 0x694   :  { %v5169_v41 = vmul.f32 0.0051020407, %v18001_v58  ;;  %v5289_v16 = vmul.f32 %v18002_v5, %v18002_v5 }
 0x695   :  { %v7829_v23 = vadd.f32 %v18000_v37, %v6869_v35  ;;  %v7830_v56 = vadd.f32 %v18000_v37, %v6870_v4  ;;  %v5633_v40 = vadd.f32 0.001, %v5393_v44  ;;  %v5156_v37 = vmul.f32 0.0051020407, %v18005_v33 }
 0x696   :  { %v5409_v31 = vsub.f32 %v5169_v41, %v5289_v16  ;;  %v5529_v16 = vld [vmem:[%s16661_s6 + $0xd0] sm:$0xff] }
 0x697   :  { %8069 = vst [vmem:[#allocation2 + $0x170] sm:$0xff] %v7829_v23  ;;  %8070 = vst [vmem:[#allocation2 + $0x178] sm:$0xff] %v7830_v56  ;;  %9289 = vrsqrt.f32 %v5633_v40  ;;  %v18007_v40 = vld [vmem:[#allocation265_spill] sm:$0xff] }
 0x698   :  { %4979 = vadd.xlane.f32.xlu1 %v13456_v8  ;;  %v5649_v35 = vadd.f32 0.001, %v5409_v31  ;;  %v5276_v31 = vmul.f32 %v18007_v40, %v18007_v40 }
 0x699   :  { %v13779_v4 = vpop.f32.mrb[112].mxu1 }
 0x69a   :  { %9291 = vrsqrt.f32 %v5649_v35  ;;  %18003 = vst [vmem:[#allocation39_spill] sm:$0xff] %v13779_v4  ;;  %v13781_v53 = vpop.f32.mrb[113].mxu1  ;;  %v4687_v52 = vmul.f32 %v13779_v4, %v13779_v4  ;;  %v5396_v35 = vsub.f32 %v5156_v37, %v5276_v31  ;;  %v18013_v31 = vld [vmem:[#allocation18_spill] sm:$0xff] }
 0x69b   :  { %18004 = vst [vmem:[#allocation255_spill] sm:$0xff] %v13781_v53  ;;  %v13787_v54 = vadd.f32 %v13781_v53, %v13779_v4  ;;  %v4688_v8 = vmul.f32 %v13781_v53, %v13781_v53 }
 0x69c   :  { %4265 = vadd.xlane.f32.xlu1 %v13544_v24  ;;  %v5513_v24 = vld [vmem:[%s16661_s6 + $0x50] sm:$0xff] }
 0x69d   :  { %v13797_v44 = vadd.f32 %v4688_v8, %v4687_v52  ;;  %v18010_v52 = vld [vmem:[#allocation267_spill] sm:$0xff]  ;;  %v9147_v8 = vld [vmem:[%s16660_s5 + $0x280] ss:$8 sps:$4 sm:$0xff]  }
 0x69e   :  { %3863 = vmatmul.mubr.bf16.gmra.mrb[128].mxu1 %v9147_v8 }
 0x6a1   :  { %v9290_v41 = vpop.eup %9289 }
 0x6a2   :  { %v5873_v56 = vmul.f32 %v9290_v41, %v5513_v24  ;;  %v5636_v24 = vadd.f32 0.001, %v5396_v35 }
 0x6a4   :  { %v9292_v58 = vpop.eup %9291  ;;  %9293 = vrsqrt.f32 %v5636_v24 }
 0x6a5   :  { %v5889_v42 = vmul.f32 %v9292_v58, %v5529_v16  ;;  %v18011_v58 = vld [vmem:[#allocation15_spill] sm:$0xff] }
 0x6ab   :  { %v13795_v23 = vpop.xlane.xlu1 %4967 }
 0x6ac   :  { %18006 = vst [vmem:[#allocation251_spill] sm:$0xff] %v13795_v23  ;;  %4268 = vadd.xlane.f32.xlu0 %v13565_v63  ;;  %v5292_v63 = vmul.f32 %v18010_v52, %v18010_v52  ;;  %v18050_v23 = vld [vmem:[#allocation30_spill] sm:$0xff] }
 0x6ad   :  { %6275 = vperm.xlu1 %8843, %v5873_v56  }
 0x6ae   :  { %v5412_v37 = vsub.f32 %v5172_v51, %v5292_v63  ;;  %v18015_v51 = vld [vmem:[#allocation28_spill] sm:$0xff] }
 0x6af   :  { %v4254_v33 = vpop.xlane.xlu1 %4253 }
 0x6b0   :  { %v13806_v29 = vmul.f32 0.0051020407, %v4254_v33  ;;  %4988 = vadd.xlane.f32.xlu0 %v13575_v14  ;;  %v18012_v14 = vsub.f32 %v18011_v58, %v17931_v7  ;;  %v5652_v41 = vadd.f32 0.001, %v5412_v37  ;;  %v18016_v58 = vld [vmem:[#allocation123_spill] sm:$0xff]  ;;  %v9294_v37 = vpop.eup %9293 }
 0x6b1   :  { %6355 = vperm.xlu1 %8843, %v5889_v42   ;;  %v18014_v42 = vsub.f32 %v18013_v31, %v17931_v7  ;;  %v18017_v7 = vsub.f32 %v18016_v58, %v17934_v1 }
 0x6b2   :  { %18009 = vst [vmem:[#allocation105_spill] sm:$0xff] %v13806_v29  ;;  %9295 = vrsqrt.f32 %v5652_v41  ;;  %v5532_v41 = vld [vmem:[%s16661_s6 + $0xe8] sm:$0xff] }
 0x6b3   :  { %v6256_v56 = vpop.permute.xlu1 %6255 }
 0x6b4   :  { %v6835_v16 = vmul.f32 %v6256_v56, %v18012_v14  ;;  %v6836_v33 = vmul.f32 %v6256_v56, %v18014_v42  ;;  %v18018_v14 = vld [vmem:[#allocation125_spill] sm:$0xff] }
 0x6b5   :  { %v18019_v31 = vsub.f32 %v18018_v14, %v17934_v1 }
 0x6b6   :  { %v7795_v35 = vadd.f32 %v18015_v51, %v6835_v16  ;;  %v7796_v63 = vadd.f32 %v18015_v51, %v6836_v33  ;;  %v5516_v33 = vld [vmem:[%s16661_s6 + $0x68] sm:$0xff] }
 0x6b7   :  { %v6336_v19 = vpop.permute.xlu1 %6335  ;;  %v5876_v1 = vmul.f32 %v9294_v37, %v5516_v33  ;;  %v13860_v33 = vpop.f32.mrb[114].mxu1 }
 0x6b8   :  { %8035 = vst [vmem:[#allocation2 + $0x60] sm:$0xff] %v7795_v35  ;;  %8036 = vst [vmem:[#allocation2 + $0x68] sm:$0xff] %v7796_v63  ;;  %v6867_v56 = vmul.f32 %v6336_v19, %v18017_v7  ;;  %v6868_v42 = vmul.f32 %v6336_v19, %v18019_v31  ;;  %v18023_v7 = vld [vmem:[#allocation158_spill] sm:$0xff]  ;;  %v18025_v31 = vld [vmem:[#allocation160_spill] sm:$0xff] }
 0x6b9   :  { %18028 = vst [vmem:[#allocation24_spill] sm:$0xff] %v13860_v33  ;;  %v18029_v19 = vld [vmem:[#allocation268_spill] sm:$0xff] }
 0x6ba   :  { %v7827_v38 = vadd.f32 %v18020_v18, %v6867_v56  ;;  %v7828_v16 = vadd.f32 %v18020_v18, %v6868_v42  ;;  %v18024_v56 = vsub.f32 %v18023_v7, %v12916_v21  ;;  %v18026_v42 = vsub.f32 %v18025_v31, %v12916_v21  ;;  %v18033_v7 = vld [vmem:[#allocation161_spill] sm:$0xff] }
 0x6bb   :  { %v5155_v51 = vmul.f32 0.0051020407, %v18029_v19 }
 0x6bc   :  { %8067 = vst [vmem:[#allocation2 + $0x160] sm:$0xff] %v7827_v38  ;;  %8068 = vst [vmem:[#allocation2 + $0x168] sm:$0xff] %v7828_v16  ;;  %v9296_v35 = vpop.eup %9295  ;;  %v18027_v16 = vld [vmem:[#allocation29_spill] sm:$0xff] }
 0x6bd   :  { %v5892_v63 = vmul.f32 %v9296_v35, %v5532_v41  ;;  %v4689_v35 = vmul.f32 %v13860_v33, %v13860_v33  ;;  %v13865_v41 = vpop.f32.mrb[115].mxu1 }
 0x6be   :  { %18030 = vst [vmem:[#allocation10_spill] sm:$0xff] %v13865_v41  ;;  %v13875_v31 = vadd.f32 %v13865_v41, %v13860_v33  ;;  %v4690_v19 = vmul.f32 %v13865_v41, %v13865_v41 }
 0x6bf   :  { %v4257_v8 = vpop.xlane.xlu0 %4256 }
 0x6c0   :  { %v13838_v24 = vmul.f32 0.0051020407, %v4257_v8  ;;  %v13884_v27 = vadd.f32 %v4690_v19, %v4689_v35  ;;  %v5515_v19 = vld [vmem:[%s16661_s6 + $0x60] sm:$0xff] }
 0x6c2   :  { %18021 = vst [vmem:[#allocation241_spill] sm:$0xff] %v13838_v24 }
 0x6c3   :  { %v13847_v18 = vpop.xlane.xlu0 %4976 }
 0x6c4   :  { %18022 = vst [vmem:[#allocation106_spill] sm:$0xff] %v13847_v18  ;;  %v13890_v18 = vpop.f32.mrb[116].mxu1 }
 0x6c5   :  { %18039 = vst [vmem:[#allocation245_spill] sm:$0xff] %v13890_v18 }
 0x6c6   :  { %6290 = vperm.xlu0 %8844, %v5876_v1  }
 0x6ca   :  { %6370 = vperm.xlu0 %8844, %v5892_v63   ;;  %v18031_v63 = vld [vmem:[#allocation159_spill] sm:$0xff] }
 0x6cb   :  { %v6271_v58 = vpop.permute.xlu0 %6270  ;;  %v18032_v21 = vsub.f32 %v18031_v63, %v12930_v2 }
 0x6cc   :  { %v6841_v14 = vmul.f32 %v6271_v58, %v18024_v56  ;;  %v6842_v38 = vmul.f32 %v6271_v58, %v18026_v42  ;;  %v18034_v56 = vsub.f32 %v18033_v7, %v12930_v2  ;;  %v18035_v42 = vld [vmem:[#allocation264_spill] sm:$0xff]  ;;  %v18038_v2 = vld [vmem:[#allocation266_spill] sm:$0xff] }
 0x6ce   :  { %v7801_v8 = vadd.f32 %v18027_v16, %v6841_v14  ;;  %v7802_v37 = vadd.f32 %v18027_v16, %v6842_v38  ;;  %v5275_v38 = vmul.f32 %v18035_v42, %v18035_v42  ;;  %v18036_v16 = vld [vmem:[#allocation45_spill] sm:$0xff] }
 0x6cf   :  { %v6351_v1 = vpop.permute.xlu0 %6350 }
 0x6d0   :  { %8041 = vst [vmem:[#allocation2 + $0x90] sm:$0xff] %v7801_v8  ;;  %8042 = vst [vmem:[#allocation2 + $0x98] sm:$0xff] %v7802_v37  ;;  %v6873_v58 = vmul.f32 %v6351_v1, %v18032_v21  ;;  %v6874_v14 = vmul.f32 %v6351_v1, %v18034_v56  ;;  %v5395_v63 = vsub.f32 %v5155_v51, %v5275_v38  ;;  %v18037_v21 = vld [vmem:[#allocation270_spill] sm:$0xff]  ;;  %v18041_v38 = vld [vmem:[#allocation279_spill] sm:$0xff] }
 0x6d1   :  { %v5171_v59 = vmul.f32 0.0051020407, %v18037_v21  ;;  %v5291_v1 = vmul.f32 %v18038_v2, %v18038_v2  ;;  %v5531_v21 = vld [vmem:[%s16661_s6 + $0xe0] sm:$0xff] }
 0x6d2   :  { %v7833_v8 = vadd.f32 %v18036_v16, %v6873_v58  ;;  %v7834_v37 = vadd.f32 %v18036_v16, %v6874_v14  ;;  %v5635_v7 = vadd.f32 0.001, %v5395_v63  ;;  %v13892_v58 = vpop.f32.mrb[117].mxu1  ;;  %v4691_v14 = vmul.f32 %v13890_v18, %v13890_v18 }
 0x6d3   :  { %v5411_v56 = vsub.f32 %v5171_v59, %v5291_v1  ;;  %18040 = vst [vmem:[#allocation9_spill] sm:$0xff] %v13892_v58  ;;  %v13896_v35 = vadd.f32 %v13892_v58, %v13890_v18  ;;  %v5158_v16 = vmul.f32 0.0051020407, %v18041_v38  ;;  %v18043_v1 = vld [vmem:[#allocation273_spill] sm:$0xff]  ;;  %v18045_v38 = vld [vmem:[#allocation275_spill] sm:$0xff] }
 0x6d4   :  { %8073 = vst [vmem:[#allocation2 + $0x190] sm:$0xff] %v7833_v8  ;;  %8074 = vst [vmem:[#allocation2 + $0x198] sm:$0xff] %v7834_v37  ;;  %9297 = vrsqrt.f32 %v5635_v7  ;;  %v5278_v7 = vmul.f32 %v18043_v1, %v18043_v1 }
 0x6d5   :  { %4985 = vadd.xlane.f32.xlu1 %v13553_v62  ;;  %v5651_v51 = vadd.f32 0.001, %v5411_v56  ;;  %v4692_v62 = vmul.f32 %v13892_v58, %v13892_v58 }
 0x6d6   :  { %v5398_v56 = vsub.f32 %v5158_v16, %v5278_v7 }
 0x6d7   :  { %9299 = vrsqrt.f32 %v5651_v51  ;;  %v13902_v59 = vadd.f32 %v4692_v62, %v4691_v14  ;;  %v18044_v51 = vld [vmem:[#allocation281_spill] sm:$0xff] }
 0x6d8   :  { %v5174_v14 = vmul.f32 0.0051020407, %v18044_v51  ;;  %v18046_v51 = vld [vmem:[#allocation154_spill] sm:$0xff] }
 0x6d9   :  { %4271 = vadd.xlane.f32.xlu1 %v13653_v10 }
 0x6de   :  { %v9298_v10 = vpop.eup %9297 }
 0x6df   :  { %v5875_v37 = vmul.f32 %v9298_v10, %v5515_v19  ;;  %v9148_v10 = vld [vmem:[%s16660_s5 + $0x294] ss:$8 sps:$4 sm:$0xff]  }
 0x6e0   :  { %8680 = vmatprep.mubr.msk.bf16.mxu1 %vm3249_vm1, %v9148_v10 }
 0x6e1   :  { %v9300_v63 = vpop.eup %9299 }
 0x6e2   :  { %v5891_v24 = vmul.f32 %v9300_v63, %v5531_v21  ;;  %v5638_v21 = vadd.f32 0.001, %v5398_v56  ;;  %v18051_v56 = vld [vmem:[#allocation155_spill] sm:$0xff]  ;;  %v18053_v63 = vld [vmem:[#allocation157_spill] sm:$0xff] }
 0x6e4   :  { %9301 = vrsqrt.f32 %v5638_v21  ;;  %v5518_v21 = vld [vmem:[%s16661_s6 + $0x78] sm:$0xff] }
 0x6e8   :  { %v13908_v8 = vpop.xlane.xlu1 %4973 }
 0x6e9   :  { %18042 = vst [vmem:[#allocation40_spill] sm:$0xff] %v13908_v8  ;;  %4274 = vadd.xlane.f32.xlu0 %v13676_v47  ;;  %v9150_v47 = vld [vmem:[%s16660_s5 + $0x290] ss:$8 sps:$4 sm:$0xff]  }
 0x6ea   :  { %6285 = vperm.xlu1 %8843, %v5875_v37   ;;  %v5294_v37 = vmul.f32 %v18045_v38, %v18045_v38  ;;  %3873 = vmatmul.mubr.bf16.gmra.mrb[132].mxu1 %v9150_v47  ;;  %v18048_v8 = vld [vmem:[#allocation156_spill] sm:$0xff] }
 0x6eb   :  { %v18049_v3 = vsub.f32 %v18048_v8, %v17965_v46 }
 0x6ec   :  { %v4260_v62 = vpop.xlane.xlu1 %4259  ;;  %v5414_v7 = vsub.f32 %v5174_v14, %v5294_v37  ;;  %v18052_v14 = vsub.f32 %v18051_v56, %v17968_v17 }
 0x6ed   :  { %v13920_v19 = vmul.f32 0.0051020407, %v4260_v62  ;;  %4994 = vadd.xlane.f32.xlu0 %v13686_v6  ;;  %v18047_v62 = vsub.f32 %v18046_v51, %v17965_v46  ;;  %v18054_v51 = vsub.f32 %v18053_v63, %v17968_v17 }
 0x6ee   :  { %6365 = vperm.xlu1 %8843, %v5891_v24   ;;  %v5654_v16 = vadd.f32 0.001, %v5414_v7  ;;  %v9302_v8 = vpop.eup %9301 }
 0x6ef   :  { %v5878_v17 = vmul.f32 %v9302_v8, %v5518_v21  ;;  %v18064_v21 = vld [vmem:[#allocation31_spill] sm:$0xff] }
 0x6f0   :  { %v6266_v6 = vpop.permute.xlu1 %6265  ;;  %9303 = vrsqrt.f32 %v5654_v16  ;;  %v5534_v16 = vld [vmem:[%s16661_s6 + $0xf8] sm:$0xff] }
 0x6f1   :  { %v6839_v29 = vmul.f32 %v6266_v6, %v18047_v62  ;;  %v6840_v24 = vmul.f32 %v6266_v6, %v18049_v3 }
 0x6f3   :  { %v7799_v10 = vadd.f32 %v18050_v23, %v6839_v29  ;;  %v7800_v47 = vadd.f32 %v18050_v23, %v6840_v24 }
 0x6f4   :  { %v6346_v55 = vpop.permute.xlu1 %6345 }
 0x6f5   :  { %8039 = vst [vmem:[#allocation2 + $0x80] sm:$0xff] %v7799_v10  ;;  %8040 = vst [vmem:[#allocation2 + $0x88] sm:$0xff] %v7800_v47  ;;  %v6871_v37 = vmul.f32 %v6346_v55, %v18052_v14  ;;  %v6872_v62 = vmul.f32 %v6346_v55, %v18054_v51  ;;  %v13963_v10 = vpop.f32.mrb[118].mxu1  ;;  %v18059_v47 = vld [vmem:[#allocation166_spill] sm:$0xff] }
 0x6f6   :  { %18058 = vst [vmem:[#allocation25_spill] sm:$0xff] %v13963_v10  ;;  %v18060_v56 = vsub.f32 %v18059_v47, %v12973_v49  ;;  %v18066_v47 = vld [vmem:[#allocation167_spill] sm:$0xff] }
 0x6f7   :  { %v7831_v46 = vadd.f32 %v18055_v11, %v6871_v37  ;;  %v7832_v3 = vadd.f32 %v18055_v11, %v6872_v62  ;;  %v18061_v37 = vld [vmem:[#allocation168_spill] sm:$0xff] }
 0x6f8   :  { %v18062_v51 = vsub.f32 %v18061_v37, %v12973_v49 }
 0x6f9   :  { %8071 = vst [vmem:[#allocation2 + $0x180] sm:$0xff] %v7831_v46  ;;  %8072 = vst [vmem:[#allocation2 + $0x188] sm:$0xff] %v7832_v3  ;;  %v13971_v46 = vpop.f32.mrb[119].mxu1  ;;  %v4693_v3 = vmul.f32 %v13963_v10, %v13963_v10 }
 0x6fa   :  { %v9304_v63 = vpop.eup %9303  ;;  %18063 = vst [vmem:[#allocation119_spill] sm:$0xff] %v13971_v46  ;;  %v4694_v8 = vmul.f32 %v13971_v46, %v13971_v46 }
 0x6fb   :  { %v5894_v6 = vmul.f32 %v9304_v63, %v5534_v16  ;;  %v18065_v16 = vld [vmem:[#allocation278_spill] sm:$0xff] }
 0x6fc   :  { %v4263_v29 = vpop.xlane.xlu0 %4262 }
 0x6fd   :  { %v13949_v23 = vmul.f32 0.0051020407, %v4263_v29  ;;  %v13977_v29 = vadd.f32 %v13971_v46, %v13963_v10 }
 0x6ff   :  { %18056 = vst [vmem:[#allocation13_spill] sm:$0xff] %v13949_v23 }
 0x700   :  { %v13958_v11 = vpop.xlane.xlu0 %4982 }
 0x701   :  { %18057 = vst [vmem:[#allocation16_spill] sm:$0xff] %v13958_v11 }
 0x703   :  { %6300 = vperm.xlu0 %8844, %v5878_v17  }
 0x707   :  { %6380 = vperm.xlu0 %8844, %v5894_v6   ;;  %v5157_v6 = vmul.f32 0.0051020407, %v18065_v16 }
 0x708   :  { %v6281_v24 = vpop.permute.xlu0 %6280 }
 0x709   :  { %v6845_v14 = vmul.f32 %v6281_v24, %v18060_v56  ;;  %v6846_v62 = vmul.f32 %v6281_v24, %v18062_v51  ;;  %v13984_v24 = vadd.f32 %v4694_v8, %v4693_v3  ;;  %v18067_v56 = vsub.f32 %v18066_v47, %v17972_v20  ;;  %v18068_v51 = vld [vmem:[#allocation169_spill] sm:$0xff]  ;;  %v18072_v3 = vld [vmem:[#allocation280_spill] sm:$0xff] }
 0x70a   :  { %v18069_v55 = vsub.f32 %v18068_v51, %v17972_v20  ;;  %v5173_v8 = vmul.f32 0.0051020407, %v18072_v3  ;;  %v18076_v51 = vld [vmem:[#allocation285_spill] sm:$0xff] }
 0x70b   :  { %v7805_v17 = vadd.f32 %v18064_v21, %v6845_v14  ;;  %v7806_v63 = vadd.f32 %v18064_v21, %v6846_v62  ;;  %v5277_v14 = vmul.f32 %v18070_v48, %v18070_v48 }
 0x70c   :  { %v6361_v49 = vpop.permute.xlu0 %6360 }
 0x70d   :  { %8045 = vst [vmem:[#allocation2 + $0xb0] sm:$0xff] %v7805_v17  ;;  %8046 = vst [vmem:[#allocation2 + $0xb8] sm:$0xff] %v7806_v63  ;;  %v6877_v37 = vmul.f32 %v6361_v49, %v18067_v56  ;;  %v6878_v7 = vmul.f32 %v6361_v49, %v18069_v55  ;;  %v5397_v16 = vsub.f32 %v5157_v6, %v5277_v14  ;;  %v18073_v17 = vld [vmem:[#allocation274_spill] sm:$0xff]  ;;  %v5176_v14 = vmul.f32 0.0051020407, %v18076_v51 }
 0x70e   :  { %v5293_v63 = vmul.f32 %v18073_v17, %v18073_v17 }
 0x70f   :  { %v7837_v62 = vadd.f32 %v18071_v13, %v6877_v37  ;;  %v7838_v21 = vadd.f32 %v18071_v13, %v6878_v7  ;;  %v5637_v47 = vadd.f32 0.001, %v5397_v16  ;;  %v5517_v37 = vld [vmem:[%s16661_s6 + $0x70] sm:$0xff]  ;;  %v9151_v16 = vld [vmem:[%s16660_s5 + $0x2a4] ss:$8 sps:$4 sm:$0xff]  }
 0x710   :  { %v5413_v20 = vsub.f32 %v5173_v8, %v5293_v63  ;;  %v5533_v8 = vld [vmem:[%s16661_s6 + $0xf0] sm:$0xff]  ;;  %v9153_v63 = vld [vmem:[%s16660_s5 + $0x2a0] ss:$8 sps:$4 sm:$0xff]   ;;  %8681 = vmatprep.mubr.msk.bf16.mxu1 %vm3249_vm1, %v9151_v16 }
 0x711   :  { %8077 = vst [vmem:[#allocation2 + $0x1b0] sm:$0xff] %v7837_v62  ;;  %8078 = vst [vmem:[#allocation2 + $0x1b8] sm:$0xff] %v7838_v21  ;;  %9305 = vrsqrt.f32 %v5637_v47  ;;  %v18077_v47 = vld [vmem:[#allocation283_spill] sm:$0xff]  ;;  %3883 = vmatmul.mubr.bf16.gmra.mrb[136].mxu1 %v9153_v63 }
 0x712   :  { %4991 = vadd.xlane.f32.xlu1 %v13662_v26  ;;  %v14001_v55 = vpop.f32.mrb[120].mxu1  ;;  %v5653_v7 = vadd.f32 0.001, %v5413_v20  ;;  %v5296_v20 = vmul.f32 %v18077_v47, %v18077_v47 }
 0x713   :  { %18074 = vst [vmem:[#allocation120_spill] sm:$0xff] %v14001_v55  ;;  %v4695_v49 = vmul.f32 %v14001_v55, %v14001_v55  ;;  %v14005_v13 = vpop.f32.mrb[121].mxu1 }
 0x714   :  { %18075 = vst [vmem:[#allocation226_spill] sm:$0xff] %v14005_v13  ;;  %v14009_v6 = vadd.f32 %v14005_v13, %v14001_v55  ;;  %v4696_v26 = vmul.f32 %v14005_v13, %v14005_v13  ;;  %9307 = vrsqrt.f32 %v5653_v7 }
 0x716   :  { %4277 = vadd.xlane.f32.xlu1 %v13764_v22  ;;  %v14013_v56 = vadd.f32 %v4696_v26, %v4695_v49  ;;  %v5416_v49 = vsub.f32 %v5176_v14, %v5296_v20  ;;  %v18080_v14 = vld [vmem:[#allocation164_spill] sm:$0xff] }
 0x717   :  { %v18082_v20 = vld [vmem:[#allocation32_spill] sm:$0xff] }
 0x718   :  { %v5656_v51 = vadd.f32 0.001, %v5416_v49 }
 0x71a   :  { %9309 = vrsqrt.f32 %v5656_v51 }
 0x71b   :  { %v9306_v22 = vpop.eup %9305 }
 0x71c   :  { %v5877_v21 = vmul.f32 %v9306_v22, %v5517_v37 }
 0x71e   :  { %v9308_v3 = vpop.eup %9307 }
 0x71f   :  { %v5893_v26 = vmul.f32 %v9308_v3, %v5533_v8  ;;  %v18081_v3 = vsub.f32 %v18080_v14, %v17999_v25  ;;  %v5536_v14 = vld [vmem:[%s16661_s6 + $0x108] sm:$0xff] }
 0x724   :  { %v9310_v51 = vpop.eup %9309 }
 0x725   :  { %v14019_v62 = vpop.xlane.xlu1 %4979 }
 0x726   :  { %4280 = vadd.xlane.f32.xlu0 %v13787_v54  ;;  %v18083_v54 = vld [vmem:[#allocation163_spill] sm:$0xff] }
 0x727   :  { %6295 = vperm.xlu1 %8843, %v5877_v21   ;;  %v18078_v21 = vld [vmem:[#allocation162_spill] sm:$0xff]  ;;  %v18084_v49 = vsub.f32 %v18083_v54, %v18002_v5 }
 0x728   :  { %v18079_v16 = vsub.f32 %v18078_v21, %v17999_v25  ;;  %v18086_v21 = vsub.f32 %v18085_v61, %v18002_v5  ;;  %v5896_v5 = vmul.f32 %v9310_v51, %v5536_v14  ;;  %v18096_v51 = vld [vmem:[#allocation33_spill] sm:$0xff]  ;;  %v18097_v61 = vld [vmem:[#allocation284_spill] sm:$0xff] }
 0x729   :  { %v4266_v7 = vpop.xlane.xlu1 %4265  ;;  %v5175_v54 = vmul.f32 0.0051020407, %v18097_v61 }
 0x72a   :  { %v14034_v22 = vmul.f32 0.0051020407, %v4266_v7  ;;  %5000 = vadd.xlane.f32.xlu0 %v13797_v44 }
 0x72b   :  { %6375 = vperm.xlu1 %8843, %v5893_v26  }
 0x72d   :  { %v6276_v11 = vpop.permute.xlu1 %6275 }
 0x72e   :  { %v6843_v63 = vmul.f32 %v6276_v11, %v18079_v16  ;;  %v6844_v8 = vmul.f32 %v6276_v11, %v18081_v3 }
 0x730   :  { %v7803_v7 = vadd.f32 %v18082_v20, %v6843_v63  ;;  %v7804_v44 = vadd.f32 %v18082_v20, %v6844_v8 }
 0x731   :  { %v6356_v26 = vpop.permute.xlu1 %6355 }
 0x732   :  { %8043 = vst [vmem:[#allocation2 + $0xa0] sm:$0xff] %v7803_v7  ;;  %8044 = vst [vmem:[#allocation2 + $0xa8] sm:$0xff] %v7804_v44  ;;  %v6875_v37 = vmul.f32 %v6356_v26, %v18084_v49  ;;  %v6876_v16 = vmul.f32 %v6356_v26, %v18086_v21  ;;  %v18092_v26 = vld [vmem:[#allocation174_spill] sm:$0xff] }
 0x733   :  { %v18093_v49 = vsub.f32 %v18092_v26, %v18007_v40 }
 0x734   :  { %v7835_v23 = vadd.f32 %v18087_v12, %v6875_v37  ;;  %v7836_v25 = vadd.f32 %v18087_v12, %v6876_v16  ;;  %v14068_v12 = vpop.f32.mrb[122].mxu1  ;;  %v18094_v16 = vld [vmem:[#allocation176_spill] sm:$0xff] }
 0x735   :  { %18090 = vst [vmem:[#allocation231_spill] sm:$0xff] %v14068_v12  ;;  %v4697_v3 = vmul.f32 %v14068_v12, %v14068_v12 }
 0x736   :  { %8075 = vst [vmem:[#allocation2 + $0x1a0] sm:$0xff] %v7835_v23  ;;  %8076 = vst [vmem:[#allocation2 + $0x1a8] sm:$0xff] %v7836_v25  ;;  %v14070_v23 = vpop.f32.mrb[123].mxu1  ;;  %v18095_v25 = vsub.f32 %v18094_v16, %v18007_v40 }
 0x737   :  { %18091 = vst [vmem:[#allocation261_spill] sm:$0xff] %v14070_v23  ;;  %v14076_v8 = vadd.f32 %v14070_v23, %v14068_v12  ;;  %v4698_v20 = vmul.f32 %v14070_v23, %v14070_v23 }
 0x739   :  { %v4269_v11 = vpop.xlane.xlu0 %4268  ;;  %v14080_v44 = vadd.f32 %v4698_v20, %v4697_v3  ;;  %v18099_v3 = vsub.f32 %v18098_v34, %v18010_v52 }
 0x73a   :  { %v14057_v63 = vmul.f32 0.0051020407, %v4269_v11 }
 0x73c   :  { %18088 = vst [vmem:[#allocation41_spill] sm:$0xff] %v14057_v63  ;;  %v18102_v63 = vld [vmem:[#allocation282_spill] sm:$0xff] }
 0x73d   :  { %v14066_v37 = vpop.xlane.xlu0 %4988  ;;  %v5295_v40 = vmul.f32 %v18102_v63, %v18102_v63 }
 0x73e   :  { %18089 = vst [vmem:[#allocation258_spill] sm:$0xff] %v14066_v37  ;;  %v18100_v37 = vld [vmem:[#allocation177_spill] sm:$0xff] }
 0x73f   :  { %v18101_v26 = vsub.f32 %v18100_v37, %v18010_v52 }
 0x740   :  { %6390 = vperm.xlu0 %8844, %v5896_v5  }
 0x744   :  { %v14102_v61 = vpop.f32.mrb[124].mxu1 }
 0x745   :  { %v6291_v7 = vpop.permute.xlu0 %6290  ;;  %18104 = vst [vmem:[#allocation11_spill] sm:$0xff] %v14102_v61  ;;  %v4699_v34 = vmul.f32 %v14102_v61, %v14102_v61 }
 0x746   :  { %v6849_v21 = vmul.f32 %v6291_v7, %v18093_v49  ;;  %v6850_v11 = vmul.f32 %v6291_v7, %v18095_v25  ;;  %v18103_v7 = vld [vmem:[#allocation49_spill] sm:$0xff]  ;;  %v5415_v25 = vsub.f32 %v5175_v54, %v5295_v40 }
 0x748   :  { %v7809_v14 = vadd.f32 %v18096_v51, %v6849_v21  ;;  %v7810_v5 = vadd.f32 %v18096_v51, %v6850_v11  ;;  %v14106_v11 = vpop.f32.mrb[125].mxu1 }
 0x749   :  { %v6371_v0 = vpop.permute.xlu0 %6370  ;;  %18105 = vst [vmem:[#allocation14_spill] sm:$0xff] %v14106_v11  ;;  %v14110_v52 = vadd.f32 %v14106_v11, %v14102_v61  ;;  %v4700_v37 = vmul.f32 %v14106_v11, %v14106_v11 }
 0x74a   :  { %8049 = vst [vmem:[#allocation2 + $0xd0] sm:$0xff] %v7809_v14  ;;  %8050 = vst [vmem:[#allocation2 + $0xd8] sm:$0xff] %v7810_v5  ;;  %v6881_v20 = vmul.f32 %v6371_v0, %v18099_v3  ;;  %v6882_v49 = vmul.f32 %v6371_v0, %v18101_v26  ;;  %v5655_v0 = vadd.f32 0.001, %v5415_v25  ;;  %v9154_v14 = vld [vmem:[%s16660_s5 + $0x2b4] ss:$8 sps:$4 sm:$0xff]  }
 0x74b   :  { %v14115_v54 = vadd.f32 %v4700_v37, %v4699_v34  ;;  %v5535_v3 = vld [vmem:[%s16661_s6 + $0x100] sm:$0xff]  ;;  %8682 = vmatprep.mubr.msk.bf16.mxu1 %vm3249_vm1, %v9154_v14 }
 0x74c   :  { %v7841_v21 = vadd.f32 %v18103_v7, %v6881_v20  ;;  %v7842_v16 = vadd.f32 %v18103_v7, %v6882_v49  ;;  %9311 = vrsqrt.f32 %v5655_v0  ;;  %v5298_v20 = vmul.f32 %v13128_v36, %v13128_v36  ;;  %v18107_v0 = vld [vmem:[#allocation170_spill] sm:$0xff] }
 0x74d   :  { %v18108_v37 = vsub.f32 %v18107_v0, %v18035_v42 }
 0x74e   :  { %8081 = vst [vmem:[#allocation2 + $0x1d0] sm:$0xff] %v7841_v21  ;;  %8082 = vst [vmem:[#allocation2 + $0x1d8] sm:$0xff] %v7842_v16 }
 0x74f   :  { %4997 = vadd.xlane.f32.xlu1 %v13773_v60  ;;  %v18106_v60 = vld [vmem:[#allocation289_spill] sm:$0xff] }
 0x750   :  { %v5178_v51 = vmul.f32 0.0051020407, %v18106_v60 }
 0x752   :  { %v5418_v26 = vsub.f32 %v5178_v51, %v5298_v20  ;;  %v18109_v51 = vld [vmem:[#allocation172_spill] sm:$0xff] }
 0x753   :  { %4283 = vadd.xlane.f32.xlu1 %v13875_v31  ;;  %v9156_v31 = vld [vmem:[%s16660_s5 + $0x2b0] ss:$8 sps:$4 sm:$0xff]  }
 0x754   :  { %3893 = vmatmul.mubr.bf16.gmra.mrb[140].mxu1 %v9156_v31 }
 0x756   :  { %v9312_v5 = vpop.eup %9311 }
 0x757   :  { %v5895_v40 = vmul.f32 %v9312_v5, %v5535_v3  ;;  %v18111_v5 = vld [vmem:[#allocation34_spill] sm:$0xff] }
 0x75f   :  { %4286 = vadd.xlane.f32.xlu0 %v13896_v35  ;;  %v5658_v35 = vadd.f32 0.001, %v5418_v26  ;;  %v18112_v26 = vld [vmem:[#allocation171_spill] sm:$0xff] }
 0x761   :  { %9313 = vrsqrt.f32 %v5658_v35 }
 0x762   :  { %v14131_v49 = vpop.xlane.xlu1 %4985 }
 0x763   :  { %5006 = vadd.xlane.f32.xlu0 %v13902_v59  ;;  %v18110_v59 = vsub.f32 %v18109_v51, %v18035_v42 }
 0x764   :  { %6385 = vperm.xlu1 %8843, %v5895_v40   ;;  %v18113_v40 = vsub.f32 %v18112_v26, %v18038_v2 }
 0x766   :  { %v4272_v7 = vpop.xlane.xlu1 %4271 }
 0x767   :  { %v14134_v21 = vmul.f32 0.0051020407, %v4272_v7  ;;  %v18114_v7 = vld [vmem:[#allocation173_spill] sm:$0xff] }
 0x768   :  { %v18115_v25 = vsub.f32 %v18114_v7, %v18038_v2  ;;  %v18125_v2 = vld [vmem:[#allocation35_spill] sm:$0xff] }
 0x76a   :  { %v6286_v34 = vpop.permute.xlu1 %6285 }
 0x76b   :  { %v6847_v60 = vmul.f32 %v6286_v34, %v18108_v37  ;;  %v6848_v14 = vmul.f32 %v6286_v34, %v18110_v59  ;;  %v18116_v37 = vld [vmem:[#allocation50_spill] sm:$0xff]  ;;  %v9314_v34 = vpop.eup %9313 }
 0x76d   :  { %v7807_v3 = vadd.f32 %v18111_v5, %v6847_v60  ;;  %v7808_v31 = vadd.f32 %v18111_v5, %v6848_v14  ;;  %v5538_v60 = vld [vmem:[%s16661_s6 + $0x118] sm:$0xff]  ;;  %v14165_v5 = vpop.f32.mrb[126].mxu1 }
 0x76e   :  { %v6366_v20 = vpop.permute.xlu1 %6365  ;;  %v5898_v14 = vmul.f32 %v9314_v34, %v5538_v60  ;;  %18117 = vst [vmem:[#allocation26_spill] sm:$0xff] %v14165_v5  ;;  %v18123_v60 = vld [vmem:[#allocation184_spill] sm:$0xff] }
 0x76f   :  { %8047 = vst [vmem:[#allocation2 + $0xc0] sm:$0xff] %v7807_v3  ;;  %8048 = vst [vmem:[#allocation2 + $0xc8] sm:$0xff] %v7808_v31  ;;  %v6879_v35 = vmul.f32 %v6366_v20, %v18113_v40  ;;  %v6880_v0 = vmul.f32 %v6366_v20, %v18115_v25  ;;  %v4701_v31 = vmul.f32 %v14165_v5, %v14165_v5 }
 0x770   :  { %v5297_v25 = vmul.f32 %v13126_v50, %v13126_v50 }
 0x771   :  { %v7839_v16 = vadd.f32 %v18116_v37, %v6879_v35  ;;  %v7840_v42 = vadd.f32 %v18116_v37, %v6880_v0  ;;  %v18120_v35 = vld [vmem:[#allocation288_spill] sm:$0xff]  ;;  %v18121_v37 = vld [vmem:[#allocation182_spill] sm:$0xff] }
 0x772   :  { %v5177_v7 = vmul.f32 0.0051020407, %v18120_v35  ;;  %v18126_v35 = vld [vmem:[#allocation183_spill] sm:$0xff] }
 0x773   :  { %8079 = vst [vmem:[#allocation2 + $0x1c0] sm:$0xff] %v7839_v16  ;;  %8080 = vst [vmem:[#allocation2 + $0x1c8] sm:$0xff] %v7840_v42  ;;  %v14167_v16 = vpop.f32.mrb[127].mxu1  ;;  %v18122_v42 = vsub.f32 %v18121_v37, %v18043_v1  ;;  %v18127_v28 = vsub.f32 %v18126_v35, %v18045_v38 }
 0x774   :  { %18118 = vst [vmem:[#allocation114_spill] sm:$0xff] %v14167_v16  ;;  %v14175_v20 = vadd.f32 %v14167_v16, %v14165_v5  ;;  %v4702_v26 = vmul.f32 %v14167_v16, %v14167_v16 }
 0x776   :  { %v4275_v51 = vpop.xlane.xlu0 %4274  ;;  %v14179_v40 = vadd.f32 %v4702_v26, %v4701_v31  ;;  %v5417_v31 = vsub.f32 %v5177_v7, %v5297_v25  ;;  %v9157_v7 = vld [vmem:[%s16660_s5 + $0x2c4] ss:$8 sps:$4 sm:$0xff]  }
 0x777   :  { %v14159_v59 = vmul.f32 0.0051020407, %v4275_v51  ;;  %v18124_v51 = vsub.f32 %v18123_v60, %v18043_v1  ;;  %8683 = vmatprep.mubr.msk.bf16.mxu1 %vm3249_vm1, %v9157_v7 }
 0x779   :  { %6400 = vperm.xlu0 %8844, %v5898_v14  }
 0x77a   :  { %v14169_v3 = vpop.xlane.xlu0 %4994 }
 0x77b   :  { %18119 = vst [vmem:[#allocation116_spill] sm:$0xff] %v14169_v3  ;;  %v18174_v3 = vld [vmem:[#allocation193_spill] sm:$0xff] }
 0x782   :  { %v6301_v0 = vpop.permute.xlu0 %6300 }
 0x783   :  { %v6853_v34 = vmul.f32 %v6301_v0, %v18122_v42  ;;  %v6854_v14 = vmul.f32 %v6301_v0, %v18124_v51  ;;  %v18128_v42 = vld [vmem:[#allocation185_spill] sm:$0xff]  ;;  %v18130_v0 = vld [vmem:[#allocation51_spill] sm:$0xff]  ;;  %v14201_v51 = vpop.f32.mrb[128].mxu1 }
 0x784   :  { %v18129_v30 = vsub.f32 %v18128_v42, %v18045_v38  ;;  %18131 = vst [vmem:[#allocation42_spill] sm:$0xff] %v14201_v51  ;;  %v18133_v38 = vld [vmem:[#allocation293_spill] sm:$0xff] }
 0x785   :  { %v7813_v32 = vadd.f32 %v18125_v2, %v6853_v34  ;;  %v7814_v57 = vadd.f32 %v18125_v2, %v6854_v14  ;;  %v5657_v2 = vadd.f32 0.001, %v5417_v31  ;;  %v5180_v25 = vmul.f32 0.0051020407, %v18133_v38  ;;  %v5537_v31 = vld [vmem:[%s16661_s6 + $0x110] sm:$0xff] }
 0x786   :  { %v6381_v26 = vpop.permute.xlu0 %6380 }
 0x787   :  { %8053 = vst [vmem:[#allocation2 + $0xf0] sm:$0xff] %v7813_v32  ;;  %8054 = vst [vmem:[#allocation2 + $0xf8] sm:$0xff] %v7814_v57  ;;  %v6885_v37 = vmul.f32 %v6381_v26, %v18127_v28  ;;  %v6886_v1 = vmul.f32 %v6381_v26, %v18129_v30  ;;  %v4703_v57 = vmul.f32 %v14201_v51, %v14201_v51  ;;  %v14205_v32 = vpop.f32.mrb[129].mxu1  ;;  %9315 = vrsqrt.f32 %v5657_v2  ;;  %v18134_v26 = vld [vmem:[#allocation291_spill] sm:$0xff]  ;;  %v18142_v2 = vld [vmem:[#allocation181_spill] sm:$0xff] }
 0x788   :  { %5003 = vadd.xlane.f32.xlu1 %v13884_v27  ;;  %18132 = vst [vmem:[#allocation17_spill] sm:$0xff] %v14205_v32  ;;  %v14209_v28 = vadd.f32 %v14205_v32, %v14201_v51  ;;  %v4704_v27 = vmul.f32 %v14205_v32, %v14205_v32  ;;  %v5300_v35 = vmul.f32 %v18134_v26, %v18134_v26 }
 0x789   :  { %v7845_v60 = vadd.f32 %v18130_v0, %v6885_v37  ;;  %v7846_v34 = vadd.f32 %v18130_v0, %v6886_v1 }
 0x78a   :  { %v14214_v30 = vadd.f32 %v4704_v27, %v4703_v57  ;;  %v5420_v37 = vsub.f32 %v5180_v25, %v5300_v35  ;;  %v18135_v27 = vld [vmem:[#allocation178_spill] sm:$0xff] }
 0x78b   :  { %8085 = vst [vmem:[#allocation2 + $0x1f0] sm:$0xff] %v7845_v60  ;;  %8086 = vst [vmem:[#allocation2 + $0x1f8] sm:$0xff] %v7846_v34  ;;  %v18136_v38 = vsub.f32 %v18135_v27, %v18070_v48  ;;  %v18143_v34 = vsub.f32 %v18142_v2, %v18073_v17 }
 0x78c   :  { %4289 = vadd.xlane.f32.xlu1 %v13977_v29  ;;  %v9159_v29 = vld [vmem:[%s16660_s5 + $0x2c0] ss:$8 sps:$4 sm:$0xff]  }
 0x78d   :  { %3903 = vmatmul.mubr.bf16.gmra.mrb[144].mxu1 %v9159_v29 }
 0x791   :  { %v9316_v14 = vpop.eup %9315 }
 0x792   :  { %v5897_v42 = vmul.f32 %v9316_v14, %v5537_v31  ;;  %v18139_v31 = vld [vmem:[#allocation36_spill] sm:$0xff] }
 0x798   :  { %4292 = vadd.xlane.f32.xlu0 %v14009_v6  ;;  %v5660_v6 = vadd.f32 0.001, %v5420_v37 }
 0x79a   :  { %9317 = vrsqrt.f32 %v5660_v6 }
 0x79c   :  { %5012 = vadd.xlane.f32.xlu0 %v14013_v56  ;;  %v18137_v56 = vld [vmem:[#allocation180_spill] sm:$0xff] }
 0x79d   :  { %6395 = vperm.xlu1 %8843, %v5897_v42   ;;  %v18138_v7 = vsub.f32 %v18137_v56, %v18070_v48  ;;  %v18140_v42 = vld [vmem:[#allocation179_spill] sm:$0xff]  ;;  %v5540_v48 = vld [vmem:[%s16661_s6 + $0x128] sm:$0xff] }
 0x79e   :  { %v18141_v6 = vsub.f32 %v18140_v42, %v18073_v17 }
 0x79f   :  { %v14231_v1 = vpop.xlane.xlu1 %4991 }
 0x7a3   :  { %v4278_v0 = vpop.xlane.xlu1 %4277 }
 0x7a4   :  { %v14233_v60 = vmul.f32 0.0051020407, %v4278_v0 }
 0x7a7   :  { %v6296_v57 = vpop.permute.xlu1 %6295 }
 0x7a8   :  { %v6851_v25 = vmul.f32 %v6296_v57, %v18136_v38  ;;  %v6852_v14 = vmul.f32 %v6296_v57, %v18138_v7  ;;  %v9318_v38 = vpop.eup %9317  ;;  %v18144_v57 = vld [vmem:[#allocation52_spill] sm:$0xff] }
 0x7a9   :  { %v5900_v7 = vmul.f32 %v9318_v38, %v5540_v48  ;;  %v18150_v48 = vld [vmem:[#allocation290_spill] sm:$0xff] }
 0x7aa   :  { %v7811_v29 = vadd.f32 %v18139_v31, %v6851_v25  ;;  %v7812_v35 = vadd.f32 %v18139_v31, %v6852_v14  ;;  %v14258_v31 = vpop.f32.mrb[130].mxu1 }
 0x7ab   :  { %v6376_v37 = vpop.permute.xlu1 %6375  ;;  %18145 = vst [vmem:[#allocation20_spill] sm:$0xff] %v14258_v31  ;;  %v14262_v17 = vpop.f32.mrb[131].mxu1 }
 0x7ac   :  { %8051 = vst [vmem:[#allocation2 + $0xe0] sm:$0xff] %v7811_v29  ;;  %8052 = vst [vmem:[#allocation2 + $0xe8] sm:$0xff] %v7812_v35  ;;  %v6883_v0 = vmul.f32 %v6376_v37, %v18141_v6  ;;  %v6884_v27 = vmul.f32 %v6376_v37, %v18143_v34  ;;  %v4705_v34 = vmul.f32 %v14258_v31, %v14258_v31 }
 0x7ad   :  { %18147 = vst [vmem:[#allocation262_spill] sm:$0xff] %v14262_v17  ;;  %v14268_v2 = vadd.f32 %v14262_v17, %v14258_v31  ;;  %v4706_v35 = vmul.f32 %v14262_v17, %v14262_v17  ;;  %v18154_v37 = vsub.f32 %v18153_v9, %v18077_v47 }
 0x7ae   :  { %v7843_v25 = vadd.f32 %v18144_v57, %v6883_v0  ;;  %v7844_v56 = vadd.f32 %v18144_v57, %v6884_v27  ;;  %v18149_v27 = vld [vmem:[#allocation292_spill] sm:$0xff]  ;;  %v5299_v57 = vmul.f32 %v18150_v48, %v18150_v48 }
 0x7af   :  { %v14276_v6 = vadd.f32 %v4706_v35, %v4705_v34  ;;  %v5179_v38 = vmul.f32 0.0051020407, %v18149_v27  ;;  %v18155_v34 = vld [vmem:[#allocation53_spill] sm:$0xff] }
 0x7b0   :  { %8083 = vst [vmem:[#allocation2 + $0x1e0] sm:$0xff] %v7843_v25  ;;  %8084 = vst [vmem:[#allocation2 + $0x1e8] sm:$0xff] %v7844_v56 }
 0x7b1   :  { %v5419_v25 = vsub.f32 %v5179_v38, %v5299_v57 }
 0x7b2   :  { %6410 = vperm.xlu0 %8844, %v5900_v7   ;;  %v18151_v7 = vld [vmem:[#allocation188_spill] sm:$0xff] }
 0x7b3   :  { %v4281_v14 = vpop.xlane.xlu0 %4280  ;;  %v5659_v53 = vadd.f32 0.001, %v5419_v25 }
 0x7b4   :  { %v14260_v29 = vmul.f32 0.0051020407, %v4281_v14  ;;  %v18152_v14 = vsub.f32 %v18151_v7, %v18077_v47 }
 0x7b5   :  { %9319 = vrsqrt.f32 %v5659_v53 }
 0x7b6   :  { %18146 = vst [vmem:[#allocation27_spill] sm:$0xff] %v14260_v29 }
 0x7b7   :  { %v14278_v0 = vpop.xlane.xlu0 %5000 }
 0x7b8   :  { %18148 = vst [vmem:[#allocation128_spill] sm:$0xff] %v14278_v0  ;;  %v18172_v0 = vld [vmem:[#allocation192_spill] sm:$0xff] }
 0x7b9   :  { %v18173_v29 = vsub.f32 %v18172_v0, %v13128_v36 }
 0x7bd   :  { %v14292_v27 = vpop.f32.mrb[132].mxu1 }
 0x7be   :  { %18156 = vst [vmem:[#allocation19_spill] sm:$0xff] %v14292_v27  ;;  %v4707_v38 = vmul.f32 %v14292_v27, %v14292_v27  ;;  %v14296_v57 = vpop.f32.mrb[133].mxu1 }
 0x7bf   :  { %v6391_v56 = vpop.permute.xlu0 %6390  ;;  %18157 = vst [vmem:[#allocation259_spill] sm:$0xff] %v14296_v57  ;;  %v14300_v9 = vadd.f32 %v14296_v57, %v14292_v27  ;;  %v9320_v25 = vpop.eup %9319 }
 0x7c0   :  { %v6889_v39 = vmul.f32 %v6391_v56, %v18152_v14  ;;  %v6890_v4 = vmul.f32 %v6391_v56, %v18154_v37  ;;  %v9160_v37 = vld [vmem:[%s16660_s5 + $0x2d4] ss:$8 sps:$4 sm:$0xff]  }
 0x7c1   :  { %5009 = vadd.xlane.f32.xlu1 %v13984_v24  ;;  %v4708_v24 = vmul.f32 %v14296_v57, %v14296_v57  ;;  %v18159_v56 = vld [vmem:[#allocation295_spill] sm:$0xff]  ;;  %8684 = vmatprep.mubr.msk.bf16.mxu1 %vm3249_vm1, %v9160_v37 }
 0x7c2   :  { %v7849_v35 = vadd.f32 %v18155_v34, %v6889_v39  ;;  %v7850_v42 = vadd.f32 %v18155_v34, %v6890_v4  ;;  %v18158_v4 = vld [vmem:[#allocation297_spill] sm:$0xff]  ;;  %v5302_v53 = vmul.f32 %v18159_v56, %v18159_v56 }
 0x7c3   :  { %v14305_v39 = vadd.f32 %v4708_v24, %v4707_v38  ;;  %v5182_v47 = vmul.f32 0.0051020407, %v18158_v4 }
 0x7c4   :  { %8089 = vst [vmem:[#allocation2 + $0x210] sm:$0xff] %v7849_v35  ;;  %8090 = vst [vmem:[#allocation2 + $0x218] sm:$0xff] %v7850_v42  ;;  %v5539_v42 = vld [vmem:[%s16661_s6 + $0x120] sm:$0xff] }
 0x7c5   :  { %4295 = vadd.xlane.f32.xlu1 %v14076_v8  ;;  %v9162_v8 = vld [vmem:[%s16660_s5 + $0x2d0] ss:$8 sps:$4 sm:$0xff]   ;;  %v5422_v7 = vsub.f32 %v5182_v47, %v5302_v53  ;;  %v5899_v14 = vmul.f32 %v9320_v25, %v5539_v42 }
 0x7c6   :  { %3913 = vmatmul.mubr.bf16.gmra.mrb[148].mxu1 %v9162_v8  ;;  %v18161_v8 = vld [vmem:[#allocation186_spill] sm:$0xff] }
 0x7c7   :  { %v18162_v47 = vsub.f32 %v18161_v8, %v18102_v63  ;;  %v14341_v8 = vpop.f32.mrb[134].mxu1 }
 0x7c8   :  { %18166 = vst [vmem:[#allocation263_spill] sm:$0xff] %v14341_v8 }
 0x7d1   :  { %4298 = vadd.xlane.f32.xlu0 %v14110_v52  ;;  %v5662_v52 = vadd.f32 0.001, %v5422_v7 }
 0x7d3   :  { %9321 = vrsqrt.f32 %v5662_v52  ;;  %v18165_v52 = vld [vmem:[#allocation54_spill] sm:$0xff] }
 0x7d5   :  { %5018 = vadd.xlane.f32.xlu0 %v14115_v54  ;;  %v18163_v54 = vld [vmem:[#allocation187_spill] sm:$0xff] }
 0x7d6   :  { %6405 = vperm.xlu1 %8843, %v5899_v14   ;;  %v18164_v42 = vsub.f32 %v18163_v54, %v18102_v63  ;;  %v5542_v14 = vld [vmem:[%s16661_s6 + $0x138] sm:$0xff]  ;;  %v14345_v63 = vpop.f32.mrb[135].mxu1 }
 0x7d7   :  { %18168 = vst [vmem:[#allocation269_spill] sm:$0xff] %v14345_v63  ;;  %v14351_v54 = vadd.f32 %v14345_v63, %v14341_v8 }
 0x7dc   :  { %v14322_v34 = vpop.xlane.xlu1 %4997 }
 0x7dd   :  { %v9322_v7 = vpop.eup %9321 }
 0x7de   :  { %v5902_v4 = vmul.f32 %v9322_v7, %v5542_v14  ;;  %v18171_v14 = vld [vmem:[#allocation294_spill] sm:$0xff] }
 0x7e0   :  { %v4284_v35 = vpop.xlane.xlu1 %4283 }
 0x7e1   :  { %v14324_v38 = vmul.f32 0.0051020407, %v4284_v35 }
 0x7e3   :  { %18160 = vst [vmem:[#allocation43_spill] sm:$0xff] %v14324_v38 }
 0x7e4   :  { %v6386_v37 = vpop.permute.xlu1 %6385 }
 0x7e5   :  { %v6887_v25 = vmul.f32 %v6386_v37, %v18162_v47  ;;  %v6888_v53 = vmul.f32 %v6386_v37, %v18164_v42  ;;  %v4709_v37 = vmul.f32 %v14341_v8, %v14341_v8 }
 0x7e7   :  { %v7847_v35 = vadd.f32 %v18165_v52, %v6887_v25  ;;  %v7848_v24 = vadd.f32 %v18165_v52, %v6888_v53  ;;  %v4710_v25 = vmul.f32 %v14345_v63, %v14345_v63  ;;  %v18170_v53 = vld [vmem:[#allocation296_spill] sm:$0xff]  ;;  %v5301_v52 = vmul.f32 %v18171_v14, %v18171_v14 }
 0x7e8   :  { %v5181_v7 = vmul.f32 0.0051020407, %v18170_v53  ;;  %v14375_v53 = vpop.f32.mrb[136].mxu1 }
 0x7e9   :  { %8087 = vst [vmem:[#allocation2 + $0x200] sm:$0xff] %v7847_v35  ;;  %8088 = vst [vmem:[#allocation2 + $0x208] sm:$0xff] %v7848_v24  ;;  %v18175_v24 = vsub.f32 %v18174_v3, %v13128_v36 }
 0x7ea   :  { %v5421_v35 = vsub.f32 %v5181_v7, %v5301_v52  ;;  %18177 = vst [vmem:[#allocation271_spill] sm:$0xff] %v14375_v53  ;;  %v4711_v7 = vmul.f32 %v14375_v53, %v14375_v53  ;;  %v14379_v52 = vpop.f32.mrb[137].mxu1 }
 0x7eb   :  { %6420 = vperm.xlu0 %8844, %v5902_v4   ;;  %18178 = vst [vmem:[#allocation267_spill] sm:$0xff] %v14379_v52  ;;  %v14383_v36 = vadd.f32 %v14379_v52, %v14375_v53 }
 0x7ec   :  { %v4287_v41 = vpop.xlane.xlu0 %4286  ;;  %v5661_v58 = vadd.f32 0.001, %v5421_v35 }
 0x7ed   :  { %v14343_v47 = vmul.f32 0.0051020407, %v4287_v41  ;;  %v14359_v41 = vadd.f32 %v4710_v25, %v4709_v37  ;;  %v18176_v37 = vld [vmem:[#allocation55_spill] sm:$0xff] }
 0x7ee   :  { %9323 = vrsqrt.f32 %v5661_v58 }
 0x7ef   :  { %18167 = vst [vmem:[#allocation260_spill] sm:$0xff] %v14343_v47 }
 0x7f0   :  { %v14361_v42 = vpop.xlane.xlu0 %5006 }
 0x7f1   :  { %18169 = vst [vmem:[#allocation265_spill] sm:$0xff] %v14361_v42  ;;  %v18194_v42 = vld [vmem:[#allocation196_spill] sm:$0xff] }
 0x7f2   :  { %v18195_v47 = vsub.f32 %v18194_v42, %v18134_v26  ;;  %v9166_v42 = vld [vmem:[%s16660_s5 + $0x2f4] ss:$8 sps:$4 sm:$0xff]  }
 0x7f8   :  { %v6401_v33 = vpop.permute.xlu0 %6400  ;;  %v9324_v0 = vpop.eup %9323 }
 0x7f9   :  { %v6893_v38 = vmul.f32 %v6401_v33, %v18173_v29  ;;  %v6894_v18 = vmul.f32 %v6401_v33, %v18175_v24  ;;  %v4712_v33 = vmul.f32 %v14379_v52, %v14379_v52  ;;  %v9163_v29 = vld [vmem:[%s16660_s5 + $0x2e4] ss:$8 sps:$4 sm:$0xff]   ;;  %v18180_v24 = vld [vmem:[#allocation299_spill] sm:$0xff] }
 0x7fa   :  { %5015 = vadd.xlane.f32.xlu1 %v14080_v44  ;;  %v18179_v44 = vld [vmem:[#allocation301_spill] sm:$0xff]  ;;  %v5304_v58 = vmul.f32 %v18180_v24, %v18180_v24  ;;  %8685 = vmatprep.mubr.msk.bf16.mxu1 %vm3249_vm1, %v9163_v29 }
 0x7fb   :  { %v7853_v25 = vadd.f32 %v18176_v37, %v6893_v38  ;;  %v7854_v4 = vadd.f32 %v18176_v37, %v6894_v18  ;;  %v14388_v18 = vadd.f32 %v4712_v33, %v4711_v7  ;;  %v5184_v3 = vmul.f32 0.0051020407, %v18179_v44  ;;  %v5541_v38 = vld [vmem:[%s16661_s6 + $0x130] sm:$0xff] }
 0x7fc   :  { %v5901_v35 = vmul.f32 %v9324_v0, %v5541_v38 }
 0x7fd   :  { %8093 = vst [vmem:[#allocation2 + $0x230] sm:$0xff] %v7853_v25  ;;  %8094 = vst [vmem:[#allocation2 + $0x238] sm:$0xff] %v7854_v4  ;;  %v5424_v4 = vsub.f32 %v5184_v3, %v5304_v58 }
 0x7fe   :  { %4301 = vadd.xlane.f32.xlu1 %v14175_v20  ;;  %v9165_v20 = vld [vmem:[%s16660_s5 + $0x2e0] ss:$8 sps:$4 sm:$0xff]  }
 0x7ff   :  { %3923 = vmatmul.mubr.bf16.gmra.mrb[152].mxu1 %v9165_v20  ;;  %v18183_v20 = vld [vmem:[#allocation190_spill] sm:$0xff] }
 0x800   :  { %v18184_v3 = vsub.f32 %v18183_v20, %v13126_v50  ;;  %v14424_v20 = vpop.f32.mrb[138].mxu1  ;;  %8686 = vmatprep.mubr.msk.bf16.mxu1 %vm3249_vm1, %v9166_v42 }
 0x801   :  { %18188 = vst [vmem:[#allocation28_spill] sm:$0xff] %v14424_v20 }
 0x80a   :  { %4304 = vadd.xlane.f32.xlu0 %v14209_v28  ;;  %v5664_v28 = vadd.f32 0.001, %v5424_v4 }
 0x80c   :  { %9325 = vrsqrt.f32 %v5664_v28  ;;  %v18187_v28 = vld [vmem:[#allocation56_spill] sm:$0xff] }
 0x80e   :  { %5024 = vadd.xlane.f32.xlu0 %v14214_v30  ;;  %v18185_v30 = vld [vmem:[#allocation191_spill] sm:$0xff] }
 0x80f   :  { %6415 = vperm.xlu1 %8843, %v5901_v35   ;;  %v18186_v38 = vsub.f32 %v18185_v30, %v13126_v50  ;;  %v5544_v35 = vld [vmem:[%s16661_s6 + $0x148] sm:$0xff]  ;;  %v14428_v50 = vpop.f32.mrb[139].mxu1 }
 0x810   :  { %18190 = vst [vmem:[#allocation125_spill] sm:$0xff] %v14428_v50  ;;  %v14434_v30 = vadd.f32 %v14428_v50, %v14424_v20 }
 0x815   :  { %v14405_v37 = vpop.xlane.xlu1 %5003 }
 0x816   :  { %18181 = vst [vmem:[#allocation15_spill] sm:$0xff] %v14405_v37  ;;  %v9326_v4 = vpop.eup %9325  ;;  %v18196_v37 = vld [vmem:[#allocation197_spill] sm:$0xff] }
 0x817   :  { %v5904_v44 = vmul.f32 %v9326_v4, %v5544_v35  ;;  %v18193_v35 = vld [vmem:[#allocation298_spill] sm:$0xff] }
 0x819   :  { %v4290_v25 = vpop.xlane.xlu1 %4289 }
 0x81a   :  { %v14407_v7 = vmul.f32 0.0051020407, %v4290_v25 }
 0x81c   :  { %18182 = vst [vmem:[#allocation18_spill] sm:$0xff] %v14407_v7 }
 0x81d   :  { %v6396_v29 = vpop.permute.xlu1 %6395 }
 0x81e   :  { %v6891_v0 = vmul.f32 %v6396_v29, %v18184_v3  ;;  %v6892_v58 = vmul.f32 %v6396_v29, %v18186_v38  ;;  %v4713_v29 = vmul.f32 %v14424_v20, %v14424_v20  ;;  %v18302_v20 = vld [vmem:[#allocation216_spill] sm:$0xff] }
 0x820   :  { %v7851_v25 = vadd.f32 %v18187_v28, %v6891_v0  ;;  %v7852_v33 = vadd.f32 %v18187_v28, %v6892_v58  ;;  %v4714_v0 = vmul.f32 %v14428_v50, %v14428_v50  ;;  %v18192_v58 = vld [vmem:[#allocation300_spill] sm:$0xff]  ;;  %v5303_v28 = vmul.f32 %v18193_v35, %v18193_v35 }
 0x821   :  { %v5183_v4 = vmul.f32 0.0051020407, %v18192_v58 }
 0x822   :  { %8091 = vst [vmem:[#allocation2 + $0x220] sm:$0xff] %v7851_v25  ;;  %8092 = vst [vmem:[#allocation2 + $0x228] sm:$0xff] %v7852_v33  ;;  %v18197_v33 = vsub.f32 %v18196_v37, %v18134_v26 }
 0x823   :  { %v5423_v25 = vsub.f32 %v5183_v4, %v5303_v28 }
 0x824   :  { %6430 = vperm.xlu0 %8844, %v5904_v44  }
 0x825   :  { %v4293_v46 = vpop.xlane.xlu0 %4292  ;;  %v5663_v13 = vadd.f32 0.001, %v5423_v25 }
 0x826   :  { %v14426_v3 = vmul.f32 0.0051020407, %v4293_v46  ;;  %v14442_v46 = vadd.f32 %v4714_v0, %v4713_v29  ;;  %v18198_v29 = vld [vmem:[#allocation57_spill] sm:$0xff] }
 0x827   :  { %v14458_v58 = vpop.f32.mrb[140].mxu1  ;;  %9327 = vrsqrt.f32 %v5663_v13 }
 0x828   :  { %18189 = vst [vmem:[#allocation123_spill] sm:$0xff] %v14426_v3  ;;  %18199 = vst [vmem:[#allocation158_spill] sm:$0xff] %v14458_v58  ;;  %v4715_v4 = vmul.f32 %v14458_v58, %v14458_v58  ;;  %v14462_v28 = vpop.f32.mrb[141].mxu1 }
 0x829   :  { %v14444_v38 = vpop.xlane.xlu0 %5012  ;;  %18200 = vst [vmem:[#allocation160_spill] sm:$0xff] %v14462_v28  ;;  %v14466_v26 = vadd.f32 %v14462_v28, %v14458_v58 }
 0x82a   :  { %18191 = vst [vmem:[#allocation44_spill] sm:$0xff] %v14444_v38  ;;  %v18216_v38 = vld [vmem:[#allocation200_spill] sm:$0xff] }
 0x82b   :  { %v18217_v3 = vsub.f32 %v18216_v38, %v18159_v56  ;;  %v9169_v38 = vld [vmem:[%s16660_s5 + $0x304] ss:$8 sps:$4 sm:$0xff]  }
 0x831   :  { %v6411_v10 = vpop.permute.xlu0 %6410  ;;  %v9328_v37 = vpop.eup %9327 }
 0x832   :  { %v6897_v7 = vmul.f32 %v6411_v10, %v18195_v47  ;;  %v6898_v55 = vmul.f32 %v6411_v10, %v18197_v33  ;;  %v4716_v10 = vmul.f32 %v14462_v28, %v14462_v28  ;;  %v18202_v33 = vld [vmem:[#allocation303_spill] sm:$0xff] }
 0x833   :  { %5021 = vadd.xlane.f32.xlu1 %v14179_v40  ;;  %v18201_v40 = vld [vmem:[#allocation305_spill] sm:$0xff]  ;;  %v5306_v13 = vmul.f32 %v18202_v33, %v18202_v33 }
 0x834   :  { %v7857_v0 = vadd.f32 %v18198_v29, %v6897_v7  ;;  %v7858_v44 = vadd.f32 %v18198_v29, %v6898_v55  ;;  %v14471_v55 = vadd.f32 %v4716_v10, %v4715_v4  ;;  %v5186_v47 = vmul.f32 0.0051020407, %v18201_v40  ;;  %v5543_v7 = vld [vmem:[%s16661_s6 + $0x140] sm:$0xff] }
 0x835   :  { %v5903_v25 = vmul.f32 %v9328_v37, %v5543_v7 }
 0x836   :  { %8097 = vst [vmem:[#allocation2 + $0x250] sm:$0xff] %v7857_v0  ;;  %8098 = vst [vmem:[#allocation2 + $0x258] sm:$0xff] %v7858_v44  ;;  %v5426_v44 = vsub.f32 %v5186_v47, %v5306_v13 }
 0x837   :  { %4307 = vadd.xlane.f32.xlu1 %v14268_v2  ;;  %v9168_v2 = vld [vmem:[%s16660_s5 + $0x2f0] ss:$8 sps:$4 sm:$0xff]  }
 0x838   :  { %3933 = vmatmul.mubr.bf16.gmra.mrb[156].mxu1 %v9168_v2  ;;  %v18205_v2 = vld [vmem:[#allocation194_spill] sm:$0xff] }
 0x839   :  { %v18206_v47 = vsub.f32 %v18205_v2, %v18150_v48  ;;  %v14507_v2 = vpop.f32.mrb[142].mxu1  ;;  %8687 = vmatprep.mubr.msk.bf16.mxu1 %vm3249_vm1, %v9169_v38 }
 0x83a   :  { %18210 = vst [vmem:[#allocation159_spill] sm:$0xff] %v14507_v2 }
 0x843   :  { %4310 = vadd.xlane.f32.xlu0 %v14300_v9  ;;  %v5666_v9 = vadd.f32 0.001, %v5426_v44 }
 0x845   :  { %9329 = vrsqrt.f32 %v5666_v9  ;;  %v18209_v9 = vld [vmem:[#allocation58_spill] sm:$0xff] }
 0x847   :  { %5030 = vadd.xlane.f32.xlu0 %v14305_v39  ;;  %v18207_v39 = vld [vmem:[#allocation195_spill] sm:$0xff] }
 0x848   :  { %6425 = vperm.xlu1 %8843, %v5903_v25   ;;  %v18208_v7 = vsub.f32 %v18207_v39, %v18150_v48  ;;  %v5546_v25 = vld [vmem:[%s16661_s6 + $0x158] sm:$0xff]  ;;  %v14511_v48 = vpop.f32.mrb[143].mxu1 }
 0x849   :  { %18212 = vst [vmem:[#allocation264_spill] sm:$0xff] %v14511_v48  ;;  %v14517_v39 = vadd.f32 %v14511_v48, %v14507_v2 }
 0x84e   :  { %v14488_v29 = vpop.xlane.xlu1 %5009 }
 0x84f   :  { %18203 = vst [vmem:[#allocation29_spill] sm:$0xff] %v14488_v29  ;;  %v9330_v44 = vpop.eup %9329  ;;  %v18218_v29 = vld [vmem:[#allocation201_spill] sm:$0xff] }
 0x850   :  { %v5906_v40 = vmul.f32 %v9330_v44, %v5546_v25  ;;  %v18215_v25 = vld [vmem:[#allocation302_spill] sm:$0xff] }
 0x852   :  { %v4296_v0 = vpop.xlane.xlu1 %4295 }
 0x853   :  { %v14490_v4 = vmul.f32 0.0051020407, %v4296_v0 }
 0x855   :  { %18204 = vst [vmem:[#allocation268_spill] sm:$0xff] %v14490_v4 }
 0x856   :  { %v6406_v42 = vpop.permute.xlu1 %6405 }
 0x857   :  { %v6895_v37 = vmul.f32 %v6406_v42, %v18206_v47  ;;  %v6896_v13 = vmul.f32 %v6406_v42, %v18208_v7  ;;  %v4717_v42 = vmul.f32 %v14507_v2, %v14507_v2  ;;  %v18322_v2 = vld [vmem:[#allocation220_spill] sm:$0xff] }
 0x859   :  { %v7855_v0 = vadd.f32 %v18209_v9, %v6895_v37  ;;  %v7856_v10 = vadd.f32 %v18209_v9, %v6896_v13  ;;  %v4718_v37 = vmul.f32 %v14511_v48, %v14511_v48  ;;  %v18214_v13 = vld [vmem:[#allocation304_spill] sm:$0xff]  ;;  %v5305_v9 = vmul.f32 %v18215_v25, %v18215_v25 }
 0x85a   :  { %v5185_v44 = vmul.f32 0.0051020407, %v18214_v13 }
 0x85b   :  { %8095 = vst [vmem:[#allocation2 + $0x240] sm:$0xff] %v7855_v0  ;;  %8096 = vst [vmem:[#allocation2 + $0x248] sm:$0xff] %v7856_v10  ;;  %v18219_v10 = vsub.f32 %v18218_v29, %v18159_v56 }
 0x85c   :  { %v5425_v0 = vsub.f32 %v5185_v44, %v5305_v9 }
 0x85d   :  { %6440 = vperm.xlu0 %8844, %v5906_v40  }
 0x85e   :  { %v4299_v23 = vpop.xlane.xlu0 %4298  ;;  %v5665_v11 = vadd.f32 0.001, %v5425_v0 }
 0x85f   :  { %v14509_v47 = vmul.f32 0.0051020407, %v4299_v23  ;;  %v14525_v23 = vadd.f32 %v4718_v37, %v4717_v42  ;;  %v18220_v42 = vld [vmem:[#allocation59_spill] sm:$0xff] }
 0x860   :  { %v14541_v13 = vpop.f32.mrb[144].mxu1  ;;  %9331 = vrsqrt.f32 %v5665_v11 }
 0x861   :  { %18211 = vst [vmem:[#allocation161_spill] sm:$0xff] %v14509_v47  ;;  %18221 = vst [vmem:[#allocation270_spill] sm:$0xff] %v14541_v13  ;;  %v4719_v44 = vmul.f32 %v14541_v13, %v14541_v13  ;;  %v14545_v9 = vpop.f32.mrb[145].mxu1 }
 0x862   :  { %v14527_v7 = vpop.xlane.xlu0 %5018  ;;  %18222 = vst [vmem:[#allocation266_spill] sm:$0xff] %v14545_v9  ;;  %v14549_v56 = vadd.f32 %v14545_v9, %v14541_v13 }
 0x863   :  { %18213 = vst [vmem:[#allocation45_spill] sm:$0xff] %v14527_v7  ;;  %v18238_v7 = vld [vmem:[#allocation204_spill] sm:$0xff] }
 0x864   :  { %v18239_v47 = vsub.f32 %v18238_v7, %v18180_v24  ;;  %v9172_v7 = vld [vmem:[%s16660_s5 + $0x314] ss:$8 sps:$4 sm:$0xff]  }
 0x86a   :  { %v6421_v12 = vpop.permute.xlu0 %6420  ;;  %v9332_v29 = vpop.eup %9331 }
 0x86b   :  { %v6901_v4 = vmul.f32 %v6421_v12, %v18217_v3  ;;  %v6902_v61 = vmul.f32 %v6421_v12, %v18219_v10  ;;  %v4720_v12 = vmul.f32 %v14545_v9, %v14545_v9  ;;  %v18224_v10 = vld [vmem:[#allocation307_spill] sm:$0xff] }
 0x86c   :  { %5027 = vadd.xlane.f32.xlu1 %v14276_v6  ;;  %v18223_v6 = vld [vmem:[#allocation311_spill] sm:$0xff]  ;;  %v5308_v11 = vmul.f32 %v18224_v10, %v18224_v10 }
 0x86d   :  { %v7861_v37 = vadd.f32 %v18220_v42, %v6901_v4  ;;  %v7862_v40 = vadd.f32 %v18220_v42, %v6902_v61  ;;  %v14554_v61 = vadd.f32 %v4720_v12, %v4719_v44  ;;  %v5188_v3 = vmul.f32 0.0051020407, %v18223_v6  ;;  %v5545_v4 = vld [vmem:[%s16661_s6 + $0x150] sm:$0xff] }
 0x86e   :  { %v5905_v0 = vmul.f32 %v9332_v29, %v5545_v4 }
 0x86f   :  { %8101 = vst [vmem:[#allocation2 + $0x270] sm:$0xff] %v7861_v37  ;;  %8102 = vst [vmem:[#allocation2 + $0x278] sm:$0xff] %v7862_v40  ;;  %v5428_v40 = vsub.f32 %v5188_v3, %v5308_v11 }
 0x870   :  { %4313 = vadd.xlane.f32.xlu1 %v14351_v54  ;;  %v9171_v54 = vld [vmem:[%s16660_s5 + $0x300] ss:$8 sps:$4 sm:$0xff]  }
 0x871   :  { %3943 = vmatmul.mubr.bf16.gmra.mrb[160].mxu1 %v9171_v54  ;;  %v18227_v54 = vld [vmem:[#allocation198_spill] sm:$0xff] }
 0x872   :  { %v18228_v3 = vsub.f32 %v18227_v54, %v18171_v14  ;;  %v14590_v54 = vpop.f32.mrb[146].mxu1  ;;  %8688 = vmatprep.mubr.msk.bf16.mxu1 %vm3249_vm1, %v9172_v7 }
 0x873   :  { %18232 = vst [vmem:[#allocation281_spill] sm:$0xff] %v14590_v54 }
 0x87c   :  { %4316 = vadd.xlane.f32.xlu0 %v14383_v36  ;;  %v5668_v36 = vadd.f32 0.001, %v5428_v40 }
 0x87e   :  { %9333 = vrsqrt.f32 %v5668_v36  ;;  %v18231_v36 = vld [vmem:[#allocation60_spill] sm:$0xff] }
 0x880   :  { %5036 = vadd.xlane.f32.xlu0 %v14388_v18  ;;  %v18229_v18 = vld [vmem:[#allocation199_spill] sm:$0xff] }
 0x881   :  { %6435 = vperm.xlu1 %8843, %v5905_v0   ;;  %v18230_v4 = vsub.f32 %v18229_v18, %v18171_v14  ;;  %v5548_v0 = vld [vmem:[%s16661_s6 + $0x168] sm:$0xff]  ;;  %v14594_v14 = vpop.f32.mrb[147].mxu1 }
 0x882   :  { %18234 = vst [vmem:[#allocation154_spill] sm:$0xff] %v14594_v14  ;;  %v14600_v18 = vadd.f32 %v14594_v14, %v14590_v54 }
 0x887   :  { %v14571_v42 = vpop.xlane.xlu1 %5015 }
 0x888   :  { %18225 = vst [vmem:[#allocation279_spill] sm:$0xff] %v14571_v42  ;;  %v9334_v40 = vpop.eup %9333  ;;  %v18240_v42 = vld [vmem:[#allocation205_spill] sm:$0xff] }
 0x889   :  { %v5908_v6 = vmul.f32 %v9334_v40, %v5548_v0  ;;  %v18237_v0 = vld [vmem:[#allocation306_spill] sm:$0xff] }
 0x88b   :  { %v4302_v37 = vpop.xlane.xlu1 %4301 }
 0x88c   :  { %v14573_v44 = vmul.f32 0.0051020407, %v4302_v37 }
 0x88e   :  { %18226 = vst [vmem:[#allocation273_spill] sm:$0xff] %v14573_v44 }
 0x88f   :  { %v6416_v38 = vpop.permute.xlu1 %6415 }
 0x890   :  { %v6899_v29 = vmul.f32 %v6416_v38, %v18228_v3  ;;  %v6900_v11 = vmul.f32 %v6416_v38, %v18230_v4  ;;  %v4721_v38 = vmul.f32 %v14590_v54, %v14590_v54 }
 0x892   :  { %v7859_v37 = vadd.f32 %v18231_v36, %v6899_v29  ;;  %v7860_v12 = vadd.f32 %v18231_v36, %v6900_v11  ;;  %v4722_v29 = vmul.f32 %v14594_v14, %v14594_v14  ;;  %v18236_v11 = vld [vmem:[#allocation310_spill] sm:$0xff]  ;;  %v5307_v36 = vmul.f32 %v18237_v0, %v18237_v0 }
 0x893   :  { %v5187_v40 = vmul.f32 0.0051020407, %v18236_v11 }
 0x894   :  { %8099 = vst [vmem:[#allocation2 + $0x260] sm:$0xff] %v7859_v37  ;;  %8100 = vst [vmem:[#allocation2 + $0x268] sm:$0xff] %v7860_v12  ;;  %v18241_v12 = vsub.f32 %v18240_v42, %v18180_v24 }
 0x895   :  { %v5427_v37 = vsub.f32 %v5187_v40, %v5307_v36 }
 0x896   :  { %6450 = vperm.xlu0 %8844, %v5908_v6  }
 0x897   :  { %v4305_v16 = vpop.xlane.xlu0 %4304  ;;  %v5667_v32 = vadd.f32 0.001, %v5427_v37 }
 0x898   :  { %v14592_v3 = vmul.f32 0.0051020407, %v4305_v16  ;;  %v14608_v16 = vadd.f32 %v4722_v29, %v4721_v38  ;;  %v18242_v38 = vld [vmem:[#allocation61_spill] sm:$0xff] }
 0x899   :  { %v14624_v11 = vpop.f32.mrb[148].mxu1  ;;  %9335 = vrsqrt.f32 %v5667_v32 }
 0x89a   :  { %18233 = vst [vmem:[#allocation275_spill] sm:$0xff] %v14592_v3  ;;  %18243 = vst [vmem:[#allocation30_spill] sm:$0xff] %v14624_v11  ;;  %v4723_v40 = vmul.f32 %v14624_v11, %v14624_v11  ;;  %v14628_v36 = vpop.f32.mrb[149].mxu1 }
 0x89b   :  { %v14610_v4 = vpop.xlane.xlu0 %5024  ;;  %18244 = vst [vmem:[#allocation155_spill] sm:$0xff] %v14628_v36  ;;  %v14632_v24 = vadd.f32 %v14628_v36, %v14624_v11 }
 0x89c   :  { %18235 = vst [vmem:[#allocation156_spill] sm:$0xff] %v14610_v4  ;;  %v18260_v4 = vld [vmem:[#allocation208_spill] sm:$0xff] }
 0x89d   :  { %v18261_v3 = vsub.f32 %v18260_v4, %v18202_v33  ;;  %v9175_v4 = vld [vmem:[%s16660_s5 + $0x324] ss:$8 sps:$4 sm:$0xff]  }
 0x8a3   :  { %v6431_v5 = vpop.permute.xlu0 %6430  ;;  %v9336_v42 = vpop.eup %9335 }
 0x8a4   :  { %v6905_v44 = vmul.f32 %v6431_v5, %v18239_v47  ;;  %v6906_v51 = vmul.f32 %v6431_v5, %v18241_v12  ;;  %v4724_v5 = vmul.f32 %v14628_v36, %v14628_v36  ;;  %v18246_v12 = vld [vmem:[#allocation313_spill] sm:$0xff] }
 0x8a5   :  { %5033 = vadd.xlane.f32.xlu1 %v14359_v41  ;;  %v18245_v41 = vld [vmem:[#allocation315_spill] sm:$0xff]  ;;  %v5310_v32 = vmul.f32 %v18246_v12, %v18246_v12 }
 0x8a6   :  { %v7865_v29 = vadd.f32 %v18242_v38, %v6905_v44  ;;  %v7866_v6 = vadd.f32 %v18242_v38, %v6906_v51  ;;  %v14637_v51 = vadd.f32 %v4724_v5, %v4723_v40  ;;  %v5190_v47 = vmul.f32 0.0051020407, %v18245_v41  ;;  %v5547_v44 = vld [vmem:[%s16661_s6 + $0x160] sm:$0xff] }
 0x8a7   :  { %v5907_v37 = vmul.f32 %v9336_v42, %v5547_v44 }
 0x8a8   :  { %8105 = vst [vmem:[#allocation2 + $0x290] sm:$0xff] %v7865_v29  ;;  %8106 = vst [vmem:[#allocation2 + $0x298] sm:$0xff] %v7866_v6  ;;  %v5430_v6 = vsub.f32 %v5190_v47, %v5310_v32 }
 0x8a9   :  { %4319 = vadd.xlane.f32.xlu1 %v14434_v30  ;;  %v9174_v30 = vld [vmem:[%s16660_s5 + $0x310] ss:$8 sps:$4 sm:$0xff]  }
 0x8aa   :  { %3953 = vmatmul.mubr.bf16.gmra.mrb[164].mxu1 %v9174_v30  ;;  %v18249_v30 = vld [vmem:[#allocation202_spill] sm:$0xff] }
 0x8ab   :  { %v18250_v47 = vsub.f32 %v18249_v30, %v18193_v35  ;;  %v14673_v30 = vpop.f32.mrb[150].mxu1  ;;  %8689 = vmatprep.mubr.msk.bf16.mxu1 %vm3249_vm1, %v9175_v4 }
 0x8ac   :  { %18254 = vst [vmem:[#allocation166_spill] sm:$0xff] %v14673_v30 }
 0x8b5   :  { %4322 = vadd.xlane.f32.xlu0 %v14466_v26  ;;  %v5670_v26 = vadd.f32 0.001, %v5430_v6 }
 0x8b7   :  { %9337 = vrsqrt.f32 %v5670_v26  ;;  %v18253_v26 = vld [vmem:[#allocation62_spill] sm:$0xff] }
 0x8b9   :  { %5042 = vadd.xlane.f32.xlu0 %v14471_v55  ;;  %v18251_v55 = vld [vmem:[#allocation203_spill] sm:$0xff] }
 0x8ba   :  { %6445 = vperm.xlu1 %8843, %v5907_v37   ;;  %v18252_v44 = vsub.f32 %v18251_v55, %v18193_v35  ;;  %v5550_v37 = vld [vmem:[%s16661_s6 + $0x178] sm:$0xff]  ;;  %v14677_v35 = vpop.f32.mrb[151].mxu1 }
 0x8bb   :  { %18256 = vst [vmem:[#allocation31_spill] sm:$0xff] %v14677_v35  ;;  %v14683_v55 = vadd.f32 %v14677_v35, %v14673_v30 }
 0x8c0   :  { %v14654_v38 = vpop.xlane.xlu1 %5021 }
 0x8c1   :  { %18247 = vst [vmem:[#allocation157_spill] sm:$0xff] %v14654_v38  ;;  %v9338_v6 = vpop.eup %9337  ;;  %v18262_v38 = vld [vmem:[#allocation209_spill] sm:$0xff] }
 0x8c2   :  { %v5910_v41 = vmul.f32 %v9338_v6, %v5550_v37  ;;  %v18259_v37 = vld [vmem:[#allocation312_spill] sm:$0xff] }
 0x8c4   :  { %v4308_v29 = vpop.xlane.xlu1 %4307 }
 0x8c5   :  { %v14656_v40 = vmul.f32 0.0051020407, %v4308_v29 }
 0x8c7   :  { %18248 = vst [vmem:[#allocation46_spill] sm:$0xff] %v14656_v40 }
 0x8c8   :  { %v6426_v7 = vpop.permute.xlu1 %6425 }
 0x8c9   :  { %v6903_v42 = vmul.f32 %v6426_v7, %v18250_v47  ;;  %v6904_v32 = vmul.f32 %v6426_v7, %v18252_v44  ;;  %v4725_v7 = vmul.f32 %v14673_v30, %v14673_v30 }
 0x8cb   :  { %v7863_v29 = vadd.f32 %v18253_v26, %v6903_v42  ;;  %v7864_v5 = vadd.f32 %v18253_v26, %v6904_v32  ;;  %v4726_v42 = vmul.f32 %v14677_v35, %v14677_v35  ;;  %v18258_v32 = vld [vmem:[#allocation314_spill] sm:$0xff]  ;;  %v5309_v26 = vmul.f32 %v18259_v37, %v18259_v37 }
 0x8cc   :  { %v5189_v6 = vmul.f32 0.0051020407, %v18258_v32 }
 0x8cd   :  { %8103 = vst [vmem:[#allocation2 + $0x280] sm:$0xff] %v7863_v29  ;;  %8104 = vst [vmem:[#allocation2 + $0x288] sm:$0xff] %v7864_v5  ;;  %v18263_v5 = vsub.f32 %v18262_v38, %v18202_v33 }
 0x8ce   :  { %v5429_v29 = vsub.f32 %v5189_v6, %v5309_v26 }
 0x8cf   :  { %6460 = vperm.xlu0 %8844, %v5910_v41  }
 0x8d0   :  { %v4311_v17 = vpop.xlane.xlu0 %4310  ;;  %v5669_v57 = vadd.f32 0.001, %v5429_v29 }
 0x8d1   :  { %v14675_v47 = vmul.f32 0.0051020407, %v4311_v17  ;;  %v14691_v17 = vadd.f32 %v4726_v42, %v4725_v7  ;;  %v18264_v7 = vld [vmem:[#allocation63_spill] sm:$0xff] }
 0x8d2   :  { %v14707_v32 = vpop.f32.mrb[152].mxu1  ;;  %9339 = vrsqrt.f32 %v5669_v57 }
 0x8d3   :  { %18255 = vst [vmem:[#allocation168_spill] sm:$0xff] %v14675_v47  ;;  %18265 = vst [vmem:[#allocation167_spill] sm:$0xff] %v14707_v32  ;;  %v4727_v6 = vmul.f32 %v14707_v32, %v14707_v32  ;;  %v14711_v26 = vpop.f32.mrb[153].mxu1 }
 0x8d4   :  { %v14693_v44 = vpop.xlane.xlu0 %5030  ;;  %18266 = vst [vmem:[#allocation169_spill] sm:$0xff] %v14711_v26  ;;  %v14715_v33 = vadd.f32 %v14711_v26, %v14707_v32 }
 0x8d5   :  { %18257 = vst [vmem:[#allocation278_spill] sm:$0xff] %v14693_v44  ;;  %v18282_v44 = vld [vmem:[#allocation212_spill] sm:$0xff] }
 0x8d6   :  { %v18283_v47 = vsub.f32 %v18282_v44, %v18224_v10 }
 0x8dc   :  { %v6441_v31 = vpop.permute.xlu0 %6440  ;;  %v9340_v38 = vpop.eup %9339 }
 0x8dd   :  { %v6909_v40 = vmul.f32 %v6441_v31, %v18261_v3  ;;  %v6910_v27 = vmul.f32 %v6441_v31, %v18263_v5  ;;  %v4728_v31 = vmul.f32 %v14711_v26, %v14711_v26  ;;  %v18268_v5 = vld [vmem:[#allocation317_spill] sm:$0xff] }
 0x8de   :  { %5039 = vadd.xlane.f32.xlu1 %v14442_v46  ;;  %v18267_v46 = vld [vmem:[#allocation319_spill] sm:$0xff]  ;;  %v5312_v57 = vmul.f32 %v18268_v5, %v18268_v5 }
 0x8df   :  { %v7869_v42 = vadd.f32 %v18264_v7, %v6909_v40  ;;  %v7870_v41 = vadd.f32 %v18264_v7, %v6910_v27  ;;  %v14720_v27 = vadd.f32 %v4728_v31, %v4727_v6  ;;  %v5192_v3 = vmul.f32 0.0051020407, %v18267_v46  ;;  %v5549_v40 = vld [vmem:[%s16661_s6 + $0x170] sm:$0xff] }
 0x8e0   :  { %v5909_v29 = vmul.f32 %v9340_v38, %v5549_v40 }
 0x8e1   :  { %8109 = vst [vmem:[#allocation2 + $0x2b0] sm:$0xff] %v7869_v42  ;;  %8110 = vst [vmem:[#allocation2 + $0x2b8] sm:$0xff] %v7870_v41  ;;  %v5432_v41 = vsub.f32 %v5192_v3, %v5312_v57 }
 0x8e2   :  { %4325 = vadd.xlane.f32.xlu1 %v14517_v39  ;;  %v9177_v39 = vld [vmem:[%s16660_s5 + $0x320] ss:$8 sps:$4 sm:$0xff]  }
 0x8e3   :  { %3963 = vmatmul.mubr.bf16.gmra.mrb[168].mxu1 %v9177_v39  ;;  %v18271_v39 = vld [vmem:[#allocation206_spill] sm:$0xff] }
 0x8e4   :  { %v18272_v3 = vsub.f32 %v18271_v39, %v18215_v25  ;;  %v14756_v39 = vpop.f32.mrb[154].mxu1 }
 0x8e5   :  { %18276 = vst [vmem:[#allocation280_spill] sm:$0xff] %v14756_v39 }
 0x8ee   :  { %4328 = vadd.xlane.f32.xlu0 %v14549_v56  ;;  %v5672_v56 = vadd.f32 0.001, %v5432_v41 }
 0x8f0   :  { %9341 = vrsqrt.f32 %v5672_v56  ;;  %v18275_v56 = vld [vmem:[#allocation64_spill] sm:$0xff] }
 0x8f2   :  { %5048 = vadd.xlane.f32.xlu0 %v14554_v61  ;;  %v18273_v61 = vld [vmem:[#allocation207_spill] sm:$0xff] }
 0x8f3   :  { %6455 = vperm.xlu1 %8843, %v5909_v29   ;;  %v18274_v40 = vsub.f32 %v18273_v61, %v18215_v25  ;;  %v5552_v29 = vld [vmem:[%s16661_s6 + $0x188] sm:$0xff]  ;;  %v14760_v25 = vpop.f32.mrb[155].mxu1 }
 0x8f4   :  { %18278 = vst [vmem:[#allocation285_spill] sm:$0xff] %v14760_v25  ;;  %v14766_v61 = vadd.f32 %v14760_v25, %v14756_v39 }
 0x8f9   :  { %v14737_v7 = vpop.xlane.xlu1 %5027 }
 0x8fa   :  { %18269 = vst [vmem:[#allocation272_spill] sm:$0xff] %v14737_v7  ;;  %v9342_v41 = vpop.eup %9341  ;;  %v18284_v7 = vld [vmem:[#allocation213_spill] sm:$0xff] }
 0x8fb   :  { %v5912_v46 = vmul.f32 %v9342_v41, %v5552_v29  ;;  %v18281_v29 = vld [vmem:[#allocation316_spill] sm:$0xff] }
 0x8fd   :  { %v4314_v42 = vpop.xlane.xlu1 %4313 }
 0x8fe   :  { %v14739_v6 = vmul.f32 0.0051020407, %v4314_v42 }
 0x900   :  { %18270 = vst [vmem:[#allocation47_spill] sm:$0xff] %v14739_v6 }
 0x901   :  { %v6436_v4 = vpop.permute.xlu1 %6435 }
 0x902   :  { %v6907_v38 = vmul.f32 %v6436_v4, %v18272_v3  ;;  %v6908_v57 = vmul.f32 %v6436_v4, %v18274_v40  ;;  %v4729_v4 = vmul.f32 %v14756_v39, %v14756_v39  ;;  %v18386_v39 = vld [vmem:[#allocation238_spill] sm:$0xff] }
 0x904   :  { %v7867_v42 = vadd.f32 %v18275_v56, %v6907_v38  ;;  %v7868_v31 = vadd.f32 %v18275_v56, %v6908_v57  ;;  %v4730_v38 = vmul.f32 %v14760_v25, %v14760_v25  ;;  %v18280_v57 = vld [vmem:[#allocation318_spill] sm:$0xff]  ;;  %v5311_v56 = vmul.f32 %v18281_v29, %v18281_v29 }
 0x905   :  { %v5191_v41 = vmul.f32 0.0051020407, %v18280_v57 }
 0x906   :  { %8107 = vst [vmem:[#allocation2 + $0x2a0] sm:$0xff] %v7867_v42  ;;  %8108 = vst [vmem:[#allocation2 + $0x2a8] sm:$0xff] %v7868_v31  ;;  %v18285_v31 = vsub.f32 %v18284_v7, %v18224_v10  ;;  %v5551_v7 = vld [vmem:[%s16661_s6 + $0x180] sm:$0xff] }
 0x907   :  { %v5431_v42 = vsub.f32 %v5191_v41, %v5311_v56 }
 0x908   :  { %6470 = vperm.xlu0 %8844, %v5912_v46  }
 0x909   :  { %v4317_v63 = vpop.xlane.xlu0 %4316  ;;  %v5671_v52 = vadd.f32 0.001, %v5431_v42 }
 0x90a   :  { %v14758_v3 = vmul.f32 0.0051020407, %v4317_v63  ;;  %v14774_v63 = vadd.f32 %v4730_v38, %v4729_v4  ;;  %v18286_v4 = vld [vmem:[#allocation65_spill] sm:$0xff] }
 0x90b   :  { %v14790_v57 = vpop.f32.mrb[156].mxu1  ;;  %9343 = vrsqrt.f32 %v5671_v52 }
 0x90c   :  { %18277 = vst [vmem:[#allocation274_spill] sm:$0xff] %v14758_v3  ;;  %18287 = vst [vmem:[#allocation162_spill] sm:$0xff] %v14790_v57  ;;  %v4731_v41 = vmul.f32 %v14790_v57, %v14790_v57  ;;  %v14794_v56 = vpop.f32.mrb[157].mxu1 }
 0x90d   :  { %v14776_v40 = vpop.xlane.xlu0 %5036  ;;  %18288 = vst [vmem:[#allocation164_spill] sm:$0xff] %v14794_v56  ;;  %v14798_v10 = vadd.f32 %v14794_v56, %v14790_v57 }
 0x90e   :  { %18279 = vst [vmem:[#allocation283_spill] sm:$0xff] %v14776_v40  ;;  %v18303_v40 = vsub.f32 %v18302_v20, %v18246_v12 }
 0x915   :  { %v6451_v8 = vpop.permute.xlu0 %6450  ;;  %v9344_v44 = vpop.eup %9343 }
 0x916   :  { %v6913_v6 = vmul.f32 %v6451_v8, %v18283_v47  ;;  %v6914_v53 = vmul.f32 %v6451_v8, %v18285_v31  ;;  %v4732_v8 = vmul.f32 %v14794_v56, %v14794_v56  ;;  %v9178_v47 = vld [vmem:[%s16660_s5 + $0x334] ss:$8 sps:$4 sm:$0xff]   ;;  %v5911_v31 = vmul.f32 %v9344_v44, %v5551_v7 }
 0x917   :  { %5045 = vadd.xlane.f32.xlu1 %v14525_v23  ;;  %v5194_v23 = vmul.f32 0.0051020407, %v13339_v43  ;;  %8690 = vmatprep.mubr.msk.bf16.mxu1 %vm3249_vm1, %v9178_v47  ;;  %v18291_v47 = vld [vmem:[#allocation210_spill] sm:$0xff] }
 0x918   :  { %v7873_v38 = vadd.f32 %v18286_v4, %v6913_v6  ;;  %v7874_v46 = vadd.f32 %v18286_v4, %v6914_v53  ;;  %v14803_v53 = vadd.f32 %v4732_v8, %v4731_v41  ;;  %v18289_v6 = vld [vmem:[#allocation323_spill] sm:$0xff] }
 0x919   :  { %v5314_v52 = vmul.f32 %v18289_v6, %v18289_v6 }
 0x91a   :  { %8113 = vst [vmem:[#allocation2 + $0x2d0] sm:$0xff] %v7873_v38  ;;  %8114 = vst [vmem:[#allocation2 + $0x2d8] sm:$0xff] %v7874_v46 }
 0x91b   :  { %4331 = vadd.xlane.f32.xlu1 %v14600_v18  ;;  %v9180_v18 = vld [vmem:[%s16660_s5 + $0x330] ss:$8 sps:$4 sm:$0xff]   ;;  %v5434_v43 = vsub.f32 %v5194_v23, %v5314_v52  ;;  %v18292_v23 = vsub.f32 %v18291_v47, %v18237_v0  ;;  %v14839_v47 = vpop.f32.mrb[158].mxu1 }
 0x91c   :  { %3973 = vmatmul.mubr.bf16.gmra.mrb[172].mxu1 %v9180_v18  ;;  %18296 = vst [vmem:[#allocation163_spill] sm:$0xff] %v14839_v47 }
 0x927   :  { %4334 = vadd.xlane.f32.xlu0 %v14632_v24  ;;  %v5674_v24 = vadd.f32 0.001, %v5434_v43  ;;  %v5554_v43 = vld [vmem:[%s16661_s6 + $0x198] sm:$0xff] }
 0x929   :  { %9345 = vrsqrt.f32 %v5674_v24 }
 0x92b   :  { %5054 = vadd.xlane.f32.xlu0 %v14637_v51  ;;  %v18293_v51 = vld [vmem:[#allocation211_spill] sm:$0xff] }
 0x92c   :  { %6465 = vperm.xlu1 %8843, %v5911_v31   ;;  %v18294_v7 = vsub.f32 %v18293_v51, %v18237_v0  ;;  %v18295_v31 = vld [vmem:[#allocation66_spill] sm:$0xff]  ;;  %v14843_v0 = vpop.f32.mrb[159].mxu1 }
 0x92d   :  { %18298 = vst [vmem:[#allocation48_spill] sm:$0xff] %v14843_v0  ;;  %v14849_v51 = vadd.f32 %v14843_v0, %v14839_v47 }
 0x932   :  { %v14820_v46 = vpop.xlane.xlu1 %5033 }
 0x933   :  { %v9346_v52 = vpop.eup %9345 }
 0x934   :  { %v5914_v41 = vmul.f32 %v9346_v52, %v5554_v43  ;;  %v18300_v52 = vld [vmem:[#allocation324_spill] sm:$0xff] }
 0x935   :  { %v5193_v43 = vmul.f32 0.0051020407, %v18300_v52 }
 0x936   :  { %v4320_v42 = vpop.xlane.xlu1 %4319 }
 0x937   :  { %v14822_v4 = vmul.f32 0.0051020407, %v4320_v42 }
 0x939   :  { %18290 = vst [vmem:[#allocation32_spill] sm:$0xff] %v14822_v4  ;;  %v18304_v4 = vld [vmem:[#allocation217_spill] sm:$0xff] }
 0x93a   :  { %v6446_v8 = vpop.permute.xlu1 %6445 }
 0x93b   :  { %v6911_v44 = vmul.f32 %v6446_v8, %v18292_v23  ;;  %v6912_v18 = vmul.f32 %v6446_v8, %v18294_v7  ;;  %v4733_v8 = vmul.f32 %v14839_v47, %v14839_v47  ;;  %v18408_v47 = vld [vmem:[#allocation244_spill] sm:$0xff] }
 0x93d   :  { %v7871_v24 = vadd.f32 %v18295_v31, %v6911_v44  ;;  %v7872_v42 = vadd.f32 %v18295_v31, %v6912_v18  ;;  %v4734_v44 = vmul.f32 %v14843_v0, %v14843_v0  ;;  %v18301_v31 = vld [vmem:[#allocation322_spill] sm:$0xff] }
 0x93f   :  { %8111 = vst [vmem:[#allocation2 + $0x2c0] sm:$0xff] %v7871_v24  ;;  %8112 = vst [vmem:[#allocation2 + $0x2c8] sm:$0xff] %v7872_v42  ;;  %v5313_v24 = vmul.f32 %v18301_v31, %v18301_v31 }
 0x941   :  { %6480 = vperm.xlu0 %8844, %v5914_v41   ;;  %v5433_v42 = vsub.f32 %v5193_v43, %v5313_v24  ;;  %v18305_v41 = vsub.f32 %v18304_v4, %v18246_v12  ;;  %v9181_v12 = vld [vmem:[%s16660_s5 + $0x344] ss:$8 sps:$4 sm:$0xff]  }
 0x942   :  { %v4323_v38 = vpop.xlane.xlu0 %4322  ;;  %v18309_v4 = vld [vmem:[#allocation326_spill] sm:$0xff]  ;;  %8691 = vmatprep.mubr.msk.bf16.mxu1 %vm3249_vm1, %v9181_v12 }
 0x943   :  { %v14841_v23 = vmul.f32 0.0051020407, %v4323_v38  ;;  %v14857_v38 = vadd.f32 %v4734_v44, %v4733_v8  ;;  %v18306_v8 = vld [vmem:[#allocation67_spill] sm:$0xff]  ;;  %v5673_v28 = vadd.f32 0.001, %v5433_v42  ;;  %v18311_v12 = vld [vmem:[#allocation214_spill] sm:$0xff] }
 0x944   :  { %v14873_v52 = vpop.f32.mrb[160].mxu1 }
 0x945   :  { %18297 = vst [vmem:[#allocation165_spill] sm:$0xff] %v14841_v23  ;;  %18307 = vst [vmem:[#allocation176_spill] sm:$0xff] %v14873_v52  ;;  %v4735_v43 = vmul.f32 %v14873_v52, %v14873_v52  ;;  %v14877_v24 = vpop.f32.mrb[161].mxu1  ;;  %9347 = vrsqrt.f32 %v5673_v28  ;;  %v5316_v28 = vmul.f32 %v18309_v4, %v18309_v4 }
 0x946   :  { %v14859_v18 = vpop.xlane.xlu0 %5042  ;;  %18308 = vst [vmem:[#allocation33_spill] sm:$0xff] %v14877_v24  ;;  %v14881_v20 = vadd.f32 %v14877_v24, %v14873_v52 }
 0x947   :  { %18299 = vst [vmem:[#allocation174_spill] sm:$0xff] %v14859_v18  ;;  %v18323_v18 = vsub.f32 %v18322_v2, %v18268_v5 }
 0x94e   :  { %v6461_v50 = vpop.permute.xlu0 %6460 }
 0x94f   :  { %v6917_v3 = vmul.f32 %v6461_v50, %v18303_v40  ;;  %v6918_v58 = vmul.f32 %v6461_v50, %v18305_v41  ;;  %v4736_v50 = vmul.f32 %v14877_v24, %v14877_v24  ;;  %v5553_v40 = vld [vmem:[%s16661_s6 + $0x190] sm:$0xff] }
 0x950   :  { %5051 = vadd.xlane.f32.xlu1 %v14608_v16  ;;  %v5196_v16 = vmul.f32 0.0051020407, %v13367_v45 }
 0x951   :  { %v7877_v44 = vadd.f32 %v18306_v8, %v6917_v3  ;;  %v7878_v7 = vadd.f32 %v18306_v8, %v6918_v58  ;;  %v14886_v58 = vadd.f32 %v4736_v50, %v4735_v43  ;;  %v9348_v3 = vpop.eup %9347 }
 0x952   :  { %v5436_v45 = vsub.f32 %v5196_v16, %v5316_v28  ;;  %v5913_v41 = vmul.f32 %v9348_v3, %v5553_v40  ;;  %v18312_v16 = vsub.f32 %v18311_v12, %v18259_v37  ;;  %v14922_v12 = vpop.f32.mrb[162].mxu1 }
 0x953   :  { %8117 = vst [vmem:[#allocation2 + $0x2f0] sm:$0xff] %v7877_v44  ;;  %8118 = vst [vmem:[#allocation2 + $0x2f8] sm:$0xff] %v7878_v7 }
 0x954   :  { %4337 = vadd.xlane.f32.xlu1 %v14683_v55  ;;  %v9183_v55 = vld [vmem:[%s16660_s5 + $0x340] ss:$8 sps:$4 sm:$0xff]   ;;  %18316 = vst [vmem:[#allocation175_spill] sm:$0xff] %v14922_v12 }
 0x955   :  { %3983 = vmatmul.mubr.bf16.gmra.mrb[176].mxu1 %v9183_v55 }
 0x960   :  { %4340 = vadd.xlane.f32.xlu0 %v14715_v33  ;;  %v5676_v33 = vadd.f32 0.001, %v5436_v45  ;;  %v5556_v45 = vld [vmem:[%s16661_s6 + $0x1a8] sm:$0xff] }
 0x962   :  { %9349 = vrsqrt.f32 %v5676_v33 }
 0x964   :  { %5060 = vadd.xlane.f32.xlu0 %v14720_v27  ;;  %v18313_v27 = vld [vmem:[#allocation215_spill] sm:$0xff] }
 0x965   :  { %6475 = vperm.xlu1 %8843, %v5913_v41   ;;  %v18314_v40 = vsub.f32 %v18313_v27, %v18259_v37  ;;  %v18315_v41 = vld [vmem:[#allocation68_spill] sm:$0xff]  ;;  %v14926_v37 = vpop.f32.mrb[163].mxu1 }
 0x966   :  { %18318 = vst [vmem:[#allocation282_spill] sm:$0xff] %v14926_v37  ;;  %v14932_v27 = vadd.f32 %v14926_v37, %v14922_v12 }
 0x96b   :  { %v14903_v7 = vpop.xlane.xlu1 %5039 }
 0x96c   :  { %v9350_v28 = vpop.eup %9349 }
 0x96d   :  { %v5916_v43 = vmul.f32 %v9350_v28, %v5556_v45  ;;  %v18320_v28 = vld [vmem:[#allocation327_spill] sm:$0xff] }
 0x96e   :  { %v5195_v45 = vmul.f32 0.0051020407, %v18320_v28 }
 0x96f   :  { %v4326_v42 = vpop.xlane.xlu1 %4325 }
 0x970   :  { %v14905_v8 = vmul.f32 0.0051020407, %v4326_v42 }
 0x972   :  { %18310 = vst [vmem:[#allocation284_spill] sm:$0xff] %v14905_v8  ;;  %v18324_v8 = vld [vmem:[#allocation221_spill] sm:$0xff] }
 0x973   :  { %v6456_v50 = vpop.permute.xlu1 %6455 }
 0x974   :  { %v6915_v3 = vmul.f32 %v6456_v50, %v18312_v16  ;;  %v6916_v55 = vmul.f32 %v6456_v50, %v18314_v40  ;;  %v4737_v50 = vmul.f32 %v14922_v12, %v14922_v12  ;;  %v18430_v12 = vld [vmem:[#allocation252_spill] sm:$0xff] }
 0x976   :  { %v7875_v33 = vadd.f32 %v18315_v41, %v6915_v3  ;;  %v7876_v42 = vadd.f32 %v18315_v41, %v6916_v55  ;;  %v4738_v3 = vmul.f32 %v14926_v37, %v14926_v37  ;;  %v18321_v41 = vld [vmem:[#allocation325_spill] sm:$0xff] }
 0x978   :  { %8115 = vst [vmem:[#allocation2 + $0x2e0] sm:$0xff] %v7875_v33  ;;  %8116 = vst [vmem:[#allocation2 + $0x2e8] sm:$0xff] %v7876_v42  ;;  %v5315_v33 = vmul.f32 %v18321_v41, %v18321_v41 }
 0x97a   :  { %6490 = vperm.xlu0 %8844, %v5916_v43   ;;  %v5435_v42 = vsub.f32 %v5195_v45, %v5315_v33  ;;  %v18325_v43 = vsub.f32 %v18324_v8, %v18268_v5  ;;  %v5555_v8 = vld [vmem:[%s16661_s6 + $0x1a0] sm:$0xff] }
 0x97b   :  { %v4329_v44 = vpop.xlane.xlu0 %4328 }
 0x97c   :  { %v14924_v16 = vmul.f32 0.0051020407, %v4329_v44  ;;  %v14940_v44 = vadd.f32 %v4738_v3, %v4737_v50  ;;  %v18326_v50 = vld [vmem:[#allocation69_spill] sm:$0xff]  ;;  %v5675_v9 = vadd.f32 0.001, %v5435_v42 }
 0x97d   :  { %v14956_v28 = vpop.f32.mrb[164].mxu1 }
 0x97e   :  { %18317 = vst [vmem:[#allocation177_spill] sm:$0xff] %v14924_v16  ;;  %18327 = vst [vmem:[#allocation289_spill] sm:$0xff] %v14956_v28  ;;  %v4739_v45 = vmul.f32 %v14956_v28, %v14956_v28  ;;  %v14960_v33 = vpop.f32.mrb[165].mxu1  ;;  %9351 = vrsqrt.f32 %v5675_v9 }
 0x97f   :  { %v14942_v55 = vpop.xlane.xlu0 %5048  ;;  %18328 = vst [vmem:[#allocation170_spill] sm:$0xff] %v14960_v33  ;;  %v14964_v2 = vadd.f32 %v14960_v33, %v14956_v28 }
 0x980   :  { %18319 = vst [vmem:[#allocation49_spill] sm:$0xff] %v14942_v55  ;;  %v18344_v55 = vld [vmem:[#allocation224_spill] sm:$0xff] }
 0x981   :  { %v18345_v16 = vsub.f32 %v18344_v55, %v18289_v6  ;;  %v9187_v55 = vld [vmem:[%s16660_s5 + $0x364] ss:$8 sps:$4 sm:$0xff]  }
 0x987   :  { %v6471_v48 = vpop.permute.xlu0 %6470 }
 0x988   :  { %v6921_v23 = vmul.f32 %v6471_v48, %v18323_v18  ;;  %v6922_v13 = vmul.f32 %v6471_v48, %v18325_v43  ;;  %v4740_v48 = vmul.f32 %v14960_v33, %v14960_v33  ;;  %v9352_v18 = vpop.eup %9351  ;;  %v18330_v43 = vld [vmem:[#allocation329_spill] sm:$0xff] }
 0x989   :  { %5057 = vadd.xlane.f32.xlu1 %v14691_v17  ;;  %v18329_v17 = vld [vmem:[#allocation331_spill] sm:$0xff]  ;;  %v5318_v9 = vmul.f32 %v18330_v43, %v18330_v43  ;;  %v5915_v42 = vmul.f32 %v9352_v18, %v5555_v8 }
 0x98a   :  { %v7881_v3 = vadd.f32 %v18326_v50, %v6921_v23  ;;  %v7882_v40 = vadd.f32 %v18326_v50, %v6922_v13  ;;  %v14969_v13 = vadd.f32 %v4740_v48, %v4739_v45  ;;  %v5198_v5 = vmul.f32 0.0051020407, %v18329_v17  ;;  %v9184_v23 = vld [vmem:[%s16660_s5 + $0x354] ss:$8 sps:$4 sm:$0xff]  }
 0x98b   :  { %8692 = vmatprep.mubr.msk.bf16.mxu1 %vm3249_vm1, %v9184_v23 }
 0x98c   :  { %8121 = vst [vmem:[#allocation2 + $0x310] sm:$0xff] %v7881_v3  ;;  %8122 = vst [vmem:[#allocation2 + $0x318] sm:$0xff] %v7882_v40  ;;  %v5438_v40 = vsub.f32 %v5198_v5, %v5318_v9 }
 0x98d   :  { %4343 = vadd.xlane.f32.xlu1 %v14766_v61  ;;  %v9186_v61 = vld [vmem:[%s16660_s5 + $0x350] ss:$8 sps:$4 sm:$0xff]  }
 0x98e   :  { %3993 = vmatmul.mubr.bf16.gmra.mrb[180].mxu1 %v9186_v61  ;;  %v18333_v61 = vld [vmem:[#allocation218_spill] sm:$0xff] }
 0x98f   :  { %v18334_v5 = vsub.f32 %v18333_v61, %v18281_v29  ;;  %v15005_v61 = vpop.f32.mrb[166].mxu1  ;;  %8693 = vmatprep.mubr.msk.bf16.mxu1 %vm3249_vm1, %v9187_v55 }
 0x990   :  { %18338 = vst [vmem:[#allocation171_spill] sm:$0xff] %v15005_v61 }
 0x999   :  { %4346 = vadd.xlane.f32.xlu0 %v14798_v10  ;;  %v5678_v10 = vadd.f32 0.001, %v5438_v40 }
 0x99b   :  { %9353 = vrsqrt.f32 %v5678_v10  ;;  %v18337_v10 = vld [vmem:[#allocation70_spill] sm:$0xff] }
 0x99d   :  { %5066 = vadd.xlane.f32.xlu0 %v14803_v53  ;;  %v18335_v53 = vld [vmem:[#allocation219_spill] sm:$0xff] }
 0x99e   :  { %6485 = vperm.xlu1 %8843, %v5915_v42   ;;  %v18336_v8 = vsub.f32 %v18335_v53, %v18281_v29  ;;  %v5558_v42 = vld [vmem:[%s16661_s6 + $0x1b8] sm:$0xff]  ;;  %v15009_v29 = vpop.f32.mrb[167].mxu1 }
 0x99f   :  { %18340 = vst [vmem:[#allocation50_spill] sm:$0xff] %v15009_v29  ;;  %v15015_v53 = vadd.f32 %v15009_v29, %v15005_v61 }
 0x9a4   :  { %v14986_v50 = vpop.xlane.xlu1 %5045 }
 0x9a5   :  { %18331 = vst [vmem:[#allocation172_spill] sm:$0xff] %v14986_v50  ;;  %v9354_v40 = vpop.eup %9353  ;;  %v18346_v50 = vld [vmem:[#allocation225_spill] sm:$0xff] }
 0x9a6   :  { %v5918_v17 = vmul.f32 %v9354_v40, %v5558_v42  ;;  %v18343_v42 = vld [vmem:[#allocation328_spill] sm:$0xff] }
 0x9a8   :  { %v4332_v3 = vpop.xlane.xlu1 %4331 }
 0x9a9   :  { %v14988_v45 = vmul.f32 0.0051020407, %v4332_v3 }
 0x9ab   :  { %18332 = vst [vmem:[#allocation34_spill] sm:$0xff] %v14988_v45 }
 0x9ac   :  { %v6466_v23 = vpop.permute.xlu1 %6465 }
 0x9ad   :  { %v6919_v18 = vmul.f32 %v6466_v23, %v18334_v5  ;;  %v6920_v9 = vmul.f32 %v6466_v23, %v18336_v8  ;;  %v4741_v23 = vmul.f32 %v15005_v61, %v15005_v61 }
 0x9af   :  { %v7879_v3 = vadd.f32 %v18337_v10, %v6919_v18  ;;  %v7880_v48 = vadd.f32 %v18337_v10, %v6920_v9  ;;  %v4742_v18 = vmul.f32 %v15009_v29, %v15009_v29  ;;  %v18342_v9 = vld [vmem:[#allocation330_spill] sm:$0xff]  ;;  %v5317_v10 = vmul.f32 %v18343_v42, %v18343_v42 }
 0x9b0   :  { %v5197_v40 = vmul.f32 0.0051020407, %v18342_v9 }
 0x9b1   :  { %8119 = vst [vmem:[#allocation2 + $0x300] sm:$0xff] %v7879_v3  ;;  %8120 = vst [vmem:[#allocation2 + $0x308] sm:$0xff] %v7880_v48  ;;  %v18347_v48 = vsub.f32 %v18346_v50, %v18289_v6 }
 0x9b2   :  { %v5437_v3 = vsub.f32 %v5197_v40, %v5317_v10 }
 0x9b3   :  { %6500 = vperm.xlu0 %8844, %v5918_v17  }
 0x9b4   :  { %v4335_v14 = vpop.xlane.xlu0 %4334  ;;  %v5677_v36 = vadd.f32 0.001, %v5437_v3 }
 0x9b5   :  { %v15007_v5 = vmul.f32 0.0051020407, %v4335_v14  ;;  %v15023_v14 = vadd.f32 %v4742_v18, %v4741_v23  ;;  %v18348_v23 = vld [vmem:[#allocation71_spill] sm:$0xff] }
 0x9b6   :  { %v15039_v9 = vpop.f32.mrb[168].mxu1  ;;  %9355 = vrsqrt.f32 %v5677_v36 }
 0x9b7   :  { %18339 = vst [vmem:[#allocation173_spill] sm:$0xff] %v15007_v5  ;;  %18349 = vst [vmem:[#allocation182_spill] sm:$0xff] %v15039_v9  ;;  %v4743_v40 = vmul.f32 %v15039_v9, %v15039_v9  ;;  %v15043_v10 = vpop.f32.mrb[169].mxu1 }
 0x9b8   :  { %v15025_v8 = vpop.xlane.xlu0 %5054  ;;  %18350 = vst [vmem:[#allocation184_spill] sm:$0xff] %v15043_v10  ;;  %v15047_v6 = vadd.f32 %v15043_v10, %v15039_v9 }
 0x9b9   :  { %18341 = vst [vmem:[#allocation288_spill] sm:$0xff] %v15025_v8  ;;  %v18366_v8 = vld [vmem:[#allocation232_spill] sm:$0xff] }
 0x9ba   :  { %v18367_v5 = vsub.f32 %v18366_v8, %v18309_v4 }
 0x9c0   :  { %v6481_v54 = vpop.permute.xlu0 %6480  ;;  %v9356_v50 = vpop.eup %9355 }
 0x9c1   :  { %v6925_v45 = vmul.f32 %v6481_v54, %v18345_v16  ;;  %v6926_v11 = vmul.f32 %v6481_v54, %v18347_v48  ;;  %v4744_v54 = vmul.f32 %v15043_v10, %v15043_v10  ;;  %v18352_v48 = vld [vmem:[#allocation333_spill] sm:$0xff] }
 0x9c2   :  { %5063 = vadd.xlane.f32.xlu1 %v14774_v63  ;;  %v18351_v63 = vld [vmem:[#allocation229_spill] sm:$0xff]  ;;  %v5320_v36 = vmul.f32 %v18352_v48, %v18352_v48 }
 0x9c3   :  { %v7885_v18 = vadd.f32 %v18348_v23, %v6925_v45  ;;  %v7886_v17 = vadd.f32 %v18348_v23, %v6926_v11  ;;  %v15052_v11 = vadd.f32 %v4744_v54, %v4743_v40  ;;  %v5200_v16 = vmul.f32 0.0051020407, %v18351_v63  ;;  %v5557_v45 = vld [vmem:[%s16661_s6 + $0x1b0] sm:$0xff] }
 0x9c4   :  { %v5917_v3 = vmul.f32 %v9356_v50, %v5557_v45 }
 0x9c5   :  { %8125 = vst [vmem:[#allocation2 + $0x330] sm:$0xff] %v7885_v18  ;;  %8126 = vst [vmem:[#allocation2 + $0x338] sm:$0xff] %v7886_v17  ;;  %v5440_v17 = vsub.f32 %v5200_v16, %v5320_v36 }
 0x9c6   :  { %4349 = vadd.xlane.f32.xlu1 %v14849_v51  ;;  %v9189_v51 = vld [vmem:[%s16660_s5 + $0x360] ss:$8 sps:$4 sm:$0xff]  }
 0x9c7   :  { %4003 = vmatmul.mubr.bf16.gmra.mrb[184].mxu1 %v9189_v51  ;;  %v18355_v51 = vld [vmem:[#allocation222_spill] sm:$0xff] }
 0x9c8   :  { %v18356_v16 = vsub.f32 %v18355_v51, %v18301_v31  ;;  %v15088_v51 = vpop.f32.mrb[170].mxu1 }
 0x9c9   :  { %18360 = vst [vmem:[#allocation185_spill] sm:$0xff] %v15088_v51 }
 0x9d2   :  { %4352 = vadd.xlane.f32.xlu0 %v14881_v20  ;;  %v5680_v20 = vadd.f32 0.001, %v5440_v17 }
 0x9d4   :  { %9357 = vrsqrt.f32 %v5680_v20  ;;  %v18359_v20 = vld [vmem:[#allocation72_spill] sm:$0xff] }
 0x9d6   :  { %5072 = vadd.xlane.f32.xlu0 %v14886_v58  ;;  %v18357_v58 = vld [vmem:[#allocation223_spill] sm:$0xff] }
 0x9d7   :  { %6495 = vperm.xlu1 %8843, %v5917_v3   ;;  %v18358_v45 = vsub.f32 %v18357_v58, %v18301_v31  ;;  %v5560_v3 = vld [vmem:[%s16661_s6 + $0x1c8] sm:$0xff]  ;;  %v15092_v31 = vpop.f32.mrb[171].mxu1 }
 0x9d8   :  { %18362 = vst [vmem:[#allocation293_spill] sm:$0xff] %v15092_v31  ;;  %v15098_v58 = vadd.f32 %v15092_v31, %v15088_v51 }
 0x9dd   :  { %v15069_v23 = vpop.xlane.xlu1 %5051 }
 0x9de   :  { %18353 = vst [vmem:[#allocation35_spill] sm:$0xff] %v15069_v23  ;;  %v9358_v17 = vpop.eup %9357  ;;  %v18368_v23 = vld [vmem:[#allocation233_spill] sm:$0xff] }
 0x9df   :  { %v5920_v63 = vmul.f32 %v9358_v17, %v5560_v3  ;;  %v18365_v3 = vld [vmem:[#allocation332_spill] sm:$0xff] }
 0x9e1   :  { %v4338_v18 = vpop.xlane.xlu1 %4337 }
 0x9e2   :  { %v15071_v40 = vmul.f32 0.0051020407, %v4338_v18 }
 0x9e4   :  { %18354 = vst [vmem:[#allocation183_spill] sm:$0xff] %v15071_v40 }
 0x9e5   :  { %v6476_v55 = vpop.permute.xlu1 %6475 }
 0x9e6   :  { %v6923_v50 = vmul.f32 %v6476_v55, %v18356_v16  ;;  %v6924_v36 = vmul.f32 %v6476_v55, %v18358_v45  ;;  %v4745_v55 = vmul.f32 %v15088_v51, %v15088_v51 }
 0x9e8   :  { %v7883_v18 = vadd.f32 %v18359_v20, %v6923_v50  ;;  %v7884_v54 = vadd.f32 %v18359_v20, %v6924_v36  ;;  %v4746_v50 = vmul.f32 %v15092_v31, %v15092_v31  ;;  %v18364_v36 = vld [vmem:[#allocation96_spill] sm:$0xff]  ;;  %v5319_v20 = vmul.f32 %v18365_v3, %v18365_v3 }
 0x9e9   :  { %v5199_v17 = vmul.f32 0.0051020407, %v18364_v36 }
 0x9ea   :  { %8123 = vst [vmem:[#allocation2 + $0x320] sm:$0xff] %v7883_v18  ;;  %8124 = vst [vmem:[#allocation2 + $0x328] sm:$0xff] %v7884_v54  ;;  %v18369_v54 = vsub.f32 %v18368_v23, %v18309_v4  ;;  %v5559_v23 = vld [vmem:[%s16661_s6 + $0x1c0] sm:$0xff] }
 0x9eb   :  { %v5439_v18 = vsub.f32 %v5199_v17, %v5319_v20 }
 0x9ec   :  { %6510 = vperm.xlu0 %8844, %v5920_v63  }
 0x9ed   :  { %v4341_v35 = vpop.xlane.xlu0 %4340  ;;  %v5679_v26 = vadd.f32 0.001, %v5439_v18 }
 0x9ee   :  { %v15090_v16 = vmul.f32 0.0051020407, %v4341_v35  ;;  %v15106_v35 = vadd.f32 %v4746_v50, %v4745_v55  ;;  %v18370_v55 = vld [vmem:[#allocation73_spill] sm:$0xff] }
 0x9ef   :  { %v15122_v36 = vpop.f32.mrb[172].mxu1  ;;  %9359 = vrsqrt.f32 %v5679_v26 }
 0x9f0   :  { %18361 = vst [vmem:[#allocation51_spill] sm:$0xff] %v15090_v16  ;;  %18371 = vst [vmem:[#allocation178_spill] sm:$0xff] %v15122_v36  ;;  %v4747_v17 = vmul.f32 %v15122_v36, %v15122_v36  ;;  %v15126_v20 = vpop.f32.mrb[173].mxu1 }
 0x9f1   :  { %v15108_v45 = vpop.xlane.xlu0 %5060  ;;  %18372 = vst [vmem:[#allocation180_spill] sm:$0xff] %v15126_v20  ;;  %v15130_v4 = vadd.f32 %v15126_v20, %v15122_v36 }
 0x9f2   :  { %18363 = vst [vmem:[#allocation291_spill] sm:$0xff] %v15108_v45  ;;  %v18387_v45 = vsub.f32 %v18386_v39, %v18330_v43 }
 0x9f9   :  { %v6491_v30 = vpop.permute.xlu0 %6490  ;;  %v9360_v8 = vpop.eup %9359 }
 0x9fa   :  { %v6929_v40 = vmul.f32 %v6491_v30, %v18367_v5  ;;  %v6930_v32 = vmul.f32 %v6491_v30, %v18369_v54  ;;  %v4748_v30 = vmul.f32 %v15126_v20, %v15126_v20  ;;  %v9190_v5 = vld [vmem:[%s16660_s5 + $0x374] ss:$8 sps:$4 sm:$0xff]   ;;  %v5919_v54 = vmul.f32 %v9360_v8, %v5559_v23 }
 0x9fb   :  { %5069 = vadd.xlane.f32.xlu1 %v14857_v38  ;;  %v5202_v38 = vmul.f32 0.0051020407, %v13684_v15  ;;  %8694 = vmatprep.mubr.msk.bf16.mxu1 %vm3249_vm1, %v9190_v5  ;;  %v18375_v5 = vld [vmem:[#allocation227_spill] sm:$0xff] }
 0x9fc   :  { %v7889_v50 = vadd.f32 %v18370_v55, %v6929_v40  ;;  %v7890_v63 = vadd.f32 %v18370_v55, %v6930_v32  ;;  %v15135_v32 = vadd.f32 %v4748_v30, %v4747_v17  ;;  %v18373_v40 = vld [vmem:[#allocation8_spill] sm:$0xff] }
 0x9fd   :  { %v5322_v26 = vmul.f32 %v18373_v40, %v18373_v40 }
 0x9fe   :  { %8129 = vst [vmem:[#allocation2 + $0x350] sm:$0xff] %v7889_v50  ;;  %8130 = vst [vmem:[#allocation2 + $0x358] sm:$0xff] %v7890_v63 }
 0x9ff   :  { %4355 = vadd.xlane.f32.xlu1 %v14932_v27  ;;  %v9192_v27 = vld [vmem:[%s16660_s5 + $0x370] ss:$8 sps:$4 sm:$0xff]   ;;  %v5442_v15 = vsub.f32 %v5202_v38, %v5322_v26  ;;  %v18376_v38 = vsub.f32 %v18375_v5, %v18321_v41  ;;  %v15171_v5 = vpop.f32.mrb[174].mxu1 }
 0xa00   :  { %4013 = vmatmul.mubr.bf16.gmra.mrb[188].mxu1 %v9192_v27  ;;  %18380 = vst [vmem:[#allocation179_spill] sm:$0xff] %v15171_v5 }
 0xa0b   :  { %4358 = vadd.xlane.f32.xlu0 %v14964_v2  ;;  %v5682_v2 = vadd.f32 0.001, %v5442_v15  ;;  %v5562_v15 = vld [vmem:[%s16661_s6 + $0x1d8] sm:$0xff] }
 0xa0d   :  { %9361 = vrsqrt.f32 %v5682_v2 }
 0xa0f   :  { %5078 = vadd.xlane.f32.xlu0 %v14969_v13  ;;  %v18377_v13 = vld [vmem:[#allocation230_spill] sm:$0xff] }
 0xa10   :  { %6505 = vperm.xlu1 %8843, %v5919_v54   ;;  %v18378_v23 = vsub.f32 %v18377_v13, %v18321_v41  ;;  %v18379_v54 = vld [vmem:[#allocation74_spill] sm:$0xff]  ;;  %v15175_v41 = vpop.f32.mrb[175].mxu1 }
 0xa11   :  { %18382 = vst [vmem:[#allocation52_spill] sm:$0xff] %v15175_v41  ;;  %v15181_v13 = vadd.f32 %v15175_v41, %v15171_v5 }
 0xa16   :  { %v15152_v63 = vpop.xlane.xlu1 %5057 }
 0xa17   :  { %v9362_v26 = vpop.eup %9361 }
 0xa18   :  { %v5922_v17 = vmul.f32 %v9362_v26, %v5562_v15  ;;  %v18384_v26 = vld [vmem:[#allocation6_spill] sm:$0xff] }
 0xa19   :  { %v5321_v15 = vmul.f32 %v18384_v26, %v18384_v26 }
 0xa1a   :  { %v4344_v18 = vpop.xlane.xlu1 %4343 }
 0xa1b   :  { %v15154_v55 = vmul.f32 0.0051020407, %v4344_v18 }
 0xa1d   :  { %18374 = vst [vmem:[#allocation36_spill] sm:$0xff] %v15154_v55  ;;  %v18388_v55 = vld [vmem:[#allocation239_spill] sm:$0xff] }
 0xa1e   :  { %v6486_v30 = vpop.permute.xlu1 %6485 }
 0xa1f   :  { %v6927_v8 = vmul.f32 %v6486_v30, %v18376_v38  ;;  %v6928_v27 = vmul.f32 %v6486_v30, %v18378_v23  ;;  %v4749_v30 = vmul.f32 %v15171_v5, %v15171_v5 }
 0xa21   :  { %v7887_v2 = vadd.f32 %v18379_v54, %v6927_v8  ;;  %v7888_v18 = vadd.f32 %v18379_v54, %v6928_v27  ;;  %v4750_v8 = vmul.f32 %v15175_v41, %v15175_v41  ;;  %v18385_v54 = vld [vmem:[#allocation22_spill] sm:$0xff] }
 0xa23   :  { %8127 = vst [vmem:[#allocation2 + $0x340] sm:$0xff] %v7887_v2  ;;  %8128 = vst [vmem:[#allocation2 + $0x348] sm:$0xff] %v7888_v18  ;;  %v5201_v2 = vmul.f32 0.0051020407, %v18385_v54 }
 0xa25   :  { %6520 = vperm.xlu0 %8844, %v5922_v17   ;;  %v5441_v18 = vsub.f32 %v5201_v2, %v5321_v15  ;;  %v18389_v17 = vsub.f32 %v18388_v55, %v18330_v43  ;;  %v5561_v55 = vld [vmem:[%s16661_s6 + $0x1d0] sm:$0xff] }
 0xa26   :  { %v4347_v50 = vpop.xlane.xlu0 %4346 }
 0xa27   :  { %v15173_v38 = vmul.f32 0.0051020407, %v4347_v50  ;;  %v15189_v50 = vadd.f32 %v4750_v8, %v4749_v30  ;;  %v18390_v30 = vld [vmem:[#allocation75_spill] sm:$0xff] }
 0xa28   :  { %v15205_v56 = vpop.f32.mrb[176].mxu1 }
 0xa29   :  { %18381 = vst [vmem:[#allocation181_spill] sm:$0xff] %v15173_v38  ;;  %18391 = vst [vmem:[#allocation290_spill] sm:$0xff] %v15205_v56  ;;  %v4751_v15 = vmul.f32 %v15205_v56, %v15205_v56  ;;  %v15209_v54 = vpop.f32.mrb[177].mxu1  ;;  %v18409_v38 = vsub.f32 %v18408_v47, %v18352_v48 }
 0xa2a   :  { %v15191_v27 = vpop.xlane.xlu0 %5066  ;;  %18392 = vst [vmem:[#allocation188_spill] sm:$0xff] %v15209_v54  ;;  %v15213_v39 = vadd.f32 %v15209_v54, %v15205_v56 }
 0xa2b   :  { %18383 = vst [vmem:[#allocation292_spill] sm:$0xff] %v15191_v27  ;;  %v5681_v27 = vadd.f32 0.001, %v5441_v18 }
 0xa2d   :  { %9363 = vrsqrt.f32 %v5681_v27 }
 0xa32   :  { %v6501_v25 = vpop.permute.xlu0 %6500 }
 0xa33   :  { %v6933_v16 = vmul.f32 %v6501_v25, %v18387_v45  ;;  %v6934_v57 = vmul.f32 %v6501_v25, %v18389_v17  ;;  %v4752_v25 = vmul.f32 %v15209_v54, %v15209_v54  ;;  %v18394_v17 = vld [vmem:[#allocation253_spill] sm:$0xff] }
 0xa34   :  { %5075 = vadd.xlane.f32.xlu1 %v14940_v44  ;;  %v18393_v44 = vld [vmem:[#allocation251_spill] sm:$0xff] }
 0xa35   :  { %v7893_v8 = vadd.f32 %v18390_v30, %v6933_v16  ;;  %v7894_v23 = vadd.f32 %v18390_v30, %v6934_v57  ;;  %v15218_v57 = vadd.f32 %v4752_v25, %v4751_v15  ;;  %v5204_v43 = vmul.f32 0.0051020407, %v18393_v44  ;;  %v9193_v16 = vld [vmem:[%s16660_s5 + $0x384] ss:$8 sps:$4 sm:$0xff]  }
 0xa36   :  { %8695 = vmatprep.mubr.msk.bf16.mxu1 %vm3249_vm1, %v9193_v16  ;;  %v18397_v16 = vld [vmem:[#allocation236_spill] sm:$0xff] }
 0xa37   :  { %8133 = vst [vmem:[#allocation2 + $0x370] sm:$0xff] %v7893_v8  ;;  %8134 = vst [vmem:[#allocation2 + $0x378] sm:$0xff] %v7894_v23  ;;  %v9364_v45 = vpop.eup %9363  ;;  %v5324_v23 = vmul.f32 %v18394_v17, %v18394_v17 }
 0xa38   :  { %4361 = vadd.xlane.f32.xlu1 %v15015_v53  ;;  %v9195_v53 = vld [vmem:[%s16660_s5 + $0x380] ss:$8 sps:$4 sm:$0xff]   ;;  %v5921_v2 = vmul.f32 %v9364_v45, %v5561_v55 }
 0xa39   :  { %4023 = vmatmul.mubr.bf16.gmra.mrb[192].mxu1 %v9195_v53  ;;  %v5444_v27 = vsub.f32 %v5204_v43, %v5324_v23  ;;  %v18398_v43 = vsub.f32 %v18397_v16, %v18343_v42  ;;  %v15254_v16 = vpop.f32.mrb[178].mxu1 }
 0xa3a   :  { %18402 = vst [vmem:[#allocation297_spill] sm:$0xff] %v15254_v16 }
 0xa44   :  { %4364 = vadd.xlane.f32.xlu0 %v15047_v6  ;;  %v5684_v6 = vadd.f32 0.001, %v5444_v27  ;;  %v5564_v27 = vld [vmem:[%s16661_s6 + $0x1e8] sm:$0xff] }
 0xa46   :  { %9365 = vrsqrt.f32 %v5684_v6 }
 0xa48   :  { %5084 = vadd.xlane.f32.xlu0 %v15052_v11  ;;  %v18399_v11 = vld [vmem:[#allocation237_spill] sm:$0xff] }
 0xa49   :  { %6515 = vperm.xlu1 %8843, %v5921_v2   ;;  %v18400_v55 = vsub.f32 %v18399_v11, %v18343_v42  ;;  %v18401_v2 = vld [vmem:[#allocation76_spill] sm:$0xff]  ;;  %v15258_v42 = vpop.f32.mrb[179].mxu1 }
 0xa4a   :  { %18404 = vst [vmem:[#allocation186_spill] sm:$0xff] %v15258_v42  ;;  %v15264_v11 = vadd.f32 %v15258_v42, %v15254_v16 }
 0xa4f   :  { %v15235_v18 = vpop.xlane.xlu1 %5063 }
 0xa50   :  { %18395 = vst [vmem:[#allocation189_spill] sm:$0xff] %v15235_v18  ;;  %v9366_v23 = vpop.eup %9365  ;;  %v18410_v18 = vld [vmem:[#allocation247_spill] sm:$0xff] }
 0xa51   :  { %v5924_v25 = vmul.f32 %v9366_v23, %v5564_v27  ;;  %v18406_v23 = vld [vmem:[#allocation235_spill] sm:$0xff] }
 0xa52   :  { %v5323_v27 = vmul.f32 %v18406_v23, %v18406_v23 }
 0xa53   :  { %v4350_v30 = vpop.xlane.xlu1 %4349 }
 0xa54   :  { %v15237_v8 = vmul.f32 0.0051020407, %v4350_v30 }
 0xa56   :  { %18396 = vst [vmem:[#allocation53_spill] sm:$0xff] %v15237_v8 }
 0xa57   :  { %v6496_v44 = vpop.permute.xlu1 %6495 }
 0xa58   :  { %v6931_v45 = vmul.f32 %v6496_v44, %v18398_v43  ;;  %v6932_v53 = vmul.f32 %v6496_v44, %v18400_v55  ;;  %v4753_v44 = vmul.f32 %v15254_v16, %v15254_v16 }
 0xa5a   :  { %v7891_v6 = vadd.f32 %v18401_v2, %v6931_v45  ;;  %v7892_v30 = vadd.f32 %v18401_v2, %v6932_v53  ;;  %v4754_v45 = vmul.f32 %v15258_v42, %v15258_v42  ;;  %v18407_v2 = vld [vmem:[#allocation102_spill] sm:$0xff] }
 0xa5c   :  { %8131 = vst [vmem:[#allocation2 + $0x360] sm:$0xff] %v7891_v6  ;;  %8132 = vst [vmem:[#allocation2 + $0x368] sm:$0xff] %v7892_v30  ;;  %v5203_v6 = vmul.f32 0.0051020407, %v18407_v2 }
 0xa5e   :  { %6530 = vperm.xlu0 %8844, %v5924_v25   ;;  %v5443_v30 = vsub.f32 %v5203_v6, %v5323_v27  ;;  %v18411_v25 = vsub.f32 %v18410_v18, %v18352_v48 }
 0xa5f   :  { %v4353_v15 = vpop.xlane.xlu0 %4352 }
 0xa60   :  { %v15256_v43 = vmul.f32 0.0051020407, %v4353_v15  ;;  %v15272_v15 = vadd.f32 %v4754_v45, %v4753_v44  ;;  %v18412_v44 = vld [vmem:[#allocation77_spill] sm:$0xff] }
 0xa61   :  { %v15288_v24 = vpop.f32.mrb[180].mxu1 }
 0xa62   :  { %18403 = vst [vmem:[#allocation295_spill] sm:$0xff] %v15256_v43  ;;  %18413 = vst [vmem:[#allocation54_spill] sm:$0xff] %v15288_v24  ;;  %v4755_v27 = vmul.f32 %v15288_v24, %v15288_v24  ;;  %v15292_v2 = vpop.f32.mrb[181].mxu1  ;;  %v18431_v43 = vsub.f32 %v18430_v12, %v18373_v40 }
 0xa63   :  { %v15274_v53 = vpop.xlane.xlu0 %5072  ;;  %18414 = vst [vmem:[#allocation296_spill] sm:$0xff] %v15292_v2  ;;  %v15296_v47 = vadd.f32 %v15292_v2, %v15288_v24 }
 0xa64   :  { %18405 = vst [vmem:[#allocation187_spill] sm:$0xff] %v15274_v53  ;;  %v5683_v53 = vadd.f32 0.001, %v5443_v30 }
 0xa66   :  { %9367 = vrsqrt.f32 %v5683_v53 }
 0xa6b   :  { %v6511_v0 = vpop.permute.xlu0 %6510 }
 0xa6c   :  { %v6937_v8 = vmul.f32 %v6511_v0, %v18409_v38  ;;  %v6938_v52 = vmul.f32 %v6511_v0, %v18411_v25  ;;  %v4756_v0 = vmul.f32 %v15292_v2, %v15292_v2  ;;  %v9196_v38 = vld [vmem:[%s16660_s5 + $0x394] ss:$8 sps:$4 sm:$0xff]   ;;  %v18416_v25 = vld [vmem:[#allocation105_spill] sm:$0xff] }
 0xa6d   :  { %5081 = vadd.xlane.f32.xlu1 %v15023_v14  ;;  %v18415_v14 = vld [vmem:[#allocation40_spill] sm:$0xff]  ;;  %8696 = vmatprep.mubr.msk.bf16.mxu1 %vm3249_vm1, %v9196_v38 }
 0xa6e   :  { %v7897_v45 = vadd.f32 %v18412_v44, %v6937_v8  ;;  %v7898_v55 = vadd.f32 %v18412_v44, %v6938_v52  ;;  %v15301_v52 = vadd.f32 %v4756_v0, %v4755_v27  ;;  %v5206_v48 = vmul.f32 0.0051020407, %v18415_v14  ;;  %v5563_v8 = vld [vmem:[%s16661_s6 + $0x1e0] sm:$0xff]  ;;  %v18419_v38 = vld [vmem:[#allocation240_spill] sm:$0xff] }
 0xa70   :  { %8137 = vst [vmem:[#allocation2 + $0x390] sm:$0xff] %v7897_v45  ;;  %8138 = vst [vmem:[#allocation2 + $0x398] sm:$0xff] %v7898_v55  ;;  %v9368_v18 = vpop.eup %9367  ;;  %v5326_v55 = vmul.f32 %v18416_v25, %v18416_v25 }
 0xa71   :  { %4367 = vadd.xlane.f32.xlu1 %v15098_v58  ;;  %v9198_v58 = vld [vmem:[%s16660_s5 + $0x390] ss:$8 sps:$4 sm:$0xff]   ;;  %v5923_v6 = vmul.f32 %v9368_v18, %v5563_v8 }
 0xa72   :  { %4033 = vmatmul.mubr.bf16.gmra.mrb[196].mxu1 %v9198_v58  ;;  %v5446_v53 = vsub.f32 %v5206_v48, %v5326_v55  ;;  %v18420_v48 = vsub.f32 %v18419_v38, %v18365_v3  ;;  %v15337_v38 = vpop.f32.mrb[182].mxu1 }
 0xa73   :  { %18424 = vst [vmem:[#allocation193_spill] sm:$0xff] %v15337_v38 }
 0xa7d   :  { %4370 = vadd.xlane.f32.xlu0 %v15130_v4  ;;  %v5686_v4 = vadd.f32 0.001, %v5446_v53  ;;  %v5566_v53 = vld [vmem:[%s16661_s6 + $0x1f8] sm:$0xff] }
 0xa7f   :  { %9369 = vrsqrt.f32 %v5686_v4 }
 0xa81   :  { %5090 = vadd.xlane.f32.xlu0 %v15135_v32  ;;  %v18421_v32 = vld [vmem:[#allocation243_spill] sm:$0xff] }
 0xa82   :  { %6525 = vperm.xlu1 %8843, %v5923_v6   ;;  %v18422_v8 = vsub.f32 %v18421_v32, %v18365_v3  ;;  %v18423_v6 = vld [vmem:[#allocation78_spill] sm:$0xff]  ;;  %v15341_v3 = vpop.f32.mrb[183].mxu1 }
 0xa83   :  { %18426 = vst [vmem:[#allocation301_spill] sm:$0xff] %v15341_v3  ;;  %v15347_v32 = vadd.f32 %v15341_v3, %v15337_v38 }
 0xa88   :  { %v15318_v30 = vpop.xlane.xlu1 %5069 }
 0xa89   :  { %18417 = vst [vmem:[#allocation294_spill] sm:$0xff] %v15318_v30  ;;  %v9370_v55 = vpop.eup %9369  ;;  %v18432_v30 = vld [vmem:[#allocation254_spill] sm:$0xff] }
 0xa8a   :  { %v5926_v0 = vmul.f32 %v9370_v55, %v5566_v53  ;;  %v18428_v55 = vld [vmem:[#allocation109_spill] sm:$0xff] }
 0xa8b   :  { %v5325_v53 = vmul.f32 %v18428_v55, %v18428_v55 }
 0xa8c   :  { %v4356_v44 = vpop.xlane.xlu1 %4355 }
 0xa8d   :  { %v15320_v45 = vmul.f32 0.0051020407, %v4356_v44 }
 0xa8f   :  { %18418 = vst [vmem:[#allocation192_spill] sm:$0xff] %v15320_v45 }
 0xa90   :  { %v6506_v14 = vpop.permute.xlu1 %6505 }
 0xa91   :  { %v6935_v18 = vmul.f32 %v6506_v14, %v18420_v48  ;;  %v6936_v58 = vmul.f32 %v6506_v14, %v18422_v8  ;;  %v4757_v14 = vmul.f32 %v15337_v38, %v15337_v38  ;;  %v18522_v38 = vld [vmem:[#allocation128_spill] sm:$0xff] }
 0xa93   :  { %v7895_v4 = vadd.f32 %v18423_v6, %v6935_v18  ;;  %v7896_v44 = vadd.f32 %v18423_v6, %v6936_v58  ;;  %v4758_v18 = vmul.f32 %v15341_v3, %v15341_v3  ;;  %v18429_v6 = vld [vmem:[#allocation246_spill] sm:$0xff] }
 0xa95   :  { %8135 = vst [vmem:[#allocation2 + $0x380] sm:$0xff] %v7895_v4  ;;  %8136 = vst [vmem:[#allocation2 + $0x388] sm:$0xff] %v7896_v44  ;;  %v5205_v4 = vmul.f32 0.0051020407, %v18429_v6 }
 0xa97   :  { %6540 = vperm.xlu0 %8844, %v5926_v0   ;;  %v5445_v44 = vsub.f32 %v5205_v4, %v5325_v53  ;;  %v18433_v0 = vsub.f32 %v18432_v30, %v18373_v40  ;;  %v9199_v40 = vld [vmem:[%s16660_s5 + $0x3a4] ss:$8 sps:$4 sm:$0xff]   ;;  %v5565_v30 = vld [vmem:[%s16661_s6 + $0x1f0] sm:$0xff] }
 0xa98   :  { %v4359_v27 = vpop.xlane.xlu0 %4358  ;;  %8697 = vmatprep.mubr.msk.bf16.mxu1 %vm3249_vm1, %v9199_v40 }
 0xa99   :  { %v15339_v48 = vmul.f32 0.0051020407, %v4359_v27  ;;  %v15355_v27 = vadd.f32 %v4758_v18, %v4757_v14  ;;  %v18434_v14 = vld [vmem:[#allocation79_spill] sm:$0xff] }
 0xa9a   :  { %v15371_v33 = vpop.f32.mrb[184].mxu1 }
 0xa9b   :  { %18425 = vst [vmem:[#allocation55_spill] sm:$0xff] %v15339_v48  ;;  %18435 = vst [vmem:[#allocation190_spill] sm:$0xff] %v15371_v33  ;;  %v4759_v53 = vmul.f32 %v15371_v33, %v15371_v33  ;;  %v15375_v6 = vpop.f32.mrb[185].mxu1  ;;  %v18450_v48 = vld [vmem:[#allocation277_spill] sm:$0xff] }
 0xa9c   :  { %v15357_v58 = vpop.xlane.xlu0 %5078  ;;  %18436 = vst [vmem:[#allocation191_spill] sm:$0xff] %v15375_v6  ;;  %v15379_v12 = vadd.f32 %v15375_v6, %v15371_v33 }
 0xa9d   :  { %18427 = vst [vmem:[#allocation299_spill] sm:$0xff] %v15357_v58  ;;  %v5685_v58 = vadd.f32 0.001, %v5445_v44  ;;  %v18448_v44 = vld [vmem:[#allocation276_spill] sm:$0xff] }
 0xa9e   :  { %v18449_v29 = vsub.f32 %v18448_v44, %v18394_v17  ;;  %v5567_v44 = vld [vmem:[%s16661_s6 + $0x200] sm:$0xff] }
 0xa9f   :  { %9371 = vrsqrt.f32 %v5685_v58 }
 0xaa4   :  { %v6521_v37 = vpop.permute.xlu0 %6520 }
 0xaa5   :  { %v6941_v45 = vmul.f32 %v6521_v37, %v18431_v43  ;;  %v6942_v28 = vmul.f32 %v6521_v37, %v18433_v0  ;;  %v4760_v37 = vmul.f32 %v15375_v6, %v15375_v6 }
 0xaa6   :  { %5087 = vadd.xlane.f32.xlu1 %v15106_v35  ;;  %v5208_v35 = vmul.f32 0.0051020407, %v14019_v62 }
 0xaa7   :  { %v7901_v18 = vadd.f32 %v18434_v14, %v6941_v45  ;;  %v7902_v8 = vadd.f32 %v18434_v14, %v6942_v28  ;;  %v15384_v28 = vadd.f32 %v4760_v37, %v4759_v53  ;;  %v5328_v45 = vmul.f32 %v13920_v19, %v13920_v19  ;;  %v18437_v53 = vld [vmem:[#allocation248_spill] sm:$0xff] }
 0xaa8   :  { %v18438_v37 = vsub.f32 %v18437_v53, %v18384_v26  ;;  %v15420_v53 = vpop.f32.mrb[186].mxu1 }
 0xaa9   :  { %8141 = vst [vmem:[#allocation2 + $0x3b0] sm:$0xff] %v7901_v18  ;;  %8142 = vst [vmem:[#allocation2 + $0x3b8] sm:$0xff] %v7902_v8  ;;  %v9372_v43 = vpop.eup %9371  ;;  %v5448_v62 = vsub.f32 %v5208_v35, %v5328_v45  ;;  %v18441_v45 = vld [vmem:[#allocation80_spill] sm:$0xff] }
 0xaaa   :  { %4373 = vadd.xlane.f32.xlu1 %v15181_v13  ;;  %v9201_v13 = vld [vmem:[%s16660_s5 + $0x3a0] ss:$8 sps:$4 sm:$0xff]   ;;  %v5925_v0 = vmul.f32 %v9372_v43, %v5565_v30  ;;  %18442 = vst [vmem:[#allocation56_spill] sm:$0xff] %v15420_v53 }
 0xaab   :  { %4043 = vmatmul.mubr.bf16.gmra.mrb[200].mxu1 %v9201_v13  ;;  %v5568_v13 = vld [vmem:[%s16661_s6 + $0x208] sm:$0xff] }
 0xab6   :  { %4376 = vadd.xlane.f32.xlu0 %v15213_v39  ;;  %v5688_v39 = vadd.f32 0.001, %v5448_v62 }
 0xab8   :  { %9373 = vrsqrt.f32 %v5688_v39 }
 0xaba   :  { %5096 = vadd.xlane.f32.xlu0 %v15218_v57  ;;  %v18439_v57 = vld [vmem:[#allocation249_spill] sm:$0xff] }
 0xabb   :  { %6535 = vperm.xlu1 %8843, %v5925_v0   ;;  %v18440_v40 = vsub.f32 %v18439_v57, %v18384_v26  ;;  %v15424_v26 = vpop.f32.mrb[187].mxu1 }
 0xabc   :  { %18444 = vst [vmem:[#allocation298_spill] sm:$0xff] %v15424_v26  ;;  %v15430_v57 = vadd.f32 %v15424_v26, %v15420_v53 }
 0xac1   :  { %v15401_v8 = vpop.xlane.xlu1 %5075 }
 0xac2   :  { %v9374_v30 = vpop.eup %9373 }
 0xac3   :  { %v5928_v39 = vmul.f32 %v9374_v30, %v5568_v13 }
 0xac5   :  { %v4362_v58 = vpop.xlane.xlu1 %4361 }
 0xac6   :  { %v15403_v4 = vmul.f32 0.0051020407, %v4362_v58 }
 0xac9   :  { %v6516_v18 = vpop.permute.xlu1 %6515 }
 0xaca   :  { %v6939_v35 = vmul.f32 %v6516_v18, %v18438_v37  ;;  %v6940_v43 = vmul.f32 %v6516_v18, %v18440_v40  ;;  %v4761_v18 = vmul.f32 %v15420_v53, %v15420_v53  ;;  %v18451_v40 = vsub.f32 %v18450_v48, %v18394_v17  ;;  %v9202_v17 = vld [vmem:[%s16660_s5 + $0x3b4] ss:$8 sps:$4 sm:$0xff]   ;;  %v18540_v53 = vld [vmem:[#allocation265_spill] sm:$0xff] }
 0xacb   :  { %8698 = vmatprep.mubr.msk.bf16.mxu1 %vm3249_vm1, %v9202_v17 }
 0xacc   :  { %v7899_v62 = vadd.f32 %v18441_v45, %v6939_v35  ;;  %v7900_v0 = vadd.f32 %v18441_v45, %v6940_v43  ;;  %v4762_v35 = vmul.f32 %v15424_v26, %v15424_v26  ;;  %v18446_v45 = vld [vmem:[#allocation241_spill] sm:$0xff] }
 0xace   :  { %8139 = vst [vmem:[#allocation2 + $0x3a0] sm:$0xff] %v7899_v62  ;;  %8140 = vst [vmem:[#allocation2 + $0x3a8] sm:$0xff] %v7900_v0  ;;  %v15438_v30 = vadd.f32 %v4762_v35, %v4761_v18  ;;  %v5327_v62 = vmul.f32 %v18446_v45, %v18446_v45  ;;  %v18447_v0 = vld [vmem:[#allocation106_spill] sm:$0xff]  ;;  %v18452_v18 = vld [vmem:[#allocation81_spill] sm:$0xff] }
 0xad0   :  { %6550 = vperm.xlu0 %8844, %v5928_v39   ;;  %v5207_v39 = vmul.f32 0.0051020407, %v18447_v0 }
 0xad1   :  { %v4365_v58 = vpop.xlane.xlu0 %4364 }
 0xad2   :  { %v15422_v37 = vmul.f32 0.0051020407, %v4365_v58  ;;  %v5447_v58 = vsub.f32 %v5207_v39, %v5327_v62 }
 0xad3   :  { %v15454_v10 = vpop.f32.mrb[188].mxu1 }
 0xad4   :  { %18443 = vst [vmem:[#allocation300_spill] sm:$0xff] %v15422_v37  ;;  %18453 = vst [vmem:[#allocation197_spill] sm:$0xff] %v15454_v10  ;;  %v4763_v62 = vmul.f32 %v15454_v10, %v15454_v10  ;;  %v15458_v0 = vpop.f32.mrb[189].mxu1  ;;  %v18467_v37 = vld [vmem:[#allocation308_spill] sm:$0xff] }
 0xad5   :  { %v15440_v13 = vpop.xlane.xlu0 %5084  ;;  %18454 = vst [vmem:[#allocation57_spill] sm:$0xff] %v15458_v0 }
 0xad6   :  { %18445 = vst [vmem:[#allocation196_spill] sm:$0xff] %v15440_v13  ;;  %v5687_v13 = vadd.f32 0.001, %v5447_v58 }
 0xad8   :  { %9375 = vrsqrt.f32 %v5687_v13 }
 0xadd   :  { %v6531_v14 = vpop.permute.xlu0 %6530 }
 0xade   :  { %v6945_v61 = vmul.f32 %v6531_v14, %v18449_v29  ;;  %v6946_v9 = vmul.f32 %v6531_v14, %v18451_v40  ;;  %v15462_v29 = vadd.f32 %v15458_v0, %v15454_v10  ;;  %v5330_v14 = vmul.f32 %v14034_v22, %v14034_v22 }
 0xadf   :  { %5093 = vadd.xlane.f32.xlu1 %v15189_v50  ;;  %v4764_v50 = vmul.f32 %v15458_v0, %v15458_v0 }
 0xae0   :  { %v7905_v35 = vadd.f32 %v18452_v18, %v6945_v61  ;;  %v7906_v43 = vadd.f32 %v18452_v18, %v6946_v9  ;;  %v5210_v9 = vmul.f32 0.0051020407, %v14131_v49  ;;  %v18466_v18 = vld [vmem:[#allocation16_spill] sm:$0xff] }
 0xae1   :  { %v15467_v61 = vadd.f32 %v4764_v50, %v4763_v62  ;;  %v18455_v62 = vld [vmem:[#allocation256_spill] sm:$0xff]  ;;  %v5209_v58 = vmul.f32 0.0051020407, %v18466_v18 }
 0xae2   :  { %8145 = vst [vmem:[#allocation2 + $0x3d0] sm:$0xff] %v7905_v35  ;;  %8146 = vst [vmem:[#allocation2 + $0x3d8] sm:$0xff] %v7906_v43  ;;  %v9376_v48 = vpop.eup %9375  ;;  %v5450_v49 = vsub.f32 %v5210_v9, %v5330_v14  ;;  %v18456_v50 = vsub.f32 %v18455_v62, %v18406_v23  ;;  %v18459_v14 = vld [vmem:[#allocation82_spill] sm:$0xff]  ;;  %v15503_v62 = vpop.f32.mrb[190].mxu1 }
 0xae3   :  { %4379 = vadd.xlane.f32.xlu1 %v15264_v11  ;;  %v9204_v11 = vld [vmem:[%s16660_s5 + $0x3b0] ss:$8 sps:$4 sm:$0xff]   ;;  %v5927_v40 = vmul.f32 %v9376_v48, %v5567_v44  ;;  %18460 = vst [vmem:[#allocation305_spill] sm:$0xff] %v15503_v62 }
 0xae4   :  { %4053 = vmatmul.mubr.bf16.gmra.mrb[204].mxu1 %v9204_v11  ;;  %v5570_v11 = vld [vmem:[%s16661_s6 + $0x218] sm:$0xff] }
 0xaef   :  { %4382 = vadd.xlane.f32.xlu0 %v15296_v47  ;;  %v5690_v47 = vadd.f32 0.001, %v5450_v49 }
 0xaf1   :  { %9377 = vrsqrt.f32 %v5690_v47 }
 0xaf3   :  { %5102 = vadd.xlane.f32.xlu0 %v15301_v52  ;;  %v18457_v52 = vld [vmem:[#allocation257_spill] sm:$0xff] }
 0xaf4   :  { %6545 = vperm.xlu1 %8843, %v5927_v40   ;;  %v18458_v17 = vsub.f32 %v18457_v52, %v18406_v23  ;;  %v15507_v23 = vpop.f32.mrb[191].mxu1 }
 0xaf5   :  { %18462 = vst [vmem:[#allocation194_spill] sm:$0xff] %v15507_v23  ;;  %v15513_v52 = vadd.f32 %v15507_v23, %v15503_v62 }
 0xafa   :  { %v15484_v43 = vpop.xlane.xlu1 %5081 }
 0xafb   :  { %v9378_v44 = vpop.eup %9377 }
 0xafc   :  { %v5930_v47 = vmul.f32 %v9378_v44, %v5570_v11  ;;  %v18469_v44 = vld [vmem:[#allocation309_spill] sm:$0xff] }
 0xafe   :  { %v4368_v13 = vpop.xlane.xlu1 %4367 }
 0xaff   :  { %v15486_v39 = vmul.f32 0.0051020407, %v4368_v13 }
 0xb02   :  { %v6526_v35 = vpop.permute.xlu1 %6525 }
 0xb03   :  { %v6943_v9 = vmul.f32 %v6526_v35, %v18456_v50  ;;  %v6944_v48 = vmul.f32 %v6526_v35, %v18458_v17  ;;  %v4765_v35 = vmul.f32 %v15503_v62, %v15503_v62 }
 0xb05   :  { %v7903_v49 = vadd.f32 %v18459_v14, %v6943_v9  ;;  %v7904_v40 = vadd.f32 %v18459_v14, %v6944_v48  ;;  %v4766_v9 = vmul.f32 %v15507_v23, %v15507_v23  ;;  %v18468_v48 = vsub.f32 %v18467_v37, %v18416_v25 }
 0xb06   :  { %v5332_v37 = vmul.f32 %v14134_v21, %v14134_v21 }
 0xb07   :  { %8143 = vst [vmem:[#allocation2 + $0x3c0] sm:$0xff] %v7903_v49  ;;  %8144 = vst [vmem:[#allocation2 + $0x3c8] sm:$0xff] %v7904_v40  ;;  %v15525_v14 = vadd.f32 %v4766_v9, %v4765_v35  ;;  %v18470_v35 = vsub.f32 %v18469_v44, %v18416_v25 }
 0xb09   :  { %6560 = vperm.xlu0 %8844, %v5930_v47   ;;  %v18465_v47 = vld [vmem:[#allocation13_spill] sm:$0xff] }
 0xb0a   :  { %v4371_v13 = vpop.xlane.xlu0 %4370 }
 0xb0b   :  { %v15505_v50 = vmul.f32 0.0051020407, %v4371_v13  ;;  %v5329_v13 = vmul.f32 %v18465_v47, %v18465_v47 }
 0xb0d   :  { %18461 = vst [vmem:[#allocation303_spill] sm:$0xff] %v15505_v50  ;;  %v15519_v17 = vmul.f32 %v15505_v50, %v15505_v50  ;;  %v5449_v31 = vsub.f32 %v5209_v58, %v5329_v13  ;;  %v15543_v50 = vpop.f32.mrb[192].mxu1  ;;  %v18486_v13 = vld [vmem:[#allocation258_spill] sm:$0xff] }
 0xb0e   :  { %v5091_v11 = vpop.xlane.xlu0 %5090  ;;  %18472 = vst [vmem:[#allocation304_spill] sm:$0xff] %v15543_v50  ;;  %v4767_v58 = vmul.f32 %v15543_v50, %v15543_v50  ;;  %v15547_v18 = vpop.f32.mrb[193].mxu1 }
 0xb0f   :  { %18463 = vst [vmem:[#allocation195_spill] sm:$0xff] %v15519_v17  ;;  %v15527_v49 = vmul.f32 0.0051020407, %v5091_v11  ;;  %v18471_v11 = vld [vmem:[#allocation83_spill] sm:$0xff]  ;;  %v5689_v17 = vadd.f32 0.001, %v5449_v31  ;;  %v15551_v25 = vadd.f32 %v15547_v18, %v15543_v50 }
 0xb10   :  { %18473 = vst [vmem:[#allocation302_spill] sm:$0xff] %v15547_v18  ;;  %v5212_v31 = vmul.f32 0.0051020407, %v14231_v1 }
 0xb11   :  { %18464 = vst [vmem:[#allocation58_spill] sm:$0xff] %v15527_v49  ;;  %9379 = vrsqrt.f32 %v5689_v17  ;;  %v18487_v49 = vld [vmem:[#allocation228_spill] sm:$0xff] }
 0xb16   :  { %v6541_v51 = vpop.permute.xlu0 %6540 }
 0xb17   :  { %v6949_v36 = vmul.f32 %v6541_v51, %v18468_v48  ;;  %v6950_v9 = vmul.f32 %v6541_v51, %v18470_v35  ;;  %v4768_v51 = vmul.f32 %v15547_v18, %v15547_v18  ;;  %v5452_v48 = vsub.f32 %v5212_v31, %v5332_v37  ;;  %v18479_v37 = vld [vmem:[#allocation84_spill] sm:$0xff] }
 0xb18   :  { %5099 = vadd.xlane.f32.xlu1 %v15272_v15 }
 0xb19   :  { %v7909_v20 = vadd.f32 %v18471_v11, %v6949_v36  ;;  %v7910_v40 = vadd.f32 %v18471_v11, %v6950_v9  ;;  %v15556_v36 = vadd.f32 %v4768_v51, %v4767_v58  ;;  %v18475_v9 = vld [vmem:[#allocation286_spill] sm:$0xff] }
 0xb1a   :  { %v18476_v11 = vsub.f32 %v18475_v9, %v18428_v55  ;;  %v15585_v9 = vpop.f32.mrb[194].mxu1 }
 0xb1b   :  { %8149 = vst [vmem:[#allocation2 + $0x3f0] sm:$0xff] %v7909_v20  ;;  %8150 = vst [vmem:[#allocation2 + $0x3f8] sm:$0xff] %v7910_v40  ;;  %v9380_v15 = vpop.eup %9379  ;;  %v5569_v20 = vld [vmem:[%s16661_s6 + $0x210] sm:$0xff] }
 0xb1c   :  { %4385 = vadd.xlane.f32.xlu1 %v15347_v32  ;;  %v5929_v44 = vmul.f32 %v9380_v15, %v5569_v20  ;;  %v5692_v32 = vadd.f32 0.001, %v5452_v48  ;;  %v5572_v20 = vld [vmem:[%s16661_s6 + $0x228] sm:$0xff]  ;;  %18480 = vst [vmem:[#allocation201_spill] sm:$0xff] %v15585_v9 }
 0xb1e   :  { %9381 = vrsqrt.f32 %v5692_v32 }
 0xb28   :  { %4388 = vadd.xlane.f32.xlu0 %v15379_v12  ;;  %v9382_v15 = vpop.eup %9381  ;;  %v5211_v12 = vmul.f32 0.0051020407, %v18486_v13 }
 0xb29   :  { %v5932_v32 = vmul.f32 %v9382_v15, %v5572_v20  ;;  %v18489_v15 = vld [vmem:[#allocation5_spill] sm:$0xff] }
 0xb2c   :  { %5108 = vadd.xlane.f32.xlu0 %v15384_v28  ;;  %v18477_v28 = vld [vmem:[#allocation287_spill] sm:$0xff] }
 0xb2d   :  { %6555 = vperm.xlu1 %8843, %v5929_v44   ;;  %v18478_v51 = vsub.f32 %v18477_v28, %v18428_v55  ;;  %v15589_v55 = vpop.f32.mrb[195].mxu1 }
 0xb2e   :  { %18482 = vst [vmem:[#allocation311_spill] sm:$0xff] %v15589_v55  ;;  %v15595_v28 = vadd.f32 %v15589_v55, %v15585_v9 }
 0xb33   :  { %v15566_v17 = vpop.xlane.xlu1 %5087 }
 0xb37   :  { %v4374_v1 = vpop.xlane.xlu1 %4373 }
 0xb38   :  { %v15568_v40 = vmul.f32 0.0051020407, %v4374_v1 }
 0xb3a   :  { %18474 = vst [vmem:[#allocation200_spill] sm:$0xff] %v15568_v40 }
 0xb3b   :  { %v6536_v35 = vpop.permute.xlu1 %6535 }
 0xb3c   :  { %v6947_v58 = vmul.f32 %v6536_v35, %v18476_v11  ;;  %v6948_v31 = vmul.f32 %v6536_v35, %v18478_v51  ;;  %v4769_v35 = vmul.f32 %v15585_v9, %v15585_v9 }
 0xb3e   :  { %v7907_v48 = vadd.f32 %v18479_v37, %v6947_v58  ;;  %v7908_v44 = vadd.f32 %v18479_v37, %v6948_v31  ;;  %v4770_v58 = vmul.f32 %v15589_v55, %v15589_v55  ;;  %v18488_v31 = vsub.f32 %v18487_v49, %v13920_v19  ;;  %v18581_v55 = vld [vmem:[#allocation53_spill] sm:$0xff] }
 0xb3f   :  { %v5334_v49 = vmul.f32 %v14233_v60, %v14233_v60  ;;  %v5358_v9 = vmul.f32 %v18581_v55, %v18581_v55 }
 0xb40   :  { %8147 = vst [vmem:[#allocation2 + $0x3e0] sm:$0xff] %v7907_v48  ;;  %8148 = vst [vmem:[#allocation2 + $0x3e8] sm:$0xff] %v7908_v44  ;;  %v15607_v37 = vadd.f32 %v4770_v58, %v4769_v35  ;;  %v18490_v35 = vsub.f32 %v18489_v15, %v13920_v19 }
 0xb42   :  { %6570 = vperm.xlu0 %8844, %v5932_v32   ;;  %v18485_v32 = vld [vmem:[#allocation41_spill] sm:$0xff] }
 0xb43   :  { %v4377_v1 = vpop.xlane.xlu0 %4376 }
 0xb44   :  { %v15587_v11 = vmul.f32 0.0051020407, %v4377_v1  ;;  %v5331_v1 = vmul.f32 %v18485_v32, %v18485_v32 }
 0xb46   :  { %18481 = vst [vmem:[#allocation59_spill] sm:$0xff] %v15587_v11  ;;  %v15601_v51 = vmul.f32 %v15587_v11, %v15587_v11  ;;  %v5451_v41 = vsub.f32 %v5211_v12, %v5331_v1  ;;  %v15625_v11 = vpop.f32.mrb[196].mxu1 }
 0xb47   :  { %v5097_v20 = vpop.xlane.xlu0 %5096  ;;  %18492 = vst [vmem:[#allocation199_spill] sm:$0xff] %v15625_v11  ;;  %v4771_v12 = vmul.f32 %v15625_v11, %v15625_v11  ;;  %v15629_v13 = vpop.f32.mrb[197].mxu1 }
 0xb48   :  { %18483 = vst [vmem:[#allocation307_spill] sm:$0xff] %v15601_v51  ;;  %v15609_v48 = vmul.f32 0.0051020407, %v5097_v20  ;;  %v18491_v20 = vld [vmem:[#allocation85_spill] sm:$0xff]  ;;  %v5691_v51 = vadd.f32 0.001, %v5451_v41  ;;  %v15633_v19 = vadd.f32 %v15629_v13, %v15625_v11 }
 0xb49   :  { %18493 = vst [vmem:[#allocation60_spill] sm:$0xff] %v15629_v13  ;;  %v5214_v41 = vmul.f32 0.0051020407, %v14322_v34  ;;  %v15650_v34 = vmul.f32 %v15568_v40, %v15568_v40  ;;  %v18504_v40 = vld [vmem:[#allocation100_spill] sm:$0xff]  ;;  %v18582_v11 = vld [vmem:[#allocation161_spill] sm:$0xff] }
 0xb4a   :  { %18484 = vst [vmem:[#allocation198_spill] sm:$0xff] %v15609_v48  ;;  %9383 = vrsqrt.f32 %v5691_v51 }
 0xb4f   :  { %v6551_v5 = vpop.permute.xlu0 %6550 }
 0xb50   :  { %v6953_v56 = vmul.f32 %v6551_v5, %v18488_v31  ;;  %v6954_v58 = vmul.f32 %v6551_v5, %v18490_v35  ;;  %v4772_v5 = vmul.f32 %v15629_v13, %v15629_v13  ;;  %v5454_v31 = vsub.f32 %v5214_v41, %v5334_v49  ;;  %v18584_v13 = vld [vmem:[#allocation192_spill] sm:$0xff] }
 0xb51   :  { %5105 = vadd.xlane.f32.xlu1 %v15355_v27 }
 0xb52   :  { %v7913_v54 = vadd.f32 %v18491_v20, %v6953_v56  ;;  %v7914_v44 = vadd.f32 %v18491_v20, %v6954_v58  ;;  %v15638_v56 = vadd.f32 %v4772_v5, %v4771_v12  ;;  %v18495_v12 = vld [vmem:[#allocation320_spill] sm:$0xff] }
 0xb53   :  { %v18496_v5 = vsub.f32 %v18495_v12, %v18446_v45  ;;  %v15673_v12 = vpop.f32.mrb[198].mxu1 }
 0xb54   :  { %8153 = vst [vmem:[#allocation2 + $0x410] sm:$0xff] %v7913_v54  ;;  %8154 = vst [vmem:[#allocation2 + $0x418] sm:$0xff] %v7914_v44  ;;  %v9384_v27 = vpop.eup %9383  ;;  %v5571_v54 = vld [vmem:[%s16661_s6 + $0x220] sm:$0xff] }
 0xb55   :  { %4391 = vadd.xlane.f32.xlu1 %v15430_v57  ;;  %v5931_v15 = vmul.f32 %v9384_v27, %v5571_v54  ;;  %v5694_v57 = vadd.f32 0.001, %v5454_v31  ;;  %v18497_v27 = vld [vmem:[#allocation321_spill] sm:$0xff] }
 0xb56   :  { %v18498_v54 = vsub.f32 %v18497_v27, %v18446_v45  ;;  %v15677_v45 = vpop.f32.mrb[199].mxu1 }
 0xb57   :  { %9385 = vrsqrt.f32 %v5694_v57  ;;  %v18499_v57 = vld [vmem:[#allocation86_spill] sm:$0xff]  ;;  %v15683_v27 = vadd.f32 %v15677_v45, %v15673_v12 }
 0xb61   :  { %4394 = vadd.xlane.f32.xlu0 %v15462_v29  ;;  %v9386_v31 = vpop.eup %9385 }
 0xb65   :  { %5114 = vadd.xlane.f32.xlu0 %v15467_v61 }
 0xb66   :  { %6565 = vperm.xlu1 %8843, %v5931_v15   ;;  %v5574_v15 = vld [vmem:[%s16661_s6 + $0x238] sm:$0xff] }
 0xb67   :  { %v5934_v61 = vmul.f32 %v9386_v31, %v5574_v15 }
 0xb6c   :  { %v5094_v51 = vpop.xlane.xlu1 %5093 }
 0xb6d   :  { %v15652_v29 = vmul.f32 0.0051020407, %v5094_v51 }
 0xb70   :  { %v4380_v1 = vpop.xlane.xlu1 %4379 }
 0xb71   :  { %v15656_v35 = vmul.f32 0.0051020407, %v4380_v1 }
 0xb73   :  { %18494 = vst [vmem:[#allocation310_spill] sm:$0xff] %v15656_v35 }
 0xb74   :  { %v6546_v20 = vpop.permute.xlu1 %6545 }
 0xb75   :  { %v6951_v41 = vmul.f32 %v6546_v20, %v18496_v5  ;;  %v6952_v49 = vmul.f32 %v6546_v20, %v18498_v54  ;;  %v4773_v20 = vmul.f32 %v15673_v12, %v15673_v12  ;;  %v18506_v54 = vld [vmem:[#allocation234_spill] sm:$0xff] }
 0xb77   :  { %v7911_v51 = vadd.f32 %v18499_v57, %v6951_v41  ;;  %v7912_v1 = vadd.f32 %v18499_v57, %v6952_v49  ;;  %v4774_v41 = vmul.f32 %v15677_v45, %v15677_v45 }
 0xb79   :  { %8151 = vst [vmem:[#allocation2 + $0x400] sm:$0xff] %v7911_v51  ;;  %8152 = vst [vmem:[#allocation2 + $0x408] sm:$0xff] %v7912_v1  ;;  %v15695_v31 = vadd.f32 %v4774_v41, %v4773_v20  ;;  %v5333_v51 = vmul.f32 %v14159_v59, %v14159_v59  ;;  %v18503_v1 = vld [vmem:[#allocation116_spill] sm:$0xff]  ;;  %v18507_v20 = vsub.f32 %v18506_v54, %v14034_v22 }
 0xb7a   :  { %v5213_v44 = vmul.f32 0.0051020407, %v18503_v1 }
 0xb7b   :  { %6580 = vperm.xlu0 %8844, %v5934_v61  }
 0xb7c   :  { %v4383_v58 = vpop.xlane.xlu0 %4382  ;;  %v5453_v42 = vsub.f32 %v5213_v44, %v5333_v51 }
 0xb7d   :  { %v15675_v5 = vmul.f32 0.0051020407, %v4383_v58  ;;  %v18505_v58 = vsub.f32 %v18504_v40, %v14034_v22 }
 0xb7f   :  { %18500 = vst [vmem:[#allocation306_spill] sm:$0xff] %v15675_v5  ;;  %v15689_v61 = vmul.f32 %v15675_v5, %v15675_v5  ;;  %v15713_v5 = vpop.f32.mrb[200].mxu1 }
 0xb80   :  { %v5103_v49 = vpop.xlane.xlu0 %5102  ;;  %v4775_v44 = vmul.f32 %v15713_v5, %v15713_v5  ;;  %v15717_v51 = vpop.f32.mrb[201].mxu1 }
 0xb81   :  { %18501 = vst [vmem:[#allocation204_spill] sm:$0xff] %v15689_v61  ;;  %v15697_v15 = vmul.f32 0.0051020407, %v5103_v49  ;;  %v18508_v49 = vld [vmem:[#allocation87_spill] sm:$0xff]  ;;  %v5693_v61 = vadd.f32 0.001, %v5453_v42  ;;  %v15721_v22 = vadd.f32 %v15717_v51, %v15713_v5 }
 0xb82   :  { %v18509_v42 = vld [vmem:[#allocation15_spill] sm:$0xff] }
 0xb83   :  { %18502 = vst [vmem:[#allocation205_spill] sm:$0xff] %v15697_v15  ;;  %9387 = vrsqrt.f32 %v5693_v61 }
 0xb88   :  { %v6561_v16 = vpop.permute.xlu0 %6560 }
 0xb89   :  { %v6957_v24 = vmul.f32 %v6561_v16, %v18505_v58  ;;  %v6958_v41 = vmul.f32 %v6561_v16, %v18507_v20  ;;  %v4776_v16 = vmul.f32 %v15717_v51, %v15717_v51  ;;  %v18510_v58 = vld [vmem:[#allocation43_spill] sm:$0xff]  ;;  %v15738_v20 = vmul.f32 %v15656_v35, %v15656_v35 }
 0xb8a   :  { %5111 = vadd.xlane.f32.xlu1 %v15438_v30  ;;  %v5216_v30 = vmul.f32 0.0051020407, %v18509_v42  ;;  %v5336_v54 = vmul.f32 %v18510_v58, %v18510_v58  ;;  %v5215_v35 = vmul.f32 0.0051020407, %v18522_v38 }
 0xb8b   :  { %v7917_v2 = vadd.f32 %v18508_v49, %v6957_v24  ;;  %v7918_v57 = vadd.f32 %v18508_v49, %v6958_v41  ;;  %v15726_v24 = vadd.f32 %v4776_v16, %v4775_v44 }
 0xb8d   :  { %8157 = vst [vmem:[#allocation2 + $0x430] sm:$0xff] %v7917_v2  ;;  %8158 = vst [vmem:[#allocation2 + $0x438] sm:$0xff] %v7918_v57  ;;  %v9388_v40 = vpop.eup %9387  ;;  %v5573_v2 = vld [vmem:[%s16661_s6 + $0x230] sm:$0xff]  ;;  %v5456_v57 = vsub.f32 %v5216_v30, %v5336_v54  ;;  %v18512_v30 = vld [vmem:[#allocation38_spill] sm:$0xff] }
 0xb8e   :  { %4397 = vadd.xlane.f32.xlu1 %v15513_v52  ;;  %v5933_v1 = vmul.f32 %v9388_v40, %v5573_v2  ;;  %v18513_v40 = vsub.f32 %v18512_v30, %v18465_v47  ;;  %v18514_v54 = vld [vmem:[#allocation153_spill] sm:$0xff]  ;;  %v15761_v30 = vpop.f32.mrb[202].mxu1 }
 0xb8f   :  { %v5696_v52 = vadd.f32 0.001, %v5456_v57  ;;  %v18515_v57 = vsub.f32 %v18514_v54, %v18465_v47  ;;  %v15765_v47 = vpop.f32.mrb[203].mxu1 }
 0xb90   :  { %18518 = vst [vmem:[#allocation313_spill] sm:$0xff] %v15765_v47  ;;  %v15771_v54 = vadd.f32 %v15765_v47, %v15761_v30 }
 0xb91   :  { %9389 = vrsqrt.f32 %v5696_v52 }
 0xb9a   :  { %4400 = vadd.xlane.f32.xlu0 %v15551_v25 }
 0xb9b   :  { %v9390_v52 = vpop.eup %9389 }
 0xb9e   :  { %5120 = vadd.xlane.f32.xlu0 %v15556_v36 }
 0xb9f   :  { %6575 = vperm.xlu1 %8843, %v5933_v1  }
 0xba5   :  { %v5100_v61 = vpop.xlane.xlu1 %5099 }
 0xba6   :  { %v15740_v25 = vmul.f32 0.0051020407, %v5100_v61  ;;  %v5576_v61 = vld [vmem:[%s16661_s6 + $0x248] sm:$0xff] }
 0xba7   :  { %v5936_v36 = vmul.f32 %v9390_v52, %v5576_v61  ;;  %v18521_v61 = vld [vmem:[#allocation27_spill] sm:$0xff] }
 0xba9   :  { %v4386_v49 = vpop.xlane.xlu1 %4385 }
 0xbaa   :  { %v15744_v44 = vmul.f32 0.0051020407, %v4386_v49  ;;  %v18516_v49 = vld [vmem:[#allocation88_spill] sm:$0xff] }
 0xbac   :  { %18511 = vst [vmem:[#allocation61_spill] sm:$0xff] %v15744_v44 }
 0xbad   :  { %v6556_v42 = vpop.permute.xlu1 %6555 }
 0xbae   :  { %v6955_v2 = vmul.f32 %v6556_v42, %v18513_v40  ;;  %v6956_v1 = vmul.f32 %v6556_v42, %v18515_v57  ;;  %v4777_v42 = vmul.f32 %v15761_v30, %v15761_v30 }
 0xbb0   :  { %v7915_v41 = vadd.f32 %v18516_v49, %v6955_v2  ;;  %v7916_v16 = vadd.f32 %v18516_v49, %v6956_v1  ;;  %v5335_v49 = vmul.f32 %v18521_v61, %v18521_v61 }
 0xbb2   :  { %8155 = vst [vmem:[#allocation2 + $0x420] sm:$0xff] %v7915_v41  ;;  %8156 = vst [vmem:[#allocation2 + $0x428] sm:$0xff] %v7916_v16  ;;  %v4778_v41 = vmul.f32 %v15765_v47, %v15765_v47  ;;  %v5455_v15 = vsub.f32 %v5215_v35, %v5335_v49  ;;  %v18523_v47 = vld [vmem:[#allocation21_spill] sm:$0xff] }
 0xbb4   :  { %6590 = vperm.xlu0 %8844, %v5936_v36   ;;  %v15783_v57 = vadd.f32 %v4778_v41, %v4777_v42  ;;  %v18525_v36 = vld [vmem:[#allocation242_spill] sm:$0xff] }
 0xbb5   :  { %v4389_v3 = vpop.xlane.xlu0 %4388  ;;  %v18526_v42 = vsub.f32 %v18525_v36, %v14134_v21 }
 0xbb6   :  { %v15763_v40 = vmul.f32 0.0051020407, %v4389_v3  ;;  %v18524_v3 = vsub.f32 %v18523_v47, %v14134_v21 }
 0xbb8   :  { %18517 = vst [vmem:[#allocation315_spill] sm:$0xff] %v15763_v40  ;;  %v15777_v16 = vmul.f32 %v15763_v40, %v15763_v40  ;;  %v15801_v40 = vpop.f32.mrb[204].mxu1 }
 0xbb9   :  { %v5109_v2 = vpop.xlane.xlu0 %5108  ;;  %v4779_v38 = vmul.f32 %v15801_v40, %v15801_v40  ;;  %v15805_v35 = vpop.f32.mrb[205].mxu1 }
 0xbba   :  { %18519 = vst [vmem:[#allocation202_spill] sm:$0xff] %v15777_v16  ;;  %v15785_v1 = vmul.f32 0.0051020407, %v5109_v2  ;;  %v18527_v2 = vld [vmem:[#allocation89_spill] sm:$0xff]  ;;  %v5695_v16 = vadd.f32 0.001, %v5455_v15  ;;  %v15809_v21 = vadd.f32 %v15805_v35, %v15801_v40 }
 0xbbc   :  { %18520 = vst [vmem:[#allocation203_spill] sm:$0xff] %v15785_v1  ;;  %9391 = vrsqrt.f32 %v5695_v16  ;;  %v18541_v1 = vld [vmem:[#allocation111_spill] sm:$0xff] }
 0xbc1   :  { %v6571_v48 = vpop.permute.xlu0 %6570 }
 0xbc2   :  { %v6961_v33 = vmul.f32 %v6571_v48, %v18524_v3  ;;  %v6962_v41 = vmul.f32 %v6571_v48, %v18526_v42  ;;  %v18528_v48 = vld [vmem:[#allocation29_spill] sm:$0xff]  ;;  %v18529_v3 = vld [vmem:[#allocation18_spill] sm:$0xff]  ;;  %v15826_v42 = vmul.f32 %v15744_v44, %v15744_v44  ;;  %v5217_v44 = vmul.f32 0.0051020407, %v18540_v53  ;;  %v18546_v53 = vld [vmem:[#allocation279_spill] sm:$0xff] }
 0xbc3   :  { %5117 = vadd.xlane.f32.xlu1 %v15525_v14  ;;  %v4780_v14 = vmul.f32 %v15805_v35, %v15805_v35  ;;  %v5218_v15 = vmul.f32 0.0051020407, %v18528_v48  ;;  %v5338_v36 = vmul.f32 %v18529_v3, %v18529_v3 }
 0xbc4   :  { %v7921_v6 = vadd.f32 %v18527_v2, %v6961_v33  ;;  %v7922_v52 = vadd.f32 %v18527_v2, %v6962_v41 }
 0xbc5   :  { %v15814_v33 = vadd.f32 %v4780_v14, %v4779_v38 }
 0xbc6   :  { %8161 = vst [vmem:[#allocation2 + $0x450] sm:$0xff] %v7921_v6  ;;  %8162 = vst [vmem:[#allocation2 + $0x458] sm:$0xff] %v7922_v52  ;;  %v9392_v47 = vpop.eup %9391  ;;  %v5575_v6 = vld [vmem:[%s16661_s6 + $0x240] sm:$0xff]  ;;  %v5458_v52 = vsub.f32 %v5218_v15, %v5338_v36  ;;  %v18531_v15 = vld [vmem:[#allocation7_spill] sm:$0xff] }
 0xbc7   :  { %4403 = vadd.xlane.f32.xlu1 %v15595_v28  ;;  %v5935_v49 = vmul.f32 %v9392_v47, %v5575_v6  ;;  %v18532_v47 = vsub.f32 %v18531_v15, %v18485_v32  ;;  %v18533_v36 = vld [vmem:[#allocation37_spill] sm:$0xff]  ;;  %v15849_v15 = vpop.f32.mrb[206].mxu1 }
 0xbc8   :  { %v5698_v28 = vadd.f32 0.001, %v5458_v52  ;;  %v18534_v52 = vsub.f32 %v18533_v36, %v18485_v32  ;;  %18536 = vst [vmem:[#allocation314_spill] sm:$0xff] %v15849_v15  ;;  %v15853_v32 = vpop.f32.mrb[207].mxu1 }
 0xbc9   :  { %18538 = vst [vmem:[#allocation208_spill] sm:$0xff] %v15853_v32  ;;  %v15859_v36 = vadd.f32 %v15853_v32, %v15849_v15 }
 0xbca   :  { %9393 = vrsqrt.f32 %v5698_v28 }
 0xbd3   :  { %4406 = vadd.xlane.f32.xlu0 %v15633_v19 }
 0xbd4   :  { %v9394_v28 = vpop.eup %9393 }
 0xbd7   :  { %5126 = vadd.xlane.f32.xlu0 %v15638_v56 }
 0xbd8   :  { %6585 = vperm.xlu1 %8843, %v5935_v49  }
 0xbde   :  { %v5106_v16 = vpop.xlane.xlu1 %5105 }
 0xbdf   :  { %v15828_v19 = vmul.f32 0.0051020407, %v5106_v16  ;;  %v5578_v16 = vld [vmem:[%s16661_s6 + $0x258] sm:$0xff] }
 0xbe0   :  { %v5938_v56 = vmul.f32 %v9394_v28, %v5578_v16  ;;  %v18539_v16 = vld [vmem:[#allocation260_spill] sm:$0xff] }
 0xbe2   :  { %v4392_v2 = vpop.xlane.xlu1 %4391 }
 0xbe3   :  { %v15832_v38 = vmul.f32 0.0051020407, %v4392_v2  ;;  %v18535_v2 = vld [vmem:[#allocation90_spill] sm:$0xff] }
 0xbe5   :  { %18530 = vst [vmem:[#allocation62_spill] sm:$0xff] %v15832_v38 }
 0xbe6   :  { %v6566_v48 = vpop.permute.xlu1 %6565 }
 0xbe7   :  { %v6959_v6 = vmul.f32 %v6566_v48, %v18532_v47  ;;  %v6960_v49 = vmul.f32 %v6566_v48, %v18534_v52  ;;  %v4781_v48 = vmul.f32 %v15849_v15, %v15849_v15 }
 0xbe9   :  { %v7919_v41 = vadd.f32 %v18535_v2, %v6959_v6  ;;  %v7920_v14 = vadd.f32 %v18535_v2, %v6960_v49  ;;  %v5337_v2 = vmul.f32 %v18539_v16, %v18539_v16 }
 0xbeb   :  { %8159 = vst [vmem:[#allocation2 + $0x440] sm:$0xff] %v7919_v41  ;;  %8160 = vst [vmem:[#allocation2 + $0x448] sm:$0xff] %v7920_v14  ;;  %v4782_v41 = vmul.f32 %v15853_v32, %v15853_v32  ;;  %v5457_v32 = vsub.f32 %v5217_v44, %v5337_v2  ;;  %v5220_v44 = vmul.f32 0.0051020407, %v18546_v53  ;;  %v18558_v2 = vld [vmem:[#allocation10_spill] sm:$0xff] }
 0xbed   :  { %6600 = vperm.xlu0 %8844, %v5938_v56   ;;  %v15871_v52 = vadd.f32 %v4782_v41, %v4781_v48  ;;  %v18543_v56 = vld [vmem:[#allocation250_spill] sm:$0xff] }
 0xbee   :  { %v4395_v26 = vpop.xlane.xlu0 %4394  ;;  %v18544_v48 = vsub.f32 %v18543_v56, %v14233_v60 }
 0xbef   :  { %v15851_v47 = vmul.f32 0.0051020407, %v4395_v26  ;;  %v18542_v26 = vsub.f32 %v18541_v1, %v14233_v60  ;;  %v5577_v60 = vld [vmem:[%s16661_s6 + $0x250] sm:$0xff] }
 0xbf1   :  { %18537 = vst [vmem:[#allocation312_spill] sm:$0xff] %v15851_v47  ;;  %v15865_v14 = vmul.f32 %v15851_v47, %v15851_v47  ;;  %v5697_v47 = vadd.f32 0.001, %v5457_v32 }
 0xbf2   :  { %v5115_v6 = vpop.xlane.xlu0 %5114 }
 0xbf3   :  { %v15873_v49 = vmul.f32 0.0051020407, %v5115_v6  ;;  %v18545_v6 = vld [vmem:[#allocation91_spill] sm:$0xff]  ;;  %9395 = vrsqrt.f32 %v5697_v47  ;;  %v15900_v47 = vmul.f32 %v15832_v38, %v15832_v38  ;;  %v18574_v38 = vld [vmem:[#allocation34_spill] sm:$0xff] }
 0xbfa   :  { %v6581_v15 = vpop.permute.xlu0 %6580 }
 0xbfb   :  { %v6965_v10 = vmul.f32 %v6581_v15, %v18542_v26  ;;  %v6966_v41 = vmul.f32 %v6581_v15, %v18544_v48 }
 0xbfc   :  { %5123 = vadd.xlane.f32.xlu1 %v15607_v37  ;;  %v18547_v37 = vld [vmem:[#allocation268_spill] sm:$0xff] }
 0xbfd   :  { %v7925_v0 = vadd.f32 %v18545_v6, %v6965_v10  ;;  %v7926_v28 = vadd.f32 %v18545_v6, %v6966_v41  ;;  %v9396_v1 = vpop.eup %9395  ;;  %v5340_v10 = vmul.f32 %v18547_v37, %v18547_v37  ;;  %v18548_v41 = vld [vmem:[#allocation12_spill] sm:$0xff] }
 0xbfe   :  { %v5937_v26 = vmul.f32 %v9396_v1, %v5577_v60  ;;  %v18549_v6 = vsub.f32 %v18548_v41, %v14159_v59 }
 0xbff   :  { %8165 = vst [vmem:[#allocation2 + $0x470] sm:$0xff] %v7925_v0  ;;  %8166 = vst [vmem:[#allocation2 + $0x478] sm:$0xff] %v7926_v28  ;;  %v5460_v15 = vsub.f32 %v5220_v44, %v5340_v10  ;;  %v18550_v44 = vld [vmem:[#allocation23_spill] sm:$0xff] }
 0xc00   :  { %4409 = vadd.xlane.f32.xlu1 %v15683_v27  ;;  %v18551_v1 = vsub.f32 %v18550_v44, %v14159_v59 }
 0xc01   :  { %v5700_v0 = vadd.f32 0.001, %v5460_v15  ;;  %v5580_v15 = vld [vmem:[%s16661_s6 + $0x268] sm:$0xff] }
 0xc03   :  { %9397 = vrsqrt.f32 %v5700_v0 }
 0xc0c   :  { %4412 = vadd.xlane.f32.xlu0 %v15721_v22 }
 0xc0d   :  { %v9398_v10 = vpop.eup %9397 }
 0xc10   :  { %5132 = vadd.xlane.f32.xlu0 %v15726_v24 }
 0xc11   :  { %6595 = vperm.xlu1 %8843, %v5937_v26   ;;  %v18552_v26 = vld [vmem:[#allocation92_spill] sm:$0xff] }
 0xc17   :  { %v5112_v27 = vpop.xlane.xlu1 %5111 }
 0xc18   :  { %v15902_v22 = vmul.f32 0.0051020407, %v5112_v27 }
 0xc1b   :  { %v4398_v56 = vpop.xlane.xlu1 %4397 }
 0xc1c   :  { %v15906_v28 = vmul.f32 0.0051020407, %v4398_v56  ;;  %v5940_v56 = vmul.f32 %v9398_v10, %v5580_v15  ;;  %v18555_v10 = vld [vmem:[#allocation44_spill] sm:$0xff] }
 0xc1d   :  { %v5219_v15 = vmul.f32 0.0051020407, %v18555_v10 }
 0xc1f   :  { %v6576_v48 = vpop.permute.xlu1 %6575 }
 0xc20   :  { %v6963_v53 = vmul.f32 %v6576_v48, %v18549_v6  ;;  %v6964_v60 = vmul.f32 %v6576_v48, %v18551_v1  ;;  %v18559_v6 = vsub.f32 %v18558_v2, %v18510_v58 }
 0xc22   :  { %v7923_v0 = vadd.f32 %v18552_v26, %v6963_v53  ;;  %v7924_v27 = vadd.f32 %v18552_v26, %v6964_v60  ;;  %v18554_v60 = vld [vmem:[#allocation123_spill] sm:$0xff] }
 0xc24   :  { %8163 = vst [vmem:[#allocation2 + $0x460] sm:$0xff] %v7923_v0  ;;  %8164 = vst [vmem:[#allocation2 + $0x468] sm:$0xff] %v7924_v27  ;;  %v18556_v27 = vld [vmem:[#allocation24_spill] sm:$0xff] }
 0xc26   :  { %6610 = vperm.xlu0 %8844, %v5940_v56   ;;  %v18557_v56 = vsub.f32 %v18556_v27, %v18510_v58  ;;  %v5579_v58 = vld [vmem:[%s16661_s6 + $0x260] sm:$0xff] }
 0xc27   :  { %v4401_v24 = vpop.xlane.xlu0 %4400 }
 0xc28   :  { %v15923_v41 = vmul.f32 0.0051020407, %v4401_v24  ;;  %v5339_v24 = vmul.f32 %v18554_v60, %v18554_v60 }
 0xc2a   :  { %18553 = vst [vmem:[#allocation209_spill] sm:$0xff] %v15923_v41  ;;  %v15927_v59 = vmul.f32 %v15923_v41, %v15923_v41  ;;  %v5459_v26 = vsub.f32 %v5219_v15, %v5339_v24  ;;  %v18561_v24 = vld [vmem:[#allocation157_spill] sm:$0xff] }
 0xc2b   :  { %v5121_v53 = vpop.xlane.xlu0 %5120  ;;  %v5222_v10 = vmul.f32 0.0051020407, %v18561_v24  ;;  %v5228_v24 = vmul.f32 0.0051020407, %v14903_v7  ;;  %v5584_v7 = vld [vmem:[%s16661_s6 + $0x288] sm:$0xff] }
 0xc2c   :  { %v15933_v44 = vmul.f32 0.0051020407, %v5121_v53  ;;  %v18560_v53 = vld [vmem:[#allocation93_spill] sm:$0xff]  ;;  %v5699_v41 = vadd.f32 0.001, %v5459_v26 }
 0xc2e   :  { %9399 = vrsqrt.f32 %v5699_v41 }
 0xc33   :  { %v6591_v0 = vpop.permute.xlu0 %6590 }
 0xc34   :  { %v6969_v48 = vmul.f32 %v6591_v0, %v18557_v56  ;;  %v6970_v32 = vmul.f32 %v6591_v0, %v18559_v6  ;;  %v18565_v0 = vld [vmem:[#allocation47_spill] sm:$0xff] }
 0xc35   :  { %5129 = vadd.xlane.f32.xlu1 %v15695_v31  ;;  %v18562_v31 = vld [vmem:[#allocation273_spill] sm:$0xff]  ;;  %v5346_v27 = vmul.f32 %v18565_v0, %v18565_v0 }
 0xc36   :  { %v7929_v18 = vadd.f32 %v18560_v53, %v6969_v48  ;;  %v7930_v1 = vadd.f32 %v18560_v53, %v6970_v32  ;;  %v5342_v2 = vmul.f32 %v18562_v31, %v18562_v31  ;;  %v18563_v32 = vld [vmem:[#allocation272_spill] sm:$0xff] }
 0xc37   :  { %v5224_v6 = vmul.f32 0.0051020407, %v18563_v32 }
 0xc38   :  { %8169 = vst [vmem:[#allocation2 + $0x490] sm:$0xff] %v7929_v18  ;;  %8170 = vst [vmem:[#allocation2 + $0x498] sm:$0xff] %v7930_v1  ;;  %v9400_v15 = vpop.eup %9399  ;;  %v5462_v48 = vsub.f32 %v5222_v10, %v5342_v2 }
 0xc39   :  { %4415 = vadd.xlane.f32.xlu1 %v15771_v54  ;;  %v5939_v18 = vmul.f32 %v9400_v15, %v5579_v58  ;;  %v18564_v54 = vld [vmem:[#allocation46_spill] sm:$0xff]  ;;  %v18566_v15 = vld [vmem:[#allocation32_spill] sm:$0xff] }
 0xc3a   :  { %v5344_v41 = vmul.f32 %v18564_v54, %v18564_v54  ;;  %v5702_v1 = vadd.f32 0.001, %v5462_v48  ;;  %v18567_v48 = vld [vmem:[#allocation172_spill] sm:$0xff] }
 0xc3b   :  { %v5230_v32 = vmul.f32 0.0051020407, %v18567_v48 }
 0xc3c   :  { %v5464_v26 = vsub.f32 %v5224_v6, %v5344_v41  ;;  %9401 = vrsqrt.f32 %v5702_v1  ;;  %v5352_v1 = vmul.f32 %v18574_v38, %v18574_v38 }
 0xc3e   :  { %v5704_v56 = vadd.f32 0.001, %v5464_v26 }
 0xc40   :  { %9403 = vrsqrt.f32 %v5704_v56 }
 0xc45   :  { %4418 = vadd.xlane.f32.xlu0 %v15809_v21  ;;  %v5226_v21 = vmul.f32 0.0051020407, %v14820_v46 }
 0xc46   :  { %v9402_v62 = vpop.eup %9401 }
 0xc47   :  { %v5466_v53 = vsub.f32 %v5226_v21, %v5346_v27  ;;  %v18569_v27 = vld [vmem:[#allocation35_spill] sm:$0xff] }
 0xc48   :  { %v5232_v56 = vmul.f32 0.0051020407, %v18569_v27 }
 0xc49   :  { %5138 = vadd.xlane.f32.xlu0 %v15814_v33  ;;  %v5348_v33 = vmul.f32 %v18566_v15, %v18566_v15  ;;  %v5706_v58 = vadd.f32 0.001, %v5466_v53 }
 0xc4a   :  { %6605 = vperm.xlu1 %8843, %v5939_v18   ;;  %v18568_v18 = vld [vmem:[#allocation284_spill] sm:$0xff] }
 0xc4b   :  { %v5468_v2 = vsub.f32 %v5228_v24, %v5348_v33  ;;  %v5350_v41 = vmul.f32 %v18568_v18, %v18568_v18  ;;  %9405 = vrsqrt.f32 %v5706_v58  ;;  %v18570_v24 = vld [vmem:[#allocation39_spill] sm:$0xff]  ;;  %v5582_v58 = vld [vmem:[%s16661_s6 + $0x278] sm:$0xff] }
 0xc4c   :  { %v18571_v33 = vsub.f32 %v18570_v24, %v18521_v61  ;;  %v5472_v24 = vsub.f32 %v5232_v56, %v5352_v1 }
 0xc4d   :  { %v5708_v26 = vadd.f32 0.001, %v5468_v2  ;;  %v5470_v21 = vsub.f32 %v5230_v32, %v5350_v41  ;;  %v18575_v2 = vld [vmem:[#allocation94_spill] sm:$0xff] }
 0xc4f   :  { %9407 = vrsqrt.f32 %v5708_v26  ;;  %v5710_v27 = vadd.f32 0.001, %v5470_v21  ;;  %v18577_v26 = vld [vmem:[#allocation189_spill] sm:$0xff] }
 0xc50   :  { %v15965_v10 = vpop.xlane.xlu1 %5117  ;;  %v5236_v21 = vmul.f32 0.0051020407, %v18577_v26 }
 0xc51   :  { %9409 = vrsqrt.f32 %v5710_v27  ;;  %v5588_v27 = vld [vmem:[%s16661_s6 + $0x2a8] sm:$0xff] }
 0xc54   :  { %v4404_v6 = vpop.xlane.xlu1 %4403 }
 0xc55   :  { %v15970_v46 = vmul.f32 0.0051020407, %v4404_v6  ;;  %v18572_v6 = vld [vmem:[#allocation255_spill] sm:$0xff] }
 0xc56   :  { %v18573_v50 = vsub.f32 %v18572_v6, %v18521_v61  ;;  %v9404_v61 = vpop.eup %9403 }
 0xc58   :  { %v6586_v53 = vpop.permute.xlu1 %6585 }
 0xc59   :  { %v6967_v48 = vmul.f32 %v6586_v53, %v18571_v33  ;;  %v6968_v23 = vmul.f32 %v6586_v53, %v18573_v50  ;;  %v5234_v33 = vmul.f32 0.0051020407, %v15152_v63  ;;  %v5942_v50 = vmul.f32 %v9402_v62, %v5582_v58  ;;  %v18576_v53 = vld [vmem:[#allocation183_spill] sm:$0xff]  ;;  %v18579_v62 = vld [vmem:[#allocation36_spill] sm:$0xff] }
 0xc5a   :  { %v5354_v6 = vmul.f32 %v18576_v53, %v18576_v53  ;;  %v5944_v63 = vmul.f32 %v9404_v61, %v5584_v7  ;;  %v5356_v58 = vmul.f32 %v18579_v62, %v18579_v62 }
 0xc5b   :  { %v7927_v32 = vadd.f32 %v18575_v2, %v6967_v48  ;;  %v7928_v41 = vadd.f32 %v18575_v2, %v6968_v23  ;;  %v5712_v48 = vadd.f32 0.001, %v5472_v24  ;;  %v9406_v2 = vpop.eup %9405  ;;  %v5341_v24 = vmul.f32 %v18582_v11, %v18582_v11  ;;  %v5590_v11 = vld [vmem:[%s16661_s6 + $0x2b8] sm:$0xff] }
 0xc5c   :  { %v5474_v23 = vsub.f32 %v5234_v33, %v5354_v6  ;;  %v5476_v33 = vsub.f32 %v5236_v21, %v5356_v58 }
 0xc5d   :  { %8167 = vst [vmem:[#allocation2 + $0x480] sm:$0xff] %v7927_v32  ;;  %8168 = vst [vmem:[#allocation2 + $0x488] sm:$0xff] %v7928_v41  ;;  %v5586_v32 = vld [vmem:[%s16661_s6 + $0x298] sm:$0xff]  ;;  %9411 = vrsqrt.f32 %v5712_v48  ;;  %v18583_v48 = vld [vmem:[#allocation45_spill] sm:$0xff] }
 0xc5e   :  { %v5714_v7 = vadd.f32 0.001, %v5474_v23  ;;  %v5946_v26 = vmul.f32 %v9406_v2, %v5586_v32  ;;  %v5221_v23 = vmul.f32 0.0051020407, %v18583_v48  ;;  %v5716_v2 = vadd.f32 0.001, %v5476_v33 }
 0xc5f   :  { %6620 = vperm.xlu0 %8844, %v5942_v50   ;;  %v18580_v50 = vld [vmem:[#allocation294_spill] sm:$0xff]  ;;  %v5240_v32 = vmul.f32 0.0051020407, %v15401_v8 }
 0xc60   :  { %v4407_v1 = vpop.xlane.xlu0 %4406  ;;  %v5238_v61 = vmul.f32 0.0051020407, %v18580_v50  ;;  %9413 = vrsqrt.f32 %v5714_v7  ;;  %v5461_v55 = vsub.f32 %v5221_v23, %v5341_v24  ;;  %v5242_v7 = vmul.f32 0.0051020407, %v15484_v43  ;;  %v5592_v43 = vld [vmem:[%s16661_s6 + $0x2c8] sm:$0xff]  ;;  %v18589_v23 = vld [vmem:[#allocation95_spill] sm:$0xff] }
 0xc61   :  { %v15999_v56 = vmul.f32 0.0051020407, %v4407_v1  ;;  %9415 = vrsqrt.f32 %v5716_v2  ;;  %v5362_v24 = vmul.f32 %v15403_v4, %v15403_v4 }
 0xc62   :  { %v5478_v58 = vsub.f32 %v5238_v61, %v5358_v9  ;;  %v18585_v9 = vld [vmem:[#allocation25_spill] sm:$0xff]  ;;  %v18587_v61 = vld [vmem:[#allocation119_spill] sm:$0xff] }
 0xc63   :  { %18578 = vst [vmem:[#allocation63_spill] sm:$0xff] %v15999_v56  ;;  %6630 = vperm.xlu0 %8844, %v5944_v63   ;;  %v16008_v41 = vmul.f32 %v15999_v56, %v15999_v56  ;;  %v9408_v63 = vpop.eup %9407  ;;  %v5360_v56 = vmul.f32 %v18584_v13, %v18584_v13  ;;  %v18586_v8 = vsub.f32 %v18585_v9, %v18529_v3 }
 0xc64   :  { %v5127_v6 = vpop.xlane.xlu0 %5126  ;;  %v5948_v50 = vmul.f32 %v9408_v63, %v5588_v27  ;;  %v18588_v63 = vsub.f32 %v18587_v61, %v18529_v3  ;;  %v18590_v9 = vsub.f32 %v15652_v29, %v15650_v34 }
 0xc65   :  { %v16015_v1 = vmul.f32 0.0051020407, %v5127_v6  ;;  %v9410_v6 = vpop.eup %9409  ;;  %v5480_v48 = vsub.f32 %v5240_v32, %v5360_v56  ;;  %v5701_v56 = vadd.f32 0.001, %v5461_v55  ;;  %v5482_v32 = vsub.f32 %v5242_v7, %v5362_v24  ;;  %v5594_v55 = vld [vmem:[%s16661_s6 + $0x2d8] sm:$0xff]  ;;  %v5581_v24 = vld [vmem:[%s16661_s6 + $0x270] sm:$0xff] }
 0xc66   :  { %v5950_v13 = vmul.f32 %v9410_v6, %v5590_v11  ;;  %v5244_v11 = vmul.f32 0.0051020407, %v15566_v17 }
 0xc67   :  { %6640 = vperm.xlu0 %8844, %v5946_v26   ;;  %v5718_v26 = vadd.f32 0.001, %v5478_v58  ;;  %v9412_v62 = vpop.eup %9411  ;;  %v5720_v3 = vadd.f32 0.001, %v5480_v48 }
 0xc69   :  { %9417 = vrsqrt.f32 %v5718_v26 }
 0xc6a   :  { %v9414_v6 = vpop.eup %9413  ;;  %9419 = vrsqrt.f32 %v5701_v56  ;;  %v18591_v56 = vsub.f32 %v15740_v25, %v15738_v20  ;;  %v5374_v20 = vmul.f32 %v15906_v28, %v15906_v28  ;;  %v5604_v25 = vld [vmem:[%s16661_s6 + $0x328] sm:$0xff] }
 0xc6b   :  { %6650 = vperm.xlu0 %8844, %v5948_v50   ;;  %v5952_v50 = vmul.f32 %v9412_v62, %v5592_v43  ;;  %9421 = vrsqrt.f32 %v5720_v3  ;;  %v5954_v26 = vmul.f32 %v9414_v6, %v5594_v55  ;;  %v9416_v17 = vpop.eup %9415  ;;  %v5596_v62 = vld [vmem:[%s16661_s6 + $0x2e8] sm:$0xff]  ;;  %v18592_v3 = vsub.f32 %v15828_v19, %v15826_v42 }
 0xc6c   :  { %v6601_v33 = vpop.permute.xlu0 %6600  ;;  %v5956_v7 = vmul.f32 %v9416_v17, %v5596_v62  ;;  %v5600_v43 = vld [vmem:[%s16661_s6 + $0x308] sm:$0xff]  ;;  %v5606_v17 = vld [vmem:[%s16661_s6 + $0x338] sm:$0xff] }
 0xc6d   :  { %v6973_v27 = vmul.f32 %v6601_v33, %v18586_v8  ;;  %v6974_v21 = vmul.f32 %v6601_v33, %v18588_v63  ;;  %v5598_v33 = vld [vmem:[%s16661_s6 + $0x2f8] sm:$0xff]  ;;  %v5726_v8 = vadd.f32 0.001, %v18590_v9 }
 0xc6e   :  { %5135 = vadd.xlane.f32.xlu1 %v15783_v57  ;;  %v5364_v57 = vmul.f32 %v15486_v39, %v15486_v39 }
 0xc6f   :  { %v7933_v2 = vadd.f32 %v18589_v23, %v6973_v27  ;;  %v7934_v58 = vadd.f32 %v18589_v23, %v6974_v21  ;;  %6660 = vperm.xlu0 %8844, %v5950_v13   ;;  %v5722_v13 = vadd.f32 0.001, %v5482_v32  ;;  %v5728_v23 = vadd.f32 0.001, %v18591_v56 }
 0xc70   :  { %v5484_v21 = vsub.f32 %v5244_v11, %v5364_v57  ;;  %v5730_v32 = vadd.f32 0.001, %v18592_v3  ;;  %v5254_v11 = vmul.f32 0.0051020407, %v15965_v10  ;;  %v18593_v57 = vsub.f32 %v15902_v22, %v15900_v47  ;;  %v18598_v3 = vld [vmem:[#allocation97_spill] sm:$0xff] }
 0xc71   :  { %8173 = vst [vmem:[#allocation2 + $0x4b0] sm:$0xff] %v7933_v2  ;;  %8174 = vst [vmem:[#allocation2 + $0x4b8] sm:$0xff] %v7934_v58  ;;  %9423 = vrsqrt.f32 %v5722_v13  ;;  %v5602_v58 = vld [vmem:[%s16661_s6 + $0x318] sm:$0xff]  ;;  %v5376_v10 = vmul.f32 %v15970_v46, %v15970_v46 }
 0xc72   :  { %4421 = vadd.xlane.f32.xlu1 %v15859_v36  ;;  %v5724_v48 = vadd.f32 0.001, %v5484_v21  ;;  %v5732_v55 = vadd.f32 0.001, %v18593_v57  ;;  %v5494_v13 = vsub.f32 %v5254_v11, %v5374_v20  ;;  %v5612_v20 = vld [vmem:[%s16661_s6 + $0x368] sm:$0xff] }
 0xc73   :  { %6670 = vperm.xlu0 %8844, %v5952_v50   ;;  %v9418_v36 = vpop.eup %9417 }
 0xc74   :  { %9425 = vrsqrt.f32 %v5724_v48  ;;  %v9420_v27 = vpop.eup %9419  ;;  %v5958_v61 = vmul.f32 %v9418_v36, %v5598_v33  ;;  %v5734_v62 = vadd.f32 0.001, %v5494_v13  ;;  %v5608_v33 = vld [vmem:[%s16661_s6 + $0x348] sm:$0xff]  ;;  %v5614_v13 = vld [vmem:[%s16661_s6 + $0x378] sm:$0xff] }
 0xc75   :  { %v9422_v63 = vpop.eup %9421  ;;  %9427 = vrsqrt.f32 %v5726_v8  ;;  %v5941_v2 = vmul.f32 %v9420_v27, %v5581_v24 }
 0xc76   :  { %v5960_v34 = vmul.f32 %v9422_v63, %v5600_v43  ;;  %9429 = vrsqrt.f32 %v5728_v23  ;;  %v18594_v43 = vld [vmem:[#allocation245_spill] sm:$0xff] }
 0xc77   :  { %6680 = vperm.xlu0 %8844, %v5954_v26   ;;  %9431 = vrsqrt.f32 %v5730_v32  ;;  %v18595_v56 = vsub.f32 %v18594_v43, %v18539_v16  ;;  %v18602_v43 = vld [vmem:[#allocation278_spill] sm:$0xff] }
 0xc78   :  { %9433 = vrsqrt.f32 %v5732_v55 }
 0xc79   :  { %9435 = vrsqrt.f32 %v5734_v62 }
 0xc7b   :  { %6690 = vperm.xlu0 %8844, %v5956_v7   ;;  %v9424_v29 = vpop.eup %9423 }
 0xc7c   :  { %v5962_v50 = vmul.f32 %v9424_v29, %v5602_v58  ;;  %v5610_v58 = vld [vmem:[%s16661_s6 + $0x358] sm:$0xff] }
 0xc7e   :  { %v9426_v6 = vpop.eup %9425 }
 0xc7f   :  { %6700 = vperm.xlu0 %8844, %v5958_v61   ;;  %v5964_v19 = vmul.f32 %v9426_v6, %v5604_v25  ;;  %v9428_v21 = vpop.eup %9427 }
 0xc80   :  { %v5966_v36 = vmul.f32 %v9428_v21, %v5606_v17  ;;  %v9430_v47 = vpop.eup %9429  ;;  %v18600_v21 = vld [vmem:[#allocation156_spill] sm:$0xff] }
 0xc81   :  { %v5968_v63 = vmul.f32 %v9430_v47, %v5608_v33  ;;  %v9432_v24 = vpop.eup %9431  ;;  %v5616_v33 = vld [vmem:[%s16661_s6 + $0x388] sm:$0xff] }
 0xc82   :  { %v9434_v6 = vpop.eup %9433 }
 0xc83   :  { %6615 = vperm.xlu1 %8843, %v5941_v2   ;;  %6710 = vperm.xlu0 %8844, %v5960_v34   ;;  %v18596_v2 = vld [vmem:[#allocation9_spill] sm:$0xff]  ;;  %v5972_v25 = vmul.f32 %v9434_v6, %v5612_v20  ;;  %v9436_v57 = vpop.eup %9435 }
 0xc84   :  { %v18597_v34 = vsub.f32 %v18596_v2, %v18539_v16 }
 0xc87   :  { %6720 = vperm.xlu0 %8844, %v5962_v50   ;;  %v5970_v50 = vmul.f32 %v9432_v24, %v5610_v58 }
 0xc89   :  { %v5124_v42 = vpop.xlane.xlu1 %5123 }
 0xc8a   :  { %v5256_v26 = vmul.f32 0.0051020407, %v5124_v42  ;;  %v18599_v42 = vld [vmem:[#allocation275_spill] sm:$0xff] }
 0xc8b   :  { %6730 = vperm.xlu0 %8844, %v5964_v19   ;;  %v5343_v19 = vmul.f32 %v18599_v42, %v18599_v42 }
 0xc8c   :  { %v5496_v48 = vsub.f32 %v5256_v26, %v5376_v10  ;;  %v5223_v10 = vmul.f32 0.0051020407, %v18600_v21 }
 0xc8d   :  { %v4410_v7 = vpop.xlane.xlu1 %4409 }
 0xc8e   :  { %v16093_v22 = vmul.f32 0.0051020407, %v4410_v7  ;;  %v5736_v9 = vadd.f32 0.001, %v5496_v48  ;;  %v5974_v48 = vmul.f32 %v9436_v57, %v5614_v13  ;;  %v18609_v13 = vld [vmem:[#allocation98_spill] sm:$0xff] }
 0xc8f   :  { %6740 = vperm.xlu0 %8844, %v5966_v36  }
 0xc90   :  { %v6213_v8 = vsub.f32 %v15673_v12, %v16093_v22  ;;  %v6214_v27 = vsub.f32 %v15677_v45, %v16093_v22  ;;  %9437 = vrsqrt.f32 %v5736_v9  ;;  %v5463_v9 = vsub.f32 %v5223_v10, %v5343_v19 }
 0xc91   :  { %v6596_v61 = vpop.permute.xlu1 %6595 }
 0xc92   :  { %v6971_v23 = vmul.f32 %v6596_v61, %v18595_v56  ;;  %v6972_v29 = vmul.f32 %v6596_v61, %v18597_v34  ;;  %v5225_v56 = vmul.f32 0.0051020407, %v18602_v43  ;;  %v5703_v2 = vadd.f32 0.001, %v5463_v9  ;;  %v18613_v43 = vld [vmem:[#allocation49_spill] sm:$0xff] }
 0xc93   :  { %6750 = vperm.xlu0 %8844, %v5968_v63   ;;  %v18601_v63 = vld [vmem:[#allocation168_spill] sm:$0xff] }
 0xc94   :  { %v7931_v32 = vadd.f32 %v18598_v3, %v6971_v23  ;;  %v7932_v11 = vadd.f32 %v18598_v3, %v6972_v29  ;;  %v5345_v24 = vmul.f32 %v18601_v63, %v18601_v63  ;;  %v18603_v29 = vld [vmem:[#allocation274_spill] sm:$0xff]  ;;  %v18604_v3 = vld [vmem:[#allocation283_spill] sm:$0xff]  ;;  %9439 = vrsqrt.f32 %v5703_v2 }
 0xc95   :  { %v5347_v58 = vmul.f32 %v18603_v29, %v18603_v29 }
 0xc96   :  { %8171 = vst [vmem:[#allocation2 + $0x4a0] sm:$0xff] %v7931_v32  ;;  %8172 = vst [vmem:[#allocation2 + $0x4a8] sm:$0xff] %v7932_v11  ;;  %v5465_v34 = vsub.f32 %v5225_v56, %v5345_v24  ;;  %v5227_v32 = vmul.f32 0.0051020407, %v18604_v3  ;;  %v18612_v24 = vld [vmem:[#allocation177_spill] sm:$0xff] }
 0xc97   :  { %6760 = vperm.xlu0 %8844, %v5970_v50   ;;  %v18605_v50 = vld [vmem:[#allocation231_spill] sm:$0xff]  ;;  %v5231_v56 = vmul.f32 0.0051020407, %v18613_v43  ;;  %v18619_v43 = vld [vmem:[#allocation292_spill] sm:$0xff] }
 0xc98   :  { %v18606_v6 = vsub.f32 %v18605_v50, %v18547_v37  ;;  %v5705_v10 = vadd.f32 0.001, %v5465_v34  ;;  %v18614_v34 = vld [vmem:[#allocation173_spill] sm:$0xff] }
 0xc99   :  { %v4413_v16 = vpop.xlane.xlu0 %4412 }
 0xc9a   :  { %v16116_v55 = vmul.f32 0.0051020407, %v4413_v16  ;;  %v9438_v36 = vpop.eup %9437  ;;  %v18607_v16 = vld [vmem:[#allocation261_spill] sm:$0xff]  ;;  %9441 = vrsqrt.f32 %v5705_v10 }
 0xc9b   :  { %6770 = vperm.xlu0 %8844, %v5972_v25   ;;  %v5976_v23 = vmul.f32 %v9438_v36, %v5616_v33  ;;  %v18608_v25 = vsub.f32 %v18607_v16, %v18547_v37  ;;  %v18611_v33 = vld [vmem:[#allocation174_spill] sm:$0xff]  ;;  %v5351_v37 = vmul.f32 %v18612_v24, %v18612_v24 }
 0xc9c   :  { %v16126_v26 = vmul.f32 %v16116_v55, %v16116_v55  ;;  %v5229_v9 = vmul.f32 0.0051020407, %v18611_v33 }
 0xc9d   :  { %v5133_v7 = vpop.xlane.xlu0 %5132  ;;  %v5471_v2 = vsub.f32 %v5231_v56, %v5351_v37  ;;  %v5237_v56 = vmul.f32 0.0051020407, %v18619_v43 }
 0xc9e   :  { %v16132_v47 = vmul.f32 0.0051020407, %v5133_v7  ;;  %v18610_v7 = vld [vmem:[#allocation165_spill] sm:$0xff]  ;;  %v9440_v50 = vpop.eup %9439 }
 0xc9f   :  { %6780 = vperm.xlu0 %8844, %v5974_v48   ;;  %v5467_v48 = vsub.f32 %v5227_v32, %v5347_v58  ;;  %v5349_v36 = vmul.f32 %v18610_v7, %v18610_v7  ;;  %v5353_v58 = vmul.f32 %v18614_v34, %v18614_v34  ;;  %v18615_v32 = vld [vmem:[#allocation288_spill] sm:$0xff] }
 0xca0   :  { %v5499_v61 = vsub.f32 %v16132_v47, %v16126_v26  ;;  %v5613_v26 = vld [vmem:[%s16661_s6 + $0x370] sm:$0xff] }
 0xca1   :  { %v18671_v47 = vld [vmem:[#allocation115_spill] sm:$0xff] }
 0xca3   :  { %6790 = vperm.xlu0 %8844, %v5976_v23   ;;  %v5469_v23 = vsub.f32 %v5229_v9, %v5349_v36  ;;  %v18618_v9 = vld [vmem:[#allocation181_spill] sm:$0xff] }
 0xca4   :  { %v9442_v10 = vpop.eup %9441  ;;  %v5357_v37 = vmul.f32 %v18618_v9, %v18618_v9 }
 0xca5   :  { %v6611_v11 = vpop.permute.xlu0 %6610  ;;  %v5709_v3 = vadd.f32 0.001, %v5469_v23 }
 0xca6   :  { %v6977_v20 = vmul.f32 %v6611_v11, %v18606_v6  ;;  %v6978_v57 = vmul.f32 %v6611_v11, %v18608_v25  ;;  %v5233_v11 = vmul.f32 0.0051020407, %v18615_v32  ;;  %v5583_v6 = vld [vmem:[%s16661_s6 + $0x280] sm:$0xff]  ;;  %v18616_v25 = vld [vmem:[#allocation51_spill] sm:$0xff] }
 0xca7   :  { %5141 = vadd.xlane.f32.xlu1 %v15871_v52  ;;  %v5707_v52 = vadd.f32 0.001, %v5467_v48  ;;  %v5585_v48 = vld [vmem:[%s16661_s6 + $0x290] sm:$0xff] }
 0xca8   :  { %v7937_v19 = vadd.f32 %v18609_v13, %v6977_v20  ;;  %v7938_v21 = vadd.f32 %v18609_v13, %v6978_v57  ;;  %v5711_v20 = vadd.f32 0.001, %v5471_v2  ;;  %v5473_v16 = vsub.f32 %v5233_v11, %v5353_v58  ;;  %v18617_v13 = vld [vmem:[#allocation291_spill] sm:$0xff]  ;;  %v5587_v2 = vld [vmem:[%s16661_s6 + $0x2a0] sm:$0xff] }
 0xca9   :  { %9443 = vrsqrt.f32 %v5707_v52  ;;  %v5355_v57 = vmul.f32 %v18616_v25, %v18616_v25  ;;  %v5945_v52 = vmul.f32 %v9442_v10, %v5585_v48  ;;  %v18621_v32 = vld [vmem:[#allocation187_spill] sm:$0xff] }
 0xcaa   :  { %8177 = vst [vmem:[#allocation2 + $0x4d0] sm:$0xff] %v7937_v19  ;;  %8178 = vst [vmem:[#allocation2 + $0x4d8] sm:$0xff] %v7938_v21  ;;  %9445 = vrsqrt.f32 %v5709_v3  ;;  %v5235_v19 = vmul.f32 0.0051020407, %v18617_v13  ;;  %v5943_v21 = vmul.f32 %v9440_v50, %v5583_v6  ;;  %v5713_v36 = vadd.f32 0.001, %v5473_v16 }
 0xcab   :  { %9447 = vrsqrt.f32 %v5711_v20  ;;  %v18620_v3 = vld [vmem:[#allocation295_spill] sm:$0xff]  ;;  %v5239_v11 = vmul.f32 0.0051020407, %v18621_v32  ;;  %v5477_v6 = vsub.f32 %v5237_v56, %v5357_v37  ;;  %v5591_v56 = vld [vmem:[%s16661_s6 + $0x2c0] sm:$0xff] }
 0xcac   :  { %v5475_v33 = vsub.f32 %v5235_v19, %v5355_v57  ;;  %v5359_v58 = vmul.f32 %v18620_v3, %v18620_v3  ;;  %9449 = vrsqrt.f32 %v5713_v36  ;;  %v5589_v57 = vld [vmem:[%s16661_s6 + $0x2b0] sm:$0xff] }
 0xcad   :  { %v18622_v19 = vld [vmem:[#allocation55_spill] sm:$0xff]  ;;  %v5717_v43 = vadd.f32 0.001, %v5477_v6 }
 0xcae   :  { %v5715_v50 = vadd.f32 0.001, %v5475_v33  ;;  %v5479_v13 = vsub.f32 %v5239_v11, %v5359_v58  ;;  %v18623_v10 = vld [vmem:[#allocation299_spill] sm:$0xff]  ;;  %v5378_v33 = vmul.f32 %v16093_v22, %v16093_v22  ;;  %v18624_v58 = vld [vmem:[#allocation300_spill] sm:$0xff] }
 0xcaf   :  { %v5241_v48 = vmul.f32 0.0051020407, %v18623_v10  ;;  %v5363_v11 = vmul.f32 %v18624_v58, %v18624_v58  ;;  %v18797_v22 = vld [vmem:[#allocation132_spill] sm:$0xff] }
 0xcb0   :  { %9451 = vrsqrt.f32 %v5715_v50  ;;  %v18625_v50 = vld [vmem:[#allocation196_spill] sm:$0xff] }
 0xcb1   :  { %9453 = vrsqrt.f32 %v5717_v43  ;;  %v5243_v6 = vmul.f32 0.0051020407, %v18625_v50  ;;  %v18626_v43 = vld [vmem:[#allocation313_spill] sm:$0xff] }
 0xcb3   :  { %v9444_v23 = vpop.eup %9443 }
 0xcb4   :  { %v5947_v20 = vmul.f32 %v9444_v23, %v5587_v2  ;;  %v9446_v16 = vpop.eup %9445  ;;  %v5719_v23 = vadd.f32 0.001, %v5479_v13 }
 0xcb5   :  { %v9448_v32 = vpop.eup %9447  ;;  %v5949_v36 = vmul.f32 %v9446_v16, %v5589_v57 }
 0xcb6   :  { %v5951_v16 = vmul.f32 %v9448_v32, %v5591_v56  ;;  %v9450_v57 = vpop.eup %9449  ;;  %9455 = vrsqrt.f32 %v5719_v23  ;;  %v18627_v56 = vld [vmem:[#allocation120_spill] sm:$0xff] }
 0xcb7   :  { %v18628_v50 = vsub.f32 %v18627_v56, %v18554_v60  ;;  %v18633_v56 = vld [vmem:[#allocation195_spill] sm:$0xff] }
 0xcb8   :  { %6625 = vperm.xlu1 %8843, %v5943_v21   ;;  %v5361_v21 = vmul.f32 %v18622_v19, %v18622_v19 }
 0xcba   :  { %v5481_v2 = vsub.f32 %v5241_v48, %v5361_v21  ;;  %v5483_v21 = vsub.f32 %v5243_v6, %v5363_v11  ;;  %v18631_v6 = vld [vmem:[#allocation99_spill] sm:$0xff] }
 0xcbc   :  { %6635 = vperm.xlu1 %8843, %v5945_v52   ;;  %v5721_v13 = vadd.f32 0.001, %v5481_v2  ;;  %v5723_v11 = vadd.f32 0.001, %v5483_v21 }
 0xcc0   :  { %6645 = vperm.xlu1 %8843, %v5947_v20  }
 0xcc2   :  { %v5130_v52 = vpop.xlane.xlu1 %5129 }
 0xcc3   :  { %v5258_v37 = vmul.f32 0.0051020407, %v5130_v52  ;;  %v5593_v52 = vld [vmem:[%s16661_s6 + $0x2d0] sm:$0xff] }
 0xcc4   :  { %6655 = vperm.xlu1 %8843, %v5949_v36  }
 0xcc5   :  { %v5498_v20 = vsub.f32 %v5258_v37, %v5378_v33  ;;  %v5953_v33 = vmul.f32 %v9450_v57, %v5593_v52  ;;  %v9452_v37 = vpop.eup %9451 }
 0xcc6   :  { %v4416_v10 = vpop.xlane.xlu1 %4415  ;;  %v9454_v36 = vpop.eup %9453 }
 0xcc7   :  { %v5738_v62 = vadd.f32 0.001, %v5498_v20  ;;  %v16195_v17 = vmul.f32 0.0051020407, %v4416_v10  ;;  %v18629_v10 = vld [vmem:[#allocation226_spill] sm:$0xff]  ;;  %v9456_v21 = vpop.eup %9455 }
 0xcc8   :  { %6665 = vperm.xlu1 %8843, %v5951_v16   ;;  %v18630_v23 = vsub.f32 %v18629_v10, %v18554_v60  ;;  %v5597_v60 = vld [vmem:[%s16661_s6 + $0x2f0] sm:$0xff] }
 0xcc9   :  { %9457 = vrsqrt.f32 %v5738_v62  ;;  %v5595_v62 = vld [vmem:[%s16661_s6 + $0x2e0] sm:$0xff] }
 0xcca   :  { %v6606_v32 = vpop.permute.xlu1 %6605  ;;  %9459 = vrsqrt.f32 %v5721_v13  ;;  %v5955_v52 = vmul.f32 %v9452_v37, %v5595_v62  ;;  %v5618_v13 = vld [vmem:[%s16661_s6 + $0x398] sm:$0xff]  ;;  %v5957_v37 = vmul.f32 %v9454_v36, %v5597_v60 }
 0xccb   :  { %v6975_v20 = vmul.f32 %v6606_v32, %v18628_v50  ;;  %v6976_v2 = vmul.f32 %v6606_v32, %v18630_v23  ;;  %9461 = vrsqrt.f32 %v5723_v11  ;;  %v18632_v32 = vld [vmem:[#allocation58_spill] sm:$0xff] }
 0xccc   :  { %6675 = vperm.xlu1 %8843, %v5953_v33   ;;  %v18634_v50 = vsub.f32 %v18632_v32, %v18633_v56  ;;  %v18635_v11 = vld [vmem:[#allocation198_spill] sm:$0xff]  ;;  %v5601_v56 = vld [vmem:[%s16661_s6 + $0x310] sm:$0xff] }
 0xccd   :  { %v7935_v16 = vadd.f32 %v18631_v6, %v6975_v20  ;;  %v7936_v57 = vadd.f32 %v18631_v6, %v6976_v2  ;;  %v5599_v2 = vld [vmem:[%s16661_s6 + $0x300] sm:$0xff]  ;;  %v18636_v6 = vld [vmem:[#allocation307_spill] sm:$0xff] }
 0xcce   :  { %v5725_v33 = vadd.f32 0.001, %v18634_v50  ;;  %v5959_v60 = vmul.f32 %v9456_v21, %v5599_v2  ;;  %v18641_v21 = vld [vmem:[#allocation203_spill] sm:$0xff]  ;;  %v18642_v2 = vld [vmem:[#allocation202_spill] sm:$0xff] }
 0xccf   :  { %8175 = vst [vmem:[#allocation2 + $0x4c0] sm:$0xff] %v7935_v16  ;;  %8176 = vst [vmem:[#allocation2 + $0x4c8] sm:$0xff] %v7936_v57  ;;  %v18637_v16 = vsub.f32 %v18635_v11, %v18636_v6  ;;  %v5603_v6 = vld [vmem:[%s16661_s6 + $0x320] sm:$0xff] }
 0xcd0   :  { %6685 = vperm.xlu1 %8843, %v5955_v52   ;;  %9463 = vrsqrt.f32 %v5725_v33  ;;  %v18638_v33 = vld [vmem:[#allocation205_spill] sm:$0xff] }
 0xcd1   :  { %v5727_v57 = vadd.f32 0.001, %v18637_v16 }
 0xcd2   :  { %v4419_v20 = vpop.xlane.xlu0 %4418 }
 0xcd3   :  { %v9458_v10 = vpop.eup %9457  ;;  %v16224_v23 = vmul.f32 0.0051020407, %v4419_v20  ;;  %9465 = vrsqrt.f32 %v5727_v57  ;;  %v18644_v57 = vld [vmem:[#allocation26_spill] sm:$0xff] }
 0xcd4   :  { %6695 = vperm.xlu1 %8843, %v5957_v37   ;;  %v5978_v62 = vmul.f32 %v9458_v10, %v5618_v13  ;;  %v9460_v32 = vpop.eup %9459  ;;  %v18639_v13 = vld [vmem:[#allocation204_spill] sm:$0xff]  ;;  %v18645_v52 = vsub.f32 %v18644_v57, %v18562_v31 }
 0xcd5   :  { %v18640_v20 = vsub.f32 %v18638_v33, %v18639_v13  ;;  %v5961_v10 = vmul.f32 %v9460_v32, %v5601_v56  ;;  %v9462_v11 = vpop.eup %9461  ;;  %v18646_v13 = vld [vmem:[#allocation114_spill] sm:$0xff] }
 0xcd6   :  { %6800 = vperm.xlu0 %8844, %v5978_v62   ;;  %v5139_v50 = vpop.xlane.xlu0 %5138  ;;  %v18643_v62 = vsub.f32 %v18641_v21, %v18642_v2  ;;  %v18647_v32 = vsub.f32 %v18646_v13, %v18562_v31  ;;  %v18650_v31 = vld [vmem:[#allocation20_spill] sm:$0xff]  ;;  %v18652_v13 = vld [vmem:[#allocation262_spill] sm:$0xff] }
 0xcd7   :  { %v5729_v37 = vadd.f32 0.001, %v18640_v20  ;;  %v5605_v20 = vld [vmem:[%s16661_s6 + $0x330] sm:$0xff] }
 0xcd8   :  { %6705 = vperm.xlu1 %8843, %v5959_v60   ;;  %v5731_v16 = vadd.f32 0.001, %v18643_v62  ;;  %v5963_v60 = vmul.f32 %v9462_v11, %v5603_v6  ;;  %v18649_v11 = vld [vmem:[#allocation101_spill] sm:$0xff] }
 0xcd9   :  { %9467 = vrsqrt.f32 %v5729_v37  ;;  %v18648_v37 = vsub.f32 %v15873_v49, %v15865_v14  ;;  %v5607_v14 = vld [vmem:[%s16661_s6 + $0x340] sm:$0xff]  ;;  %v18654_v49 = vsub.f32 %v15933_v44, %v15927_v59 }
 0xcda   :  { %v9464_v36 = vpop.eup %9463  ;;  %9469 = vrsqrt.f32 %v5731_v16  ;;  %v18653_v16 = vsub.f32 %v18652_v13, %v18564_v54 }
 0xcdc   :  { %6715 = vperm.xlu1 %8843, %v5961_v10   ;;  %v5733_v10 = vadd.f32 0.001, %v18648_v37 }
 0xcdd   :  { %v9466_v62 = vpop.eup %9465 }
 0xcde   :  { %v6621_v48 = vpop.permute.xlu0 %6620  ;;  %9471 = vrsqrt.f32 %v5733_v10  ;;  %v5967_v37 = vmul.f32 %v9466_v62, %v5607_v14  ;;  %v18660_v62 = vsub.f32 %v16015_v1, %v16008_v41  ;;  %v5611_v41 = vld [vmem:[%s16661_s6 + $0x360] sm:$0xff]  ;;  %v5739_v1 = vadd.f32 0.001, %v5499_v61 }
 0xcdf   :  { %v6981_v33 = vmul.f32 %v6621_v48, %v18645_v52  ;;  %v6982_v56 = vmul.f32 %v6621_v48, %v18647_v32  ;;  %v5965_v52 = vmul.f32 %v9464_v36, %v5605_v20  ;;  %v18651_v48 = vsub.f32 %v18650_v31, %v18564_v54  ;;  %v5609_v31 = vld [vmem:[%s16661_s6 + $0x350] sm:$0xff] }
 0xce0   :  { %6725 = vperm.xlu1 %8843, %v5963_v60   ;;  %v5735_v36 = vadd.f32 0.001, %v18654_v49  ;;  %v5381_v54 = vmul.f32 %v16224_v23, %v16224_v23 }
 0xce1   :  { %v7941_v6 = vadd.f32 %v18649_v11, %v6981_v33  ;;  %v7942_v21 = vadd.f32 %v18649_v11, %v6982_v56  ;;  %v18655_v33 = vld [vmem:[#allocation104_spill] sm:$0xff] }
 0xce2   :  { %v6631_v2 = vpop.permute.xlu0 %6630  ;;  %9473 = vrsqrt.f32 %v5735_v36 }
 0xce3   :  { %8181 = vst [vmem:[#allocation2 + $0x4f0] sm:$0xff] %v7941_v6  ;;  %8182 = vst [vmem:[#allocation2 + $0x4f8] sm:$0xff] %v7942_v21  ;;  %v6985_v57 = vmul.f32 %v6631_v2, %v18651_v48  ;;  %v6986_v60 = vmul.f32 %v6631_v2, %v18653_v16  ;;  %v9468_v11 = vpop.eup %9467  ;;  %v5261_v6 = vmul.f32 0.0051020407, %v5139_v50  ;;  %v18656_v21 = vld [vmem:[#allocation263_spill] sm:$0xff]  ;;  %v18661_v48 = vld [vmem:[#allocation108_spill] sm:$0xff] }
 0xce4   :  { %6735 = vperm.xlu1 %8843, %v5965_v52   ;;  %v18657_v10 = vsub.f32 %v18656_v21, %v18565_v0  ;;  %v18658_v52 = vld [vmem:[#allocation269_spill] sm:$0xff]  ;;  %v5737_v50 = vadd.f32 0.001, %v18660_v62  ;;  %v9470_v14 = vpop.eup %9469 }
 0xce5   :  { %v7945_v32 = vadd.f32 %v18655_v33, %v6985_v57  ;;  %v7946_v56 = vadd.f32 %v18655_v33, %v6986_v60  ;;  %v18659_v59 = vsub.f32 %v18658_v52, %v18565_v0  ;;  %v5969_v60 = vmul.f32 %v9468_v11, %v5609_v31  ;;  %v18662_v0 = vld [vmem:[#allocation28_spill] sm:$0xff] }
 0xce6   :  { %v6641_v20 = vpop.permute.xlu0 %6640  ;;  %v5501_v49 = vsub.f32 %v5261_v6, %v5381_v54  ;;  %v18663_v33 = vsub.f32 %v18662_v0, %v18566_v15  ;;  %9475 = vrsqrt.f32 %v5737_v50  ;;  %v5971_v21 = vmul.f32 %v9470_v14, %v5611_v41  ;;  %v18674_v14 = vld [vmem:[#allocation154_spill] sm:$0xff] }
 0xce7   :  { %8185 = vst [vmem:[#allocation2 + $0x510] sm:$0xff] %v7945_v32  ;;  %8186 = vst [vmem:[#allocation2 + $0x518] sm:$0xff] %v7946_v56  ;;  %v6989_v2 = vmul.f32 %v6641_v20, %v18657_v10  ;;  %v6990_v44 = vmul.f32 %v6641_v20, %v18659_v59  ;;  %v18664_v56 = vld [vmem:[#allocation125_spill] sm:$0xff]  ;;  %9477 = vrsqrt.f32 %v5739_v1 }
 0xce8   :  { %6745 = vperm.xlu1 %8843, %v5967_v37   ;;  %v18665_v36 = vsub.f32 %v18664_v56, %v18566_v15  ;;  %v18666_v37 = vld [vmem:[#allocation112_spill] sm:$0xff]  ;;  %v9472_v10 = vpop.eup %9471  ;;  %v18667_v15 = vld [vmem:[#allocation159_spill] sm:$0xff] }
 0xce9   :  { %v7949_v57 = vadd.f32 %v18661_v48, %v6989_v2  ;;  %v7950_v13 = vadd.f32 %v18661_v48, %v6990_v44  ;;  %v5741_v2 = vadd.f32 0.001, %v5501_v49  ;;  %v18668_v52 = vsub.f32 %v18667_v15, %v18568_v18  ;;  %v18669_v44 = vld [vmem:[#allocation264_spill] sm:$0xff] }
 0xcea   :  { %v6651_v16 = vpop.permute.xlu0 %6650  ;;  %v18670_v31 = vsub.f32 %v18669_v44, %v18568_v18  ;;  %v18675_v49 = vsub.f32 %v18674_v14, %v18574_v38  ;;  %v18687_v14 = vld [vmem:[#allocation126_spill] sm:$0xff] }
 0xceb   :  { %8189 = vst [vmem:[#allocation2 + $0x530] sm:$0xff] %v7949_v57  ;;  %8190 = vst [vmem:[#allocation2 + $0x538] sm:$0xff] %v7950_v13  ;;  %v6993_v32 = vmul.f32 %v6651_v16, %v18663_v33  ;;  %v6994_v20 = vmul.f32 %v6651_v16, %v18665_v36  ;;  %v5973_v57 = vmul.f32 %v9472_v10, %v5613_v26  ;;  %9479 = vrsqrt.f32 %v5741_v2  ;;  %v18672_v16 = vld [vmem:[#allocation281_spill] sm:$0xff]  ;;  %v5617_v10 = vld [vmem:[%s16661_s6 + $0x390] sm:$0xff] }
 0xcec   :  { %6755 = vperm.xlu1 %8843, %v5969_v60   ;;  %v9474_v13 = vpop.eup %9473  ;;  %v18673_v18 = vsub.f32 %v18672_v16, %v18574_v38  ;;  %v5615_v33 = vld [vmem:[%s16661_s6 + $0x380] sm:$0xff]  ;;  %v18679_v38 = vld [vmem:[#allocation31_spill] sm:$0xff]  ;;  %v18681_v2 = vld [vmem:[#allocation122_spill] sm:$0xff]  ;;  %v5380_v16 = vmul.f32 %v16195_v17, %v16195_v17 }
 0xced   :  { %v7953_v11 = vadd.f32 %v18666_v37, %v6993_v32  ;;  %v7954_v54 = vadd.f32 %v18666_v37, %v6994_v20  ;;  %v18676_v32 = vld [vmem:[#allocation118_spill] sm:$0xff]  ;;  %v5975_v41 = vmul.f32 %v9474_v13, %v5615_v33  ;;  %v18683_v26 = vld [vmem:[#allocation36_spill] sm:$0xff]  ;;  %v5619_v13 = vld [vmem:[%s16661_s6 + $0x3a0] sm:$0xff] }
 0xcee   :  { %v6661_v6 = vpop.permute.xlu0 %6660  ;;  %v18677_v37 = vld [vmem:[#allocation166_spill] sm:$0xff]  ;;  %v5621_v33 = vld [vmem:[%s16661_s6 + $0x3b0] sm:$0xff] }
 0xcef   :  { %8193 = vst [vmem:[#allocation2 + $0x550] sm:$0xff] %v7953_v11  ;;  %8194 = vst [vmem:[#allocation2 + $0x558] sm:$0xff] %v7954_v54  ;;  %v6997_v59 = vmul.f32 %v6661_v6, %v18668_v52  ;;  %v6998_v62 = vmul.f32 %v6661_v6, %v18670_v31  ;;  %v18678_v11 = vsub.f32 %v18677_v37, %v18576_v53 }
 0xcf0   :  { %6765 = vperm.xlu1 %8843, %v5971_v21   ;;  %v9476_v1 = vpop.eup %9475  ;;  %v18680_v6 = vsub.f32 %v18679_v38, %v18576_v53  ;;  %v18685_v53 = vld [vmem:[#allocation285_spill] sm:$0xff] }
 0xcf1   :  { %v7957_v61 = vadd.f32 %v18671_v47, %v6997_v59  ;;  %v7958_v50 = vadd.f32 %v18671_v47, %v6998_v62  ;;  %v5977_v44 = vmul.f32 %v9476_v1, %v5617_v10  ;;  %v9478_v31 = vpop.eup %9477  ;;  %v18682_v62 = vld [vmem:[#allocation280_spill] sm:$0xff] }
 0xcf2   :  { %v6671_v48 = vpop.permute.xlu0 %6670  ;;  %v18684_v47 = vsub.f32 %v18682_v62, %v18683_v26 }
 0xcf3   :  { %8197 = vst [vmem:[#allocation2 + $0x570] sm:$0xff] %v7957_v61  ;;  %8198 = vst [vmem:[#allocation2 + $0x578] sm:$0xff] %v7958_v50  ;;  %v7001_v60 = vmul.f32 %v6671_v48, %v18673_v18  ;;  %v7002_v0 = vmul.f32 %v6671_v48, %v18675_v49  ;;  %v18686_v50 = vsub.f32 %v18685_v53, %v18683_v26  ;;  %v18695_v26 = vld [vmem:[#allocation208_spill] sm:$0xff] }
 0xcf4   :  { %6775 = vperm.xlu1 %8843, %v5973_v57   ;;  %v18697_v53 = vld [vmem:[#allocation192_spill] sm:$0xff] }
 0xcf5   :  { %v7961_v56 = vadd.f32 %v18676_v32, %v7001_v60  ;;  %v7962_v36 = vadd.f32 %v18676_v32, %v7002_v0  ;;  %v9480_v60 = vpop.eup %9479 }
 0xcf6   :  { %v6681_v20 = vpop.permute.xlu0 %6680 }
 0xcf7   :  { %8201 = vst [vmem:[#allocation2 + $0x590] sm:$0xff] %v7961_v56  ;;  %8202 = vst [vmem:[#allocation2 + $0x598] sm:$0xff] %v7962_v36  ;;  %v7005_v54 = vmul.f32 %v6681_v20, %v18678_v11  ;;  %v7006_v21 = vmul.f32 %v6681_v20, %v18680_v6  ;;  %v5979_v36 = vmul.f32 %v9478_v31, %v5619_v13  ;;  %v18688_v20 = vld [vmem:[#allocation163_spill] sm:$0xff]  ;;  %v18691_v11 = vld [vmem:[#allocation48_spill] sm:$0xff] }
 0xcf8   :  { %6785 = vperm.xlu1 %8843, %v5975_v41   ;;  %v18689_v41 = vld [vmem:[#allocation53_spill] sm:$0xff]  ;;  %v18694_v31 = vld [vmem:[#allocation314_spill] sm:$0xff] }
 0xcf9   :  { %v7965_v15 = vadd.f32 %v18681_v2, %v7005_v54  ;;  %v7966_v52 = vadd.f32 %v18681_v2, %v7006_v21  ;;  %v18690_v1 = vsub.f32 %v18688_v20, %v18689_v41  ;;  %v18692_v54 = vsub.f32 %v18691_v11, %v18689_v41 }
 0xcfa   :  { %v6691_v59 = vpop.permute.xlu0 %6690  ;;  %v5981_v2 = vmul.f32 %v9480_v60, %v5621_v33  ;;  %v18701_v60 = vld [vmem:[#allocation11_spill] sm:$0xff]  ;;  %v18704_v33 = vld [vmem:[#allocation14_spill] sm:$0xff] }
 0xcfb   :  { %8205 = vst [vmem:[#allocation2 + $0x5b0] sm:$0xff] %v7965_v15  ;;  %8206 = vst [vmem:[#allocation2 + $0x5b8] sm:$0xff] %v7966_v52  ;;  %v7009_v61 = vmul.f32 %v6691_v59, %v18684_v47  ;;  %v7010_v48 = vmul.f32 %v6691_v59, %v18686_v50  ;;  %v5136_v57 = vpop.xlane.xlu1 %5135  ;;  %v18693_v15 = vld [vmem:[#allocation129_spill] sm:$0xff] }
 0xcfc   :  { %v5260_v18 = vmul.f32 0.0051020407, %v5136_v57  ;;  %6795 = vperm.xlu1 %8843, %v5977_v44   ;;  %v18699_v57 = vld [vmem:[#allocation282_spill] sm:$0xff] }
 0xcfd   :  { %v7969_v49 = vadd.f32 %v18687_v14, %v7009_v61  ;;  %v7970_v0 = vadd.f32 %v18687_v14, %v7010_v48  ;;  %v18696_v61 = vld [vmem:[#allocation175_spill] sm:$0xff]  ;;  %v18700_v13 = vsub.f32 %v18699_v57, %v18697_v53  ;;  %v18702_v14 = vld [vmem:[#allocation161_spill] sm:$0xff] }
 0xcfe   :  { %v5500_v32 = vsub.f32 %v5260_v18, %v5380_v16  ;;  %v6701_v56 = vpop.permute.xlu0 %6700  ;;  %v18698_v50 = vsub.f32 %v18696_v61, %v18697_v53  ;;  %v18713_v57 = vld [vmem:[#allocation185_spill] sm:$0xff] }
 0xcff   :  { %8209 = vst [vmem:[#allocation2 + $0x5d0] sm:$0xff] %v7969_v49  ;;  %8210 = vst [vmem:[#allocation2 + $0x5d8] sm:$0xff] %v7970_v0  ;;  %v7013_v37 = vmul.f32 %v6701_v56, %v18690_v1  ;;  %v7014_v38 = vmul.f32 %v6701_v56, %v18692_v54  ;;  %v4422_v6 = vpop.xlane.xlu1 %4421  ;;  %v18703_v49 = vsub.f32 %v18701_v60, %v18702_v14  ;;  %v7181_v1 = vld [vmem:[%s16662_s7 + $0x3b0] sm:$0xff] }
 0xd00   :  { %v5740_v21 = vadd.f32 0.001, %v5500_v32  ;;  %v16361_v10 = vmul.f32 0.0051020407, %v4422_v6  ;;  %6805 = vperm.xlu1 %8843, %v5979_v36   ;;  %v18705_v32 = vsub.f32 %v18704_v33, %v18702_v14  ;;  %v18706_v36 = vld [vmem:[#allocation131_spill] sm:$0xff] }
 0xd01   :  { %v7973_v52 = vadd.f32 %v18693_v15, %v7013_v37  ;;  %v7974_v59 = vadd.f32 %v18693_v15, %v7014_v38  ;;  %v18707_v37 = vld [vmem:[#allocation103_spill] sm:$0xff] }
 0xd02   :  { %9481 = vrsqrt.f32 %v5740_v21  ;;  %v6711_v44 = vpop.permute.xlu0 %6710  ;;  %v6221_v62 = vsub.f32 %v18694_v31, %v16361_v10  ;;  %v6222_v47 = vsub.f32 %v18695_v26, %v16361_v10  ;;  %v18708_v6 = vld [vmem:[#allocation171_spill] sm:$0xff] }
 0xd03   :  { %8213 = vst [vmem:[#allocation2 + $0x5f0] sm:$0xff] %v7973_v52  ;;  %8214 = vst [vmem:[#allocation2 + $0x5f8] sm:$0xff] %v7974_v59  ;;  %v7017_v48 = vmul.f32 %v6711_v44, %v18698_v50  ;;  %v7018_v16 = vmul.f32 %v6711_v44, %v18700_v13  ;;  %v6616_v18 = vpop.permute.xlu1 %6615  ;;  %v18709_v21 = vsub.f32 %v18708_v6, %v15403_v4  ;;  %v18712_v44 = vld [vmem:[#allocation133_spill] sm:$0xff] }
 0xd04   :  { %v6979_v0 = vmul.f32 %v6616_v18, %v18703_v49  ;;  %v6980_v56 = vmul.f32 %v6616_v18, %v18705_v32  ;;  %6815 = vperm.xlu1 %8843, %v5981_v2   ;;  %v18710_v2 = vld [vmem:[#allocation50_spill] sm:$0xff]  ;;  %v18714_v13 = vsub.f32 %v18713_v57, %v15486_v39  ;;  %v18717_v49 = vld [vmem:[#allocation135_spill] sm:$0xff] }
 0xd05   :  { %v7977_v20 = vadd.f32 %v18706_v36, %v7017_v48  ;;  %v7978_v41 = vadd.f32 %v18706_v36, %v7018_v16  ;;  %v18711_v52 = vsub.f32 %v18710_v2, %v15403_v4  ;;  %v5620_v48 = vld [vmem:[%s16661_s6 + $0x3a8] sm:$0xff]  ;;  %v18715_v4 = vld [vmem:[#allocation293_spill] sm:$0xff]  ;;  %v18718_v36 = vld [vmem:[#allocation179_spill] sm:$0xff] }
 0xd06   :  { %v7939_v11 = vadd.f32 %v18707_v37, %v6979_v0  ;;  %v7940_v54 = vadd.f32 %v18707_v37, %v6980_v56  ;;  %v6721_v38 = vpop.permute.xlu0 %6720  ;;  %v18716_v18 = vsub.f32 %v18715_v4, %v15486_v39  ;;  %v18721_v37 = vld [vmem:[#allocation52_spill] sm:$0xff]  ;;  %v18723_v39 = vld [vmem:[#allocation137_spill] sm:$0xff]  ;;  %v18725_v2 = vld [vmem:[#allocation310_spill] sm:$0xff] }
 0xd07   :  { %8217 = vst [vmem:[#allocation2 + $0x610] sm:$0xff] %v7977_v20  ;;  %8218 = vst [vmem:[#allocation2 + $0x618] sm:$0xff] %v7978_v41  ;;  %v7021_v15 = vmul.f32 %v6721_v38, %v18709_v21  ;;  %v7022_v59 = vmul.f32 %v6721_v38, %v18711_v52  ;;  %v18719_v20 = vld [vmem:[#allocation200_spill] sm:$0xff]  ;;  %v18731_v4 = vld [vmem:[#allocation61_spill] sm:$0xff] }
 0xd08   :  { %8179 = vst [vmem:[#allocation2 + $0x4e0] sm:$0xff] %v7939_v11  ;;  %8180 = vst [vmem:[#allocation2 + $0x4e8] sm:$0xff] %v7940_v54  ;;  %7775 = vperm.xlu1 %8843, %v7181_v1   ;;  %v18720_v41 = vsub.f32 %v18718_v36, %v18719_v20  ;;  %v18722_v11 = vsub.f32 %v18721_v37, %v18719_v20  ;;  %v18736_v20 = vld [vmem:[#allocation56_spill] sm:$0xff] }
 0xd09   :  { %v7981_v61 = vadd.f32 %v18712_v44, %v7021_v15  ;;  %v7982_v53 = vadd.f32 %v18712_v44, %v7022_v59  ;;  %v18724_v15 = vld [vmem:[#allocation297_spill] sm:$0xff]  ;;  %v18727_v44 = vld [vmem:[#allocation186_spill] sm:$0xff] }
 0xd0a   :  { %v6731_v50 = vpop.permute.xlu0 %6730  ;;  %v18726_v52 = vsub.f32 %v18724_v15, %v18725_v2 }
 0xd0b   :  { %8221 = vst [vmem:[#allocation2 + $0x630] sm:$0xff] %v7981_v61  ;;  %8222 = vst [vmem:[#allocation2 + $0x638] sm:$0xff] %v7982_v53  ;;  %v7025_v16 = vmul.f32 %v6731_v50, %v18714_v13  ;;  %v7026_v60 = vmul.f32 %v6731_v50, %v18716_v18  ;;  %v18728_v61 = vsub.f32 %v18727_v44, %v18725_v2  ;;  %v18729_v50 = vld [vmem:[#allocation139_spill] sm:$0xff]  ;;  %v18742_v2 = vld [vmem:[#allocation305_spill] sm:$0xff] }
 0xd0c   :  { %v9482_v14 = vpop.eup %9481  ;;  %v18744_v44 = vld [vmem:[#allocation194_spill] sm:$0xff] }
 0xd0d   :  { %v7985_v0 = vadd.f32 %v18717_v49, %v7025_v16  ;;  %v7986_v33 = vadd.f32 %v18717_v49, %v7026_v60  ;;  %v5980_v32 = vmul.f32 %v9482_v14, %v5620_v48  ;;  %v18730_v16 = vld [vmem:[#allocation193_spill] sm:$0xff] }
 0xd0e   :  { %v6741_v56 = vpop.permute.xlu0 %6740  ;;  %v18732_v18 = vsub.f32 %v18730_v16, %v18731_v4  ;;  %v18733_v14 = vld [vmem:[#allocation301_spill] sm:$0xff] }
 0xd0f   :  { %8225 = vst [vmem:[#allocation2 + $0x650] sm:$0xff] %v7985_v0  ;;  %8226 = vst [vmem:[#allocation2 + $0x658] sm:$0xff] %v7986_v33  ;;  %v7029_v1 = vmul.f32 %v6741_v56, %v18720_v41  ;;  %v7030_v54 = vmul.f32 %v6741_v56, %v18722_v11  ;;  %6810 = vperm.xlu0 %8844, %v5980_v32   ;;  %v18734_v49 = vsub.f32 %v18733_v14, %v18731_v4  ;;  %v18735_v33 = vld [vmem:[#allocation141_spill] sm:$0xff]  ;;  %v18737_v41 = vld [vmem:[#allocation62_spill] sm:$0xff] }
 0xd10   :  { %v18739_v11 = vld [vmem:[#allocation298_spill] sm:$0xff]  ;;  %v18747_v16 = vld [vmem:[#allocation201_spill] sm:$0xff] }
 0xd11   :  { %v7989_v38 = vadd.f32 %v18723_v39, %v7029_v1  ;;  %v7990_v6 = vadd.f32 %v18723_v39, %v7030_v54  ;;  %v18738_v1 = vsub.f32 %v18736_v20, %v18737_v41  ;;  %v18740_v54 = vsub.f32 %v18739_v11, %v18737_v41 }
 0xd12   :  { %v6751_v21 = vpop.permute.xlu0 %6750  ;;  %v18748_v4 = vsub.f32 %v18747_v16, %v15970_v46  ;;  %v18762_v16 = vld [vmem:[#allocation271_spill] sm:$0xff] }
 0xd13   :  { %8229 = vst [vmem:[#allocation2 + $0x670] sm:$0xff] %v7989_v38  ;;  %8230 = vst [vmem:[#allocation2 + $0x678] sm:$0xff] %v7990_v6  ;;  %v7033_v59 = vmul.f32 %v6751_v21, %v18726_v52  ;;  %v7034_v53 = vmul.f32 %v6751_v21, %v18728_v61  ;;  %v18741_v38 = vld [vmem:[#allocation143_spill] sm:$0xff]  ;;  %v18743_v52 = vsub.f32 %v18742_v2, %v15906_v28 }
 0xd14   :  { %v18745_v61 = vsub.f32 %v18744_v44, %v15906_v28 }
 0xd15   :  { %v7993_v48 = vadd.f32 %v18729_v50, %v7033_v59  ;;  %v7994_v57 = vadd.f32 %v18729_v50, %v7034_v53  ;;  %v18746_v50 = vld [vmem:[#allocation145_spill] sm:$0xff] }
 0xd16   :  { %v6761_v13 = vpop.permute.xlu0 %6760 }
 0xd17   :  { %8233 = vst [vmem:[#allocation2 + $0x690] sm:$0xff] %v7993_v48  ;;  %8234 = vst [vmem:[#allocation2 + $0x698] sm:$0xff] %v7994_v57  ;;  %v7037_v60 = vmul.f32 %v6761_v13, %v18732_v18  ;;  %v7038_v0 = vmul.f32 %v6761_v13, %v18734_v49 }
 0xd19   :  { %v7997_v32 = vadd.f32 %v18735_v33, %v7037_v60  ;;  %v7998_v56 = vadd.f32 %v18735_v33, %v7038_v0  ;;  %v18749_v60 = vld [vmem:[#allocation311_spill] sm:$0xff] }
 0xd1a   :  { %v6771_v36 = vpop.permute.xlu0 %6770  ;;  %v18750_v14 = vsub.f32 %v18749_v60, %v15970_v46  ;;  %v18751_v0 = vld [vmem:[#allocation147_spill] sm:$0xff]  ;;  %v18754_v46 = vld [vmem:[#allocation17_spill] sm:$0xff] }
 0xd1b   :  { %8237 = vst [vmem:[#allocation2 + $0x6b0] sm:$0xff] %v7997_v32  ;;  %8238 = vst [vmem:[#allocation2 + $0x6b8] sm:$0xff] %v7998_v56  ;;  %v7041_v37 = vmul.f32 %v6771_v36, %v18738_v1  ;;  %v7042_v39 = vmul.f32 %v6771_v36, %v18740_v54  ;;  %v5382_v56 = vmul.f32 %v16361_v10, %v16361_v10  ;;  %v18764_v60 = vld [vmem:[#allocation267_spill] sm:$0xff] }
 0xd1d   :  { %v8001_v6 = vadd.f32 %v18741_v38, %v7041_v37  ;;  %v8002_v21 = vadd.f32 %v18741_v38, %v7042_v39  ;;  %v18752_v37 = vld [vmem:[#allocation42_spill] sm:$0xff]  ;;  %v18755_v39 = vsub.f32 %v18754_v46, %v18599_v42 }
 0xd1e   :  { %v6781_v15 = vpop.permute.xlu0 %6780  ;;  %v18753_v11 = vsub.f32 %v18752_v37, %v18599_v42 }
 0xd1f   :  { %8241 = vst [vmem:[#allocation2 + $0x6d0] sm:$0xff] %v8001_v6  ;;  %8242 = vst [vmem:[#allocation2 + $0x6d8] sm:$0xff] %v8002_v21  ;;  %v7045_v59 = vmul.f32 %v6781_v15, %v18743_v52  ;;  %v7046_v53 = vmul.f32 %v6781_v15, %v18745_v61  ;;  %v18756_v6 = vld [vmem:[#allocation107_spill] sm:$0xff] }
 0xd20   :  { %v18757_v52 = vld [vmem:[#allocation19_spill] sm:$0xff] }
 0xd21   :  { %v8005_v48 = vadd.f32 %v18746_v50, %v7045_v59  ;;  %v8006_v57 = vadd.f32 %v18746_v50, %v7046_v53  ;;  %v18758_v59 = vsub.f32 %v18757_v52, %v18601_v63  ;;  %v18759_v61 = vld [vmem:[#allocation259_spill] sm:$0xff] }
 0xd22   :  { %v6791_v13 = vpop.permute.xlu0 %6790  ;;  %v18760_v53 = vsub.f32 %v18759_v61, %v18601_v63 }
 0xd23   :  { %8245 = vst [vmem:[#allocation2 + $0x6f0] sm:$0xff] %v8005_v48  ;;  %8246 = vst [vmem:[#allocation2 + $0x6f8] sm:$0xff] %v8006_v57  ;;  %v7049_v18 = vmul.f32 %v6791_v13, %v18748_v4  ;;  %v7050_v49 = vmul.f32 %v6791_v13, %v18750_v14  ;;  %v18761_v48 = vld [vmem:[#allocation110_spill] sm:$0xff]  ;;  %v18763_v4 = vsub.f32 %v18762_v16, %v18603_v29 }
 0xd24   :  { %v18765_v14 = vsub.f32 %v18764_v60, %v18603_v29 }
 0xd25   :  { %v8009_v33 = vadd.f32 %v18751_v0, %v7049_v18  ;;  %v8010_v28 = vadd.f32 %v18751_v0, %v7050_v49  ;;  %v18766_v0 = vld [vmem:[#allocation113_spill] sm:$0xff] }
 0xd27   :  { %8249 = vst [vmem:[#allocation2 + $0x710] sm:$0xff] %v8009_v33  ;;  %8250 = vst [vmem:[#allocation2 + $0x718] sm:$0xff] %v8010_v28  ;;  %v5622_v28 = vld [vmem:[%s16661_s6 + $0x3b8] sm:$0xff] }
 0xd34   :  { %v5142_v32 = vpop.xlane.xlu1 %5141 }
 0xd35   :  { %v5262_v36 = vmul.f32 0.0051020407, %v5142_v32 }
 0xd37   :  { %v5502_v20 = vsub.f32 %v5262_v36, %v5382_v56  ;;  %v18767_v36 = vld [vmem:[#allocation158_spill] sm:$0xff] }
 0xd38   :  { %v6626_v41 = vpop.permute.xlu1 %6625 }
 0xd39   :  { %v5742_v1 = vadd.f32 0.001, %v5502_v20  ;;  %v6983_v54 = vmul.f32 %v6626_v41, %v18753_v11  ;;  %v6984_v38 = vmul.f32 %v6626_v41, %v18755_v39  ;;  %v18768_v20 = vsub.f32 %v18767_v36, %v18610_v7 }
 0xd3b   :  { %9483 = vrsqrt.f32 %v5742_v1  ;;  %v7943_v21 = vadd.f32 %v18756_v6, %v6983_v54  ;;  %v7944_v15 = vadd.f32 %v18756_v6, %v6984_v38  ;;  %v18769_v1 = vld [vmem:[#allocation160_spill] sm:$0xff]  ;;  %v18771_v54 = vld [vmem:[#allocation117_spill] sm:$0xff]  ;;  %v18772_v6 = vld [vmem:[#allocation270_spill] sm:$0xff] }
 0xd3c   :  { %v6636_v2 = vpop.permute.xlu1 %6635  ;;  %v18770_v29 = vsub.f32 %v18769_v1, %v18610_v7  ;;  %v7182_v7 = vld [vmem:[%s16662_s7 + $0x3b8] sm:$0xff]  ;;  %s9510_s7 = smov [#allocation2]  }
 0xd3d   :  { %8183 = vst [vmem:[#allocation2 + $0x500] sm:$0xff] %v7943_v21  ;;  %8184 = vst [vmem:[#allocation2 + $0x508] sm:$0xff] %v7944_v15  ;;  %v6987_v44 = vmul.f32 %v6636_v2, %v18758_v59  ;;  %v6988_v50 = vmul.f32 %v6636_v2, %v18760_v53  ;;  %v18773_v21 = vsub.f32 %v18772_v6, %v18612_v24  ;;  %v18774_v2 = vld [vmem:[#allocation266_spill] sm:$0xff]  ;;  %s8268_s23 = sshll.u32 %s9510_s7, 4  ;;  %s8269_s23 = int_to_ptr.vmem [resolvable:$true] %s8268_s23 }
 0xd3e   :  { %v18775_v52 = vsub.f32 %v18774_v2, %v18612_v24  ;;  %s9485_s5 = scalar_lea.vmem %s8269_s23, 30720  ;;  %p9490_p1 = scmp.lt.s32.totalorder %s8269_s23, %s8269_s23 }
 0xd3f   :  { %v7947_v57 = vadd.f32 %v18761_v48, %v6987_v44  ;;  %v7948_v42 = vadd.f32 %v18761_v48, %v6988_v50  ;;  %v18776_v44 = vld [vmem:[#allocation121_spill] sm:$0xff]  ;;  %v18777_v48 = vld [vmem:[#allocation30_spill] sm:$0xff]  ;;  %p9486_p0 = scmp.ne.s32.totalorder %s8269_s23, %s9485_s5  ;;  %p9491_p2 = scmp.lt.s32.totalorder %s9485_s5, %s9485_s5 }
 0xd40   :  { %v6646_v13 = vpop.permute.xlu1 %6645 }
 0xd41   :  { %8187 = vst [vmem:[#allocation2 + $0x520] sm:$0xff] %v7947_v57  ;;  %8188 = vst [vmem:[#allocation2 + $0x528] sm:$0xff] %v7948_v42  ;;  %v6991_v18 = vmul.f32 %v6646_v13, %v18763_v4  ;;  %v6992_v49 = vmul.f32 %v6646_v13, %v18765_v14  ;;  %v18778_v57 = vsub.f32 %v18777_v48, %v18614_v34  ;;  %v18779_v13 = vld [vmem:[#allocation155_spill] sm:$0xff]  ;;  %v18781_v4 = vld [vmem:[#allocation124_spill] sm:$0xff]  ;;  %p9492_p3 = por %p9491_p2, %p9490_p1 }
 0xd42   :  { %v18780_v24 = vsub.f32 %v18779_v13, %v18614_v34 }
 0xd43   :  { %v7951_v33 = vadd.f32 %v18766_v0, %v6991_v18  ;;  %v7952_v63 = vadd.f32 %v18766_v0, %v6992_v49  ;;  %v18782_v49 = vld [vmem:[#allocation167_spill] sm:$0xff]  ;;  %p9493_p4 = pnand %p9492_p3, %p9486_p0 }
 0xd44   :  { %v6656_v32 = vpop.permute.xlu1 %6655  ;;  %v18783_v0 = vsub.f32 %v18782_v49, %v18616_v25 }
 0xd45   :  { %v9484_v56 = vpop.eup %9483  ;;  %8191 = vst [vmem:[#allocation2 + $0x540] sm:$0xff] %v7951_v33  ;;  %8192 = vst [vmem:[#allocation2 + $0x548] sm:$0xff] %v7952_v63  ;;  %v6995_v41 = vmul.f32 %v6656_v32, %v18768_v20  ;;  %v6996_v37 = vmul.f32 %v6656_v32, %v18770_v29  ;;  %v18784_v63 = vld [vmem:[#allocation169_spill] sm:$0xff] }
 0xd46   :  { %v5982_v11 = vmul.f32 %v9484_v56, %v5622_v28  ;;  %v18785_v28 = vsub.f32 %v18784_v63, %v18616_v25  ;;  %v18786_v56 = vld [vmem:[#allocation127_spill] sm:$0xff] }
 0xd47   :  { %v7955_v46 = vadd.f32 %v18771_v54, %v6995_v41  ;;  %v7956_v39 = vadd.f32 %v18771_v54, %v6996_v37  ;;  %v18787_v41 = vld [vmem:[#allocation162_spill] sm:$0xff]  ;;  %v18789_v37 = vld [vmem:[#allocation164_spill] sm:$0xff] }
 0xd48   :  { %6820 = vperm.xlu0 %8844, %v5982_v11   ;;  %v6666_v38 = vpop.permute.xlu1 %6665  ;;  %v18788_v1 = vsub.f32 %v18787_v41, %v18618_v9  ;;  %v18790_v11 = vsub.f32 %v18789_v37, %v18618_v9  ;;  %v18793_v9 = vld [vmem:[#allocation176_spill] sm:$0xff] }
 0xd49   :  { %8195 = vst [vmem:[#allocation2 + $0x560] sm:$0xff] %v7955_v46  ;;  %8196 = vst [vmem:[#allocation2 + $0x568] sm:$0xff] %v7956_v39  ;;  %v6999_v15 = vmul.f32 %v6666_v38, %v18773_v21  ;;  %v7000_v59 = vmul.f32 %v6666_v38, %v18775_v52  ;;  %v18791_v38 = vld [vmem:[#allocation130_spill] sm:$0xff] }
 0xd4b   :  { %v7959_v61 = vadd.f32 %v18776_v44, %v6999_v15  ;;  %v7960_v53 = vadd.f32 %v18776_v44, %v7000_v59  ;;  %v18792_v15 = vld [vmem:[#allocation149_spill] sm:$0xff] }
 0xd4c   :  { %7780 = vperm.xlu0 %8844, %v7182_v7   ;;  %v6676_v50 = vpop.permute.xlu1 %6675  ;;  %v18794_v7 = vsub.f32 %v18793_v9, %v18620_v3 }
 0xd4d   :  { %8199 = vst [vmem:[#allocation2 + $0x580] sm:$0xff] %v7959_v61  ;;  %8200 = vst [vmem:[#allocation2 + $0x588] sm:$0xff] %v7960_v53  ;;  %v7003_v42 = vmul.f32 %v6676_v50, %v18778_v57  ;;  %v7004_v16 = vmul.f32 %v6676_v50, %v18780_v24  ;;  %v18798_v50 = vld [vmem:[#allocation289_spill] sm:$0xff] }
 0xd4e   :  { %v18799_v48 = vsub.f32 %v18798_v50, %v18622_v19 }
 0xd4f   :  { %v7963_v18 = vadd.f32 %v18781_v4, %v7003_v42  ;;  %v7964_v60 = vadd.f32 %v18781_v4, %v7004_v16  ;;  %v18800_v42 = vld [vmem:[#allocation170_spill] sm:$0xff] }
 0xd50   :  { %v6686_v14 = vpop.permute.xlu1 %6685  ;;  %v18801_v13 = vsub.f32 %v18800_v42, %v18622_v19  ;;  %v18802_v16 = vld [vmem:[#allocation134_spill] sm:$0xff] }
 0xd51   :  { %8203 = vst [vmem:[#allocation2 + $0x5a0] sm:$0xff] %v7963_v18  ;;  %8204 = vst [vmem:[#allocation2 + $0x5a8] sm:$0xff] %v7964_v60  ;;  %v7007_v33 = vmul.f32 %v6686_v14, %v18783_v0  ;;  %v7008_v32 = vmul.f32 %v6686_v14, %v18785_v28  ;;  %v18803_v60 = vld [vmem:[#allocation182_spill] sm:$0xff]  ;;  %v18805_v0 = vld [vmem:[#allocation184_spill] sm:$0xff] }
 0xd52   :  { %v18804_v14 = vsub.f32 %v18803_v60, %v18624_v58  ;;  %v18807_v28 = vld [vmem:[#allocation136_spill] sm:$0xff]  ;;  %v18826_v42 = vld [vmem:[#allocation190_spill] sm:$0xff] }
 0xd53   :  { %v7967_v36 = vadd.f32 %v18786_v56, %v7007_v33  ;;  %v7968_v34 = vadd.f32 %v18786_v56, %v7008_v32  ;;  %v18806_v33 = vsub.f32 %v18805_v0, %v18624_v58  ;;  %v18831_v60 = vld [vmem:[#allocation144_spill] sm:$0xff] }
 0xd54   :  { %v6696_v20 = vpop.permute.xlu1 %6695 }
 0xd55   :  { %8207 = vst [vmem:[#allocation2 + $0x5c0] sm:$0xff] %v7967_v36  ;;  %8208 = vst [vmem:[#allocation2 + $0x5c8] sm:$0xff] %v7968_v34  ;;  %v7011_v29 = vmul.f32 %v6696_v20, %v18788_v1  ;;  %v7012_v54 = vmul.f32 %v6696_v20, %v18790_v11  ;;  %v6801_v46 = vpop.permute.xlu0 %6800  ;;  %v18808_v36 = vld [vmem:[#allocation178_spill] sm:$0xff]  ;;  %v18809_v34 = vld [vmem:[#allocation303_spill] sm:$0xff] }
 0xd56   :  { %v7053_v25 = vmul.f32 %v6801_v46, %v6213_v8  ;;  %v7054_v39 = vmul.f32 %v6801_v46, %v6214_v27  ;;  %v18795_v8 = vld [vmem:[#allocation33_spill] sm:$0xff]  ;;  %v18810_v20 = vsub.f32 %v18808_v36, %v18809_v34  ;;  %v18811_v1 = vld [vmem:[#allocation180_spill] sm:$0xff]  ;;  %v18813_v11 = vld [vmem:[#allocation138_spill] sm:$0xff] }
 0xd57   :  { %v7971_v6 = vadd.f32 %v18791_v38, %v7011_v29  ;;  %v7972_v21 = vadd.f32 %v18791_v38, %v7012_v54  ;;  %v18796_v44 = vsub.f32 %v18795_v8, %v18620_v3  ;;  %v18812_v29 = vsub.f32 %v18811_v1, %v18809_v34  ;;  %v18821_v8 = vld [vmem:[#allocation306_spill] sm:$0xff] }
 0xd58   :  { %v8013_v2 = vadd.f32 %v18792_v15, %v7053_v25  ;;  %v8014_v52 = vadd.f32 %v18792_v15, %v7054_v39  ;;  %v6706_v59 = vpop.permute.xlu1 %6705  ;;  %v18814_v25 = vld [vmem:[#allocation290_spill] sm:$0xff]  ;;  %v18815_v39 = vld [vmem:[#allocation59_spill] sm:$0xff] }
 0xd59   :  { %8211 = vst [vmem:[#allocation2 + $0x5e0] sm:$0xff] %v7971_v6  ;;  %8212 = vst [vmem:[#allocation2 + $0x5e8] sm:$0xff] %v7972_v21  ;;  %v7015_v12 = vmul.f32 %v6706_v59, %v18794_v7  ;;  %v7016_v45 = vmul.f32 %v6706_v59, %v18796_v44  ;;  %v18816_v38 = vsub.f32 %v18814_v25, %v18815_v39  ;;  %v18817_v21 = vld [vmem:[#allocation188_spill] sm:$0xff]  ;;  %v18837_v34 = vld [vmem:[#allocation146_spill] sm:$0xff] }
 0xd5a   :  { %8253 = vst [vmem:[#allocation2 + $0x730] sm:$0xff] %v8013_v2  ;;  %8254 = vst [vmem:[#allocation2 + $0x738] sm:$0xff] %v8014_v52  ;;  %v18818_v15 = vsub.f32 %v18817_v21, %v18815_v39  ;;  %v18819_v52 = vld [vmem:[#allocation140_spill] sm:$0xff] }
 0xd5b   :  { %v7975_v27 = vadd.f32 %v18797_v22, %v7015_v12  ;;  %v7976_v61 = vadd.f32 %v18797_v22, %v7016_v45  ;;  %v18820_v12 = vld [vmem:[#allocation54_spill] sm:$0xff]  ;;  %v18823_v22 = vld [vmem:[#allocation296_spill] sm:$0xff] }
 0xd5c   :  { %v6716_v53 = vpop.permute.xlu1 %6715  ;;  %v18822_v44 = vsub.f32 %v18820_v12, %v18821_v8  ;;  %v18843_v39 = vld [vmem:[#allocation148_spill] sm:$0xff] }
 0xd5d   :  { %8215 = vst [vmem:[#allocation2 + $0x600] sm:$0xff] %v7975_v27  ;;  %8216 = vst [vmem:[#allocation2 + $0x608] sm:$0xff] %v7976_v61  ;;  %v7019_v57 = vmul.f32 %v6716_v53, %v18799_v48  ;;  %v7020_v24 = vmul.f32 %v6716_v53, %v18801_v13  ;;  %v18824_v27 = vsub.f32 %v18823_v22, %v18821_v8  ;;  %v18825_v53 = vld [vmem:[#allocation142_spill] sm:$0xff]  ;;  %v18827_v13 = vld [vmem:[#allocation315_spill] sm:$0xff] }
 0xd5e   :  { %v18849_v8 = vld [vmem:[#allocation150_spill] sm:$0xff] }
 0xd5f   :  { %v7979_v3 = vadd.f32 %v18802_v16, %v7019_v57  ;;  %v7980_v4 = vadd.f32 %v18802_v16, %v7020_v24  ;;  %v18828_v24 = vsub.f32 %v18826_v42, %v18827_v13 }
 0xd60   :  { %v6726_v18 = vpop.permute.xlu1 %6725 }
 0xd61   :  { %8219 = vst [vmem:[#allocation2 + $0x620] sm:$0xff] %v7979_v3  ;;  %8220 = vst [vmem:[#allocation2 + $0x628] sm:$0xff] %v7980_v4  ;;  %v7023_v49 = vmul.f32 %v6726_v18, %v18804_v14  ;;  %v7024_v63 = vmul.f32 %v6726_v18, %v18806_v33  ;;  %v18829_v3 = vld [vmem:[#allocation191_spill] sm:$0xff]  ;;  %v18832_v33 = vld [vmem:[#allocation197_spill] sm:$0xff] }
 0xd62   :  { %v18830_v4 = vsub.f32 %v18829_v3, %v18827_v13  ;;  %v18854_v3 = vsub.f32 %v15805_v35, %v16224_v23 }
 0xd63   :  { %v7983_v32 = vadd.f32 %v18807_v28, %v7023_v49  ;;  %v7984_v19 = vadd.f32 %v18807_v28, %v7024_v63  ;;  %v18833_v63 = vld [vmem:[#allocation312_spill] sm:$0xff] }
 0xd64   :  { %v6736_v56 = vpop.permute.xlu1 %6735  ;;  %v18834_v28 = vsub.f32 %v18832_v33, %v18833_v63 }
 0xd65   :  { %8223 = vst [vmem:[#allocation2 + $0x640] sm:$0xff] %v7983_v32  ;;  %8224 = vst [vmem:[#allocation2 + $0x648] sm:$0xff] %v7984_v19  ;;  %v7027_v41 = vmul.f32 %v6736_v56, %v18810_v20  ;;  %v7028_v37 = vmul.f32 %v6736_v56, %v18812_v29  ;;  %v18835_v19 = vld [vmem:[#allocation57_spill] sm:$0xff]  ;;  %v18838_v29 = vld [vmem:[#allocation304_spill] sm:$0xff] }
 0xd66   :  { %v18836_v56 = vsub.f32 %v18835_v19, %v18833_v63 }
 0xd67   :  { %v7987_v54 = vadd.f32 %v18813_v11, %v7027_v41  ;;  %v7988_v58 = vadd.f32 %v18813_v11, %v7028_v37  ;;  %v18839_v37 = vld [vmem:[#allocation209_spill] sm:$0xff] }
 0xd68   :  { %v6746_v46 = vpop.permute.xlu1 %6745  ;;  %v18840_v11 = vsub.f32 %v18838_v29, %v18839_v37 }
 0xd69   :  { %8227 = vst [vmem:[#allocation2 + $0x660] sm:$0xff] %v7987_v54  ;;  %8228 = vst [vmem:[#allocation2 + $0x668] sm:$0xff] %v7988_v58  ;;  %v7031_v6 = vmul.f32 %v6746_v46, %v18816_v38  ;;  %v7032_v2 = vmul.f32 %v6746_v46, %v18818_v15  ;;  %v18841_v58 = vld [vmem:[#allocation302_spill] sm:$0xff]  ;;  %v18844_v15 = vld [vmem:[#allocation199_spill] sm:$0xff] }
 0xd6a   :  { %v18842_v46 = vsub.f32 %v18841_v58, %v18839_v37 }
 0xd6b   :  { %v7991_v59 = vadd.f32 %v18819_v52, %v7031_v6  ;;  %v7992_v9 = vadd.f32 %v18819_v52, %v7032_v2  ;;  %v18845_v2 = vld [vmem:[#allocation63_spill] sm:$0xff] }
 0xd6c   :  { %v6756_v7 = vpop.permute.xlu1 %6755  ;;  %v18846_v52 = vsub.f32 %v18844_v15, %v18845_v2 }
 0xd6d   :  { %8231 = vst [vmem:[#allocation2 + $0x680] sm:$0xff] %v7991_v59  ;;  %8232 = vst [vmem:[#allocation2 + $0x688] sm:$0xff] %v7992_v9  ;;  %v7035_v45 = vmul.f32 %v6756_v7, %v18822_v44  ;;  %v7036_v61 = vmul.f32 %v6756_v7, %v18824_v27  ;;  %v18847_v9 = vld [vmem:[#allocation60_spill] sm:$0xff]  ;;  %v18850_v27 = vsub.f32 %v15713_v5, %v16116_v55 }
 0xd6e   :  { %v18848_v7 = vsub.f32 %v18847_v9, %v18845_v2 }
 0xd6f   :  { %v7995_v50 = vadd.f32 %v18825_v53, %v7035_v45  ;;  %v7996_v48 = vadd.f32 %v18825_v53, %v7036_v61  ;;  %v18851_v53 = vsub.f32 %v15717_v51, %v16116_v55  ;;  %v18855_v55 = vsub.f32 %v15761_v30, %v16195_v17 }
 0xd70   :  { %v6766_v57 = vpop.permute.xlu1 %6765 }
 0xd71   :  { %8235 = vst [vmem:[#allocation2 + $0x6a0] sm:$0xff] %v7995_v50  ;;  %8236 = vst [vmem:[#allocation2 + $0x6a8] sm:$0xff] %v7996_v48  ;;  %v7039_v16 = vmul.f32 %v6766_v57, %v18828_v24  ;;  %v7040_v18 = vmul.f32 %v6766_v57, %v18830_v4  ;;  %v18852_v48 = vld [vmem:[#allocation152_spill] sm:$0xff]  ;;  %v18853_v24 = vsub.f32 %v15801_v40, %v16224_v23  ;;  %v18857_v40 = vld [vmem:[#allocation151_spill] sm:$0xff] }
 0xd73   :  { %v7999_v14 = vadd.f32 %v18831_v60, %v7039_v16  ;;  %v8000_v49 = vadd.f32 %v18831_v60, %v7040_v18 }
 0xd74   :  { %v6776_v0 = vpop.permute.xlu1 %6775 }
 0xd75   :  { %8239 = vst [vmem:[#allocation2 + $0x6c0] sm:$0xff] %v7999_v14  ;;  %8240 = vst [vmem:[#allocation2 + $0x6c8] sm:$0xff] %v8000_v49  ;;  %v7043_v32 = vmul.f32 %v6776_v0, %v18834_v28  ;;  %v7044_v36 = vmul.f32 %v6776_v0, %v18836_v56  ;;  %v18856_v49 = vsub.f32 %v18626_v43, %v16195_v17 }
 0xd77   :  { %v8003_v20 = vadd.f32 %v18837_v34, %v7043_v32  ;;  %v8004_v41 = vadd.f32 %v18837_v34, %v7044_v36 }
 0xd78   :  { %v6786_v1 = vpop.permute.xlu1 %6785 }
 0xd79   :  { %8243 = vst [vmem:[#allocation2 + $0x6e0] sm:$0xff] %v8003_v20  ;;  %8244 = vst [vmem:[#allocation2 + $0x6e8] sm:$0xff] %v8004_v41  ;;  %v7047_v54 = vmul.f32 %v6786_v1, %v18840_v11  ;;  %v7048_v25 = vmul.f32 %v6786_v1, %v18842_v46 }
 0xd7b   :  { %v8007_v38 = vadd.f32 %v18843_v39, %v7047_v54  ;;  %v8008_v6 = vadd.f32 %v18843_v39, %v7048_v25 }
 0xd7c   :  { %v6796_v21 = vpop.permute.xlu1 %6795 }
 0xd7d   :  { %8247 = vst [vmem:[#allocation2 + $0x700] sm:$0xff] %v8007_v38  ;;  %8248 = vst [vmem:[#allocation2 + $0x708] sm:$0xff] %v8008_v6  ;;  %v7051_v59 = vmul.f32 %v6796_v21, %v18846_v52  ;;  %v7052_v12 = vmul.f32 %v6796_v21, %v18848_v7 }
 0xd7f   :  { %v8011_v44 = vadd.f32 %v18849_v8, %v7051_v59  ;;  %v8012_v45 = vadd.f32 %v18849_v8, %v7052_v12 }
 0xd80   :  { %v6806_v22 = vpop.permute.xlu1 %6805 }
 0xd81   :  { %8251 = vst [vmem:[#allocation2 + $0x720] sm:$0xff] %v8011_v44  ;;  %8252 = vst [vmem:[#allocation2 + $0x728] sm:$0xff] %v8012_v45  ;;  %v7055_v61 = vmul.f32 %v6806_v22, %v18850_v27  ;;  %v7056_v50 = vmul.f32 %v6806_v22, %v18851_v53 }
 0xd83   :  { %v8015_v57 = vadd.f32 %v18852_v48, %v7055_v61  ;;  %v8016_v42 = vadd.f32 %v18852_v48, %v7056_v50 }
 0xd84   :  { %v6816_v13 = vpop.permute.xlu1 %6815 }
 0xd85   :  { %8255 = vst [vmem:[#allocation2 + $0x740] sm:$0xff] %v8015_v57  ;;  %8256 = vst [vmem:[#allocation2 + $0x748] sm:$0xff] %v8016_v42  ;;  %v7059_v16 = vmul.f32 %v6816_v13, %v18853_v24  ;;  %v7060_v5 = vmul.f32 %v6816_v13, %v18854_v3 }
 0xd88   :  { %v7776_v4 = vpop.permute.xlu1 %7775 }
 0xd89   :  { %v8019_v18 = vadd.f32 %v7776_v4, %v7059_v16  ;;  %v8020_v60 = vadd.f32 %v7776_v4, %v7060_v5 }
 0xd8b   :  { %8259 = vst [vmem:[#allocation2 + $0x760] sm:$0xff] %v8019_v18  ;;  %8260 = vst [vmem:[#allocation2 + $0x768] sm:$0xff] %v8020_v60 }
 0xd8e   :  { %v6811_v51 = vpop.permute.xlu0 %6810 }
 0xd8f   :  { %v7057_v14 = vmul.f32 %v6811_v51, %v18855_v55  ;;  %v7058_v0 = vmul.f32 %v6811_v51, %v18856_v49 }
 0xd91   :  { %v8017_v33 = vadd.f32 %v18857_v40, %v7057_v14  ;;  %v8018_v63 = vadd.f32 %v18857_v40, %v7058_v0 }
 0xd93   :  { %8257 = vst [vmem:[#allocation2 + $0x750] sm:$0xff] %v8017_v33  ;;  %8258 = vst [vmem:[#allocation2 + $0x758] sm:$0xff] %v8018_v63 }
 0xdc7   :  { %v6821_v35 = vpop.permute.xlu0 %6820 }
 0xdc8   :  { %v7061_v23 = vmul.f32 %v6821_v35, %v6221_v62  ;;  %v7062_v30 = vmul.f32 %v6821_v35, %v6222_v47 }
 0xdcb   :  { %v7781_v28 = vpop.permute.xlu0 %7780 }
 0xdcc   :  { %v8021_v17 = vadd.f32 %v7781_v28, %v7061_v23  ;;  %v8022_v43 = vadd.f32 %v7781_v28, %v7062_v30 }
 0xdce   :  { %8261 = vst [vmem:[#allocation2 + $0x770] sm:$0xff] %v8021_v17  ;;  %8262 = vst [vmem:[#allocation2 + $0x778] sm:$0xff] %v8022_v43 }
 0xdcf   :  { %9496 = shalt.err (!%p9493_p4)
}
 0xdd0   :  { %s9497_s26 = scalar_lea.hbm %s16663_s8, 30720 }
 0xdd1   :  { %p9498_p5 = scmp.ne.s32.totalorder %s16663_s8, %s9497_s26  ;;  %p9501_p6 = scmp.lt.u32.totalorder %s9497_s26, %s16663_s8 }
 0xdd3   :  { %p9503_p7 = pnand %p9501_p6, %p9498_p5 }
 0xdd5   :  { %9506 = shalt.err (!%p9503_p7)
}
 0xdd6   :  { %s9511_s30 = smov 256   ;;  %s9512_s3 = smov 16  }
 0xdd7   :  { %8274 = dma.vmem_to_hbm [thread:$0]  %s8269_s23, 30720, %s16663_s8, [#allocation3], %s9511_s30, %s9511_s30, %s9512_s3  }
 0xdd8   :  { %9507 = dma.done.wait [#allocation3], 30720  }
 0xdd9   :  { %9508 = vsyncadd [#allocation3], 4294936576 }
 0xdda   :  { %8278 = vsyncpa [#allocation3], 1 }

</bundles_post_ra>
